<compile_context>
chip_gen: v5e
topology: v5e:2x2
jax: 0.10.0
libtpu: 0.0.40
codegen_flags: <defaults>
</compile_context>

<pallas_src>
import math
import functools

import jax
import jax.numpy as jnp
from jax import lax
from jax.experimental import pallas as pl
from jax.experimental.pallas import tpu as pltpu


def attention_block_kernel(x_ref, red_ref, bcast_ref, gamma_ref, beta_ref,
                           wq_ref, bq_ref, wk_ref, bk_ref, wv_ref, bv_ref,
                           wproj_ref, bproj_ref,
                           out_ref, q_s, k_s, v_s,
                           *, num_heads, eps, tq, t_valid):
    x = x_ref[0]                                     # [C, Tp] f32
    C, Tp = x.shape
    ch = C // num_heads
    nqt = Tp // tq
    padded = Tp > t_valid                            # static

    # ---------------- GroupNorm(32, C): two-pass (centered) variance ----------------
    # red_ref [G, C] sums channels of a group (pre-divided by group_size * T_valid);
    # bcast_ref [C, G] broadcasts the group statistic back to every channel.
    col_ok = None
    if padded:
        col_ok = lax.broadcasted_iota(jnp.int32, (1, Tp), 1) < t_valid   # [1, Tp]
    sum_t = jnp.sum(x, axis=1, keepdims=True)                            # [C, 1]
    mean_c = jnp.dot(bcast_ref[...],
                     jnp.dot(red_ref[...], sum_t,
                             preferred_element_type=jnp.float32),
                     preferred_element_type=jnp.float32)                 # [C, 1]
    xc = x - mean_c
    if padded:
        xc = jnp.where(col_ok, xc, 0.0)
    ss = jnp.sum(xc * xc, axis=1, keepdims=True)                         # [C, 1]
    var_c = jnp.dot(bcast_ref[...],
                    jnp.dot(red_ref[...], ss,
                            preferred_element_type=jnp.float32),
                    preferred_element_type=jnp.float32)                  # [C, 1]
    inv = lax.rsqrt(var_c + eps) * gamma_ref[...]                        # fold gamma
    yb = (xc * inv + beta_ref[...]).astype(jnp.bfloat16)                 # [C, Tp] bf16

    # ---------------- qkv (1x1 conv) straight into scratch (no [3C,T] f32) ----------
    # k stays channel-major [H, ch, Tp]; q and v are staged transposed [H, Tp, ch] so
    # every attention matmul below contracts on MXU-native axes.
    k_s[...] = (jnp.dot(wk_ref[...], yb, preferred_element_type=jnp.float32)
                + bk_ref[...]).reshape(num_heads, ch, Tp).astype(jnp.bfloat16)
    qf = jnp.dot(wq_ref[...], yb, preferred_element_type=jnp.float32) + bq_ref[...]
    vf = jnp.dot(wv_ref[...], yb, preferred_element_type=jnp.float32) + bv_ref[...]
    for h in range(num_heads):   # static unroll; one small 2-D transpose per head/batch
        q_s[h, :, :] = qf[h * ch:(h + 1) * ch, :].T.astype(jnp.bfloat16)
        v_s[h, :, :] = vf[h * ch:(h + 1) * ch, :].T.astype(jnp.bfloat16)

    key_bias = None
    if padded:
        key_bias = jnp.where(col_ok, 0.0, -1e30).reshape(1, 1, Tp)       # mask pad keys

    wp = wproj_ref[...]                              # [H, ch, C] bf16 (hoisted)
    bp = bproj_ref[...]                              # [C, 1] f32

    # ---------------- attention: heads batched, query-tiled, softmax in f32 ---------
    def tile_body(qt, carry):
        q0 = pl.multiple_of(qt * tq, tq)
        q_t = q_s[:, pl.ds(q0, tq), :]                                   # [H, tq, ch]
        s = jnp.einsum('htc,hcs->hts', q_t, k_s[...],
                       preferred_element_type=jnp.float32)               # [H, tq, Tp]
        if padded:
            s = s + key_bias
        s = s - jnp.max(s, axis=-1, keepdims=True)
        e = jnp.exp(s)
        # approx reciprocal (EUP slot): softmax rows sum to 1 only to ~1e-3 rel.
        w = e * pl.reciprocal(jnp.sum(e, axis=-1, keepdims=True), approx=True)
        a = jnp.einsum('hts,hsc->htc', w.astype(jnp.bfloat16), v_s[...],
                       preferred_element_type=jnp.float32)               # [H, tq, ch]
        # proj_out as per-head partial matmuls, summed over heads, then one 2-D
        # transpose to the channel-major output layout + residual add (lane-dense tq).
        p = jnp.einsum('htc,hco->hto', a.astype(jnp.bfloat16), wp,
                       preferred_element_type=jnp.float32)               # [H, tq, C]
        h_ct = jnp.transpose(jnp.sum(p, axis=0)) + bp                    # [C, tq]
        out_ref[0, :, pl.ds(q0, tq)] = x_ref[0, :, pl.ds(q0, tq)] + h_ct
        return carry

    lax.fori_loop(0, nqt, tile_body, 0, unroll=True)


def _vmem_phys_bytes():
    try:
        return int(pltpu.get_tpu_info().vmem_capacity_bytes)
    except Exception:
        return 64 * 1024 * 1024          # conservative (v7x-sized) fallback


def _vmem_limit_bytes(C, Tp, H, ch, tq, G):
    f32, bf16 = 4, 2
    lane = 128
    ch_pad = max(ch, lane)               # narrow-lane scratches pad to 128 lanes
    io_blocks = 2 * 2 * C * Tp * f32                                   # x & out, dbl-buffered
    weights = 2 * ((3 * C * C + H * ch * C) * bf16
                   + (G * C + C * G + 6 * C) * f32)
    scratch = (2 * H * Tp * ch_pad + H * ch * Tp) * bf16               # q, v, k
    temps = (4 * C * Tp * f32                                          # y / qkv f32 temps
             + 2 * H * tq * Tp * f32                                   # scores + exp
             + H * tq * max(C, lane) * f32                             # proj partials
             + 2 * C * tq * f32)
    est = io_blocks + weights + scratch + temps
    cap = (_vmem_phys_bytes() * 3) // 4            # ~48 MiB on v7x, ~96 MiB on v5e/v6e
    return int(min(max(2 * est, 32 * 1024 * 1024), cap))


def attention_block(x_nchw, params, *, num_heads, num_groups):
    gamma, beta, wqkv, bqkv, wproj, bproj = params
    B, C = x_nchw.shape[:2]
    spatial = x_nchw.shape[2:]
    T = int(math.prod(spatial))
    assert C % num_groups == 0 and C % num_heads == 0
    ch = C // num_heads
    G = num_groups
    gc = C // G

    # Pad T to a multiple of 128 (lane-dense tiles & stores); padded keys are masked.
    tq = 128
    Tp = ((T + tq - 1) // tq) * tq
    x_bct = x_nchw.reshape(B, C, T).astype(jnp.float32)
    if Tp != T:
        x_bct = jnp.pad(x_bct, ((0, 0), (0, 0), (0, Tp - T)))

    # GroupNorm stat matrices: [G, C] reduce (pre-divided by group_size*T) and [C, G]
    # broadcast-back.
    gid = jnp.arange(C) // gc
    red = (jnp.arange(G)[:, None] == gid[None, :]).astype(jnp.float32) / float(gc * T)
    bcast = (gid[:, None] == jnp.arange(G)[None, :]).astype(jnp.float32)

    # Legacy head-ordered qkv split; attention scale (1/sqrt(ch)) folded into q weights.
    w3 = wqkv.reshape(num_heads, 3, ch, C)
    b3 = bqkv.reshape(num_heads, 3, ch)
    scale2 = 1.0 / math.sqrt(ch)
    wq = (w3[:, 0].reshape(C, C) * scale2).astype(jnp.bfloat16)
    wk = w3[:, 1].reshape(C, C).astype(jnp.bfloat16)
    wv = w3[:, 2].reshape(C, C).astype(jnp.bfloat16)
    bq = (b3[:, 0].reshape(C, 1) * scale2).astype(jnp.float32)
    bk = b3[:, 1].reshape(C, 1).astype(jnp.float32)
    bv = b3[:, 2].reshape(C, 1).astype(jnp.float32)
    # proj weight per head, transposed: wproj_h[h, c, o] = wproj[o, h*ch + c].
    wproj_h = wproj.reshape(C, num_heads, ch).transpose(1, 2, 0).astype(jnp.bfloat16)
    bproj_c = bproj.reshape(C, 1).astype(jnp.float32)

    kernel = functools.partial(attention_block_kernel, num_heads=num_heads,
                               eps=1e-5, tq=tq, t_valid=T)

    grid_spec = pltpu.PrefetchScalarGridSpec(
        num_scalar_prefetch=0,
        grid=(B,),
        in_specs=[
            pl.BlockSpec((1, C, Tp), lambda b: (b, 0, 0)),          # x
            pl.BlockSpec((G, C), lambda b: (0, 0)),                 # group reduce
            pl.BlockSpec((C, G), lambda b: (0, 0)),                 # group broadcast
            pl.BlockSpec((C, 1), lambda b: (0, 0)),                 # gamma
            pl.BlockSpec((C, 1), lambda b: (0, 0)),                 # beta
            pl.BlockSpec((C, C), lambda b: (0, 0)),                 # wq (scaled, bf16)
            pl.BlockSpec((C, 1), lambda b: (0, 0)),                 # bq (scaled)
            pl.BlockSpec((C, C), lambda b: (0, 0)),                 # wk (bf16)
            pl.BlockSpec((C, 1), lambda b: (0, 0)),                 # bk
            pl.BlockSpec((C, C), lambda b: (0, 0)),                 # wv (bf16)
            pl.BlockSpec((C, 1), lambda b: (0, 0)),                 # bv
            pl.BlockSpec((num_heads, ch, C), lambda b: (0, 0, 0)),  # wproj per head
            pl.BlockSpec((C, 1), lambda b: (0, 0)),                 # bproj
        ],
        out_specs=pl.BlockSpec((1, C, Tp), lambda b: (b, 0, 0)),
        scratch_shapes=[
            pltpu.VMEM((num_heads, Tp, ch), jnp.bfloat16),          # q (transposed)
            pltpu.VMEM((num_heads, ch, Tp), jnp.bfloat16),          # k (channel-major)
            pltpu.VMEM((num_heads, Tp, ch), jnp.bfloat16),          # v (transposed)
        ],
    )

    out_bct = pl.pallas_call(
        kernel,
        grid_spec=grid_spec,
        out_shape=jax.ShapeDtypeStruct((B, C, Tp), jnp.float32),
        compiler_params=pltpu.CompilerParams(
            dimension_semantics=("parallel",),
            vmem_limit_bytes=_vmem_limit_bytes(C, Tp, num_heads, ch, tq, G)),
    )(x_bct, red, bcast,
      gamma.reshape(C, 1).astype(jnp.float32), beta.reshape(C, 1).astype(jnp.float32),
      wq, bq, wk, bk, wv, bv, wproj_h, bproj_c)

    if Tp != T:
        out_bct = out_bct[:, :, :T]
    return out_bct.reshape(B, C, *spatial)


def ref_attention_block(x_nchw, params, *, num_heads, num_groups):
    """Pure-JAX f32 reference mirroring the PyTorch forward (for validation)."""
    gamma, beta, wqkv, bqkv, wproj, bproj = params
    B, C = x_nchw.shape[:2]
    spatial = x_nchw.shape[2:]
    x = x_nchw.reshape(B, C, -1).astype(jnp.float32)
    T = x.shape[-1]
    gc = C // num_groups
    xg = x.reshape(B, num_groups, gc * T)
    mean = xg.mean(-1, keepdims=True)
    var = xg.var(-1, keepdims=True)
    xn = ((xg - mean) / jnp.sqrt(var + 1e-5)).reshape(B, C, T)
    y = xn * gamma[None, :, None] + beta[None, :, None]
    qkv = jnp.einsum('oc,bct->bot', wqkv, y) + bqkv[None, :, None]
    ch = C // num_heads
    qkv = qkv.reshape(B * num_heads, 3 * ch, T)
    q, k, v = qkv[:, :ch], qkv[:, ch:2 * ch], qkv[:, 2 * ch:]
    scale = 1.0 / math.sqrt(math.sqrt(ch))
    w = jnp.einsum('bct,bcs->bts', q * scale, k * scale)
    w = jax.nn.softmax(w, axis=-1)
    a = jnp.einsum('bts,bcs->bct', w, v).reshape(B, C, T)
    h = jnp.einsum('oc,bct->bot', wproj, a) + bproj[None, :, None]
    return (x + h).reshape(B, C, *spatial)


if __name__ == "__main__":
    # GroupNorm(32, C) requires C % 32 == 0; spatial 16x16 -> T = 256 (multiple of 128).
    B, C, Hs, Ws = 2, 64, 16, 16
    num_heads = 4            # AttentionBlock(channels=64, num_heads=4) -> head dim 16
    num_groups = 32

    key = jax.random.PRNGKey(0)
    kx, kw1, kb1, kw2, kb2 = jax.random.split(key, 5)

    x = jax.random.normal(kx, (B, C, Hs, Ws), dtype=jnp.float32)

    # GroupNorm default init.
    gamma = jnp.ones((C,), jnp.float32)
    beta = jnp.zeros((C,), jnp.float32)
    # qkv = Conv1d(C, 3C, 1): weight [3C, C], bias [3C].
    wqkv = 0.05 * jax.random.normal(kw1, (3 * C, C), jnp.float32)
    bqkv = 0.05 * jax.random.normal(kb1, (3 * C,), jnp.float32)
    # NOTE: the module zero-inits proj_out via zero_module(); we use small nonzero
    # deterministic values so the attention path actually contributes to the output.
    wproj = 0.05 * jax.random.normal(kw2, (C, C), jnp.float32)
    bproj = 0.05 * jax.random.normal(kb2, (C,), jnp.float32)

    params = (gamma, beta, wqkv, bqkv, wproj, bproj)

    out = attention_block(x, params, num_heads=num_heads, num_groups=num_groups)
    out = jax.block_until_ready(out)

    ref = ref_attention_block(x, params, num_heads=num_heads, num_groups=num_groups)
    assert out.shape == x.shape
    # bf16 MXU operands (f32 accumulation) vs f32 reference -> relaxed tolerance.
    assert jnp.allclose(out, ref, atol=2e-2, rtol=2e-2), "mismatch vs pure-JAX reference"

    print("KERNEL_OK")
</pallas_src>

<mosaic_0001>
module attributes {stable_mosaic.version = 11 : i64} {
  func.func @attention_block_kernel(%arg0: i32, %arg1: memref<1x64x256xf32, #tpu.memory_space<vmem>>, %arg2: memref<32x64xf32, #tpu.memory_space<vmem>>, %arg3: memref<64x32xf32, #tpu.memory_space<vmem>>, %arg4: memref<64x1xf32, #tpu.memory_space<vmem>>, %arg5: memref<64x1xf32, #tpu.memory_space<vmem>>, %arg6: memref<64x64xbf16, #tpu.memory_space<vmem>>, %arg7: memref<64x1xf32, #tpu.memory_space<vmem>>, %arg8: memref<64x64xbf16, #tpu.memory_space<vmem>>, %arg9: memref<64x1xf32, #tpu.memory_space<vmem>>, %arg10: memref<64x64xbf16, #tpu.memory_space<vmem>>, %arg11: memref<64x1xf32, #tpu.memory_space<vmem>>, %arg12: memref<4x16x64xbf16, #tpu.memory_space<vmem>>, %arg13: memref<64x1xf32, #tpu.memory_space<vmem>>, %arg14: memref<1x64x256xf32, #tpu.memory_space<vmem>>, %arg15: memref<4x256x16xbf16, #tpu.memory_space<vmem>>, %arg16: memref<4x16x256xbf16, #tpu.memory_space<vmem>>, %arg17: memref<4x256x16xbf16, #tpu.memory_space<vmem>>) attributes {dimension_semantics = [#tpu.dimension_semantics<parallel>], iteration_bounds = array<i64: 2>, scalar_prefetch = 0 : i64, scratch_operands = 3 : i64, tpu.core_type = #tpu.core_type<tc>, window_params = [{transform_indices = @transform_0, window_bounds = array<i64: 1, 64, 256>}, {pipeline_mode = #tpu.pipeline_mode<synchronous>, transform_indices = @transform_1, window_bounds = array<i64: 32, 64>}, {pipeline_mode = #tpu.pipeline_mode<synchronous>, transform_indices = @transform_2, window_bounds = array<i64: 64, 32>}, {pipeline_mode = #tpu.pipeline_mode<synchronous>, transform_indices = @transform_3, window_bounds = array<i64: 64, 1>}, {pipeline_mode = #tpu.pipeline_mode<synchronous>, transform_indices = @transform_4, window_bounds = array<i64: 64, 1>}, {pipeline_mode = #tpu.pipeline_mode<synchronous>, transform_indices = @transform_5, window_bounds = array<i64: 64, 64>}, {pipeline_mode = #tpu.pipeline_mode<synchronous>, transform_indices = @transform_6, window_bounds = array<i64: 64, 1>}, {pipeline_mode = #tpu.pipeline_mode<synchronous>, transform_indices = @transform_7, window_bounds = array<i64: 64, 64>}, {pipeline_mode = #tpu.pipeline_mode<synchronous>, transform_indices = @transform_8, window_bounds = array<i64: 64, 1>}, {pipeline_mode = #tpu.pipeline_mode<synchronous>, transform_indices = @transform_9, window_bounds = array<i64: 64, 64>}, {pipeline_mode = #tpu.pipeline_mode<synchronous>, transform_indices = @transform_10, window_bounds = array<i64: 64, 1>}, {pipeline_mode = #tpu.pipeline_mode<synchronous>, transform_indices = @transform_11, window_bounds = array<i64: 4, 16, 64>}, {pipeline_mode = #tpu.pipeline_mode<synchronous>, transform_indices = @transform_12, window_bounds = array<i64: 64, 1>}, {transform_indices = @transform_13, window_bounds = array<i64: 1, 64, 256>}]} {
    %c0 = arith.constant 0 : index
    %c0_0 = arith.constant 0 : index
    %c0_1 = arith.constant 0 : index
    %0 = vector.load %arg1[%c0, %c0_0, %c0_1] : memref<1x64x256xf32, #tpu.memory_space<vmem>>, vector<1x64x256xf32>
    %1 = vector.shape_cast %0 : vector<1x64x256xf32> to vector<64x256xf32>
    %cst = arith.constant dense<0.000000e+00> : vector<64xf32>
    %2 = vector.multi_reduction <add>, %1, %cst [1] : vector<64x256xf32> to vector<64xf32>
    %3 = vector.shape_cast %2 : vector<64xf32> to vector<64x1xf32>
    %c0_2 = arith.constant 0 : index
    %c0_3 = arith.constant 0 : index
    %4 = vector.load %arg3[%c0_2, %c0_3] : memref<64x32xf32, #tpu.memory_space<vmem>>, vector<64x32xf32>
    %c0_4 = arith.constant 0 : index
    %c0_5 = arith.constant 0 : index
    %5 = vector.load %arg2[%c0_4, %c0_5] : memref<32x64xf32, #tpu.memory_space<vmem>>, vector<32x64xf32>
    %cst_6 = arith.constant dense<0.000000e+00> : vector<32x1xf32>
    %6 = tpu.matmul %5, %3, %cst_6 {dimension_numbers = #tpu.dot_dimension_numbers<[1], [0], [0], [1], [0, 0, 1, 1], [], []>} : vector<32x64xf32>, vector<64x1xf32>, vector<32x1xf32> -> vector<32x1xf32>
    %cst_7 = arith.constant dense<0.000000e+00> : vector<64x1xf32>
    %7 = tpu.matmul %4, %6, %cst_7 {dimension_numbers = #tpu.dot_dimension_numbers<[1], [0], [0], [1], [0, 0, 1, 1], [], []>} : vector<64x32xf32>, vector<32x1xf32>, vector<64x1xf32> -> vector<64x1xf32>
    %8 = vector.broadcast %7 : vector<64x1xf32> to vector<64x256xf32>
    %9 = arith.subf %1, %8 : vector<64x256xf32>
    %10 = arith.mulf %9, %9 : vector<64x256xf32>
    %cst_8 = arith.constant dense<0.000000e+00> : vector<64xf32>
    %11 = vector.multi_reduction <add>, %10, %cst_8 [1] : vector<64x256xf32> to vector<64xf32>
    %12 = vector.shape_cast %11 : vector<64xf32> to vector<64x1xf32>
    %c0_9 = arith.constant 0 : index
    %c0_10 = arith.constant 0 : index
    %13 = vector.load %arg3[%c0_9, %c0_10] : memref<64x32xf32, #tpu.memory_space<vmem>>, vector<64x32xf32>
    %c0_11 = arith.constant 0 : index
    %c0_12 = arith.constant 0 : index
    %14 = vector.load %arg2[%c0_11, %c0_12] : memref<32x64xf32, #tpu.memory_space<vmem>>, vector<32x64xf32>
    %cst_13 = arith.constant dense<0.000000e+00> : vector<32x1xf32>
    %15 = tpu.matmul %14, %12, %cst_13 {dimension_numbers = #tpu.dot_dimension_numbers<[1], [0], [0], [1], [0, 0, 1, 1], [], []>} : vector<32x64xf32>, vector<64x1xf32>, vector<32x1xf32> -> vector<32x1xf32>
    %cst_14 = arith.constant dense<0.000000e+00> : vector<64x1xf32>
    %16 = tpu.matmul %13, %15, %cst_14 {dimension_numbers = #tpu.dot_dimension_numbers<[1], [0], [0], [1], [0, 0, 1, 1], [], []>} : vector<64x32xf32>, vector<32x1xf32>, vector<64x1xf32> -> vector<64x1xf32>
    %cst_15 = arith.constant 9.99999974E-6 : f32
    %17 = vector.broadcast %cst_15 : f32 to vector<64x1xf32>
    %18 = arith.addf %16, %17 : vector<64x1xf32>
    %19 = math.rsqrt %18 : vector<64x1xf32>
    %c0_16 = arith.constant 0 : index
    %c0_17 = arith.constant 0 : index
    %20 = vector.load %arg4[%c0_16, %c0_17] : memref<64x1xf32, #tpu.memory_space<vmem>>, vector<64x1xf32>
    %21 = arith.mulf %19, %20 : vector<64x1xf32>
    %22 = vector.broadcast %21 : vector<64x1xf32> to vector<64x256xf32>
    %23 = arith.mulf %9, %22 : vector<64x256xf32>
    %c0_18 = arith.constant 0 : index
    %c0_19 = arith.constant 0 : index
    %24 = vector.load %arg5[%c0_18, %c0_19] : memref<64x1xf32, #tpu.memory_space<vmem>>, vector<64x1xf32>
    %25 = vector.broadcast %24 : vector<64x1xf32> to vector<64x256xf32>
    %26 = arith.addf %23, %25 : vector<64x256xf32>
    %27 = arith.truncf %26 : vector<64x256xf32> to vector<64x256xbf16>
    %c0_20 = arith.constant 0 : index
    %c0_21 = arith.constant 0 : index
    %28 = vector.load %arg8[%c0_20, %c0_21] : memref<64x64xbf16, #tpu.memory_space<vmem>>, vector<64x64xbf16>
    %cst_22 = arith.constant dense<0.000000e+00> : vector<64x256xf32>
    %29 = tpu.matmul %28, %27, %cst_22 {dimension_numbers = #tpu.dot_dimension_numbers<[1], [0], [0], [1], [0, 0, 1, 1], [], []>} : vector<64x64xbf16>, vector<64x256xbf16>, vector<64x256xf32> -> vector<64x256xf32>
    %c0_23 = arith.constant 0 : index
    %c0_24 = arith.constant 0 : index
    %30 = vector.load %arg9[%c0_23, %c0_24] : memref<64x1xf32, #tpu.memory_space<vmem>>, vector<64x1xf32>
    %31 = vector.broadcast %30 : vector<64x1xf32> to vector<64x256xf32>
    %32 = arith.addf %29, %31 : vector<64x256xf32>
    %33 = vector.shape_cast %32 : vector<64x256xf32> to vector<4x16x256xf32>
    %34 = arith.truncf %33 : vector<4x16x256xf32> to vector<4x16x256xbf16>
    %c0_25 = arith.constant 0 : index
    %c0_26 = arith.constant 0 : index
    %c0_27 = arith.constant 0 : index
    %35 = vector.load %arg16[%c0_25, %c0_26, %c0_27] : memref<4x16x256xbf16, #tpu.memory_space<vmem>>, vector<4x16x256xbf16>
    tpu.vector_store %arg16[%c0_25, %c0_26, %c0_27], %34 {strides = array<i32>} : memref<4x16x256xbf16, #tpu.memory_space<vmem>>, vector<4x16x256xbf16>,
    %c0_28 = arith.constant 0 : index
    %c0_29 = arith.constant 0 : index
    %36 = vector.load %arg6[%c0_28, %c0_29] : memref<64x64xbf16, #tpu.memory_space<vmem>>, vector<64x64xbf16>
    %cst_30 = arith.constant dense<0.000000e+00> : vector<64x256xf32>
    %37 = tpu.matmul %36, %27, %cst_30 {dimension_numbers = #tpu.dot_dimension_numbers<[1], [0], [0], [1], [0, 0, 1, 1], [], []>} : vector<64x64xbf16>, vector<64x256xbf16>, vector<64x256xf32> -> vector<64x256xf32>
    %c0_31 = arith.constant 0 : index
    %c0_32 = arith.constant 0 : index
    %38 = vector.load %arg7[%c0_31, %c0_32] : memref<64x1xf32, #tpu.memory_space<vmem>>, vector<64x1xf32>
    %39 = vector.broadcast %38 : vector<64x1xf32> to vector<64x256xf32>
    %40 = arith.addf %37, %39 : vector<64x256xf32>
    %c0_33 = arith.constant 0 : index
    %c0_34 = arith.constant 0 : index
    %41 = vector.load %arg10[%c0_33, %c0_34] : memref<64x64xbf16, #tpu.memory_space<vmem>>, vector<64x64xbf16>
    %cst_35 = arith.constant dense<0.000000e+00> : vector<64x256xf32>
    %42 = tpu.matmul %41, %27, %cst_35 {dimension_numbers = #tpu.dot_dimension_numbers<[1], [0], [0], [1], [0, 0, 1, 1], [], []>} : vector<64x64xbf16>, vector<64x256xbf16>, vector<64x256xf32> -> vector<64x256xf32>
    %c0_36 = arith.constant 0 : index
    %c0_37 = arith.constant 0 : index
    %43 = vector.load %arg11[%c0_36, %c0_37] : memref<64x1xf32, #tpu.memory_space<vmem>>, vector<64x1xf32>
    %44 = vector.broadcast %43 : vector<64x1xf32> to vector<64x256xf32>
    %45 = arith.addf %42, %44 : vector<64x256xf32>
    %46 = vector.extract_strided_slice %40 {offsets = [0, 0], sizes = [16, 256], strides = [1, 1]} : vector<64x256xf32> to vector<16x256xf32>
    %47 = tpu.transpose %46, [1, 0] : vector<16x256xf32> -> vector<256x16xf32>
    %48 = arith.truncf %47 : vector<256x16xf32> to vector<256x16xbf16>
    %c0_38 = arith.constant 0 : index
    %c0_39 = arith.constant 0 : index
    %c0_40 = arith.constant 0 : index
    %49 = vector.load %arg15[%c0_38, %c0_39, %c0_40] : memref<4x256x16xbf16, #tpu.memory_space<vmem>>, vector<1x256x16xbf16>
    %50 = vector.shape_cast %49 : vector<1x256x16xbf16> to vector<256x16xbf16>
    %51 = vector.shape_cast %48 : vector<256x16xbf16> to vector<1x256x16xbf16>
    tpu.vector_store %arg15[%c0_38, %c0_39, %c0_40], %51 {strides = array<i32>} : memref<4x256x16xbf16, #tpu.memory_space<vmem>>, vector<1x256x16xbf16>,
    %52 = vector.extract_strided_slice %45 {offsets = [0, 0], sizes = [16, 256], strides = [1, 1]} : vector<64x256xf32> to vector<16x256xf32>
    %53 = tpu.transpose %52, [1, 0] : vector<16x256xf32> -> vector<256x16xf32>
    %54 = arith.truncf %53 : vector<256x16xf32> to vector<256x16xbf16>
    %c0_41 = arith.constant 0 : index
    %c0_42 = arith.constant 0 : index
    %c0_43 = arith.constant 0 : index
    %55 = vector.load %arg17[%c0_41, %c0_42, %c0_43] : memref<4x256x16xbf16, #tpu.memory_space<vmem>>, vector<1x256x16xbf16>
    %56 = vector.shape_cast %55 : vector<1x256x16xbf16> to vector<256x16xbf16>
    %57 = vector.shape_cast %54 : vector<256x16xbf16> to vector<1x256x16xbf16>
    tpu.vector_store %arg17[%c0_41, %c0_42, %c0_43], %57 {strides = array<i32>} : memref<4x256x16xbf16, #tpu.memory_space<vmem>>, vector<1x256x16xbf16>,
    %58 = vector.extract_strided_slice %40 {offsets = [16, 0], sizes = [16, 256], strides = [1, 1]} : vector<64x256xf32> to vector<16x256xf32>
    %59 = tpu.transpose %58, [1, 0] : vector<16x256xf32> -> vector<256x16xf32>
    %60 = arith.truncf %59 : vector<256x16xf32> to vector<256x16xbf16>
    %c1 = arith.constant 1 : index
    %c0_44 = arith.constant 0 : index
    %c0_45 = arith.constant 0 : index
    %61 = vector.load %arg15[%c1, %c0_44, %c0_45] : memref<4x256x16xbf16, #tpu.memory_space<vmem>>, vector<1x256x16xbf16>
    %62 = vector.shape_cast %61 : vector<1x256x16xbf16> to vector<256x16xbf16>
    %63 = vector.shape_cast %60 : vector<256x16xbf16> to vector<1x256x16xbf16>
    tpu.vector_store %arg15[%c1, %c0_44, %c0_45], %63 {strides = array<i32>} : memref<4x256x16xbf16, #tpu.memory_space<vmem>>, vector<1x256x16xbf16>,
    %64 = vector.extract_strided_slice %45 {offsets = [16, 0], sizes = [16, 256], strides = [1, 1]} : vector<64x256xf32> to vector<16x256xf32>
    %65 = tpu.transpose %64, [1, 0] : vector<16x256xf32> -> vector<256x16xf32>
    %66 = arith.truncf %65 : vector<256x16xf32> to vector<256x16xbf16>
    %c1_46 = arith.constant 1 : index
    %c0_47 = arith.constant 0 : index
    %c0_48 = arith.constant 0 : index
    %67 = vector.load %arg17[%c1_46, %c0_47, %c0_48] : memref<4x256x16xbf16, #tpu.memory_space<vmem>>, vector<1x256x16xbf16>
    %68 = vector.shape_cast %67 : vector<1x256x16xbf16> to vector<256x16xbf16>
    %69 = vector.shape_cast %66 : vector<256x16xbf16> to vector<1x256x16xbf16>
    tpu.vector_store %arg17[%c1_46, %c0_47, %c0_48], %69 {strides = array<i32>} : memref<4x256x16xbf16, #tpu.memory_space<vmem>>, vector<1x256x16xbf16>,
    %70 = vector.extract_strided_slice %40 {offsets = [32, 0], sizes = [16, 256], strides = [1, 1]} : vector<64x256xf32> to vector<16x256xf32>
    %71 = tpu.transpose %70, [1, 0] : vector<16x256xf32> -> vector<256x16xf32>
    %72 = arith.truncf %71 : vector<256x16xf32> to vector<256x16xbf16>
    %c2 = arith.constant 2 : index
    %c0_49 = arith.constant 0 : index
    %c0_50 = arith.constant 0 : index
    %73 = vector.load %arg15[%c2, %c0_49, %c0_50] : memref<4x256x16xbf16, #tpu.memory_space<vmem>>, vector<1x256x16xbf16>
    %74 = vector.shape_cast %73 : vector<1x256x16xbf16> to vector<256x16xbf16>
    %75 = vector.shape_cast %72 : vector<256x16xbf16> to vector<1x256x16xbf16>
    tpu.vector_store %arg15[%c2, %c0_49, %c0_50], %75 {strides = array<i32>} : memref<4x256x16xbf16, #tpu.memory_space<vmem>>, vector<1x256x16xbf16>,
    %76 = vector.extract_strided_slice %45 {offsets = [32, 0], sizes = [16, 256], strides = [1, 1]} : vector<64x256xf32> to vector<16x256xf32>
    %77 = tpu.transpose %76, [1, 0] : vector<16x256xf32> -> vector<256x16xf32>
    %78 = arith.truncf %77 : vector<256x16xf32> to vector<256x16xbf16>
    %c2_51 = arith.constant 2 : index
    %c0_52 = arith.constant 0 : index
    %c0_53 = arith.constant 0 : index
    %79 = vector.load %arg17[%c2_51, %c0_52, %c0_53] : memref<4x256x16xbf16, #tpu.memory_space<vmem>>, vector<1x256x16xbf16>
    %80 = vector.shape_cast %79 : vector<1x256x16xbf16> to vector<256x16xbf16>
    %81 = vector.shape_cast %78 : vector<256x16xbf16> to vector<1x256x16xbf16>
    tpu.vector_store %arg17[%c2_51, %c0_52, %c0_53], %81 {strides = array<i32>} : memref<4x256x16xbf16, #tpu.memory_space<vmem>>, vector<1x256x16xbf16>,
    %82 = vector.extract_strided_slice %40 {offsets = [48, 0], sizes = [16, 256], strides = [1, 1]} : vector<64x256xf32> to vector<16x256xf32>
    %83 = tpu.transpose %82, [1, 0] : vector<16x256xf32> -> vector<256x16xf32>
    %84 = arith.truncf %83 : vector<256x16xf32> to vector<256x16xbf16>
    %c3 = arith.constant 3 : index
    %c0_54 = arith.constant 0 : index
    %c0_55 = arith.constant 0 : index
    %85 = vector.load %arg15[%c3, %c0_54, %c0_55] : memref<4x256x16xbf16, #tpu.memory_space<vmem>>, vector<1x256x16xbf16>
    %86 = vector.shape_cast %85 : vector<1x256x16xbf16> to vector<256x16xbf16>
    %87 = vector.shape_cast %84 : vector<256x16xbf16> to vector<1x256x16xbf16>
    tpu.vector_store %arg15[%c3, %c0_54, %c0_55], %87 {strides = array<i32>} : memref<4x256x16xbf16, #tpu.memory_space<vmem>>, vector<1x256x16xbf16>,
    %88 = vector.extract_strided_slice %45 {offsets = [48, 0], sizes = [16, 256], strides = [1, 1]} : vector<64x256xf32> to vector<16x256xf32>
    %89 = tpu.transpose %88, [1, 0] : vector<16x256xf32> -> vector<256x16xf32>
    %90 = arith.truncf %89 : vector<256x16xf32> to vector<256x16xbf16>
    %c3_56 = arith.constant 3 : index
    %c0_57 = arith.constant 0 : index
    %c0_58 = arith.constant 0 : index
    %91 = vector.load %arg17[%c3_56, %c0_57, %c0_58] : memref<4x256x16xbf16, #tpu.memory_space<vmem>>, vector<1x256x16xbf16>
    %92 = vector.shape_cast %91 : vector<1x256x16xbf16> to vector<256x16xbf16>
    %93 = vector.shape_cast %90 : vector<256x16xbf16> to vector<1x256x16xbf16>
    tpu.vector_store %arg17[%c3_56, %c0_57, %c0_58], %93 {strides = array<i32>} : memref<4x256x16xbf16, #tpu.memory_space<vmem>>, vector<1x256x16xbf16>,
    %c0_59 = arith.constant 0 : index
    %c0_60 = arith.constant 0 : index
    %c0_61 = arith.constant 0 : index
    %94 = vector.load %arg12[%c0_59, %c0_60, %c0_61] : memref<4x16x64xbf16, #tpu.memory_space<vmem>>, vector<4x16x64xbf16>
    %c0_62 = arith.constant 0 : index
    %c0_63 = arith.constant 0 : index
    %95 = vector.load %arg13[%c0_62, %c0_63] : memref<64x1xf32, #tpu.memory_space<vmem>>, vector<64x1xf32>
    %c0_i32 = arith.constant 0 : i32
    %c128_i32 = arith.constant 128 : i32
    %96 = arith.muli %c0_i32, %c128_i32 : i32
    %97 = tpu.assume_multiple %96, 128 : i32
    %c0_64 = arith.constant 0 : index
    %98 = arith.index_cast %97 : i32 to index
    %c0_65 = arith.constant 0 : index
    %99 = vector.load %arg15[%c0_64, %98, %c0_65] : memref<4x256x16xbf16, #tpu.memory_space<vmem>>, vector<4x128x16xbf16>
    %c0_66 = arith.constant 0 : index
    %c0_67 = arith.constant 0 : index
    %c0_68 = arith.constant 0 : index
    %100 = vector.load %arg16[%c0_66, %c0_67, %c0_68] : memref<4x16x256xbf16, #tpu.memory_space<vmem>>, vector<4x16x256xbf16>
    "tpu.trace_start"() <{level = 10 : i32, message = "htc,hcs->hts"}> : () -> ()
    %cst_69 = arith.constant dense<0.000000e+00> : vector<4x128x256xf32>
    %101 = tpu.matmul %99, %100, %cst_69 {dimension_numbers = #tpu.dot_dimension_numbers<[2], [1], [1], [2], [0, 0, 0, 1, 1, 2], [0], [0]>} : vector<4x128x16xbf16>, vector<4x16x256xbf16>, vector<4x128x256xf32> -> vector<4x128x256xf32>
    "tpu.trace_stop"() : () -> ()
    %cst_70 = arith.constant dense<0xFF800000> : vector<4x128xf32>
    %102 = vector.multi_reduction <maximumf>, %101, %cst_70 [2] : vector<4x128x256xf32> to vector<4x128xf32>
    %103 = vector.shape_cast %102 : vector<4x128xf32> to vector<4x128x1xf32>
    %104 = vector.broadcast %103 : vector<4x128x1xf32> to vector<4x128x256xf32>
    %105 = arith.subf %101, %104 : vector<4x128x256xf32>
    %106 = math.exp %105 : vector<4x128x256xf32>
    %cst_71 = arith.constant dense<0.000000e+00> : vector<4x128xf32>
    %107 = vector.multi_reduction <add>, %106, %cst_71 [2] : vector<4x128x256xf32> to vector<4x128xf32>
    %108 = vector.shape_cast %107 : vector<4x128xf32> to vector<4x128x1xf32>
    %109 = tpu.reciprocal %108 {approx = true} : vector<4x128x1xf32> -> vector<4x128x1xf32>
    %110 = vector.broadcast %109 : vector<4x128x1xf32> to vector<4x128x256xf32>
    %111 = arith.mulf %106, %110 : vector<4x128x256xf32>
    %112 = arith.truncf %111 : vector<4x128x256xf32> to vector<4x128x256xbf16>
    %c0_72 = arith.constant 0 : index
    %c0_73 = arith.constant 0 : index
    %c0_74 = arith.constant 0 : index
    %113 = vector.load %arg17[%c0_72, %c0_73, %c0_74] : memref<4x256x16xbf16, #tpu.memory_space<vmem>>, vector<4x256x16xbf16>
    "tpu.trace_start"() <{level = 10 : i32, message = "hts,hsc->htc"}> : () -> ()
    %cst_75 = arith.constant dense<0.000000e+00> : vector<4x128x16xf32>
    %114 = tpu.matmul %112, %113, %cst_75 {dimension_numbers = #tpu.dot_dimension_numbers<[2], [1], [1], [2], [0, 0, 0, 1, 1, 2], [0], [0]>} : vector<4x128x256xbf16>, vector<4x256x16xbf16>, vector<4x128x16xf32> -> vector<4x128x16xf32>
    "tpu.trace_stop"() : () -> ()
    %115 = arith.truncf %114 : vector<4x128x16xf32> to vector<4x128x16xbf16>
    "tpu.trace_start"() <{level = 10 : i32, message = "htc,hco->hto"}> : () -> ()
    %cst_76 = arith.constant dense<0.000000e+00> : vector<4x128x64xf32>
    %116 = tpu.matmul %115, %94, %cst_76 {dimension_numbers = #tpu.dot_dimension_numbers<[2], [1], [1], [2], [0, 0, 0, 1, 1, 2], [0], [0]>} : vector<4x128x16xbf16>, vector<4x16x64xbf16>, vector<4x128x64xf32> -> vector<4x128x64xf32>
    "tpu.trace_stop"() : () -> ()
    %cst_77 = arith.constant dense<0.000000e+00> : vector<128x64xf32>
    %117 = vector.multi_reduction <add>, %116, %cst_77 [0] : vector<4x128x64xf32> to vector<128x64xf32>
    %118 = tpu.transpose %117, [1, 0] : vector<128x64xf32> -> vector<64x128xf32>
    %119 = vector.broadcast %95 : vector<64x1xf32> to vector<64x128xf32>
    %120 = arith.addf %118, %119 : vector<64x128xf32>
    %c0_78 = arith.constant 0 : index
    %c0_79 = arith.constant 0 : index
    %121 = arith.index_cast %97 : i32 to index
    %122 = vector.load %arg1[%c0_78, %c0_79, %121] : memref<1x64x256xf32, #tpu.memory_space<vmem>>, vector<1x64x128xf32>
    %123 = vector.shape_cast %122 : vector<1x64x128xf32> to vector<64x128xf32>
    %124 = arith.addf %123, %120 : vector<64x128xf32>
    %c0_80 = arith.constant 0 : index
    %c0_81 = arith.constant 0 : index
    %125 = arith.index_cast %97 : i32 to index
    %126 = vector.load %arg14[%c0_80, %c0_81, %125] : memref<1x64x256xf32, #tpu.memory_space<vmem>>, vector<1x64x128xf32>
    %127 = vector.shape_cast %126 : vector<1x64x128xf32> to vector<64x128xf32>
    %128 = vector.shape_cast %124 : vector<64x128xf32> to vector<1x64x128xf32>
    tpu.vector_store %arg14[%c0_80, %c0_81, %125], %128 {strides = array<i32>} : memref<1x64x256xf32, #tpu.memory_space<vmem>>, vector<1x64x128xf32>,
    %c1_i32 = arith.constant 1 : i32
    %c128_i32_82 = arith.constant 128 : i32
    %129 = arith.muli %c1_i32, %c128_i32_82 : i32
    %130 = tpu.assume_multiple %129, 128 : i32
    %c0_83 = arith.constant 0 : index
    %131 = arith.index_cast %130 : i32 to index
    %c0_84 = arith.constant 0 : index
    %132 = vector.load %arg15[%c0_83, %131, %c0_84] : memref<4x256x16xbf16, #tpu.memory_space<vmem>>, vector<4x128x16xbf16>
    %c0_85 = arith.constant 0 : index
    %c0_86 = arith.constant 0 : index
    %c0_87 = arith.constant 0 : index
    %133 = vector.load %arg16[%c0_85, %c0_86, %c0_87] : memref<4x16x256xbf16, #tpu.memory_space<vmem>>, vector<4x16x256xbf16>
    "tpu.trace_start"() <{level = 10 : i32, message = "htc,hcs->hts"}> : () -> ()
    %cst_88 = arith.constant dense<0.000000e+00> : vector<4x128x256xf32>
    %134 = tpu.matmul %132, %133, %cst_88 {dimension_numbers = #tpu.dot_dimension_numbers<[2], [1], [1], [2], [0, 0, 0, 1, 1, 2], [0], [0]>} : vector<4x128x16xbf16>, vector<4x16x256xbf16>, vector<4x128x256xf32> -> vector<4x128x256xf32>
    "tpu.trace_stop"() : () -> ()
    %cst_89 = arith.constant dense<0xFF800000> : vector<4x128xf32>
    %135 = vector.multi_reduction <maximumf>, %134, %cst_89 [2] : vector<4x128x256xf32> to vector<4x128xf32>
    %136 = vector.shape_cast %135 : vector<4x128xf32> to vector<4x128x1xf32>
    %137 = vector.broadcast %136 : vector<4x128x1xf32> to vector<4x128x256xf32>
    %138 = arith.subf %134, %137 : vector<4x128x256xf32>
    %139 = math.exp %138 : vector<4x128x256xf32>
    %cst_90 = arith.constant dense<0.000000e+00> : vector<4x128xf32>
    %140 = vector.multi_reduction <add>, %139, %cst_90 [2] : vector<4x128x256xf32> to vector<4x128xf32>
    %141 = vector.shape_cast %140 : vector<4x128xf32> to vector<4x128x1xf32>
    %142 = tpu.reciprocal %141 {approx = true} : vector<4x128x1xf32> -> vector<4x128x1xf32>
    %143 = vector.broadcast %142 : vector<4x128x1xf32> to vector<4x128x256xf32>
    %144 = arith.mulf %139, %143 : vector<4x128x256xf32>
    %145 = arith.truncf %144 : vector<4x128x256xf32> to vector<4x128x256xbf16>
    %c0_91 = arith.constant 0 : index
    %c0_92 = arith.constant 0 : index
    %c0_93 = arith.constant 0 : index
    %146 = vector.load %arg17[%c0_91, %c0_92, %c0_93] : memref<4x256x16xbf16, #tpu.memory_space<vmem>>, vector<4x256x16xbf16>
    "tpu.trace_start"() <{level = 10 : i32, message = "hts,hsc->htc"}> : () -> ()
    %cst_94 = arith.constant dense<0.000000e+00> : vector<4x128x16xf32>
    %147 = tpu.matmul %145, %146, %cst_94 {dimension_numbers = #tpu.dot_dimension_numbers<[2], [1], [1], [2], [0, 0, 0, 1, 1, 2], [0], [0]>} : vector<4x128x256xbf16>, vector<4x256x16xbf16>, vector<4x128x16xf32> -> vector<4x128x16xf32>
    "tpu.trace_stop"() : () -> ()
    %148 = arith.truncf %147 : vector<4x128x16xf32> to vector<4x128x16xbf16>
    "tpu.trace_start"() <{level = 10 : i32, message = "htc,hco->hto"}> : () -> ()
    %cst_95 = arith.constant dense<0.000000e+00> : vector<4x128x64xf32>
    %149 = tpu.matmul %148, %94, %cst_95 {dimension_numbers = #tpu.dot_dimension_numbers<[2], [1], [1], [2], [0, 0, 0, 1, 1, 2], [0], [0]>} : vector<4x128x16xbf16>, vector<4x16x64xbf16>, vector<4x128x64xf32> -> vector<4x128x64xf32>
    "tpu.trace_stop"() : () -> ()
    %cst_96 = arith.constant dense<0.000000e+00> : vector<128x64xf32>
    %150 = vector.multi_reduction <add>, %149, %cst_96 [0] : vector<4x128x64xf32> to vector<128x64xf32>
    %151 = tpu.transpose %150, [1, 0] : vector<128x64xf32> -> vector<64x128xf32>
    %152 = vector.broadcast %95 : vector<64x1xf32> to vector<64x128xf32>
    %153 = arith.addf %151, %152 : vector<64x128xf32>
    %c0_97 = arith.constant 0 : index
    %c0_98 = arith.constant 0 : index
    %154 = arith.index_cast %130 : i32 to index
    %155 = vector.load %arg1[%c0_97, %c0_98, %154] : memref<1x64x256xf32, #tpu.memory_space<vmem>>, vector<1x64x128xf32>
    %156 = vector.shape_cast %155 : vector<1x64x128xf32> to vector<64x128xf32>
    %157 = arith.addf %156, %153 : vector<64x128xf32>
    %c0_99 = arith.constant 0 : index
    %c0_100 = arith.constant 0 : index
    %158 = arith.index_cast %130 : i32 to index
    %159 = vector.load %arg14[%c0_99, %c0_100, %158] : memref<1x64x256xf32, #tpu.memory_space<vmem>>, vector<1x64x128xf32>
    %160 = vector.shape_cast %159 : vector<1x64x128xf32> to vector<64x128xf32>
    %161 = vector.shape_cast %157 : vector<64x128xf32> to vector<1x64x128xf32>
    tpu.vector_store %arg14[%c0_99, %c0_100, %158], %161 {strides = array<i32>} : memref<1x64x256xf32, #tpu.memory_space<vmem>>, vector<1x64x128xf32>,
    %c2_i32 = arith.constant 2 : i32
    return
  }
  func.func @transform_0(%arg0: i32) -> (i32, i32, i32) {
    %c0_i32 = arith.constant 0 : i32
    %c0_i32_0 = arith.constant 0 : i32
    %c0_i32_1 = arith.constant 0 : i32
    return %arg0, %c0_i32, %c0_i32_0 : i32, i32, i32
  }
  func.func @transform_1(%arg0: i32) -> (i32, i32) {
    %c0_i32 = arith.constant 0 : i32
    %c0_i32_0 = arith.constant 0 : i32
    %c0_i32_1 = arith.constant 0 : i32
    return %c0_i32, %c0_i32_0 : i32, i32
  }
  func.func @transform_2(%arg0: i32) -> (i32, i32) {
    %c0_i32 = arith.constant 0 : i32
    %c0_i32_0 = arith.constant 0 : i32
    %c0_i32_1 = arith.constant 0 : i32
    return %c0_i32, %c0_i32_0 : i32, i32
  }
  func.func @transform_3(%arg0: i32) -> (i32, i32) {
    %c0_i32 = arith.constant 0 : i32
    %c0_i32_0 = arith.constant 0 : i32
    %c0_i32_1 = arith.constant 0 : i32
    return %c0_i32, %c0_i32_0 : i32, i32
  }
  func.func @transform_4(%arg0: i32) -> (i32, i32) {
    %c0_i32 = arith.constant 0 : i32
    %c0_i32_0 = arith.constant 0 : i32
    %c0_i32_1 = arith.constant 0 : i32
    return %c0_i32, %c0_i32_0 : i32, i32
  }
  func.func @transform_5(%arg0: i32) -> (i32, i32) {
    %c0_i32 = arith.constant 0 : i32
    %c0_i32_0 = arith.constant 0 : i32
    %c0_i32_1 = arith.constant 0 : i32
    return %c0_i32, %c0_i32_0 : i32, i32
  }
  func.func @transform_6(%arg0: i32) -> (i32, i32) {
    %c0_i32 = arith.constant 0 : i32
    %c0_i32_0 = arith.constant 0 : i32
    %c0_i32_1 = arith.constant 0 : i32
    return %c0_i32, %c0_i32_0 : i32, i32
  }
  func.func @transform_7(%arg0: i32) -> (i32, i32) {
    %c0_i32 = arith.constant 0 : i32
    %c0_i32_0 = arith.constant 0 : i32
    %c0_i32_1 = arith.constant 0 : i32
    return %c0_i32, %c0_i32_0 : i32, i32
  }
  func.func @transform_8(%arg0: i32) -> (i32, i32) {
    %c0_i32 = arith.constant 0 : i32
    %c0_i32_0 = arith.constant 0 : i32
    %c0_i32_1 = arith.constant 0 : i32
    return %c0_i32, %c0_i32_0 : i32, i32
  }
  func.func @transform_9(%arg0: i32) -> (i32, i32) {
    %c0_i32 = arith.constant 0 : i32
    %c0_i32_0 = arith.constant 0 : i32
    %c0_i32_1 = arith.constant 0 : i32
    return %c0_i32, %c0_i32_0 : i32, i32
  }
  func.func @transform_10(%arg0: i32) -> (i32, i32) {
    %c0_i32 = arith.constant 0 : i32
    %c0_i32_0 = arith.constant 0 : i32
    %c0_i32_1 = arith.constant 0 : i32
    return %c0_i32, %c0_i32_0 : i32, i32
  }
  func.func @transform_11(%arg0: i32) -> (i32, i32, i32) {
    %c0_i32 = arith.constant 0 : i32
    %c0_i32_0 = arith.constant 0 : i32
    %c0_i32_1 = arith.constant 0 : i32
    %c0_i32_2 = arith.constant 0 : i32
    return %c0_i32, %c0_i32_0, %c0_i32_1 : i32, i32, i32
  }
  func.func @transform_12(%arg0: i32) -> (i32, i32) {
    %c0_i32 = arith.constant 0 : i32
    %c0_i32_0 = arith.constant 0 : i32
    %c0_i32_1 = arith.constant 0 : i32
    return %c0_i32, %c0_i32_0 : i32, i32
  }
  func.func @transform_13(%arg0: i32) -> (i32, i32, i32) {
    %c0_i32 = arith.constant 0 : i32
    %c0_i32_0 = arith.constant 0 : i32
    %c0_i32_1 = arith.constant 0 : i32
    return %arg0, %c0_i32, %c0_i32_0 : i32, i32, i32
  }
}

</mosaic_0001>

<bundles_post_ra>
// kernel: tpu_custom_call.1
= control target key start
LH: loop header
LB: loop body
LE: loop exit
PB: predicated region body
PF: predicated region fallthrough
CT: control target
= control target key end

     0   :  { %s17419_s0 = inlined_call_operand.hbm [shape: f32[2,64,256], index: 0, kind: input, shape index: {}]   ;;  %s17420_s1 = inlined_call_operand.vmem [shape: f32[32,64], index: 1, kind: input, shape index: {}]   ;;  %s17421_s2 = inlined_call_operand.vmem [shape: f32[64,32], index: 2, kind: input, shape index: {}]   ;;  %s17422_s3 = inlined_call_operand.vmem [shape: f32[64,1], index: 3, kind: input, shape index: {}]   ;;  %s17423_s4 = inlined_call_operand.vmem [shape: f32[64,1], index: 4, kind: input, shape index: {}]   ;;  %s17424_s5 = inlined_call_operand.vmem [shape: bf16[64,64], index: 5, kind: input, shape index: {}]   ;;  %s17425_s6 = inlined_call_operand.vmem [shape: f32[64,1], index: 6, kind: input, shape index: {}]   ;;  %s17426_s7 = inlined_call_operand.vmem [shape: bf16[64,64], index: 7, kind: input, shape index: {}]   ;;  %s17427_s8 = inlined_call_operand.vmem [shape: f32[64,1], index: 8, kind: input, shape index: {}]   ;;  %s17428_s9 = inlined_call_operand.vmem [shape: bf16[64,64], index: 9, kind: input, shape index: {}]   ;;  %s17429_s10 = inlined_call_operand.vmem [shape: f32[64,1], index: 10, kind: input, shape index: {}]   ;;  %s17430_s11 = inlined_call_operand.vmem [shape: bf16[4,16,64], index: 11, kind: input, shape index: {}]   ;;  %s17431_s12 = inlined_call_operand.vmem [shape: f32[64,1], index: 12, kind: input, shape index: {}]   ;;  %s17432_s13 = inlined_call_operand.hbm [shape: f32[2,64,256], index: 13, kind: output, shape index: {}]  }
   0x1   :  { %17676 = sst [smem:[#allocation109_spill]] %s17419_s0 }
   0x2   :  { %17677 = sst [smem:[#allocation110_spill]] %s17432_s13 }
   0x3   :  { %18 = vsyncpa [#allocation6], 0 }
   0x4   :  { %20 = vsyncpa [#allocation6 + $0x1], 0 }
   0x5   :  { %21 = vsyncpa [#allocation7], 0 }
   0x6   :  { %23 = vsyncpa [#allocation7 + $0x1], 0  ;;  %s13166_s25 = smov 0   ;;  %s13168_s26 = smov 0  }
   0x7   :  { %s13170_s27 = smov 0   ;;  %s13172_s28 = smov 0  }
   0x8 LB: > { %17678 = sst [smem:[#allocation11_spill]] %s13077_s25  ;;  %s13187_s29 = sadd.s32 4294967295, %s13089_s28   ;;  %s13089_s28 = sphi %s13172_s28, %s18368_s28   ;;  %s13085_s27 = sphi %s13170_s27, %s18370_s27   ;;  %s13081_s26 = sphi %s13168_s26, %s18372_s26   ;;  %s13077_s25 = sphi %s13166_s25, %s18371_s25  }
   0x9   : > { %17679 = sst [smem:[#allocation12_spill]] %s13085_s27  ;;  %s10070_s30 = sadd.s32 4294967294, %s13089_s28  }
   0xa   : > { %s13191_s14 = sadd.s32 1, %s13089_s28   ;;  %s36_s15 = sadd.s32 1, %s13085_s27 }
   0xb   : > { %17680 = sst [smem:[#allocation13_spill]] %s13191_s14  ;;  %s33_s16 = ssub.s32 %s13089_s28, %s13191_s14 }
   0xc   : > { %p43_p0 = scmp.ne.s32.totalorder %s13085_s27, %s13081_s26  ;;  %p34_p1 = scmp.eq.s32.totalorder %s33_s16, 0 }
   0xd   : > { %p44_p2 = scmp.eq.s32.totalorder %s13089_s28, 0  ;;  %p49_p3 = scmp.ne.s32.totalorder %s13081_s26, %s13077_s25 }
   0xe   : > { %p50_p4 = scmp.eq.s32.totalorder %s13187_s29, 0  ;;  %p325_p7 = scmp.eq.s32.totalorder %s13187_s29, 1 }
   0xf   : > { %s13203_s17 = scalar_select %p34_p1, %s13085_s27, %s36_s15  }
  0x10   : > { %p13205_p5 = por %p44_p2, %p43_p0  ;;  %p13209_p6 = por %p50_p4, %p49_p3 }
  0x11   : > { %17681 = sst [smem:[#allocation14_spill]] %s13203_s17  ;;  %p331_p8 = scmp.eq.s32.totalorder %s10070_s30, 1 }
  0x12   : > { %p11490_p10 = scmp.lt.s32.totalorder %s13089_s28, 2  ;;  %p13216_p11 = por %p325_p7, %p43_p0 }
  0x13   : > { %p13220_p12 = por %p331_p8, %p49_p3  ;;  %s387_s22 = sand.u32 1, %s13085_s27  }
  0x14   : > { %s17684_s20 = scalar_select %p13216_p11, 1, 0 }
  0x15   : > { %s17686_s21 = scalar_select %p13220_p12, 1, 0 }
  0x16   : > { %17685 = sst [smem:[#allocation15_spill]] %s17684_s20  ;;  %s11236_s23 = sshll.u32 %s13089_s28, 7 }
  0x17   : > { %17687 = sst [smem:[#allocation16_spill]] %s17686_s21  ;;  %s10073_s24 = sshll.u32 %s387_s22, 7 }
  0x18   : > { %s17688_s0 = sld [smem:[#allocation109_spill]]  ;;  %s391_s30 = scalar_lea.vmem [#allocation5], %s10073_s24 }
  0x19   : > { %s399_s25 = sshll.u32 %s391_s30, 4  ;;  %p13231_p13 = pnand %p11490_p10, %p13205_p5  ;;  %s400_s25 = int_to_ptr.vmem [resolvable:$true] %s399_s25 }
  0x1a   : > { %p10076_p0 = scmp.ge.s32.totalorder %s13089_s28, 1  ;;  %p407_p1 = scmp.lt.s32.totalorder %s13089_s28, 3 }
  0x1b   : > { %s388_s27 = scalar_lea.sflag [#allocation6], %s387_s22  ;;  %p12997_p3 = pneg %p13231_p13 }
  0x1e   : > { %s396_s17 = scalar_lea.hbm %s17688_s0, %s11236_s23  ;;  %s13000_s18 = scalar_lea.hbm %s17688_s0, 256 }
  0x1f   : > { %s397_s14 = sshll.u32 %s396_s17, 4  ;;  %s398_s14 = int_to_ptr.hbm [resolvable:$true] %s397_s14 }
  0x20   : > { %s12993_s21 = sshra.s32 %s398_s14, 4  ;;  %s12994_s21 = int_to_ptr.hbm [resolvable:$true] %s12993_s21 }
  0x21   : > { %s12995_s20 = scalar_lea.hbm %s12994_s21, 128  ;;  %p13001_p5 = scmp.lt.s32.totalorder %s12994_s21, %s17688_s0 }
  0x22   : > { %p12996_p2 = scmp.ne.s32.totalorder %s12994_s21, %s12995_s20  ;;  %p13002_p8 = scmp.lt.s32.totalorder %s13000_s18, %s12995_s20 }
  0x24   : > { %p12998_p4 = pnand %p12997_p3, %p12996_p2  ;;  %p13003_p10 = por %p13002_p8, %p13001_p5 }
  0x26   : > { %p12999_p7 = pneg %p12998_p4 }
  0x28   : > { %p13004_p9 = pnand %p13003_p10, %p12999_p7 }
  0x2a   : > { %13007 = shalt.err (!%p13004_p9)
}
  0x2b   : > { %s13091_s22 = smov 256   ;;  %s13092_s16 = smov 16  }
  0x2c   : > { %11485 = dma.hbm_to_vmem [thread:$0]  (!%p13231_p13), %s398_s14, 2048, %s400_s25, %s388_s27, %s13091_s22, %s13091_s22, %s13092_s16  }
  0x2d   : > { %p408_p2 = pnand %p10076_p0, %p407_p1 }
  0x2f   : > { %411 = sbr.rel (%p408_p2) target bundleno = 3966 (0xf7e), region = 72 }
  0x34   : > { %s13252_s30 = sand.u32 1, %s13081_s26  }
  0x35   : > { %s10077_s20 = sshll.u32 %s13252_s30, 7  ;;  %s414_s21 = scalar_lea.sflag [#allocation6], %s13252_s30 }
  0x36   : > { %s13258_s17 = scalar_lea.vmem [#allocation5], %s10077_s20 }
  0x37   : > { %13068 = dma.done.wait (%p13209_p6), %s414_s21, 2048  }
  0x38   : > { %13070 = vsyncadd (%p13209_p6), %s414_s21, 4294965248  ;;  %v13265_v0 = vld [vmem:[%s13258_s17 + $0x70] sm:$0xff]  ;;  %v13268_v1 = vld [vmem:[%s13258_s17 + $0x78] sm:$0xff]  ;;  %vm514_vm0 = vcmask 523264   ;;  %vm556_vm1 = vcmask 261120   ;;  %v13093_v48 = vmov 0  }
  0x39   : > { %v13271_v2 = vld [vmem:[%s13258_s17 + $0x50] sm:$0xff]  ;;  %v499_v3 = vadd.f32 %v13268_v1, %v13265_v0  ;;  %v13276_v4 = vld [vmem:[%s13258_s17 + $0x58] sm:$0xff]  ;;  %v13289_v9 = vld [vmem:[%s13258_s17 + $0x60] sm:$0xff]  ;;  %11532 = vset.pattern.permute.xlu2 %v13093_v48  ;;  %11531 = vset.pattern.permute.xlu1 %v13093_v48  ;;  %s17237_s19 = scalar_lea.vmem [#allocation8], %s10077_s20  ;;  %s11461_s20 = sshll.u32 %s13187_s29, 7 }
  0x3a   : > { %v493_v5 = vadd.f32 %v13276_v4, %v13271_v2  ;;  %v13281_v6 = vld [vmem:[%s13258_s17 + $0x30] sm:$0xff]  ;;  %v13284_v7 = vld [vmem:[%s13258_s17 + $0x38] sm:$0xff]  ;;  %v13292_v10 = vld [vmem:[%s13258_s17 + $0x68] sm:$0xff]  ;;  %11530 = vset.pattern.permute.xlu0 %v13093_v48  ;;  %s18363_s24 = sld [smem:[#allocation110_spill]]  ;;  %s9994_s16 = sshll.u32 %s17237_s19, 4  ;;  %s9995_s16 = int_to_ptr.vmem [resolvable:$true] %s9994_s16 }
  0x3b   : > { %500 = vadd.xlane.f32.xlu0 %v499_v3  ;;  %v487_v8 = vadd.f32 %v13284_v7, %v13281_v6  ;;  %v13295_v11 = vld [vmem:[%s13258_s17 + $0x40] sm:$0xff]  ;;  %v13298_v12 = vld [vmem:[%s13258_s17 + $0x48] sm:$0xff]  ;;  %v496_v15 = vadd.f32 %v13292_v10, %v13289_v9  ;;  %v13313_v18 = vld [vmem:[%s13258_s17 + $0x10] sm:$0xff]  ;;  %s9982_s13 = scalar_lea.sflag [#allocation7], %s13252_s30 }
  0x3c   : > { %494 = vadd.xlane.f32.xlu1 %v493_v5  ;;  %v13301_v13 = vld [vmem:[%s13258_s17 + $0x20] sm:$0xff]  ;;  %v13304_v14 = vld [vmem:[%s13258_s17 + $0x28] sm:$0xff]  ;;  %v490_v16 = vadd.f32 %v13298_v12, %v13295_v11  ;;  %v13316_v19 = vld [vmem:[%s13258_s17 + $0x18] sm:$0xff] }
  0x3d   : > { %488 = vadd.xlane.f32.xlu2 %v487_v8  ;;  %v484_v17 = vadd.f32 %v13304_v14, %v13301_v13  ;;  %v13319_v20 = vld [vmem:[%s13258_s17] sm:$0xff]  ;;  %v13322_v21 = vld [vmem:[%s13258_s17 + $0x8] sm:$0xff]  ;;  %v481_v22 = vadd.f32 %v13316_v19, %v13313_v18  ;;  %v13331_v32 = vld [vmem:[%s17420_s1 + $0x10] sm:$0xff] }
  0x3e   : > { %v478_v23 = vadd.f32 %v13322_v21, %v13319_v20  ;;  %v13336_v33 = vld [vmem:[%s17420_s1] sm:$0xff]  ;;  %v13345_v34 = vld [vmem:[%s17420_s1 + $0x18] sm:$0xff]  ;;  %v13350_v35 = vld [vmem:[%s17420_s1 + $0x8] sm:$0xff] }
  0x3f   : > { %v13359_v40 = vld [vmem:[%s17421_s2] sm:$0xff]  ;;  %v13366_v41 = vld [vmem:[%s17421_s2 + $0x8] sm:$0xff]  ;;  %v13373_v42 = vld [vmem:[%s17421_s2 + $0x10] sm:$0xff] }
  0x40   : > { %v13380_v43 = vld [vmem:[%s17421_s2 + $0x18] sm:$0xff]  ;;  %v13387_v44 = vld [vmem:[%s17421_s2 + $0x20] sm:$0xff]  ;;  %v13394_v45 = vld [vmem:[%s17421_s2 + $0x28] sm:$0xff]  ;;  %s9993_s15 = scalar_lea.hbm %s18363_s24, %s11461_s20  ;;  %s13043_s20 = scalar_lea.hbm %s18363_s24, 256 }
  0x41   : > { %v13401_v46 = vld [vmem:[%s17421_s2 + $0x30] sm:$0xff]  ;;  %v13408_v47 = vld [vmem:[%s17421_s2 + $0x38] sm:$0xff]  ;;  %s9996_s21 = sshll.u32 %s9993_s15, 4  ;;  %s9997_s21 = int_to_ptr.hbm [resolvable:$true] %s9996_s21 }
  0x42   : > { %s13037_s25 = sshra.s32 %s9997_s21, 4  ;;  %s13038_s25 = int_to_ptr.hbm [resolvable:$true] %s13037_s25 }
  0x43   : > { %497 = vadd.xlane.f32.xlu0 %v496_v15  ;;  %s13039_s29 = scalar_lea.hbm %s13038_s25, 128  ;;  %p13044_p0 = scmp.lt.s32.totalorder %s13038_s25, %s18363_s24 }
  0x44   : > { %491 = vadd.xlane.f32.xlu1 %v490_v16  ;;  %p13040_p6 = scmp.ne.s32.totalorder %s13038_s25, %s13039_s29  ;;  %p13045_p1 = scmp.lt.s32.totalorder %s13043_s20, %s13039_s29 }
  0x45   : > { %485 = vadd.xlane.f32.xlu2 %v484_v17 }
  0x46   : > { %p13041_p9 = pnand %p13040_p6, %p13216_p11  ;;  %p13046_p3 = por %p13045_p1, %p13044_p0 }
  0x48   : > { %p13042_p13 = pneg %p13041_p9 }
  0x4a   : > { %p13047_p4 = pnand %p13046_p3, %p13042_p13 }
  0x4b   : > { %482 = vadd.xlane.f32.xlu0 %v481_v22 }
  0x4c   : > { %479 = vadd.xlane.f32.xlu1 %v478_v23 }
  0xae   : > { %v501_v24 = vpop.xlane.xlu0 %500 }
  0xaf   : > { %535 = vmatpush.msra.mxu0 %v501_v24  ;;  %11462 = vmatpush.msra.mxu1 %v501_v24  ;;  %v495_v25 = vpop.xlane.xlu1 %494 }
  0xb0   : > { %v489_v26 = vpop.xlane.xlu2 %488 }
  0xb6   : > { %v498_v27 = vpop.xlane.xlu0 %497 }
  0xb7   : > { %536 = vmatpush.msra.mxu0 %v498_v27  ;;  %11463 = vmatpush.msra.mxu1 %v498_v27  ;;  %v492_v28 = vpop.xlane.xlu1 %491 }
  0xb8   : > { %v486_v29 = vpop.xlane.xlu2 %485 }
  0xb9   : > { %537 = vmatpush.msra.mxu0 %v495_v25  ;;  %11464 = vmatpush.msra.mxu1 %v495_v25 }
  0xbb   : > { %538 = vmatpush.msra.mxu0 %v492_v28  ;;  %11465 = vmatpush.msra.mxu1 %v492_v28 }
  0xbd   : > { %539 = vmatpush.msra.mxu0 %v489_v26  ;;  %11466 = vmatpush.msra.mxu1 %v489_v26 }
  0xbe   : > { %v483_v30 = vpop.xlane.xlu0 %482 }
  0xbf   : > { %540 = vmatpush.msra.mxu0 %v486_v29  ;;  %11467 = vmatpush.msra.mxu1 %v486_v29  ;;  %v480_v31 = vpop.xlane.xlu1 %479 }
  0xc1   : > { %541 = vmatpush.msra.mxu0 %v483_v30  ;;  %11468 = vmatpush.msra.mxu1 %v483_v30 }
  0xc3   : > { %542 = vmatpush.msra.mxu0 %v480_v31  ;;  %11469 = vmatpush.msra.mxu1 %v480_v31 }
  0xc4   : > { %10081 = vmatmul.msk.f32.vlgmr.msra.gmra.mxu1 %vm514_vm0, %v13331_v32  ;;  %10079 = vmatmul.msk.f32.vlgmr.msra.gmra.mxu0 %vm514_vm0, %v13336_v33 }
  0xcc   : > { %10082 = vmatmul.msk.f32.gmra.mxu1 %vm514_vm0, %v13345_v34  ;;  %10080 = vmatmul.msk.f32.gmra.mxu0 %vm514_vm0, %v13350_v35 }
 0x141   : > { %v550_v36 = vpop.f32.mrf.mxu1  ;;  %v544_v37 = vpop.f32.mrf.mxu0 }
 0x149   : > { %v553_v38 = vpop.f32.mrf.mxu1  ;;  %v547_v39 = vpop.f32.mrf.mxu0 }
 0x14a   : > { %593 = vmatpush.msrb.mxu1 %v553_v38 }
 0x14c   : > { %594 = vmatpush.msrb.mxu1 %v550_v36 }
 0x14e   : > { %595 = vmatpush.msrb.mxu1 %v547_v39 }
 0x150   : > { %596 = vmatpush.msrb.mxu1 %v544_v37 }
 0x151   : > { %10083 = vmatmul.msk.f32.vlgmr.msrb.gmra.mxu1 %vm556_vm1, %v13359_v40 }
 0x159   : > { %10084 = vmatmul.msk.f32.gmra.mxu1 %vm556_vm1, %v13366_v41 }
 0x161   : > { %10085 = vmatmul.msk.f32.gmra.mxu1 %vm556_vm1, %v13373_v42 }
 0x169   : > { %10086 = vmatmul.msk.f32.gmra.mxu1 %vm556_vm1, %v13380_v43 }
 0x171   : > { %10087 = vmatmul.msk.f32.gmra.mxu1 %vm556_vm1, %v13387_v44 }
 0x179   : > { %10088 = vmatmul.msk.f32.gmra.mxu1 %vm556_vm1, %v13394_v45 }
 0x181   : > { %10089 = vmatmul.msk.f32.gmra.mxu1 %vm556_vm1, %v13401_v46 }
 0x189   : > { %10090 = vmatmul.msk.f32.gmra.mxu1 %vm556_vm1, %v13408_v47 }
 0x1ce   : > { %v598_v49 = vpop.f32.mrf.mxu1 }
 0x1d6   : > { %v601_v50 = vpop.f32.mrf.mxu1 }
 0x1de   : > { %v604_v51 = vpop.f32.mrf.mxu1 }
 0x1e6   : > { %v607_v52 = vpop.f32.mrf.mxu1 }
 0x1ee   : > { %v610_v53 = vpop.f32.mrf.mxu1 }
 0x1ef   : > { %644 = vperm.xlu2 %11532, %v610_v53  }
 0x1f6   : > { %v613_v54 = vpop.f32.mrf.mxu1 }
 0x1f7   : > { %649 = vperm.xlu1 %11531, %v613_v54  }
 0x1fe   : > { %v616_v55 = vpop.f32.mrf.mxu1 }
 0x1ff   : > { %634 = vperm.xlu1 %11531, %v604_v51   ;;  %654 = vperm.xlu0 %11530, %v616_v55   ;;  %v944_v55 = vld [vmem:[%s17423_s4 + $0x20] sm:$0xff] }
 0x206   : > { %v619_v56 = vpop.f32.mrf.mxu1 }
 0x207   : > { %624 = vperm.xlu1 %11531, %v598_v49   ;;  %659 = vperm.xlu2 %11532, %v619_v56   ;;  %v945_v56 = vld [vmem:[%s17423_s4 + $0x28] sm:$0xff] }
 0x20f   : > { %639 = vperm.xlu2 %11532, %v607_v52  }
 0x217   : > { %629 = vperm.xlu2 %11532, %v601_v50  }
 0x249   : > { %v645_v57 = vpop.permute.xlu2 %644 }
 0x261   : > { %v660_v58 = vpop.permute.xlu2 %659 }
 0x262   : > { %v13413_v59 = vsub.f32 %v13265_v0, %v660_v58  ;;  %v13416_v60 = vsub.f32 %v13268_v1, %v660_v58  ;;  %v947_v58 = vld [vmem:[%s17423_s4 + $0x38] sm:$0xff] }
 0x264   : > { %v692_v61 = vmul.f32 %v13413_v59, %v13413_v59  ;;  %v693_v62 = vmul.f32 %v13416_v60, %v13416_v60 }
 0x266   : > { %v715_v63 = vadd.f32 %v693_v62, %v692_v61  ;;  %v1020_v61 = vld [vmem:[%s17427_s8] sm:$0xff]  ;;  %v943_v62 = vld [vmem:[%s17423_s4 + $0x18] sm:$0xff] }
 0x268   : > { %716 = vadd.xlane.f32.xlu0 %v715_v63  ;;  %v1022_v63 = vld [vmem:[%s17427_s8 + $0x10] sm:$0xff] }
 0x269   : > { %v650_v3 = vpop.permute.xlu1 %649  ;;  %v640_v5 = vpop.permute.xlu2 %639 }
 0x26a   : > { %v13423_v8 = vsub.f32 %v13271_v2, %v650_v3  ;;  %v13426_v15 = vsub.f32 %v13276_v4, %v650_v3  ;;  %v13429_v0 = vsub.f32 %v13281_v6, %v640_v5  ;;  %v13432_v1 = vsub.f32 %v13284_v7, %v640_v5  ;;  %v1023_v3 = vld [vmem:[%s17427_s8 + $0x18] sm:$0xff]  ;;  %v946_v5 = vld [vmem:[%s17423_s4 + $0x30] sm:$0xff] }
 0x26c   : > { %v688_v16 = vmul.f32 %v13423_v8, %v13423_v8  ;;  %v689_v17 = vmul.f32 %v13426_v15, %v13426_v15  ;;  %v684_v22 = vmul.f32 %v13429_v0, %v13429_v0  ;;  %v685_v2 = vmul.f32 %v13432_v1, %v13432_v1 }
 0x26e   : > { %v709_v4 = vadd.f32 %v689_v17, %v688_v16  ;;  %v703_v23 = vadd.f32 %v685_v2, %v684_v22  ;;  %v1025_v16 = vld [vmem:[%s17427_s8 + $0x28] sm:$0xff]  ;;  %v1026_v17 = vld [vmem:[%s17427_s8 + $0x30] sm:$0xff]  ;;  %v1182_v2 = vld [vmem:[%s17425_s6] sm:$0xff] }
 0x26f   : > { %v1021_v22 = vld [vmem:[%s17427_s8 + $0x8] sm:$0xff] }
 0x270   : > { %710 = vadd.xlane.f32.xlu1 %v709_v4  ;;  %704 = vadd.xlane.f32.xlu0 %v703_v23  ;;  %v1183_v4 = vld [vmem:[%s17425_s6 + $0x8] sm:$0xff]  ;;  %v1024_v23 = vld [vmem:[%s17427_s8 + $0x20] sm:$0xff] }
 0x271   : > { %v635_v6 = vpop.permute.xlu1 %634  ;;  %v655_v24 = vpop.permute.xlu0 %654 }
 0x272   : > { %v13443_v7 = vsub.f32 %v13301_v13, %v635_v6  ;;  %v13446_v25 = vsub.f32 %v13304_v14, %v635_v6  ;;  %v13449_v26 = vsub.f32 %v13289_v9, %v655_v24  ;;  %v13452_v27 = vsub.f32 %v13292_v10, %v655_v24  ;;  %v630_v48 = vpop.permute.xlu2 %629  ;;  %v1185_v6 = vld [vmem:[%s17425_s6 + $0x18] sm:$0xff]  ;;  %v1186_v24 = vld [vmem:[%s17425_s6 + $0x20] sm:$0xff] }
 0x273   : > { %v13463_v14 = vsub.f32 %v13295_v11, %v645_v57  ;;  %v13466_v9 = vsub.f32 %v13298_v12, %v645_v57  ;;  %v13483_v50 = vsub.f32 %v13313_v18, %v630_v48  ;;  %v941_v18 = vld [vmem:[%s17423_s4 + $0x8] sm:$0xff]  ;;  %v940_v57 = vld [vmem:[%s17423_s4] sm:$0xff] }
 0x274   : > { %v682_v28 = vmul.f32 %v13443_v7, %v13443_v7  ;;  %v683_v29 = vmul.f32 %v13446_v25, %v13446_v25  ;;  %v690_v30 = vmul.f32 %v13449_v26, %v13449_v26  ;;  %v691_v13 = vmul.f32 %v13452_v27, %v13452_v27 }
 0x275   : > { %v686_v39 = vmul.f32 %v13463_v14, %v13463_v14  ;;  %v687_v11 = vmul.f32 %v13466_v9, %v13466_v9  ;;  %v680_v52 = vmul.f32 %v13483_v50, %v13483_v50 }
 0x276   : > { %v700_v10 = vadd.f32 %v683_v29, %v682_v28  ;;  %v712_v31 = vadd.f32 %v691_v13, %v690_v30  ;;  %v1027_v28 = vld [vmem:[%s17427_s8 + $0x38] sm:$0xff]  ;;  %v1188_v29 = vld [vmem:[%s17425_s6 + $0x30] sm:$0xff] }
 0x277   : > { %v1189_v30 = vld [vmem:[%s17425_s6 + $0x38] sm:$0xff]  ;;  %v1184_v13 = vld [vmem:[%s17425_s6 + $0x10] sm:$0xff] }
 0x278   : > { %701 = vadd.xlane.f32.xlu1 %v700_v10  ;;  %713 = vadd.xlane.f32.xlu2 %v712_v31  ;;  %v1329_v10 = vld [vmem:[%s17429_s10 + $0x8] sm:$0xff]  ;;  %v1330_v31 = vld [vmem:[%s17429_s10 + $0x10] sm:$0xff] }
 0x279   : > { %v625_v36 = vpop.permute.xlu1 %624 }
 0x27a   : > { %v13469_v37 = vsub.f32 %v13319_v20, %v625_v36  ;;  %v13472_v38 = vsub.f32 %v13322_v21, %v625_v36  ;;  %v13486_v20 = vsub.f32 %v13316_v19, %v630_v48  ;;  %v706_v21 = vadd.f32 %v687_v11, %v686_v39  ;;  %v942_v19 = vld [vmem:[%s17423_s4 + $0x10] sm:$0xff]  ;;  %v1187_v36 = vld [vmem:[%s17425_s6 + $0x28] sm:$0xff]  ;;  %v1332_v39 = vld [vmem:[%s17429_s10 + $0x20] sm:$0xff] }
 0x27b   : > { %v1333_v11 = vld [vmem:[%s17429_s10 + $0x28] sm:$0xff] }
 0x27c   : > { %v678_v12 = vmul.f32 %v13469_v37, %v13469_v37  ;;  %v679_v49 = vmul.f32 %v13472_v38, %v13472_v38  ;;  %v681_v53 = vmul.f32 %v13486_v20, %v13486_v20 }
 0x27e   : > { %v694_v51 = vadd.f32 %v679_v49, %v678_v12  ;;  %v697_v54 = vadd.f32 %v681_v53, %v680_v52  ;;  %v1328_v12 = vld [vmem:[%s17429_s10] sm:$0xff]  ;;  %v1335_v49 = vld [vmem:[%s17429_s10 + $0x38] sm:$0xff]  ;;  %v1334_v53 = vld [vmem:[%s17429_s10 + $0x30] sm:$0xff] }
 0x280   : > { %707 = vadd.xlane.f32.xlu2 %v706_v21  ;;  %695 = vadd.xlane.f32.xlu0 %v694_v51  ;;  %v1331_v21 = vld [vmem:[%s17429_s10 + $0x18] sm:$0xff] }
 0x288   : > { %698 = vadd.xlane.f32.xlu2 %v697_v54 }
 0x291   : > { %955 = vperm.xlu1 %11531, %v941_v18  }
 0x294   : > { %960 = vperm.xlu0 %11530, %v942_v19  }
 0x299   : > { %970 = vperm.xlu1 %11531, %v944_v55  }
 0x29c   : > { %975 = vperm.xlu0 %11530, %v945_v56  }
 0x2a0   : > { %950 = vperm.xlu2 %11532, %v940_v57  }
 0x2a1   : > { %985 = vperm.xlu1 %11531, %v947_v58  }
 0x2a4   : > { %1030 = vperm.xlu0 %11530, %v1020_v61  }
 0x2a8   : > { %965 = vperm.xlu2 %11532, %v943_v62  }
 0x2a9   : > { %1040 = vperm.xlu1 %11531, %v1022_v63  }
 0x2ac   : > { %1045 = vperm.xlu0 %11530, %v1023_v3  }
 0x2b0   : > { %980 = vperm.xlu2 %11532, %v946_v5  }
 0x2b1   : > { %1055 = vperm.xlu1 %11531, %v1025_v16  }
 0x2b4   : > { %1060 = vperm.xlu0 %11530, %v1026_v17  }
 0x2b8   : > { %1035 = vperm.xlu2 %11532, %v1021_v22  }
 0x2b9   : > { %1192 = vperm.xlu1 %11531, %v1182_v2  }
 0x2bc   : > { %1197 = vperm.xlu0 %11530, %v1183_v4  }
 0x2c0   : > { %1050 = vperm.xlu2 %11532, %v1024_v23  }
 0x2c1   : > { %1207 = vperm.xlu1 %11531, %v1185_v6  }
 0x2c4   : > { %1212 = vperm.xlu0 %11530, %v1186_v24  }
 0x2c8   : > { %1065 = vperm.xlu2 %11532, %v1027_v28  }
 0x2c9   : > { %1222 = vperm.xlu1 %11531, %v1188_v29  }
 0x2cc   : > { %1227 = vperm.xlu0 %11530, %v1189_v30   ;;  %v869_v30 = vld [vmem:[%s17422_s3 + $0x8] sm:$0xff] }
 0x2d0   : > { %1202 = vperm.xlu2 %11532, %v1184_v13  }
 0x2d1   : > { %1343 = vperm.xlu1 %11531, %v1329_v10  }
 0x2d4   : > { %1348 = vperm.xlu0 %11530, %v1330_v31  }
 0x2d8   : > { %1217 = vperm.xlu2 %11532, %v1187_v36  }
 0x2d9   : > { %1358 = vperm.xlu1 %11531, %v1332_v39  }
 0x2db   : > { %v717_v48 = vpop.xlane.xlu0 %716 }
 0x2dc   : > { %1363 = vperm.xlu0 %11530, %v1333_v11   ;;  %726 = vmatpush.msra.mxu2 %v717_v48 }
 0x2dd   : > { %11470 = vmatpush.msra.mxu3 %v717_v48 }
 0x2e0   : > { %1338 = vperm.xlu2 %11532, %v1328_v12  }
 0x2e1   : > { %1373 = vperm.xlu1 %11531, %v1335_v49  }
 0x2e3   : > { %v711_v52 = vpop.xlane.xlu1 %710  ;;  %v705_v18 = vpop.xlane.xlu0 %704 }
 0x2e8   : > { %1353 = vperm.xlu2 %11532, %v1331_v21  }
 0x2eb   : > { %v714_v51 = vpop.xlane.xlu2 %713  ;;  %v702_v19 = vpop.xlane.xlu1 %701 }
 0x2ec   : > { %727 = vmatpush.msra.mxu2 %v714_v51  ;;  %11471 = vmatpush.msra.mxu3 %v714_v51  ;;  %v870_v51 = vld [vmem:[%s17422_s3 + $0x10] sm:$0xff] }
 0x2ee   : > { %728 = vmatpush.msra.mxu2 %v711_v52  ;;  %11472 = vmatpush.msra.mxu3 %v711_v52 }
 0x2f0   : > { %1368 = vperm.xlu2 %11532, %v1334_v53  }
 0x2f3   : > { %v708_v54 = vpop.xlane.xlu2 %707  ;;  %v696_v56 = vpop.xlane.xlu0 %695 }
 0x2f4   : > { %729 = vmatpush.msra.mxu2 %v708_v54  ;;  %11473 = vmatpush.msra.mxu3 %v708_v54 }
 0x2f6   : > { %730 = vmatpush.msra.mxu2 %v705_v18  ;;  %11474 = vmatpush.msra.mxu3 %v705_v18 }
 0x2f8   : > { %731 = vmatpush.msra.mxu2 %v702_v19  ;;  %11475 = vmatpush.msra.mxu3 %v702_v19 }
 0x2fb   : > { %v699_v55 = vpop.xlane.xlu2 %698 }
 0x2fc   : > { %732 = vmatpush.msra.mxu2 %v699_v55  ;;  %11476 = vmatpush.msra.mxu3 %v699_v55 }
 0x2fe   : > { %733 = vmatpush.msra.mxu2 %v696_v56  ;;  %11477 = vmatpush.msra.mxu3 %v696_v56 }
 0x2ff   : > { %10093 = vmatmul.msk.f32.vlgmr.msra.gmra.mxu3 %vm514_vm0, %v13331_v32  ;;  %10091 = vmatmul.msk.f32.vlgmr.msra.gmra.mxu2 %vm514_vm0, %v13336_v33 }
 0x307   : > { %10094 = vmatmul.msk.f32.gmra.mxu3 %vm514_vm0, %v13345_v34  ;;  %10092 = vmatmul.msk.f32.gmra.mxu2 %vm514_vm0, %v13350_v35 }
 0x382   : > { %v741_v57 = vpop.f32.mrf.mxu3  ;;  %v735_v58 = vpop.f32.mrf.mxu2 }
 0x38a   : > { %v744_v61 = vpop.f32.mrf.mxu3  ;;  %v738_v62 = vpop.f32.mrf.mxu2 }
 0x38b   : > { %759 = vmatpush.msrb.mxu3 %v744_v61 }
 0x38d   : > { %760 = vmatpush.msrb.mxu3 %v741_v57 }
 0x38f   : > { %761 = vmatpush.msrb.mxu3 %v738_v62  ;;  %v871_v62 = vld [vmem:[%s17422_s3 + $0x18] sm:$0xff] }
 0x391   : > { %762 = vmatpush.msrb.mxu3 %v735_v58 }
 0x392   : > { %10095 = vmatmul.msk.f32.vlgmr.msrb.gmra.mxu3 %vm556_vm1, %v13359_v40 }
 0x39a   : > { %10096 = vmatmul.msk.f32.gmra.mxu3 %vm556_vm1, %v13366_v41 }
 0x3a2   : > { %10097 = vmatmul.msk.f32.gmra.mxu3 %vm556_vm1, %v13373_v42 }
 0x3aa   : > { %10098 = vmatmul.msk.f32.gmra.mxu3 %vm556_vm1, %v13380_v43 }
 0x3b2   : > { %10099 = vmatmul.msk.f32.gmra.mxu3 %vm556_vm1, %v13387_v44 }
 0x3ba   : > { %10100 = vmatmul.msk.f32.gmra.mxu3 %vm556_vm1, %v13394_v45 }
 0x3c2   : > { %10101 = vmatmul.msk.f32.gmra.mxu3 %vm556_vm1, %v13401_v46 }
 0x3ca   : > { %10102 = vmatmul.msk.f32.gmra.mxu3 %vm556_vm1, %v13408_v47  ;;  %v868_v47 = vld [vmem:[%s17422_s3] sm:$0xff] }
 0x415   : > { %v764_v32 = vpop.f32.mrf.mxu3 }
 0x416   : > { %v765_v33 = vadd.f32 1e-05, %v764_v32 }
 0x418   : > { %12205 = vrsqrt.f32 %v765_v33  ;;  %vm794_vm3 = vweird.f32 %v765_v33 }
 0x41d   : > { %v767_v34 = vpop.f32.mrf.mxu3 }
 0x41e   : > { %v12206_v35 = vpop.eup %12205  ;;  %v768_v40 = vadd.f32 1e-05, %v767_v34 }
 0x41f   : > { %v789_v41 = vmul.f32 %v12206_v35, %v765_v33  ;;  %vm795_vm2 = vweird.f32 %v12206_v35 }
 0x420   : > { %12207 = vrsqrt.f32 %v768_v40  ;;  %vm796_vm4 = vmor %vm794_vm3, %vm795_vm2  ;;  %vm804_vm6 = vweird.f32 %v768_v40 }
 0x421   : > { %v790_v42 = vmul.f32 %v12206_v35, %v789_v41 }
 0x423   : > { %v791_v43 = vmul.f32 0.5, %v790_v42 }
 0x425   : > { %v792_v44 = vsub.f32 1.5, %v791_v43  ;;  %v770_v63 = vpop.f32.mrf.mxu3 }
 0x426   : > { %v12208_v45 = vpop.eup %12207  ;;  %v771_v3 = vadd.f32 1e-05, %v770_v63 }
 0x427   : > { %v799_v46 = vmul.f32 %v12208_v45, %v768_v40  ;;  %v793_v5 = vmul.f32 %v12206_v35, %v792_v44  ;;  %vm805_vm5 = vweird.f32 %v12208_v45 }
 0x428   : > { %12209 = vrsqrt.f32 %v771_v3  ;;  %vm806_vm7 = vmor %vm804_vm6, %vm805_vm5  ;;  %vm814_vm9 = vweird.f32 %v771_v3 }
 0x429   : > { %v800_v16 = vmul.f32 %v12208_v45, %v799_v46  ;;  %v797_v17 = vsel %vm796_vm4, %v12206_v35, %v793_v5 }
 0x42a   : > { %v876_v22 = vmul.f32 %v868_v47, %v797_v17 }
 0x42b   : > { %v801_v2 = vmul.f32 0.5, %v800_v16 }
 0x42c   : > { %886 = vperm.xlu1 %11531, %v876_v22  }
 0x42d   : > { %v802_v4 = vsub.f32 1.5, %v801_v2  ;;  %v773_v23 = vpop.f32.mrf.mxu3 }
 0x42e   : > { %v12210_v6 = vpop.eup %12209  ;;  %v774_v24 = vadd.f32 1e-05, %v773_v23 }
 0x42f   : > { %v809_v28 = vmul.f32 %v12210_v6, %v771_v3  ;;  %v803_v29 = vmul.f32 %v12208_v45, %v802_v4  ;;  %vm815_vm8 = vweird.f32 %v12210_v6 }
 0x430   : > { %12211 = vrsqrt.f32 %v774_v24  ;;  %vm816_vm10 = vmor %vm814_vm9, %vm815_vm8  ;;  %vm824_vm12 = vweird.f32 %v774_v24 }
 0x431   : > { %v810_v13 = vmul.f32 %v12210_v6, %v809_v28  ;;  %v807_v10 = vsel %vm806_vm7, %v12208_v45, %v803_v29  ;;  %v872_v45 = vld [vmem:[%s17422_s3 + $0x20] sm:$0xff] }
 0x432   : > { %v877_v31 = vmul.f32 %v869_v30, %v807_v10 }
 0x433   : > { %v811_v36 = vmul.f32 0.5, %v810_v13 }
 0x434   : > { %891 = vperm.xlu2 %11532, %v877_v31   ;;  %v13630_v31 = vpop.permute.xlu1 %955 }
 0x435   : > { %v812_v39 = vsub.f32 1.5, %v811_v36  ;;  %v776_v11 = vpop.f32.mrf.mxu3 }
 0x436   : > { %v12212_v48 = vpop.eup %12211  ;;  %v777_v12 = vadd.f32 1e-05, %v776_v11  ;;  %v874_v11 = vld [vmem:[%s17422_s3 + $0x30] sm:$0xff] }
 0x437   : > { %v819_v49 = vmul.f32 %v12212_v48, %v774_v24  ;;  %v813_v21 = vmul.f32 %v12210_v6, %v812_v39  ;;  %vm825_vm11 = vweird.f32 %v12212_v48 }
 0x438   : > { %12213 = vrsqrt.f32 %v777_v12  ;;  %vm826_vm13 = vmor %vm824_vm12, %vm825_vm11  ;;  %vm834_vm15 = vweird.f32 %v777_v12  ;;  %vm1562_vm11 = vcmask 125952   ;;  %vm2635_vm12 = vcmask 130048  }
 0x439   : > { %v820_v52 = vmul.f32 %v12212_v48, %v819_v49  ;;  %v817_v53 = vsel %vm816_vm10, %v12210_v6, %v813_v21  ;;  %v873_v6 = vld [vmem:[%s17422_s3 + $0x28] sm:$0xff] }
 0x43a   : > { %v878_v54 = vmul.f32 %v870_v51, %v817_v53  ;;  %v875_v53 = vld [vmem:[%s17422_s3 + $0x38] sm:$0xff] }
 0x43b   : > { %v821_v18 = vmul.f32 0.5, %v820_v52 }
 0x43c   : > { %896 = vperm.xlu0 %11530, %v878_v54   ;;  %v971_v54 = vpop.permute.xlu1 %970 }
 0x43d   : > { %v822_v19 = vsub.f32 1.5, %v821_v18  ;;  %v779_v55 = vpop.f32.mrf.mxu3  ;;  %v13638_v18 = vpop.permute.xlu2 %950 }
 0x43e   : > { %v12214_v56 = vpop.eup %12213  ;;  %v780_v57 = vadd.f32 1e-05, %v779_v55 }
 0x43f   : > { %v829_v58 = vmul.f32 %v12214_v56, %v777_v12  ;;  %v823_v61 = vmul.f32 %v12212_v48, %v822_v19  ;;  %vm835_vm14 = vweird.f32 %v12214_v56 }
 0x440   : > { %12215 = vrsqrt.f32 %v780_v57  ;;  %vm836_vm1 = vmor %vm834_vm15, %vm835_vm14  ;;  %vm844_vm3 = vweird.f32 %v780_v57 }
 0x441   : > { %v830_v32 = vmul.f32 %v12214_v56, %v829_v58  ;;  %v827_v33 = vsel %vm826_vm13, %v12212_v48, %v823_v61 }
 0x442   : > { %v879_v34 = vmul.f32 %v871_v62, %v827_v33 }
 0x443   : > { %v831_v35 = vmul.f32 0.5, %v830_v32 }
 0x444   : > { %901 = vperm.xlu1 %11531, %v879_v34  }
 0x445   : > { %v832_v40 = vsub.f32 1.5, %v831_v35  ;;  %v782_v41 = vpop.f32.mrf.mxu3  ;;  %v13642_v58 = vpop.permute.xlu2 %965 }
 0x446   : > { %v12216_v42 = vpop.eup %12215  ;;  %v783_v43 = vadd.f32 1e-05, %v782_v41 }
 0x447   : > { %v839_v44 = vmul.f32 %v12216_v42, %v780_v57  ;;  %v833_v63 = vmul.f32 %v12214_v56, %v832_v40  ;;  %vm845_vm2 = vweird.f32 %v12216_v42  ;;  %v986_v57 = vpop.permute.xlu1 %985 }
 0x448   : > { %12217 = vrsqrt.f32 %v783_v43  ;;  %vm846_vm4 = vmor %vm844_vm3, %vm845_vm2  ;;  %vm854_vm6 = vweird.f32 %v783_v43 }
 0x449   : > { %v840_v3 = vmul.f32 %v12216_v42, %v839_v44  ;;  %v837_v46 = vsel %vm836_vm1, %v12214_v56, %v833_v63  ;;  %v13640_v56 = vpop.permute.xlu0 %960 }
 0x44a   : > { %v880_v5 = vmul.f32 %v872_v45, %v837_v46 }
 0x44b   : > { %v841_v47 = vmul.f32 0.5, %v840_v3 }
 0x44c   : > { %906 = vperm.xlu0 %11530, %v880_v5  }
 0x44d   : > { %v842_v16 = vsub.f32 1.5, %v841_v47  ;;  %v785_v17 = vpop.f32.mrf.mxu3  ;;  %v981_v32 = vpop.permute.xlu2 %980 }
 0x44e   : > { %v12218_v22 = vpop.eup %12217  ;;  %v786_v2 = vadd.f32 1e-05, %v785_v17 }
 0x44f   : > { %v849_v4 = vmul.f32 %v12218_v22, %v783_v43  ;;  %v843_v23 = vmul.f32 %v12216_v42, %v842_v16  ;;  %vm855_vm5 = vweird.f32 %v12218_v22  ;;  %v13644_v62 = vpop.permute.xlu1 %1040 }
 0x450   : > { %12219 = vrsqrt.f32 %v786_v2  ;;  %vm856_vm7 = vmor %vm854_vm6, %vm855_vm5  ;;  %vm864_vm9 = vweird.f32 %v786_v2 }
 0x451   : > { %v850_v24 = vmul.f32 %v12218_v22, %v849_v4  ;;  %v847_v28 = vsel %vm846_vm4, %v12216_v42, %v843_v23  ;;  %v976_v61 = vpop.permute.xlu0 %975 }
 0x452   : > { %v881_v29 = vmul.f32 %v873_v6, %v847_v28 }
 0x453   : > { %v851_v30 = vmul.f32 0.5, %v850_v24 }
 0x454   : > { %911 = vperm.xlu2 %11532, %v881_v29  }
 0x455   : > { %v852_v13 = vsub.f32 1.5, %v851_v30  ;;  %v13650_v35 = vpop.permute.xlu2 %1035 }
 0x456   : > { %v12220_v10 = vpop.eup %12219 }
 0x457   : > { %v859_v36 = vmul.f32 %v12220_v10, %v786_v2  ;;  %v853_v39 = vmul.f32 %v12218_v22, %v852_v13  ;;  %vm865_vm8 = vweird.f32 %v12220_v10  ;;  %v13648_v34 = vpop.permute.xlu1 %1055 }
 0x458   : > { %vm866_vm10 = vmor %vm864_vm9, %vm865_vm8 }
 0x459   : > { %v860_v48 = vmul.f32 %v12220_v10, %v859_v36  ;;  %v857_v12 = vsel %vm856_vm7, %v12218_v22, %v853_v39  ;;  %v13646_v33 = vpop.permute.xlu0 %1030 }
 0x45a   : > { %v882_v49 = vmul.f32 %v874_v11, %v857_v12 }
 0x45b   : > { %v861_v21 = vmul.f32 0.5, %v860_v48 }
 0x45c   : > { %916 = vperm.xlu1 %11531, %v882_v49  }
 0x45d   : > { %v862_v51 = vsub.f32 1.5, %v861_v21  ;;  %v13656_v42 = vpop.permute.xlu2 %1050 }
 0x45f   : > { %v863_v52 = vmul.f32 %v12220_v10, %v862_v51  ;;  %v13654_v41 = vpop.permute.xlu1 %1192 }
 0x461   : > { %v867_v19 = vsel %vm866_vm10, %v12220_v10, %v863_v52  ;;  %v13652_v40 = vpop.permute.xlu0 %1045 }
 0x462   : > { %v883_v55 = vmul.f32 %v875_v53, %v867_v19 }
 0x464   : > { %921 = vperm.xlu0 %11530, %v883_v55  }
 0x465   : > { %v13662_v63 = vpop.permute.xlu2 %1065 }
 0x467   : > { %v13660_v44 = vpop.permute.xlu1 %1207 }
 0x469   : > { %v13658_v43 = vpop.permute.xlu0 %1060 }
 0x46d   : > { %v13668_v46 = vpop.permute.xlu2 %1202 }
 0x46f   : > { %v13666_v3 = vpop.permute.xlu1 %1222 }
 0x471   : > { %v13664_v45 = vpop.permute.xlu0 %1197 }
 0x475   : > { %v13674_v16 = vpop.permute.xlu2 %1217 }
 0x476   : > { %17691 = vst [vmem:[#allocation18_spill] sm:$0xff] %v13674_v16 }
 0x477   : > { %v13672_v47 = vpop.permute.xlu1 %1343 }
 0x478   : > { %17690 = vst [vmem:[#allocation17_spill] sm:$0xff] %v13672_v47 }
 0x479   : > { %v13670_v5 = vpop.permute.xlu0 %1212 }
 0x47d   : > { %v13680_v2 = vpop.permute.xlu2 %1338 }
 0x47e   : > { %17693 = vst [vmem:[#allocation20_spill] sm:$0xff] %v13680_v2 }
 0x47f   : > { %v13678_v22 = vpop.permute.xlu1 %1358 }
 0x481   : > { %v13676_v17 = vpop.permute.xlu0 %1227 }
 0x482   : > { %17692 = vst [vmem:[#allocation19_spill] sm:$0xff] %v13676_v17 }
 0x485   : > { %v13686_v6 = vpop.permute.xlu2 %1353 }
 0x486   : > { %17695 = vst [vmem:[#allocation22_spill] sm:$0xff] %v13686_v6 }
 0x487   : > { %v13684_v23 = vpop.permute.xlu1 %1373 }
 0x488   : > { %17694 = vst [vmem:[#allocation21_spill] sm:$0xff] %v13684_v23 }
 0x489   : > { %v13682_v4 = vpop.permute.xlu0 %1348 }
 0x48d   : > { %v13690_v29 = vpop.permute.xlu2 %1368 }
 0x491   : > { %v13688_v24 = vpop.permute.xlu0 %1363 }
 0x492   : > { %17696 = vst [vmem:[#allocation23_spill] sm:$0xff] %v13688_v24 }
 0x495   : > { %v892_v10 = vpop.permute.xlu2 %891 }
 0x49e   : > { %v887_v28 = vpop.permute.xlu1 %886 }
 0x4ae   : > { %v897_v30 = vpop.permute.xlu0 %896  ;;  %v912_v11 = vpop.permute.xlu2 %911 }
 0x4af   : > { %v934_v19 = vmul.f32 %v912_v11, %v13423_v8  ;;  %v935_v55 = vmul.f32 %v912_v11, %v13426_v15  ;;  %v924_v15 = vmul.f32 %v887_v28, %v13469_v37  ;;  %v11245_v11 = vld [vmem:[%s17428_s9] sm:$0xff] }
 0x4b1   : > { %v999_v8 = vadd.f32 %v976_v61, %v935_v55  ;;  %v988_v37 = vadd.f32 %v13638_v18, %v924_v15 }
 0x4b6   : > { %v902_v13 = vpop.permute.xlu1 %901 }
 0x4be   : > { %v907_v36 = vpop.permute.xlu0 %906 }
 0x4bf   : > { %v932_v21 = vmul.f32 %v907_v36, %v13463_v14  ;;  %v933_v51 = vmul.f32 %v907_v36, %v13466_v9  ;;  %v998_v36 = vadd.f32 %v976_v61, %v934_v19 }
 0x4c1   : > { %v997_v14 = vadd.f32 %v971_v54, %v933_v51 }
 0x4ce   : > { %v917_v39 = vpop.permute.xlu1 %916 }
 0x4cf   : > { %v936_v48 = vmul.f32 %v917_v39, %v13449_v26  ;;  %v937_v12 = vmul.f32 %v917_v39, %v13452_v27  ;;  %v930_v26 = vmul.f32 %v902_v13, %v13429_v0  ;;  %v931_v27 = vmul.f32 %v902_v13, %v13432_v1  ;;  %v11240_v13 = vld [vmem:[%s17426_s7 + $0x18] sm:$0xff] }
 0x4d0   : > { %v996_v39 = vadd.f32 %v971_v54, %v932_v21 }
 0x4d1   : > { %v1000_v24 = vadd.f32 %v981_v32, %v936_v48  ;;  %v1001_v23 = vadd.f32 %v981_v32, %v937_v12  ;;  %v994_v0 = vadd.f32 %v13642_v58, %v930_v26  ;;  %v995_v1 = vadd.f32 %v13642_v58, %v931_v27  ;;  %v11246_v48 = vld [vmem:[%s17428_s9 + $0x8] sm:$0xff]  ;;  %v11247_v12 = vld [vmem:[%s17428_s9 + $0x10] sm:$0xff] }
 0x4d2   : > { %v1008_v54 = vpack.c.bf16 %v998_v36, %v996_v39  ;;  %v1009_v32 = vpack.c.bf16 %v999_v8, %v997_v14 }
 0x4d6   : > { %v922_v49 = vpop.permute.xlu0 %921 }
 0x4d7   : > { %v938_v52 = vmul.f32 %v922_v49, %v13413_v59  ;;  %v939_v53 = vmul.f32 %v922_v49, %v13416_v60  ;;  %v928_v59 = vmul.f32 %v897_v30, %v13443_v7  ;;  %v929_v60 = vmul.f32 %v897_v30, %v13446_v25  ;;  %v11243_v30 = vld [vmem:[%s17424_s5 + $0x10] sm:$0xff]  ;;  %v11248_v49 = vld [vmem:[%s17428_s9 + $0x18] sm:$0xff] }
 0x4d8   : > { %v926_v7 = vmul.f32 %v892_v10, %v13483_v50  ;;  %v927_v25 = vmul.f32 %v892_v10, %v13486_v20  ;;  %v11244_v10 = vld [vmem:[%s17424_s5 + $0x18] sm:$0xff] }
 0x4d9   : > { %v1002_v47 = vadd.f32 %v986_v57, %v938_v52  ;;  %v1003_v2 = vadd.f32 %v986_v57, %v939_v53  ;;  %v925_v57 = vmul.f32 %v887_v28, %v13472_v38  ;;  %v992_v61 = vadd.f32 %v13640_v56, %v928_v59  ;;  %v11239_v28 = vld [vmem:[%s17426_s7 + $0x10] sm:$0xff] }
 0x4da   : > { %v991_v50 = vadd.f32 %v13630_v31, %v927_v25 }
 0x4db   : > { %v1010_v6 = vpack.c.bf16 %v1002_v47, %v1000_v24  ;;  %v1011_v9 = vpack.c.bf16 %v1003_v2, %v1001_v23  ;;  %v993_v47 = vadd.f32 %v13640_v56, %v929_v60  ;;  %v989_v38 = vadd.f32 %v13638_v18, %v925_v57  ;;  %v11237_v24 = vld [vmem:[%s17426_s7] sm:$0xff] }
 0x4dc   : > { %v1006_v2 = vpack.c.bf16 %v994_v0, %v992_v61  ;;  %v990_v23 = vadd.f32 %v13630_v31, %v926_v7  ;;  %v11241_v18 = vld [vmem:[%s17424_s5] sm:$0xff]  ;;  %v11238_v31 = vld [vmem:[%s17426_s7 + $0x8] sm:$0xff] }
 0x4dd   : > { %1104 = vmatpush.bf16.msrb.mxu0 %v1010_v6  ;;  %1133 = vmatpush.bf16.msrb.mxu2 %v1011_v9  ;;  %v1007_v58 = vpack.c.bf16 %v995_v1, %v993_v47  ;;  %v1005_v56 = vpack.c.bf16 %v991_v50, %v989_v38 }
 0x4de   : > { %1266 = vmatpush.bf16.msra.mxu1 %v1010_v6  ;;  %1295 = vmatpush.bf16.msra.mxu3 %v1011_v9  ;;  %v1004_v20 = vpack.c.bf16 %v990_v23, %v988_v37 }
 0x4e1   : > { %1105 = vmatpush.bf16.msrb.mxu0 %v1008_v54  ;;  %1134 = vmatpush.bf16.msrb.mxu2 %v1009_v32 }
 0x4e2   : > { %1267 = vmatpush.bf16.msra.mxu1 %v1008_v54  ;;  %1296 = vmatpush.bf16.msra.mxu3 %v1009_v32 }
 0x4e5   : > { %1106 = vmatpush.bf16.msrb.mxu0 %v1006_v2  ;;  %1135 = vmatpush.bf16.msrb.mxu2 %v1007_v58 }
 0x4e6   : > { %1268 = vmatpush.bf16.msra.mxu1 %v1006_v2  ;;  %1297 = vmatpush.bf16.msra.mxu3 %v1007_v58 }
 0x4e9   : > { %1107 = vmatpush.bf16.msrb.mxu0 %v1004_v20  ;;  %1136 = vmatpush.bf16.msrb.mxu2 %v1005_v56 }
 0x4ea   : > { %1269 = vmatpush.bf16.msra.mxu1 %v1004_v20  ;;  %1298 = vmatpush.bf16.msra.mxu3 %v1005_v56 }
 0x4ec   : > { %10119 = vmatmul.msk.bf16.vlgmr.msrb.gmra.mxu0 %vm514_vm0, %v11237_v24  ;;  %10123 = vmatmul.msk.bf16.vlgmr.msrb.gmra.mxu2 %vm514_vm0, %v11237_v24 }
 0x4ed   : > { %1412 = vmatpush.bf16.msra.mxu0 %v1010_v6  ;;  %1441 = vmatpush.bf16.msra.mxu2 %v1011_v9  ;;  %v11242_v6 = vld [vmem:[%s17424_s5 + $0x8] sm:$0xff] }
 0x4ee   : > { %10143 = vmatmul.msk.bf16.vlgmr.msra.gmra.mxu1 %vm514_vm0, %v11241_v18  ;;  %10147 = vmatmul.msk.bf16.vlgmr.msra.gmra.mxu3 %vm514_vm0, %v11241_v18 }
 0x4f1   : > { %1413 = vmatpush.bf16.msra.mxu0 %v1008_v54  ;;  %1442 = vmatpush.bf16.msra.mxu2 %v1009_v32 }
 0x4f5   : > { %1414 = vmatpush.bf16.msra.mxu0 %v1006_v2  ;;  %1443 = vmatpush.bf16.msra.mxu2 %v1007_v58 }
 0x4f9   : > { %1415 = vmatpush.bf16.msra.mxu0 %v1004_v20  ;;  %1444 = vmatpush.bf16.msra.mxu2 %v1005_v56 }
 0x4fc   : > { %10120 = vmatmul.msk.bf16.gmra.mxu0 %vm514_vm0, %v11238_v31  ;;  %10124 = vmatmul.msk.bf16.gmra.mxu2 %vm514_vm0, %v11238_v31 }
 0x4fe   : > { %10144 = vmatmul.msk.bf16.gmra.mxu1 %vm514_vm0, %v11242_v6  ;;  %10148 = vmatmul.msk.bf16.gmra.mxu3 %vm514_vm0, %v11242_v6 }
 0x50c   : > { %10121 = vmatmul.msk.bf16.gmra.mxu0 %vm514_vm0, %v11239_v28  ;;  %10125 = vmatmul.msk.bf16.gmra.mxu2 %vm514_vm0, %v11239_v28 }
 0x50e   : > { %10145 = vmatmul.msk.bf16.gmra.mxu1 %vm514_vm0, %v11243_v30  ;;  %10149 = vmatmul.msk.bf16.gmra.mxu3 %vm514_vm0, %v11243_v30 }
 0x51c   : > { %10122 = vmatmul.msk.bf16.gmra.mxu0 %vm514_vm0, %v11240_v13  ;;  %10126 = vmatmul.msk.bf16.gmra.mxu2 %vm514_vm0, %v11240_v13 }
 0x51e   : > { %10146 = vmatmul.msk.bf16.gmra.mxu1 %vm514_vm0, %v11244_v10  ;;  %10150 = vmatmul.msk.bf16.gmra.mxu3 %vm514_vm0, %v11244_v10 }
 0x52c   : > { %10167 = vmatmul.msk.bf16.vlgmr.msra.gmra.mxu0 %vm514_vm0, %v11245_v11  ;;  %10171 = vmatmul.msk.bf16.vlgmr.msra.gmra.mxu2 %vm514_vm0, %v11245_v11 }
 0x53c   : > { %10168 = vmatmul.msk.bf16.gmra.mxu0 %vm514_vm0, %v11246_v48  ;;  %10172 = vmatmul.msk.bf16.gmra.mxu2 %vm514_vm0, %v11246_v48 }
 0x54c   : > { %10169 = vmatmul.msk.bf16.gmra.mxu0 %vm514_vm0, %v11247_v12  ;;  %10173 = vmatmul.msk.bf16.gmra.mxu2 %vm514_vm0, %v11247_v12 }
 0x55c   : > { %10170 = vmatmul.msk.bf16.gmra.mxu0 %vm514_vm0, %v11248_v49  ;;  %10174 = vmatmul.msk.bf16.gmra.mxu2 %vm514_vm0, %v11248_v49 }
 0x569   : > { %v1109_v21 = vpop.f32.mrf.mxu0 }
 0x56a   : > { %v1110_v53 = vadd.f32 %v1109_v21, %v13646_v33 }
 0x56b   : > { %v1271_v51 = vpop.f32.mrf.mxu1 }
 0x56c   : > { %v1272_v26 = vadd.f32 %v1271_v51, %v13654_v41 }
 0x56f   : > { %v1138_v52 = vpop.f32.mrf.mxu2 }
 0x570   : > { %v1139_v19 = vadd.f32 %v1138_v52, %v13646_v33 }
 0x571   : > { %v1300_v55 = vpop.f32.mrf.mxu3  ;;  %v1111_v39 = vpop.f32.mrf.mxu0 }
 0x572   : > { %v1301_v27 = vadd.f32 %v1300_v55, %v13654_v41  ;;  %v1158_v14 = vpack.c.bf16 %v1139_v19, %v1110_v53  ;;  %v1112_v36 = vadd.f32 %v1111_v39, %v13650_v35 }
 0x573   : > { %v1273_v9 = vpop.f32.mrf.mxu1 }
 0x574   : > { %v11533_v59 = vpack.i.bf16 %v1301_v27, %v1272_v26  ;;  %1166 = vst [vmem:[#allocation3] sm:$0xff] %v1158_v14  ;;  %v1274_v57 = vadd.f32 %v1273_v9, %v13664_v45 }
 0x576   : > { %11534 = vxpose.xlu0.b32.start [1/2] (short) %v11533_v59, 128 }
 0x577   : > { %v1140_v60 = vpop.f32.mrf.mxu2 }
 0x578   : > { %v1141_v8 = vadd.f32 %v1140_v60, %v13650_v35 }
 0x579   : > { %v1302_v15 = vpop.f32.mrf.mxu3  ;;  %v1114_v0 = vpop.f32.mrf.mxu0 }
 0x57a   : > { %v1303_v33 = vadd.f32 %v1302_v15, %v13664_v45  ;;  %v1159_v1 = vpack.c.bf16 %v1141_v8, %v1112_v36  ;;  %v1115_v7 = vadd.f32 %v1114_v0, %v13644_v62 }
 0x57b   : > { %v1276_v54 = vpop.f32.mrf.mxu1  ;;  %v10209_v45 = vld [vmem:[#allocation3] sm:$0xf]  ;;  %v11285_v50 = vld [vmem:[#allocation3 + $0x4] sm:$0xf] }
 0x57c   : > { %v11535_v41 = vpack.i.bf16 %v1303_v33, %v1274_v57  ;;  %1167 = vst [vmem:[#allocation3 + $0x8] sm:$0xff] %v1159_v1  ;;  %v1277_v47 = vadd.f32 %v1276_v54, %v13668_v46 }
 0x57e   : > { %11536 = vxpose.xlu0.b32.end [2/2] (short) %v11535_v41, 128 }
 0x57f   : > { %v1143_v32 = vpop.f32.mrf.mxu2 }
 0x580   : > { %v1144_v25 = vadd.f32 %v1143_v32, %v13644_v62 }
 0x581   : > { %v1305_v61 = vpop.f32.mrf.mxu3  ;;  %v1116_v37 = vpop.f32.mrf.mxu0 }
 0x582   : > { %v1306_v35 = vadd.f32 %v1305_v61, %v13668_v46  ;;  %v1160_v38 = vpack.c.bf16 %v1144_v25, %v1115_v7  ;;  %v1117_v18 = vadd.f32 %v1116_v37, %v13652_v40 }
 0x583   : > { %v1278_v2 = vpop.f32.mrf.mxu1  ;;  %v11286_v23 = vld [vmem:[#allocation3 + $0x4] sm:$0xf0]  ;;  %v10211_v20 = vld [vmem:[#allocation3 + $0x8] sm:$0xf0] }
 0x584   : > { %v11617_v58 = vpack.i.bf16 %v1306_v35, %v1277_v47  ;;  %1168 = vst [vmem:[#allocation3 + $0x10] sm:$0xff] %v1160_v38  ;;  %v10210_v56 = vor.u32 %v11286_v23, %v10209_v45  ;;  %v10214_v24 = vor.u32 %v11285_v50, %v10211_v20  ;;  %v1279_v6 = vadd.f32 %v1278_v2, %v13660_v44 }
 0x586   : > { %11618 = vxpose.xlu1.b32.start [1/2] (short) %v11617_v58, 128  ;;  %2667 = vmatpush.bf16.msrb.mxu1 %v10210_v56 }
 0x587   : > { %2716 = vmatpush.bf16.msrb.mxu3 %v10214_v24  ;;  %v1145_v62 = vpop.f32.mrf.mxu2 }
 0x588   : > { %v1146_v31 = vadd.f32 %v1145_v62, %v13652_v40 }
 0x589   : > { %v1307_v46 = vpop.f32.mrf.mxu3  ;;  %v1119_v30 = vpop.f32.mrf.mxu0 }
 0x58a   : > { %v1308_v28 = vadd.f32 %v1307_v46, %v13660_v44  ;;  %v1161_v13 = vpack.c.bf16 %v1146_v31, %v1117_v18  ;;  %v1120_v12 = vadd.f32 %v1119_v30, %v13656_v42 }
 0x58b   : > { %v1281_v10 = vpop.f32.mrf.mxu1  ;;  %v10265_v53 = vld [vmem:[#allocation3 + $0x10] sm:$0xf]  ;;  %v11287_v55 = vld [vmem:[#allocation3 + $0x14] sm:$0xf] }
 0x58c   : > { %v11619_v11 = vpack.i.bf16 %v1308_v28, %v1279_v6  ;;  %1169 = vst [vmem:[#allocation3 + $0x18] sm:$0xff] %v1161_v13  ;;  %v1282_v8 = vadd.f32 %v1281_v10, %v13670_v5 }
 0x58e   : > { %11620 = vxpose.xlu1.b32.end [2/2] (short) %v11619_v11, 128 }
 0x58f   : > { %v1148_v48 = vpop.f32.mrf.mxu2 }
 0x590   : > { %v1149_v49 = vadd.f32 %v1148_v48, %v13656_v42 }
 0x591   : > { %v1310_v21 = vpop.f32.mrf.mxu3  ;;  %v1121_v51 = vpop.f32.mrf.mxu0 }
 0x592   : > { %v1162_v52 = vpack.c.bf16 %v1149_v49, %v1120_v12  ;;  %v1122_v14 = vadd.f32 %v1121_v51, %v13648_v34 }
 0x593   : > { %v1283_v40 = vpop.f32.mrf.mxu1  ;;  %v11288_v19 = vld [vmem:[#allocation3 + $0x14] sm:$0xf0]  ;;  %v10267_v26 = vld [vmem:[#allocation3 + $0x18] sm:$0xf0] }
 0x594   : > { %1170 = vst [vmem:[#allocation3 + $0x20] sm:$0xff] %v1162_v52  ;;  %v10266_v44 = vor.u32 %v11288_v19, %v10265_v53  ;;  %v10270_v27 = vor.u32 %v11287_v55, %v10267_v26  ;;  %v1284_v47 = vadd.f32 %v1283_v40, %v13674_v16 }
 0x596   : > { %2839 = vmatpush.bf16.msrb.mxu0 %v10266_v44  ;;  %2888 = vmatpush.bf16.msrb.mxu2 %v10270_v27 }
 0x597   : > { %v1150_v39 = vpop.f32.mrf.mxu2 }
 0x598   : > { %v1151_v9 = vadd.f32 %v1150_v39, %v13648_v34  ;;  %v13803_v34 = vadd.f32 %v1310_v21, %v13670_v5 }
 0x599   : > { %v13796_v59 = vpop.f32.mrf.mxu3  ;;  %v1124_v42 = vpop.f32.mrf.mxu0 }
 0x59a   : > { %17697 = vst [vmem:[#allocation24_spill] sm:$0xff] %v13796_v59  ;;  %v1163_v60 = vpack.c.bf16 %v1151_v9, %v1122_v14  ;;  %v1125_v0 = vadd.f32 %v1124_v42, %v13658_v43  ;;  %v17706_v42 = vld [vmem:[#allocation22_spill] sm:$0xff] }
 0x59b   : > { %v1286_v36 = vpop.f32.mrf.mxu1  ;;  %17698 = vst [vmem:[#allocation25_spill] sm:$0xff] %v13803_v34  ;;  %v10321_v61 = vld [vmem:[#allocation3 + $0x20] sm:$0xf] }
 0x59c   : > { %v1287_v15 = vadd.f32 %v1286_v36, %v13666_v3  ;;  %1171 = vst [vmem:[#allocation3 + $0x28] sm:$0xff] %v1163_v60 }
 0x59e   : > { %v11701_v57 = vpack.i.bf16 %v1282_v8, %v1287_v15 }
 0x59f   : > { %v1153_v33 = vpop.f32.mrf.mxu2 }
 0x5a0   : > { %11702 = vxpose.xlu2.b32.start [1/2] (short) %v11701_v57, 128  ;;  %v1154_v1 = vadd.f32 %v1153_v33, %v13658_v43  ;;  %v11289_v43 = vld [vmem:[#allocation3 + $0x24] sm:$0xf] }
 0x5a1   : > { %v1315_v54 = vpop.f32.mrf.mxu3  ;;  %v1126_v32 = vpop.f32.mrf.mxu0 }
 0x5a2   : > { %v13806_v41 = vadd.f32 %v1315_v54, %v13666_v3  ;;  %v1164_v7 = vpack.c.bf16 %v1154_v1, %v1125_v0  ;;  %v1127_v23 = vadd.f32 %v1126_v32, %v13662_v63 }
 0x5a3   : > { %v1288_v25 = vpop.f32.mrf.mxu1  ;;  %v11290_v38 = vld [vmem:[#allocation3 + $0x24] sm:$0xf0]  ;;  %v10323_v2 = vld [vmem:[#allocation3 + $0x28] sm:$0xf0] }
 0x5a4   : > { %17699 = vst [vmem:[#allocation26_spill] sm:$0xff] %v13806_v41  ;;  %v1289_v37 = vadd.f32 %v1288_v25, %v13676_v17  ;;  %v10322_v5 = vor.u32 %v11290_v38, %v10321_v61  ;;  %v10326_v45 = vor.u32 %v11289_v43, %v10323_v2 }
 0x5a5   : > { %1172 = vst [vmem:[#allocation3 + $0x30] sm:$0xff] %v1164_v7 }
 0x5a6   : > { %v11703_v58 = vpack.i.bf16 %v1284_v47, %v1289_v37  ;;  %3011 = vmatpush.bf16.msra.mxu1 %v10322_v5  ;;  %3060 = vmatpush.bf16.msra.mxu3 %v10326_v45 }
 0x5a7   : > { %v1155_v3 = vpop.f32.mrf.mxu2 }
 0x5a8   : > { %11704 = vxpose.xlu2.b32.end [2/2] (short) %v11703_v58, 128  ;;  %v1156_v50 = vadd.f32 %v1155_v3, %v13662_v63 }
 0x5a9   : > { %v1417_v20 = vpop.f32.mrf.mxu0 }
 0x5aa   : > { %v1165_v56 = vpack.c.bf16 %v1156_v50, %v1127_v23 }
 0x5ac   : > { %1173 = vst [vmem:[#allocation3 + $0x38] sm:$0xff] %v1165_v56  ;;  %v10377_v18 = vld [vmem:[#allocation3 + $0x30] sm:$0xf]  ;;  %v11291_v46 = vld [vmem:[#allocation3 + $0x34] sm:$0xf] }
 0x5af   : > { %v1446_v24 = vpop.f32.mrf.mxu2 }
 0x5b1   : > { %v1419_v62 = vpop.f32.mrf.mxu0 }
 0x5b3   : > { %v11292_v31 = vld [vmem:[#allocation3 + $0x34] sm:$0xf0]  ;;  %v10379_v6 = vld [vmem:[#allocation3 + $0x38] sm:$0xf0] }
 0x5b4   : > { %v10378_v28 = vor.u32 %v11292_v31, %v10377_v18  ;;  %v10382_v30 = vor.u32 %v11291_v46, %v10379_v6 }
 0x5b6   : > { %3183 = vmatpush.bf16.msra.mxu0 %v10378_v28  ;;  %3232 = vmatpush.bf16.msra.mxu2 %v10382_v30 }
 0x5b7   : > { %v1448_v13 = vpop.f32.mrf.mxu2 }
 0x5b9   : > { %v1422_v10 = vpop.f32.mrf.mxu0 }
 0x5ba   : > { %v1423_v14 = vadd.f32 %v1422_v10, %v13682_v4 }
 0x5bf   : > { %v1451_v11 = vpop.f32.mrf.mxu2 }
 0x5c0   : > { %v1452_v39 = vadd.f32 %v1451_v11, %v13682_v4  ;;  %v17708_v4 = vld [vmem:[#allocation17_spill] sm:$0xff] }
 0x5c1   : > { %v1424_v48 = vpop.f32.mrf.mxu0  ;;  %v1449_v7 = vadd.f32 %v1448_v13, %v17708_v4  ;;  %v1420_v37 = vadd.f32 %v1419_v62, %v17708_v4 }
 0x5c2   : > { %v11869_v9 = vpack.i.bf16 %v1452_v39, %v1423_v14  ;;  %v1425_v36 = vadd.f32 %v1424_v48, %v17706_v42 }
 0x5c3   : > { %v11787_v2 = vpack.i.bf16 %v1449_v7, %v1420_v37 }
 0x5c7   : > { %v1453_v12 = vpop.f32.mrf.mxu2 }
 0x5c8   : > { %v1454_v60 = vadd.f32 %v1453_v12, %v17706_v42 }
 0x5c9   : > { %v1427_v49 = vpop.f32.mrf.mxu0 }
 0x5ca   : > { %v13819_v40 = vadd.f32 %v1427_v49, %v13678_v22  ;;  %v11871_v8 = vpack.i.bf16 %v1454_v60, %v1425_v36 }
 0x5cc   : > { %17702 = vst [vmem:[#allocation29_spill] sm:$0xff] %v13819_v40 }
 0x5cf   : > { %v1456_v63 = vpop.f32.mrf.mxu2 }
 0x5d0   : > { %v13827_v26 = vadd.f32 %v1456_v63, %v13678_v22  ;;  %v17707_v22 = vld [vmem:[#allocation20_spill] sm:$0xff] }
 0x5d1   : > { %v13814_v21 = vpop.f32.mrf.mxu0  ;;  %v1447_v15 = vadd.f32 %v1446_v24, %v17707_v22  ;;  %v1418_v0 = vadd.f32 %v1417_v20, %v17707_v22 }
 0x5d2   : > { %17700 = vst [vmem:[#allocation27_spill] sm:$0xff] %v13814_v21 }
 0x5d3   : > { %17704 = vst [vmem:[#allocation31_spill] sm:$0xff] %v13827_v26  ;;  %v11785_v32 = vpack.i.bf16 %v1447_v15, %v1418_v0 }
 0x5d7   : > { %v13816_v51 = vpop.f32.mrf.mxu2 }
 0x5d8   : > { %17701 = vst [vmem:[#allocation28_spill] sm:$0xff] %v13816_v51 }
 0x5d9   : > { %v1432_v52 = vpop.f32.mrf.mxu0 }
 0x5da   : > { %v13822_v53 = vadd.f32 %v1432_v52, %v13690_v29 }
 0x5dc   : > { %17703 = vst [vmem:[#allocation30_spill] sm:$0xff] %v13822_v53 }
 0x5df   : > { %v1461_v55 = vpop.f32.mrf.mxu2 }
 0x5e0   : > { %v13830_v44 = vadd.f32 %v1461_v55, %v13690_v29 }
 0x5e2   : > { %17705 = vst [vmem:[#allocation32_spill] sm:$0xff] %v13830_v44 }
 0x5f6   : > { %11870 = vxpose.xlu0.b32.start [1/2] (short) %v11869_v9, 128 }
 0x5fe   : > { %11872 = vxpose.xlu0.b32.end [2/2] (short) %v11871_v8, 128 }
 0x61a   : > { %v11537_v57 = vpop.trf.xlu0 }
 0x61b   : > { %v11541_v29 = vunpack.i.h.bf16 %v11537_v57  ;;  %v11538_v33 = vunpack.i.l.bf16 %v11537_v57 }
 0x61d   : > { %v1546_v1 = vpack.c.bf16 %v11541_v29, %v11541_v29  ;;  %v1530_v54 = vpack.c.bf16 %v11538_v33, %v11538_v33 }
 0x61f   : > { %1579 = vst.msk [vmem:[#allocation2 + $0x40] sm:$0xf] %vm1562_vm11, %v1546_v1 }
 0x620   : > { %1563 = vst.msk [vmem:[#allocation2] sm:$0xf] %vm1562_vm11, %v1530_v54  ;;  %11786 = vxpose.xlu2.b32.start [1/2] (short) %v11785_v32, 128 }
 0x622   : > { %v11542_v25 = vpop.trf.xlu0 }
 0x623   : > { %v11546_v61 = vunpack.i.h.bf16 %v11542_v25  ;;  %v11543_v47 = vunpack.i.l.bf16 %v11542_v25 }
 0x625   : > { %v1547_v38 = vpack.c.bf16 %v11546_v61, %v11546_v61  ;;  %v1531_v43 = vpack.c.bf16 %v11543_v47, %v11543_v47 }
 0x627   : > { %1580 = vst.msk [vmem:[#allocation2 + $0x44] sm:$0xf] %vm1562_vm11, %v1547_v38 }
 0x628   : > { %1564 = vst.msk [vmem:[#allocation2 + $0x4] sm:$0xf] %vm1562_vm11, %v1531_v43  ;;  %11788 = vxpose.xlu2.b32.end [2/2] (short) %v11787_v2, 128 }
 0x62a   : > { %v11621_v5 = vpop.trf.xlu1  ;;  %v11547_v45 = vpop.trf.xlu0 }
 0x62b   : > { %v11625_v58 = vunpack.i.h.bf16 %v11621_v5  ;;  %v11622_v3 = vunpack.i.l.bf16 %v11621_v5  ;;  %v11551_v23 = vunpack.i.h.bf16 %v11547_v45  ;;  %v11548_v50 = vunpack.i.l.bf16 %v11547_v45 }
 0x62d   : > { %v1803_v20 = vpack.c.bf16 %v11625_v58, %v11625_v58  ;;  %v1787_v56 = vpack.c.bf16 %v11622_v3, %v11622_v3  ;;  %v1548_v24 = vpack.c.bf16 %v11551_v23, %v11551_v23  ;;  %v1532_v18 = vpack.c.bf16 %v11548_v50, %v11548_v50 }
 0x62f   : > { %1836 = vst.msk [vmem:[#allocation2 + $0xc0] sm:$0xf] %vm1562_vm11, %v1803_v20  ;;  %v11253_v62 = vld [vmem:[#allocation2] sm:$0xff] }
 0x630   : > { %1820 = vst.msk [vmem:[#allocation2 + $0x80] sm:$0xf] %vm1562_vm11, %v1787_v56  ;;  %10223 = vmatmul.msk.bf16.vlgmr.msrb.gmra.mxu3 %vm2635_vm12, %v11253_v62  ;;  %10215 = vmatmul.msk.bf16.vlgmr.msrb.gmra.mxu1 %vm2635_vm12, %v11253_v62 }
 0x631   : > { %1581 = vst.msk [vmem:[#allocation2 + $0x48] sm:$0xf] %vm1562_vm11, %v1548_v24 }
 0x632   : > { %1565 = vst.msk [vmem:[#allocation2 + $0x8] sm:$0xf] %vm1562_vm11, %v1532_v18  ;;  %v11626_v31 = vpop.trf.xlu1  ;;  %v11552_v46 = vpop.trf.xlu0 }
 0x633   : > { %v11630_v6 = vunpack.i.h.bf16 %v11626_v31  ;;  %v11627_v28 = vunpack.i.l.bf16 %v11626_v31  ;;  %v11556_v30 = vunpack.i.h.bf16 %v11552_v46  ;;  %v11553_v13 = vunpack.i.l.bf16 %v11552_v46 }
 0x635   : > { %v1804_v10 = vpack.c.bf16 %v11630_v6, %v11630_v6  ;;  %v1788_v11 = vpack.c.bf16 %v11627_v28, %v11627_v28  ;;  %v1549_v48 = vpack.c.bf16 %v11556_v30, %v11556_v30  ;;  %v1533_v12 = vpack.c.bf16 %v11553_v13, %v11553_v13 }
 0x637   : > { %1837 = vst.msk [vmem:[#allocation2 + $0xc4] sm:$0xf] %vm1562_vm11, %v1804_v10 }
 0x638   : > { %1821 = vst.msk [vmem:[#allocation2 + $0x84] sm:$0xf] %vm1562_vm11, %v1788_v11 }
 0x639   : > { %1582 = vst.msk [vmem:[#allocation2 + $0x4c] sm:$0xf] %vm1562_vm11, %v1549_v48  ;;  %v11705_v49 = vpop.trf.xlu2 }
 0x63a   : > { %1566 = vst.msk [vmem:[#allocation2 + $0xc] sm:$0xf] %vm1562_vm11, %v1533_v12  ;;  %v11709_v63 = vunpack.i.h.bf16 %v11705_v49  ;;  %v11706_v52 = vunpack.i.l.bf16 %v11705_v49  ;;  %v11631_v55 = vpop.trf.xlu1  ;;  %v11557_v39 = vpop.trf.xlu0 }
 0x63b   : > { %v11635_v14 = vunpack.i.h.bf16 %v11631_v55  ;;  %v11632_v9 = vunpack.i.l.bf16 %v11631_v55  ;;  %v11561_v36 = vunpack.i.h.bf16 %v11557_v39  ;;  %v11558_v15 = vunpack.i.l.bf16 %v11557_v39 }
 0x63c   : > { %v2045_v42 = vpack.c.bf16 %v11709_v63, %v11709_v63  ;;  %v2303_v60 = vpack.c.bf16 %v11706_v52, %v11706_v52 }
 0x63d   : > { %v1805_v8 = vpack.c.bf16 %v11635_v14, %v11635_v14  ;;  %v1789_v22 = vpack.c.bf16 %v11632_v9, %v11632_v9  ;;  %v1550_v57 = vpack.c.bf16 %v11561_v36, %v11561_v36  ;;  %v1534_v29 = vpack.c.bf16 %v11558_v15, %v11558_v15 }
 0x63e   : > { %2078 = vst.msk [vmem:[#allocation2 + $0x100] sm:$0xf] %vm1562_vm11, %v2045_v42 }
 0x63f   : > { %2336 = vst.msk [vmem:[#allocation2 + $0x180] sm:$0xf] %vm1562_vm11, %v2303_v60  ;;  %v11261_v33 = vld [vmem:[#allocation2 + $0x80] sm:$0xff] }
 0x640   : > { %1838 = vst.msk [vmem:[#allocation2 + $0xc8] sm:$0xf] %vm1562_vm11, %v1805_v8  ;;  %10271 = vmatmul.msk.bf16.vlgmr.msrb.gmra.mxu0 %vm2635_vm12, %v11261_v33  ;;  %10279 = vmatmul.msk.bf16.vlgmr.msrb.gmra.mxu2 %vm2635_vm12, %v11261_v33 }
 0x641   : > { %1822 = vst.msk [vmem:[#allocation2 + $0x88] sm:$0xf] %vm1562_vm11, %v1789_v22  ;;  %v11710_v0 = vpop.trf.xlu2  ;;  %v11254_v1 = vld [vmem:[#allocation2 + $0x8] sm:$0xff] }
 0x642   : > { %1583 = vst.msk [vmem:[#allocation2 + $0x50] sm:$0xf] %vm1562_vm11, %v1550_v57  ;;  %v11714_v54 = vunpack.i.h.bf16 %v11710_v0  ;;  %v11711_v32 = vunpack.i.l.bf16 %v11710_v0  ;;  %v11636_v4 = vpop.trf.xlu1  ;;  %v11562_v7 = vpop.trf.xlu0  ;;  %10224 = vmatmul.msk.bf16.gmra.mxu3 %vm2635_vm12, %v11254_v1  ;;  %10216 = vmatmul.msk.bf16.gmra.mxu1 %vm2635_vm12, %v11254_v1 }
 0x643   : > { %1567 = vst.msk [vmem:[#allocation2 + $0x10] sm:$0xf] %vm1562_vm11, %v1534_v29  ;;  %v11640_v25 = vunpack.i.h.bf16 %v11636_v4  ;;  %v11637_v61 = vunpack.i.l.bf16 %v11636_v4  ;;  %v11566_v38 = vunpack.i.h.bf16 %v11562_v7  ;;  %v11563_v5 = vunpack.i.l.bf16 %v11562_v7 }
 0x644   : > { %v2046_v47 = vpack.c.bf16 %v11714_v54, %v11714_v54  ;;  %v2304_v37 = vpack.c.bf16 %v11711_v32, %v11711_v32 }
 0x645   : > { %v1806_v43 = vpack.c.bf16 %v11640_v25, %v11640_v25  ;;  %v1790_v2 = vpack.c.bf16 %v11637_v61, %v11637_v61  ;;  %v1551_v45 = vpack.c.bf16 %v11566_v38, %v11566_v38  ;;  %v1535_v58 = vpack.c.bf16 %v11563_v5, %v11563_v5 }
 0x646   : > { %2079 = vst.msk [vmem:[#allocation2 + $0x104] sm:$0xf] %vm1562_vm11, %v2046_v47 }
 0x647   : > { %2337 = vst.msk [vmem:[#allocation2 + $0x184] sm:$0xf] %vm1562_vm11, %v2304_v37 }
 0x648   : > { %1839 = vst.msk [vmem:[#allocation2 + $0xcc] sm:$0xf] %vm1562_vm11, %v1806_v43 }
 0x649   : > { %1823 = vst.msk [vmem:[#allocation2 + $0x8c] sm:$0xf] %vm1562_vm11, %v1790_v2  ;;  %v11715_v3 = vpop.trf.xlu2 }
 0x64a   : > { %1584 = vst.msk [vmem:[#allocation2 + $0x54] sm:$0xf] %vm1562_vm11, %v1551_v45  ;;  %v11719_v23 = vunpack.i.h.bf16 %v11715_v3  ;;  %v11716_v50 = vunpack.i.l.bf16 %v11715_v3  ;;  %v11641_v20 = vpop.trf.xlu1  ;;  %v11567_v56 = vpop.trf.xlu0 }
 0x64b   : > { %1568 = vst.msk [vmem:[#allocation2 + $0x14] sm:$0xf] %vm1562_vm11, %v1535_v58  ;;  %v11645_v24 = vunpack.i.h.bf16 %v11641_v20  ;;  %v11642_v18 = vunpack.i.l.bf16 %v11641_v20  ;;  %v11571_v46 = vunpack.i.h.bf16 %v11567_v56  ;;  %v11568_v30 = vunpack.i.l.bf16 %v11567_v56 }
 0x64c   : > { %v2047_v62 = vpack.c.bf16 %v11719_v23, %v11719_v23  ;;  %v2305_v31 = vpack.c.bf16 %v11716_v50, %v11716_v50 }
 0x64d   : > { %v1807_v6 = vpack.c.bf16 %v11645_v24, %v11645_v24  ;;  %v1791_v28 = vpack.c.bf16 %v11642_v18, %v11642_v18  ;;  %v1552_v13 = vpack.c.bf16 %v11571_v46, %v11571_v46  ;;  %v1536_v10 = vpack.c.bf16 %v11568_v30, %v11568_v30 }
 0x64e   : > { %2080 = vst.msk [vmem:[#allocation2 + $0x108] sm:$0xf] %vm1562_vm11, %v2047_v62 }
 0x64f   : > { %2338 = vst.msk [vmem:[#allocation2 + $0x188] sm:$0xf] %vm1562_vm11, %v2305_v31 }
 0x650   : > { %1840 = vst.msk [vmem:[#allocation2 + $0xd0] sm:$0xf] %vm1562_vm11, %v1807_v6  ;;  %v11262_v11 = vld [vmem:[#allocation2 + $0x88] sm:$0xff] }
 0x651   : > { %1824 = vst.msk [vmem:[#allocation2 + $0x90] sm:$0xf] %vm1562_vm11, %v1791_v28  ;;  %v11720_v48 = vpop.trf.xlu2  ;;  %10272 = vmatmul.msk.bf16.gmra.mxu0 %vm2635_vm12, %v11262_v11  ;;  %10280 = vmatmul.msk.bf16.gmra.mxu2 %vm2635_vm12, %v11262_v11 }
 0x652   : > { %1585 = vst.msk [vmem:[#allocation2 + $0x58] sm:$0xf] %vm1562_vm11, %v1552_v13  ;;  %v11724_v12 = vunpack.i.h.bf16 %v11720_v48  ;;  %v11721_v49 = vunpack.i.l.bf16 %v11720_v48  ;;  %v11255_v63 = vld [vmem:[#allocation2 + $0x10] sm:$0xff]  ;;  %v11646_v52 = vpop.trf.xlu1  ;;  %v11572_v55 = vpop.trf.xlu0 }
 0x653   : > { %1569 = vst.msk [vmem:[#allocation2 + $0x18] sm:$0xf] %vm1562_vm11, %v1536_v10  ;;  %v11650_v39 = vunpack.i.h.bf16 %v11646_v52  ;;  %v11647_v14 = vunpack.i.l.bf16 %v11646_v52  ;;  %10225 = vmatmul.msk.bf16.gmra.mxu3 %vm2635_vm12, %v11255_v63  ;;  %v11576_v60 = vunpack.i.h.bf16 %v11572_v55  ;;  %10217 = vmatmul.msk.bf16.gmra.mxu1 %vm2635_vm12, %v11255_v63  ;;  %v11573_v22 = vunpack.i.l.bf16 %v11572_v55 }
 0x654   : > { %v2048_v9 = vpack.c.bf16 %v11724_v12, %v11724_v12  ;;  %v2306_v42 = vpack.c.bf16 %v11721_v49, %v11721_v49 }
 0x655   : > { %v1808_v36 = vpack.c.bf16 %v11650_v39, %v11650_v39  ;;  %v1792_v8 = vpack.c.bf16 %v11647_v14, %v11647_v14  ;;  %v1553_v15 = vpack.c.bf16 %v11576_v60, %v11576_v60  ;;  %v1537_v57 = vpack.c.bf16 %v11573_v22, %v11573_v22 }
 0x656   : > { %2081 = vst.msk [vmem:[#allocation2 + $0x10c] sm:$0xf] %vm1562_vm11, %v2048_v9 }
 0x657   : > { %2339 = vst.msk [vmem:[#allocation2 + $0x18c] sm:$0xf] %vm1562_vm11, %v2306_v42 }
 0x658   : > { %1841 = vst.msk [vmem:[#allocation2 + $0xd4] sm:$0xf] %vm1562_vm11, %v1808_v36 }
 0x659   : > { %1825 = vst.msk [vmem:[#allocation2 + $0x94] sm:$0xf] %vm1562_vm11, %v1792_v8  ;;  %v11725_v29 = vpop.trf.xlu2 }
 0x65a   : > { %1586 = vst.msk [vmem:[#allocation2 + $0x5c] sm:$0xf] %vm1562_vm11, %v1553_v15  ;;  %v11729_v33 = vunpack.i.h.bf16 %v11725_v29  ;;  %v11726_v0 = vunpack.i.l.bf16 %v11725_v29  ;;  %v11651_v1 = vpop.trf.xlu1  ;;  %v11577_v54 = vpop.trf.xlu0 }
 0x65b   : > { %1570 = vst.msk [vmem:[#allocation2 + $0x1c] sm:$0xf] %vm1562_vm11, %v1537_v57  ;;  %v11655_v32 = vunpack.i.h.bf16 %v11651_v1  ;;  %v11652_v4 = vunpack.i.l.bf16 %v11651_v1  ;;  %v11581_v61 = vunpack.i.h.bf16 %v11577_v54  ;;  %v11578_v38 = vunpack.i.l.bf16 %v11577_v54 }
 0x65c   : > { %v2049_v7 = vpack.c.bf16 %v11729_v33, %v11729_v33  ;;  %v2307_v25 = vpack.c.bf16 %v11726_v0, %v11726_v0 }
 0x65d   : > { %v1809_v47 = vpack.c.bf16 %v11655_v32, %v11655_v32  ;;  %v1793_v37 = vpack.c.bf16 %v11652_v4, %v11652_v4  ;;  %v1554_v43 = vpack.c.bf16 %v11581_v61, %v11581_v61  ;;  %v1538_v2 = vpack.c.bf16 %v11578_v38, %v11578_v38 }
 0x65e   : > { %2082 = vst.msk [vmem:[#allocation2 + $0x110] sm:$0xf] %vm1562_vm11, %v2049_v7 }
 0x65f   : > { %2340 = vst.msk [vmem:[#allocation2 + $0x190] sm:$0xf] %vm1562_vm11, %v2307_v25 }
 0x660   : > { %1842 = vst.msk [vmem:[#allocation2 + $0xd8] sm:$0xf] %vm1562_vm11, %v1809_v47  ;;  %v11263_v5 = vld [vmem:[#allocation2 + $0x90] sm:$0xff] }
 0x661   : > { %1826 = vst.msk [vmem:[#allocation2 + $0x98] sm:$0xf] %vm1562_vm11, %v1793_v37  ;;  %v11730_v45 = vpop.trf.xlu2  ;;  %10273 = vmatmul.msk.bf16.gmra.mxu0 %vm2635_vm12, %v11263_v5  ;;  %10281 = vmatmul.msk.bf16.gmra.mxu2 %vm2635_vm12, %v11263_v5 }
 0x662   : > { %1587 = vst.msk [vmem:[#allocation2 + $0x60] sm:$0xf] %vm1562_vm11, %v1554_v43  ;;  %v11734_v58 = vunpack.i.h.bf16 %v11730_v45  ;;  %v11731_v3 = vunpack.i.l.bf16 %v11730_v45  ;;  %v11256_v23 = vld [vmem:[#allocation2 + $0x18] sm:$0xff]  ;;  %v11656_v50 = vpop.trf.xlu1  ;;  %v11582_v20 = vpop.trf.xlu0 }
 0x663   : > { %1571 = vst.msk [vmem:[#allocation2 + $0x20] sm:$0xf] %vm1562_vm11, %v1538_v2  ;;  %v11660_v56 = vunpack.i.h.bf16 %v11656_v50  ;;  %v11657_v24 = vunpack.i.l.bf16 %v11656_v50  ;;  %10226 = vmatmul.msk.bf16.gmra.mxu3 %vm2635_vm12, %v11256_v23  ;;  %v11586_v31 = vunpack.i.h.bf16 %v11582_v20  ;;  %10218 = vmatmul.msk.bf16.gmra.mxu1 %vm2635_vm12, %v11256_v23  ;;  %v11583_v28 = vunpack.i.l.bf16 %v11582_v20 }
 0x664   : > { %v2050_v18 = vpack.c.bf16 %v11734_v58, %v11734_v58  ;;  %v2308_v62 = vpack.c.bf16 %v11731_v3, %v11731_v3 }
 0x665   : > { %v1810_v46 = vpack.c.bf16 %v11660_v56, %v11660_v56  ;;  %v1794_v6 = vpack.c.bf16 %v11657_v24, %v11657_v24  ;;  %v1555_v30 = vpack.c.bf16 %v11586_v31, %v11586_v31  ;;  %v1539_v13 = vpack.c.bf16 %v11583_v28, %v11583_v28 }
 0x666   : > { %2083 = vst.msk [vmem:[#allocation2 + $0x114] sm:$0xf] %vm1562_vm11, %v2050_v18 }
 0x667   : > { %2341 = vst.msk [vmem:[#allocation2 + $0x194] sm:$0xf] %vm1562_vm11, %v2308_v62 }
 0x668   : > { %1843 = vst.msk [vmem:[#allocation2 + $0xdc] sm:$0xf] %vm1562_vm11, %v1810_v46 }
 0x669   : > { %1827 = vst.msk [vmem:[#allocation2 + $0x9c] sm:$0xf] %vm1562_vm11, %v1794_v6  ;;  %v11735_v10 = vpop.trf.xlu2 }
 0x66a   : > { %1588 = vst.msk [vmem:[#allocation2 + $0x64] sm:$0xf] %vm1562_vm11, %v1555_v30  ;;  %v11739_v11 = vunpack.i.h.bf16 %v11735_v10  ;;  %v11736_v48 = vunpack.i.l.bf16 %v11735_v10  ;;  %v11661_v12 = vpop.trf.xlu1  ;;  %v11587_v49 = vpop.trf.xlu0 }
 0x66b   : > { %1572 = vst.msk [vmem:[#allocation2 + $0x24] sm:$0xf] %vm1562_vm11, %v1539_v13  ;;  %v11665_v63 = vunpack.i.h.bf16 %v11661_v12  ;;  %v11662_v52 = vunpack.i.l.bf16 %v11661_v12  ;;  %v11591_v14 = vunpack.i.h.bf16 %v11587_v49  ;;  %v11588_v60 = vunpack.i.l.bf16 %v11587_v49 }
 0x66c   : > { %v2051_v55 = vpack.c.bf16 %v11739_v11, %v11739_v11  ;;  %v2309_v39 = vpack.c.bf16 %v11736_v48, %v11736_v48 }
 0x66d   : > { %v1811_v9 = vpack.c.bf16 %v11665_v63, %v11665_v63  ;;  %v1795_v42 = vpack.c.bf16 %v11662_v52, %v11662_v52  ;;  %v1556_v36 = vpack.c.bf16 %v11591_v14, %v11591_v14  ;;  %v1540_v8 = vpack.c.bf16 %v11588_v60, %v11588_v60 }
 0x66e   : > { %2084 = vst.msk [vmem:[#allocation2 + $0x118] sm:$0xf] %vm1562_vm11, %v2051_v55 }
 0x66f   : > { %2342 = vst.msk [vmem:[#allocation2 + $0x198] sm:$0xf] %vm1562_vm11, %v2309_v39 }
 0x670   : > { %1844 = vst.msk [vmem:[#allocation2 + $0xe0] sm:$0xf] %vm1562_vm11, %v1811_v9  ;;  %v11264_v22 = vld [vmem:[#allocation2 + $0x98] sm:$0xff] }
 0x671   : > { %1828 = vst.msk [vmem:[#allocation2 + $0xa0] sm:$0xf] %vm1562_vm11, %v1795_v42  ;;  %v11740_v15 = vpop.trf.xlu2  ;;  %10274 = vmatmul.msk.bf16.gmra.mxu0 %vm2635_vm12, %v11264_v22  ;;  %10282 = vmatmul.msk.bf16.gmra.mxu2 %vm2635_vm12, %v11264_v22 }
 0x672   : > { %1589 = vst.msk [vmem:[#allocation2 + $0x68] sm:$0xf] %vm1562_vm11, %v1556_v36  ;;  %v11744_v57 = vunpack.i.h.bf16 %v11740_v15  ;;  %v11741_v29 = vunpack.i.l.bf16 %v11740_v15  ;;  %v11257_v33 = vld [vmem:[#allocation2 + $0x20] sm:$0xff]  ;;  %v11666_v0 = vpop.trf.xlu1  ;;  %v11592_v1 = vpop.trf.xlu0 }
 0x673   : > { %1573 = vst.msk [vmem:[#allocation2 + $0x28] sm:$0xf] %vm1562_vm11, %v1540_v8  ;;  %v11670_v54 = vunpack.i.h.bf16 %v11666_v0  ;;  %v11667_v32 = vunpack.i.l.bf16 %v11666_v0  ;;  %10227 = vmatmul.msk.bf16.gmra.mxu3 %vm2635_vm12, %v11257_v33  ;;  %v11596_v25 = vunpack.i.h.bf16 %v11592_v1  ;;  %10219 = vmatmul.msk.bf16.gmra.mxu1 %vm2635_vm12, %v11257_v33  ;;  %v11593_v37 = vunpack.i.l.bf16 %v11592_v1 }
 0x674   : > { %v2052_v4 = vpack.c.bf16 %v11744_v57, %v11744_v57  ;;  %v2310_v7 = vpack.c.bf16 %v11741_v29, %v11741_v29 }
 0x675   : > { %v1812_v61 = vpack.c.bf16 %v11670_v54, %v11670_v54  ;;  %v1796_v47 = vpack.c.bf16 %v11667_v32, %v11667_v32  ;;  %v1557_v38 = vpack.c.bf16 %v11596_v25, %v11596_v25  ;;  %v1541_v43 = vpack.c.bf16 %v11593_v37, %v11593_v37 }
 0x676   : > { %2085 = vst.msk [vmem:[#allocation2 + $0x11c] sm:$0xf] %vm1562_vm11, %v2052_v4 }
 0x677   : > { %2343 = vst.msk [vmem:[#allocation2 + $0x19c] sm:$0xf] %vm1562_vm11, %v2310_v7 }
 0x678   : > { %1845 = vst.msk [vmem:[#allocation2 + $0xe4] sm:$0xf] %vm1562_vm11, %v1812_v61 }
 0x679   : > { %1829 = vst.msk [vmem:[#allocation2 + $0xa4] sm:$0xf] %vm1562_vm11, %v1796_v47  ;;  %v11745_v2 = vpop.trf.xlu2 }
 0x67a   : > { %1590 = vst.msk [vmem:[#allocation2 + $0x6c] sm:$0xf] %vm1562_vm11, %v1557_v38  ;;  %v11749_v5 = vunpack.i.h.bf16 %v11745_v2  ;;  %v11746_v45 = vunpack.i.l.bf16 %v11745_v2  ;;  %v11671_v58 = vpop.trf.xlu1  ;;  %v11597_v3 = vpop.trf.xlu0 }
 0x67b   : > { %1574 = vst.msk [vmem:[#allocation2 + $0x2c] sm:$0xf] %vm1562_vm11, %v1541_v43  ;;  %v11675_v23 = vunpack.i.h.bf16 %v11671_v58  ;;  %v11672_v50 = vunpack.i.l.bf16 %v11671_v58  ;;  %v11601_v24 = vunpack.i.h.bf16 %v11597_v3  ;;  %v11598_v31 = vunpack.i.l.bf16 %v11597_v3 }
 0x67c   : > { %v2053_v20 = vpack.c.bf16 %v11749_v5, %v11749_v5  ;;  %v2311_v56 = vpack.c.bf16 %v11746_v45, %v11746_v45 }
 0x67d   : > { %v1813_v18 = vpack.c.bf16 %v11675_v23, %v11675_v23  ;;  %v1797_v62 = vpack.c.bf16 %v11672_v50, %v11672_v50  ;;  %v1558_v46 = vpack.c.bf16 %v11601_v24, %v11601_v24  ;;  %v1542_v6 = vpack.c.bf16 %v11598_v31, %v11598_v31 }
 0x67e   : > { %2086 = vst.msk [vmem:[#allocation2 + $0x120] sm:$0xf] %vm1562_vm11, %v2053_v20 }
 0x67f   : > { %2344 = vst.msk [vmem:[#allocation2 + $0x1a0] sm:$0xf] %vm1562_vm11, %v2311_v56 }
 0x680   : > { %1846 = vst.msk [vmem:[#allocation2 + $0xe8] sm:$0xf] %vm1562_vm11, %v1813_v18  ;;  %v11265_v28 = vld [vmem:[#allocation2 + $0xa0] sm:$0xff] }
 0x681   : > { %1830 = vst.msk [vmem:[#allocation2 + $0xa8] sm:$0xf] %vm1562_vm11, %v1797_v62  ;;  %v11750_v30 = vpop.trf.xlu2  ;;  %10275 = vmatmul.msk.bf16.gmra.mxu0 %vm2635_vm12, %v11265_v28  ;;  %10283 = vmatmul.msk.bf16.gmra.mxu2 %vm2635_vm12, %v11265_v28 }
 0x682   : > { %1591 = vst.msk [vmem:[#allocation2 + $0x70] sm:$0xf] %vm1562_vm11, %v1558_v46  ;;  %v11754_v13 = vunpack.i.h.bf16 %v11750_v30  ;;  %v11751_v10 = vunpack.i.l.bf16 %v11750_v30  ;;  %v11258_v11 = vld [vmem:[#allocation2 + $0x28] sm:$0xff]  ;;  %v11676_v48 = vpop.trf.xlu1  ;;  %v11602_v12 = vpop.trf.xlu0 }
 0x683   : > { %1575 = vst.msk [vmem:[#allocation2 + $0x30] sm:$0xf] %vm1562_vm11, %v1542_v6  ;;  %v11680_v49 = vunpack.i.h.bf16 %v11676_v48  ;;  %v11677_v63 = vunpack.i.l.bf16 %v11676_v48  ;;  %10228 = vmatmul.msk.bf16.gmra.mxu3 %vm2635_vm12, %v11258_v11  ;;  %v11606_v39 = vunpack.i.h.bf16 %v11602_v12  ;;  %10220 = vmatmul.msk.bf16.gmra.mxu1 %vm2635_vm12, %v11258_v11  ;;  %v11603_v42 = vunpack.i.l.bf16 %v11602_v12 }
 0x684   : > { %v2054_v52 = vpack.c.bf16 %v11754_v13, %v11754_v13  ;;  %v2312_v55 = vpack.c.bf16 %v11751_v10, %v11751_v10 }
 0x685   : > { %v1814_v14 = vpack.c.bf16 %v11680_v49, %v11680_v49  ;;  %v1798_v9 = vpack.c.bf16 %v11677_v63, %v11677_v63  ;;  %v1559_v60 = vpack.c.bf16 %v11606_v39, %v11606_v39  ;;  %v1543_v36 = vpack.c.bf16 %v11603_v42, %v11603_v42 }
 0x686   : > { %2087 = vst.msk [vmem:[#allocation2 + $0x124] sm:$0xf] %vm1562_vm11, %v2054_v52 }
 0x687   : > { %2345 = vst.msk [vmem:[#allocation2 + $0x1a4] sm:$0xf] %vm1562_vm11, %v2312_v55 }
 0x688   : > { %1847 = vst.msk [vmem:[#allocation2 + $0xec] sm:$0xf] %vm1562_vm11, %v1814_v14 }
 0x689   : > { %1831 = vst.msk [vmem:[#allocation2 + $0xac] sm:$0xf] %vm1562_vm11, %v1798_v9  ;;  %v11755_v8 = vpop.trf.xlu2 }
 0x68a   : > { %1592 = vst.msk [vmem:[#allocation2 + $0x74] sm:$0xf] %vm1562_vm11, %v1559_v60  ;;  %v11759_v22 = vunpack.i.h.bf16 %v11755_v8  ;;  %v11756_v15 = vunpack.i.l.bf16 %v11755_v8  ;;  %v11681_v57 = vpop.trf.xlu1  ;;  %v11607_v29 = vpop.trf.xlu0 }
 0x68b   : > { %1576 = vst.msk [vmem:[#allocation2 + $0x34] sm:$0xf] %vm1562_vm11, %v1543_v36  ;;  %v11685_v33 = vunpack.i.h.bf16 %v11681_v57  ;;  %v11682_v0 = vunpack.i.l.bf16 %v11681_v57  ;;  %v11611_v32 = vunpack.i.h.bf16 %v11607_v29  ;;  %v11608_v25 = vunpack.i.l.bf16 %v11607_v29 }
 0x68c   : > { %v2055_v1 = vpack.c.bf16 %v11759_v22, %v11759_v22  ;;  %v2313_v54 = vpack.c.bf16 %v11756_v15, %v11756_v15 }
 0x68d   : > { %v1815_v4 = vpack.c.bf16 %v11685_v33, %v11685_v33  ;;  %v1799_v7 = vpack.c.bf16 %v11682_v0, %v11682_v0  ;;  %v1560_v61 = vpack.c.bf16 %v11611_v32, %v11611_v32  ;;  %v1544_v47 = vpack.c.bf16 %v11608_v25, %v11608_v25 }
 0x68e   : > { %2088 = vst.msk [vmem:[#allocation2 + $0x128] sm:$0xf] %vm1562_vm11, %v2055_v1 }
 0x68f   : > { %2346 = vst.msk [vmem:[#allocation2 + $0x1a8] sm:$0xf] %vm1562_vm11, %v2313_v54 }
 0x690   : > { %1848 = vst.msk [vmem:[#allocation2 + $0xf0] sm:$0xf] %vm1562_vm11, %v1815_v4  ;;  %v11266_v37 = vld [vmem:[#allocation2 + $0xa8] sm:$0xff] }
 0x691   : > { %1832 = vst.msk [vmem:[#allocation2 + $0xb0] sm:$0xf] %vm1562_vm11, %v1799_v7  ;;  %v11760_v38 = vpop.trf.xlu2  ;;  %10276 = vmatmul.msk.bf16.gmra.mxu0 %vm2635_vm12, %v11266_v37  ;;  %10284 = vmatmul.msk.bf16.gmra.mxu2 %vm2635_vm12, %v11266_v37 }
 0x692   : > { %1593 = vst.msk [vmem:[#allocation2 + $0x78] sm:$0xf] %vm1562_vm11, %v1560_v61  ;;  %v11764_v43 = vunpack.i.h.bf16 %v11760_v38  ;;  %v11761_v2 = vunpack.i.l.bf16 %v11760_v38  ;;  %v11259_v5 = vld [vmem:[#allocation2 + $0x30] sm:$0xff]  ;;  %v11686_v45 = vpop.trf.xlu1  ;;  %v11612_v58 = vpop.trf.xlu0 }
 0x693   : > { %1577 = vst.msk [vmem:[#allocation2 + $0x38] sm:$0xf] %vm1562_vm11, %v1544_v47  ;;  %v11690_v3 = vunpack.i.h.bf16 %v11686_v45  ;;  %v11687_v23 = vunpack.i.l.bf16 %v11686_v45  ;;  %10229 = vmatmul.msk.bf16.gmra.mxu3 %vm2635_vm12, %v11259_v5  ;;  %v11616_v56 = vunpack.i.h.bf16 %v11612_v58  ;;  %10221 = vmatmul.msk.bf16.gmra.mxu1 %vm2635_vm12, %v11259_v5  ;;  %v11613_v62 = vunpack.i.l.bf16 %v11612_v58  ;;  %v13968_v45 = vpop.f32.mrf.mxu3 }
 0x694   : > { %v2056_v50 = vpack.c.bf16 %v11764_v43, %v11764_v43  ;;  %v2314_v20 = vpack.c.bf16 %v11761_v2, %v11761_v2  ;;  %17709 = vst [vmem:[#allocation22_spill] sm:$0xff] %v13968_v45 }
 0x695   : > { %v1816_v24 = vpack.c.bf16 %v11690_v3, %v11690_v3  ;;  %v1800_v18 = vpack.c.bf16 %v11687_v23, %v11687_v23  ;;  %v1561_v31 = vpack.c.bf16 %v11616_v56, %v11616_v56  ;;  %v1545_v46 = vpack.c.bf16 %v11613_v62, %v11613_v62 }
 0x696   : > { %2089 = vst.msk [vmem:[#allocation2 + $0x12c] sm:$0xf] %vm1562_vm11, %v2056_v50 }
 0x697   : > { %2347 = vst.msk [vmem:[#allocation2 + $0x1ac] sm:$0xf] %vm1562_vm11, %v2314_v20 }
 0x698   : > { %1849 = vst.msk [vmem:[#allocation2 + $0xf4] sm:$0xf] %vm1562_vm11, %v1816_v24 }
 0x699   : > { %1833 = vst.msk [vmem:[#allocation2 + $0xb4] sm:$0xf] %vm1562_vm11, %v1800_v18  ;;  %v11765_v6 = vpop.trf.xlu2 }
 0x69a   : > { %1594 = vst.msk [vmem:[#allocation2 + $0x7c] sm:$0xf] %vm1562_vm11, %v1561_v31  ;;  %v11769_v28 = vunpack.i.h.bf16 %v11765_v6  ;;  %v11766_v30 = vunpack.i.l.bf16 %v11765_v6  ;;  %v11691_v13 = vpop.trf.xlu1  ;;  %v11873_v10 = vpop.trf.xlu0  ;;  %v11269_v31 = vld [vmem:[#allocation2 + $0x100] sm:$0xff] }
 0x69b   : > { %1578 = vst.msk [vmem:[#allocation2 + $0x3c] sm:$0xf] %vm1562_vm11, %v1545_v46  ;;  %v11695_v11 = vunpack.i.h.bf16 %v11691_v13  ;;  %v11692_v48 = vunpack.i.l.bf16 %v11691_v13  ;;  %v11877_v63 = vunpack.i.h.bf16 %v11873_v10  ;;  %v11874_v39 = vunpack.i.l.bf16 %v11873_v10 }
 0x69c   : > { %v2057_v12 = vpack.c.bf16 %v11769_v28, %v11769_v28  ;;  %v2315_v49 = vpack.c.bf16 %v11766_v30, %v11766_v30 }
 0x69d   : > { %v1817_v52 = vpack.c.bf16 %v11695_v11, %v11695_v11  ;;  %v1801_v55 = vpack.c.bf16 %v11692_v48, %v11692_v48  ;;  %v1932_v14 = vpack.c.bf16 %v11877_v63, %v11877_v63  ;;  %v1916_v9 = vpack.c.bf16 %v11874_v39, %v11874_v39 }
 0x69e   : > { %2090 = vst.msk [vmem:[#allocation2 + $0x130] sm:$0xf] %vm1562_vm11, %v2057_v12  ;;  %v13982_v12 = vpop.f32.mrf.mxu0 }
 0x69f   : > { %2348 = vst.msk [vmem:[#allocation2 + $0x1b0] sm:$0xf] %vm1562_vm11, %v2315_v49 }
 0x6a0   : > { %1850 = vst.msk [vmem:[#allocation2 + $0xf8] sm:$0xf] %vm1562_vm11, %v1817_v52  ;;  %v11267_v42 = vld [vmem:[#allocation2 + $0xb0] sm:$0xff] }
 0x6a1   : > { %1834 = vst.msk [vmem:[#allocation2 + $0xb8] sm:$0xf] %vm1562_vm11, %v1801_v55  ;;  %v11770_v60 = vpop.trf.xlu2  ;;  %10277 = vmatmul.msk.bf16.gmra.mxu0 %vm2635_vm12, %v11267_v42  ;;  %10285 = vmatmul.msk.bf16.gmra.mxu2 %vm2635_vm12, %v11267_v42  ;;  %v13990_v42 = vpop.f32.mrf.mxu2 }
 0x6a2   : > { %1965 = vst.msk [vmem:[#allocation4 + $0xc0] sm:$0xf] %vm1562_vm11, %v1932_v14  ;;  %v11774_v36 = vunpack.i.h.bf16 %v11770_v60  ;;  %v11771_v8 = vunpack.i.l.bf16 %v11770_v60  ;;  %v11260_v22 = vld [vmem:[#allocation2 + $0x38] sm:$0xff]  ;;  %v11696_v15 = vpop.trf.xlu1  ;;  %v11878_v57 = vpop.trf.xlu0 }
 0x6a3   : > { %1949 = vst.msk [vmem:[#allocation4 + $0x80] sm:$0xf] %vm1562_vm11, %v1916_v9  ;;  %v11700_v29 = vunpack.i.h.bf16 %v11696_v15  ;;  %v11697_v33 = vunpack.i.l.bf16 %v11696_v15  ;;  %10230 = vmatmul.msk.bf16.gmra.mxu3 %vm2635_vm12, %v11260_v22  ;;  %v11882_v54 = vunpack.i.h.bf16 %v11878_v57  ;;  %10222 = vmatmul.msk.bf16.gmra.mxu1 %vm2635_vm12, %v11260_v22  ;;  %v11879_v7 = vunpack.i.l.bf16 %v11878_v57 }
 0x6a4   : > { %v2058_v0 = vpack.c.bf16 %v11774_v36, %v11774_v36  ;;  %v2316_v1 = vpack.c.bf16 %v11771_v8, %v11771_v8  ;;  %17710 = vst [vmem:[#allocation20_spill] sm:$0xff] %v13982_v12 }
 0x6a5   : > { %v1818_v32 = vpack.c.bf16 %v11700_v29, %v11700_v29  ;;  %v1802_v4 = vpack.c.bf16 %v11697_v33, %v11697_v33  ;;  %v1933_v25 = vpack.c.bf16 %v11882_v54, %v11882_v54  ;;  %v1917_v61 = vpack.c.bf16 %v11879_v7, %v11879_v7  ;;  %17711 = vst [vmem:[#allocation17_spill] sm:$0xff] %v13990_v42 }
 0x6a6   : > { %2091 = vst.msk [vmem:[#allocation2 + $0x134] sm:$0xf] %vm1562_vm11, %v2058_v0  ;;  %v11277_v0 = vld [vmem:[#allocation2 + $0x180] sm:$0xff] }
 0x6a7   : > { %2349 = vst.msk [vmem:[#allocation2 + $0x1b4] sm:$0xf] %vm1562_vm11, %v2316_v1 }
 0x6a8   : > { %1851 = vst.msk [vmem:[#allocation2 + $0xfc] sm:$0xf] %vm1562_vm11, %v1818_v32 }
 0x6a9   : > { %1835 = vst.msk [vmem:[#allocation2 + $0xbc] sm:$0xf] %vm1562_vm11, %v1802_v4  ;;  %v11775_v47 = vpop.trf.xlu2  ;;  %v11270_v4 = vld [vmem:[#allocation2 + $0x108] sm:$0xff] }
 0x6aa   : > { %1966 = vst.msk [vmem:[#allocation4 + $0xc4] sm:$0xf] %vm1562_vm11, %v1933_v25  ;;  %v11779_v37 = vunpack.i.h.bf16 %v11775_v47  ;;  %v11776_v38 = vunpack.i.l.bf16 %v11775_v47  ;;  %v11883_v43 = vpop.trf.xlu0 }
 0x6ab   : > { %1950 = vst.msk [vmem:[#allocation4 + $0x84] sm:$0xf] %vm1562_vm11, %v1917_v61  ;;  %v11887_v2 = vunpack.i.h.bf16 %v11883_v43  ;;  %v11884_v5 = vunpack.i.l.bf16 %v11883_v43 }
 0x6ac   : > { %v2059_v58 = vpack.c.bf16 %v11779_v37, %v11779_v37  ;;  %v2317_v3 = vpack.c.bf16 %v11776_v38, %v11776_v38 }
 0x6ad   : > { %v1934_v23 = vpack.c.bf16 %v11887_v2, %v11887_v2  ;;  %v1918_v50 = vpack.c.bf16 %v11884_v5, %v11884_v5  ;;  %v13971_v20 = vpop.f32.mrf.mxu1 }
 0x6ae   : > { %2092 = vst.msk [vmem:[#allocation2 + $0x138] sm:$0xf] %vm1562_vm11, %v2059_v58 }
 0x6af   : > { %2350 = vst.msk [vmem:[#allocation2 + $0x1b8] sm:$0xf] %vm1562_vm11, %v2317_v3 }
 0x6b0   : > { %1967 = vst.msk [vmem:[#allocation4 + $0xc8] sm:$0xf] %vm1562_vm11, %v1934_v23  ;;  %v11268_v56 = vld [vmem:[#allocation2 + $0xb8] sm:$0xff] }
 0x6b1   : > { %1951 = vst.msk [vmem:[#allocation4 + $0x88] sm:$0xf] %vm1562_vm11, %v1918_v50  ;;  %v11780_v24 = vpop.trf.xlu2  ;;  %10278 = vmatmul.msk.bf16.gmra.mxu0 %vm2635_vm12, %v11268_v56  ;;  %10286 = vmatmul.msk.bf16.gmra.mxu2 %vm2635_vm12, %v11268_v56 }
 0x6b2   : > { %v11784_v18 = vunpack.i.h.bf16 %v11780_v24  ;;  %v11781_v62 = vunpack.i.l.bf16 %v11780_v24  ;;  %v11888_v46 = vpop.trf.xlu0 }
 0x6b3   : > { %v11892_v6 = vunpack.i.h.bf16 %v11888_v46  ;;  %v11889_v28 = vunpack.i.l.bf16 %v11888_v46  ;;  %10335 = vmatmul.msk.bf16.vlgmr.msra.gmra.mxu3 %vm2635_vm12, %v11269_v31  ;;  %v13979_v10 = vpop.f32.mrf.mxu3  ;;  %10327 = vmatmul.msk.bf16.vlgmr.msra.gmra.mxu1 %vm2635_vm12, %v11269_v31 }
 0x6b4   : > { %v2060_v30 = vpack.c.bf16 %v11784_v18, %v11784_v18  ;;  %v2318_v13 = vpack.c.bf16 %v11781_v62, %v11781_v62 }
 0x6b5   : > { %v1935_v11 = vpack.c.bf16 %v11892_v6, %v11892_v6  ;;  %v1919_v48 = vpack.c.bf16 %v11889_v28, %v11889_v28  ;;  %v13985_v49 = vpop.f32.mrf.mxu1 }
 0x6b6   : > { %2093 = vst.msk [vmem:[#allocation2 + $0x13c] sm:$0xf] %vm1562_vm11, %v2060_v30 }
 0x6b7   : > { %2351 = vst.msk [vmem:[#allocation2 + $0x1bc] sm:$0xf] %vm1562_vm11, %v2318_v13 }
 0x6b8   : > { %1968 = vst.msk [vmem:[#allocation4 + $0xcc] sm:$0xf] %vm1562_vm11, %v1935_v11 }
 0x6b9   : > { %1952 = vst.msk [vmem:[#allocation4 + $0x8c] sm:$0xf] %vm1562_vm11, %v1919_v48  ;;  %v11789_v63 = vpop.trf.xlu2 }
 0x6ba   : > { %v11793_v52 = vunpack.i.h.bf16 %v11789_v63  ;;  %v11790_v55 = vunpack.i.l.bf16 %v11789_v63  ;;  %v11893_v39 = vpop.trf.xlu0 }
 0x6bb   : > { %v11897_v14 = vunpack.i.h.bf16 %v11893_v39  ;;  %v11894_v9 = vunpack.i.l.bf16 %v11893_v39  ;;  %v13992_v8 = vpop.f32.mrf.mxu3 }
 0x6bc   : > { %v1675_v60 = vpack.c.bf16 %v11793_v52, %v11793_v52  ;;  %v1659_v36 = vpack.c.bf16 %v11790_v55, %v11790_v55  ;;  %v3277_v57 = vmax.f32 %v13985_v49, %v13992_v8  ;;  %v11278_v52 = vld [vmem:[#allocation2 + $0x188] sm:$0xff] }
 0x6bd   : > { %v1936_v22 = vpack.c.bf16 %v11897_v14, %v11897_v14  ;;  %v1920_v15 = vpack.c.bf16 %v11894_v9, %v11894_v9  ;;  %v13997_v29 = vpop.f32.mrf.mxu0  ;;  %v11276_v26 = vld [vmem:[#allocation2 + $0x138] sm:$0xff] }
 0x6be   : > { %1707 = vst.msk [vmem:[#allocation4 + $0x40] sm:$0xf] %vm1562_vm11, %v1675_v60  ;;  %3278 = vmax.xlane.f32.xlu1 %v3277_v57  ;;  %v11271_v60 = vld [vmem:[#allocation2 + $0x110] sm:$0xff] }
 0x6bf   : > { %1691 = vst.msk [vmem:[#allocation4] sm:$0xf] %vm1562_vm11, %v1659_v36  ;;  %v14001_v33 = vpop.f32.mrf.mxu1 }
 0x6c0   : > { %1969 = vst.msk [vmem:[#allocation4 + $0xd0] sm:$0xf] %vm1562_vm11, %v1936_v22 }
 0x6c1   : > { %1953 = vst.msk [vmem:[#allocation4 + $0x90] sm:$0xf] %vm1562_vm11, %v1920_v15  ;;  %v11794_v1 = vpop.trf.xlu2  ;;  %10383 = vmatmul.msk.bf16.vlgmr.msra.gmra.mxu0 %vm2635_vm12, %v11277_v0  ;;  %10391 = vmatmul.msk.bf16.vlgmr.msra.gmra.mxu2 %vm2635_vm12, %v11277_v0 }
 0x6c2   : > { %v11798_v54 = vunpack.i.h.bf16 %v11794_v1  ;;  %v11795_v32 = vunpack.i.l.bf16 %v11794_v1  ;;  %v11898_v7 = vpop.trf.xlu0 }
 0x6c3   : > { %v11902_v25 = vunpack.i.h.bf16 %v11898_v7  ;;  %v11899_v61 = vunpack.i.l.bf16 %v11898_v7  ;;  %10336 = vmatmul.msk.bf16.gmra.mxu3 %vm2635_vm12, %v11270_v4  ;;  %v14007_v38 = vpop.f32.mrf.mxu2  ;;  %10328 = vmatmul.msk.bf16.gmra.mxu1 %vm2635_vm12, %v11270_v4 }
 0x6c4   : > { %v1676_v47 = vpack.c.bf16 %v11798_v54, %v11798_v54  ;;  %v1660_v37 = vpack.c.bf16 %v11795_v32, %v11795_v32  ;;  %v3322_v5 = vmax.f32 %v13997_v29, %v14007_v38 }
 0x6c5   : > { %v1937_v43 = vpack.c.bf16 %v11902_v25, %v11902_v25  ;;  %v1921_v2 = vpack.c.bf16 %v11899_v61, %v11899_v61  ;;  %v14013_v58 = vpop.f32.mrf.mxu3  ;;  %v14015_v3 = vpop.f32.mrf.mxu0 }
 0x6c6   : > { %1708 = vst.msk [vmem:[#allocation4 + $0x44] sm:$0xf] %vm1562_vm11, %v1676_v47  ;;  %3323 = vmax.xlane.f32.xlu1 %v3322_v5  ;;  %v3280_v11 = vmax.f32 %v14001_v33, %v14013_v58 }
 0x6c7   : > { %1692 = vst.msk [vmem:[#allocation4 + $0x4] sm:$0xf] %vm1562_vm11, %v1660_v37  ;;  %v14019_v23 = vpop.f32.mrf.mxu1 }
 0x6c8   : > { %1970 = vst.msk [vmem:[#allocation4 + $0xd4] sm:$0xf] %vm1562_vm11, %v1937_v43 }
 0x6c9   : > { %1954 = vst.msk [vmem:[#allocation4 + $0x94] sm:$0xf] %vm1562_vm11, %v1921_v2  ;;  %v11799_v50 = vpop.trf.xlu2 }
 0x6ca   : > { %v11803_v56 = vunpack.i.h.bf16 %v11799_v50  ;;  %v11800_v24 = vunpack.i.l.bf16 %v11799_v50  ;;  %v11903_v18 = vpop.trf.xlu0 }
 0x6cb   : > { %v11907_v62 = vunpack.i.h.bf16 %v11903_v18  ;;  %v11904_v31 = vunpack.i.l.bf16 %v11903_v18  ;;  %v14022_v28 = vpop.f32.mrf.mxu2 }
 0x6cc   : > { %v1677_v46 = vpack.c.bf16 %v11803_v56, %v11803_v56  ;;  %v1661_v6 = vpack.c.bf16 %v11800_v24, %v11800_v24  ;;  %v3325_v18 = vmax.f32 %v14015_v3, %v14022_v28 }
 0x6cd   : > { %v1938_v30 = vpack.c.bf16 %v11907_v62, %v11907_v62  ;;  %v1922_v13 = vpack.c.bf16 %v11904_v31, %v11904_v31  ;;  %v14027_v48 = vpop.f32.mrf.mxu3 }
 0x6ce   : > { %1709 = vst.msk [vmem:[#allocation4 + $0x48] sm:$0xf] %vm1562_vm11, %v1677_v46  ;;  %v14030_v63 = vpop.f32.mrf.mxu0  ;;  %3281 = vmax.xlane.f32.xlu1 %v3280_v11  ;;  %v3283_v4 = vmax.f32 %v14019_v23, %v14027_v48  ;;  %v11279_v11 = vld [vmem:[#allocation2 + $0x190] sm:$0xff] }
 0x6cf   : > { %1693 = vst.msk [vmem:[#allocation4 + $0x8] sm:$0xf] %vm1562_vm11, %v1661_v6 }
 0x6d0   : > { %1971 = vst.msk [vmem:[#allocation4 + $0xd8] sm:$0xf] %vm1562_vm11, %v1938_v30  ;;  %v14034_v39 = vpop.f32.mrf.mxu1 }
 0x6d1   : > { %1955 = vst.msk [vmem:[#allocation4 + $0x98] sm:$0xf] %vm1562_vm11, %v1922_v13  ;;  %v11804_v55 = vpop.trf.xlu2  ;;  %10384 = vmatmul.msk.bf16.gmra.mxu0 %vm2635_vm12, %v11278_v52  ;;  %10392 = vmatmul.msk.bf16.gmra.mxu2 %vm2635_vm12, %v11278_v52 }
 0x6d2   : > { %v11808_v14 = vunpack.i.h.bf16 %v11804_v55  ;;  %v11805_v9 = vunpack.i.l.bf16 %v11804_v55  ;;  %v11908_v36 = vpop.trf.xlu0 }
 0x6d3   : > { %v11912_v22 = vunpack.i.h.bf16 %v11908_v36  ;;  %v11909_v15 = vunpack.i.l.bf16 %v11908_v36  ;;  %10337 = vmatmul.msk.bf16.gmra.mxu3 %vm2635_vm12, %v11271_v60  ;;  %10329 = vmatmul.msk.bf16.gmra.mxu1 %vm2635_vm12, %v11271_v60  ;;  %v11272_v60 = vld [vmem:[#allocation2 + $0x118] sm:$0xff] }
 0x6d4   : > { %v1678_v57 = vpack.c.bf16 %v11808_v14, %v11808_v14  ;;  %v1662_v0 = vpack.c.bf16 %v11805_v9, %v11805_v9  ;;  %v14040_v32 = vpop.f32.mrf.mxu2 }
 0x6d5   : > { %v1939_v1 = vpack.c.bf16 %v11912_v22, %v11912_v22  ;;  %v1923_v54 = vpack.c.bf16 %v11909_v15, %v11909_v15  ;;  %v3328_v6 = vmax.f32 %v14030_v63, %v14040_v32 }
 0x6d6   : > { %1710 = vst.msk [vmem:[#allocation4 + $0x4c] sm:$0xf] %vm1562_vm11, %v1678_v57  ;;  %v14046_v7 = vpop.f32.mrf.mxu3  ;;  %v14048_v25 = vpop.f32.mrf.mxu0  ;;  %3284 = vmax.xlane.f32.xlu1 %v3283_v4 }
 0x6d7   : > { %1694 = vst.msk [vmem:[#allocation4 + $0xc] sm:$0xf] %vm1562_vm11, %v1662_v0 }
 0x6d8   : > { %1972 = vst.msk [vmem:[#allocation4 + $0xdc] sm:$0xf] %vm1562_vm11, %v1939_v1  ;;  %v14052_v47 = vpop.f32.mrf.mxu1 }
 0x6d9   : > { %1956 = vst.msk [vmem:[#allocation4 + $0x9c] sm:$0xf] %vm1562_vm11, %v1923_v54  ;;  %v11809_v61 = vpop.trf.xlu2 }
 0x6da   : > { %v11813_v37 = vunpack.i.h.bf16 %v11809_v61  ;;  %v11810_v43 = vunpack.i.l.bf16 %v11809_v61  ;;  %v11913_v2 = vpop.trf.xlu0  ;;  %v3286_v61 = vmax.f32 %v14034_v39, %v14046_v7 }
 0x6db   : > { %v11917_v5 = vunpack.i.h.bf16 %v11913_v2  ;;  %v11914_v50 = vunpack.i.l.bf16 %v11913_v2 }
 0x6dc   : > { %v1679_v56 = vpack.c.bf16 %v11813_v37, %v11813_v37  ;;  %v1663_v24 = vpack.c.bf16 %v11810_v43, %v11810_v43  ;;  %v14056_v46 = vpop.f32.mrf.mxu2 }
 0x6dd   : > { %v1940_v62 = vpack.c.bf16 %v11917_v5, %v11917_v5  ;;  %v1924_v31 = vpack.c.bf16 %v11914_v50, %v11914_v50 }
 0x6de   : > { %1711 = vst.msk [vmem:[#allocation4 + $0x50] sm:$0xf] %vm1562_vm11, %v1679_v56  ;;  %v14062_v30 = vpop.f32.mrf.mxu3  ;;  %v14064_v13 = vpop.f32.mrf.mxu0  ;;  %3329 = vmax.xlane.f32.xlu1 %v3328_v6 }
 0x6df   : > { %1695 = vst.msk [vmem:[#allocation4 + $0x10] sm:$0xf] %vm1562_vm11, %v1663_v24  ;;  %3326 = vmax.xlane.f32.xlu0 %v3325_v18 }
 0x6e0   : > { %1973 = vst.msk [vmem:[#allocation4 + $0xe0] sm:$0xf] %vm1562_vm11, %v1940_v62  ;;  %v14068_v55 = vpop.f32.mrf.mxu1 }
 0x6e1   : > { %1957 = vst.msk [vmem:[#allocation4 + $0xa0] sm:$0xf] %vm1562_vm11, %v1924_v31  ;;  %v11814_v52 = vpop.trf.xlu2  ;;  %10385 = vmatmul.msk.bf16.gmra.mxu0 %vm2635_vm12, %v11279_v11  ;;  %10393 = vmatmul.msk.bf16.gmra.mxu2 %vm2635_vm12, %v11279_v11 }
 0x6e2   : > { %v11818_v14 = vunpack.i.h.bf16 %v11814_v52  ;;  %v11815_v9 = vunpack.i.l.bf16 %v11814_v52  ;;  %v11918_v36 = vpop.trf.xlu0 }
 0x6e3   : > { %v11922_v22 = vunpack.i.h.bf16 %v11918_v36  ;;  %v11919_v15 = vunpack.i.l.bf16 %v11918_v36  ;;  %10338 = vmatmul.msk.bf16.gmra.mxu3 %vm2635_vm12, %v11272_v60  ;;  %10330 = vmatmul.msk.bf16.gmra.mxu1 %vm2635_vm12, %v11272_v60 }
 0x6e4   : > { %v1680_v57 = vpack.c.bf16 %v11818_v14, %v11818_v14  ;;  %v1664_v0 = vpack.c.bf16 %v11815_v9, %v11815_v9  ;;  %v14074_v4 = vpop.f32.mrf.mxu2  ;;  %v3331_v9 = vmax.f32 %v14048_v25, %v14056_v46 }
 0x6e5   : > { %v1941_v1 = vpack.c.bf16 %v11922_v22, %v11922_v22  ;;  %v1925_v54 = vpack.c.bf16 %v11919_v15, %v11919_v15  ;;  %v11280_v22 = vld [vmem:[#allocation2 + $0x198] sm:$0xff] }
 0x6e6   : > { %1712 = vst.msk [vmem:[#allocation4 + $0x54] sm:$0xf] %vm1562_vm11, %v1680_v57  ;;  %v14080_v37 = vpop.f32.mrf.mxu3  ;;  %v14082_v43 = vpop.f32.mrf.mxu0  ;;  %3287 = vmax.xlane.f32.xlu1 %v3286_v61 }
 0x6e7   : > { %1696 = vst.msk [vmem:[#allocation4 + $0x14] sm:$0xf] %vm1562_vm11, %v1664_v0 }
 0x6e8   : > { %1974 = vst.msk [vmem:[#allocation4 + $0xe4] sm:$0xf] %vm1562_vm11, %v1941_v1  ;;  %v14086_v5 = vpop.f32.mrf.mxu1 }
 0x6e9   : > { %1958 = vst.msk [vmem:[#allocation4 + $0xa4] sm:$0xf] %vm1562_vm11, %v1925_v54  ;;  %v11819_v2 = vpop.trf.xlu2  ;;  %v11273_v54 = vld [vmem:[#allocation2 + $0x120] sm:$0xff] }
 0x6ea   : > { %v11823_v50 = vunpack.i.h.bf16 %v11819_v2  ;;  %v11820_v56 = vunpack.i.l.bf16 %v11819_v2  ;;  %v11923_v24 = vpop.trf.xlu0 }
 0x6eb   : > { %v11927_v18 = vunpack.i.h.bf16 %v11923_v24  ;;  %v11924_v62 = vunpack.i.l.bf16 %v11923_v24 }
 0x6ec   : > { %v1681_v31 = vpack.c.bf16 %v11823_v50, %v11823_v50  ;;  %v1665_v6 = vpack.c.bf16 %v11820_v56, %v11820_v56  ;;  %v14088_v14 = vpop.f32.mrf.mxu2 }
 0x6ed   : > { %v1942_v11 = vpack.c.bf16 %v11927_v18, %v11927_v18  ;;  %v1926_v52 = vpack.c.bf16 %v11924_v62, %v11924_v62 }
 0x6ee   : > { %1713 = vst.msk [vmem:[#allocation4 + $0x58] sm:$0xf] %vm1562_vm11, %v1681_v31  ;;  %v14094_v60 = vpop.f32.mrf.mxu3  ;;  %v14096_v36 = vpop.f32.mrf.mxu0  ;;  %3332 = vmax.xlane.f32.xlu1 %v3331_v9 }
 0x6ef   : > { %1697 = vst.msk [vmem:[#allocation4 + $0x18] sm:$0xf] %vm1562_vm11, %v1665_v6  ;;  %v3289_v6 = vmax.f32 %v14052_v47, %v14062_v30 }
 0x6f0   : > { %1975 = vst.msk [vmem:[#allocation4 + $0xe8] sm:$0xf] %vm1562_vm11, %v1942_v11  ;;  %v14100_v57 = vpop.f32.mrf.mxu1 }
 0x6f1   : > { %1959 = vst.msk [vmem:[#allocation4 + $0xa8] sm:$0xf] %vm1562_vm11, %v1926_v52  ;;  %v11824_v15 = vpop.trf.xlu2  ;;  %10386 = vmatmul.msk.bf16.gmra.mxu0 %vm2635_vm12, %v11280_v22  ;;  %10394 = vmatmul.msk.bf16.gmra.mxu2 %vm2635_vm12, %v11280_v22 }
 0x6f2   : > { %v11828_v0 = vunpack.i.h.bf16 %v11824_v15  ;;  %v11825_v1 = vunpack.i.l.bf16 %v11824_v15  ;;  %v11928_v61 = vpop.trf.xlu0 }
 0x6f3   : > { %v11932_v2 = vunpack.i.h.bf16 %v11928_v61  ;;  %v11929_v50 = vunpack.i.l.bf16 %v11928_v61  ;;  %10339 = vmatmul.msk.bf16.gmra.mxu3 %vm2635_vm12, %v11273_v54  ;;  %10331 = vmatmul.msk.bf16.gmra.mxu1 %vm2635_vm12, %v11273_v54 }
 0x6f4   : > { %v1682_v56 = vpack.c.bf16 %v11828_v0, %v11828_v0  ;;  %v1666_v24 = vpack.c.bf16 %v11825_v1, %v11825_v1  ;;  %v14106_v31 = vpop.f32.mrf.mxu2 }
 0x6f5   : > { %v1943_v18 = vpack.c.bf16 %v11932_v2, %v11932_v2  ;;  %v1927_v62 = vpack.c.bf16 %v11929_v50, %v11929_v50  ;;  %v3340_v51 = vmax.f32 %v14096_v36, %v14106_v31 }
 0x6f6   : > { %1714 = vst.msk [vmem:[#allocation4 + $0x5c] sm:$0xf] %vm1562_vm11, %v1682_v56  ;;  %v14112_v11 = vpop.f32.mrf.mxu3  ;;  %v14114_v52 = vpop.f32.mrf.mxu0  ;;  %3290 = vmax.xlane.f32.xlu1 %v3289_v6 }
 0x6f7   : > { %1698 = vst.msk [vmem:[#allocation4 + $0x1c] sm:$0xf] %vm1562_vm11, %v1666_v24  ;;  %v3298_v9 = vmax.f32 %v14100_v57, %v14112_v11 }
 0x6f8   : > { %1976 = vst.msk [vmem:[#allocation4 + $0xec] sm:$0xf] %vm1562_vm11, %v1943_v18  ;;  %v14120_v15 = vpop.f32.mrf.mxu1  ;;  %v3334_v18 = vmax.f32 %v14064_v13, %v14074_v4 }
 0x6f9   : > { %1960 = vst.msk [vmem:[#allocation4 + $0xac] sm:$0xf] %vm1562_vm11, %v1927_v62  ;;  %v11829_v22 = vpop.trf.xlu2  ;;  %3299 = vmax.xlane.f32.xlu0 %v3298_v9 }
 0x6fa   : > { %v11833_v0 = vunpack.i.h.bf16 %v11829_v22  ;;  %v11830_v1 = vunpack.i.l.bf16 %v11829_v22  ;;  %v11933_v54 = vpop.trf.xlu0  ;;  %v11281_v22 = vld [vmem:[#allocation2 + $0x1a0] sm:$0xff] }
 0x6fb   : > { %v11937_v61 = vunpack.i.h.bf16 %v11933_v54  ;;  %v11934_v2 = vunpack.i.l.bf16 %v11933_v54 }
 0x6fc   : > { %v1683_v50 = vpack.c.bf16 %v11833_v0, %v11833_v0  ;;  %v1667_v56 = vpack.c.bf16 %v11830_v1, %v11830_v1  ;;  %v14122_v35 = vpop.f32.mrf.mxu2 }
 0x6fd   : > { %v1944_v24 = vpack.c.bf16 %v11937_v61, %v11937_v61  ;;  %v1928_v6 = vpack.c.bf16 %v11934_v2, %v11934_v2  ;;  %v11274_v2 = vld [vmem:[#allocation2 + $0x128] sm:$0xff] }
 0x6fe   : > { %1715 = vst.msk [vmem:[#allocation4 + $0x60] sm:$0xf] %vm1562_vm11, %v1683_v50  ;;  %v14128_v62 = vpop.f32.mrf.mxu3  ;;  %v14130_v9 = vpop.f32.mrf.mxu0  ;;  %3335 = vmax.xlane.f32.xlu1 %v3334_v18 }
 0x6ff   : > { %1699 = vst.msk [vmem:[#allocation4 + $0x20] sm:$0xf] %vm1562_vm11, %v1667_v56 }
 0x700   : > { %1977 = vst.msk [vmem:[#allocation4 + $0xf0] sm:$0xf] %vm1562_vm11, %v1944_v24  ;;  %v14134_v61 = vpop.f32.mrf.mxu1 }
 0x701   : > { %1961 = vst.msk [vmem:[#allocation4 + $0xb0] sm:$0xf] %vm1562_vm11, %v1928_v6  ;;  %v11834_v0 = vpop.trf.xlu2  ;;  %10387 = vmatmul.msk.bf16.gmra.mxu0 %vm2635_vm12, %v11281_v22  ;;  %10395 = vmatmul.msk.bf16.gmra.mxu2 %vm2635_vm12, %v11281_v22  ;;  %v3274_v22 = vmax.f32 %v13971_v20, %v13979_v10 }
 0x702   : > { %v11838_v1 = vunpack.i.h.bf16 %v11834_v0  ;;  %v11835_v54 = vunpack.i.l.bf16 %v11834_v0  ;;  %v11938_v50 = vpop.trf.xlu0  ;;  %v3292_v0 = vmax.f32 %v14068_v55, %v14080_v37 }
 0x703   : > { %v11942_v56 = vunpack.i.h.bf16 %v11938_v50  ;;  %v11939_v19 = vunpack.i.l.bf16 %v11938_v50  ;;  %10340 = vmatmul.msk.bf16.gmra.mxu3 %vm2635_vm12, %v11274_v2  ;;  %10332 = vmatmul.msk.bf16.gmra.mxu1 %vm2635_vm12, %v11274_v2 }
 0x704   : > { %v1684_v27 = vpack.c.bf16 %v11838_v1, %v11838_v1  ;;  %v1668_v18 = vpack.c.bf16 %v11835_v54, %v11835_v54  ;;  %v14140_v59 = vpop.f32.mrf.mxu2 }
 0x705   : > { %v1945_v24 = vpack.c.bf16 %v11942_v56, %v11942_v56  ;;  %v1929_v6 = vpack.c.bf16 %v11939_v19, %v11939_v19 }
 0x706   : > { %1716 = vst.msk [vmem:[#allocation4 + $0x64] sm:$0xf] %vm1562_vm11, %v1684_v27  ;;  %v14148_v1 = vpop.f32.mrf.mxu3  ;;  %v14150_v54 = vpop.f32.mrf.mxu0  ;;  %3293 = vmax.xlane.f32.xlu1 %v3292_v0 }
 0x707   : > { %1700 = vst.msk [vmem:[#allocation4 + $0x24] sm:$0xf] %vm1562_vm11, %v1668_v18  ;;  %v3346_v18 = vmax.f32 %v14130_v9, %v14140_v59 }
 0x708   : > { %1978 = vst.msk [vmem:[#allocation4 + $0xf4] sm:$0xf] %vm1562_vm11, %v1945_v24  ;;  %v14154_v41 = vpop.f32.mrf.mxu1  ;;  %v3337_v24 = vmax.f32 %v14082_v43, %v14088_v14 }
 0x709   : > { %1962 = vst.msk [vmem:[#allocation4 + $0xb4] sm:$0xf] %vm1562_vm11, %v1929_v6  ;;  %v11839_v19 = vpop.trf.xlu2  ;;  %3275 = vmax.xlane.f32.xlu2 %v3274_v22 }
 0x70a   : > { %v11843_v2 = vunpack.i.h.bf16 %v11839_v19  ;;  %v11840_v50 = vunpack.i.l.bf16 %v11839_v19  ;;  %v11943_v56 = vpop.trf.xlu0  ;;  %17712 = vst [vmem:[#allocation33_spill] sm:$0xff] %v14154_v41 }
 0x70b   : > { %v11947_v27 = vunpack.i.h.bf16 %v11943_v56  ;;  %v11944_v16 = vunpack.i.l.bf16 %v11943_v56 }
 0x70c   : > { %v1685_v45 = vpack.c.bf16 %v11843_v2, %v11843_v2  ;;  %v1669_v17 = vpack.c.bf16 %v11840_v50, %v11840_v50  ;;  %v14158_v21 = vpop.f32.mrf.mxu2 }
 0x70d   : > { %v1946_v34 = vpack.c.bf16 %v11947_v27, %v11947_v27  ;;  %v1930_v0 = vpack.c.bf16 %v11944_v16, %v11944_v16  ;;  %v3349_v6 = vmax.f32 %v14150_v54, %v14158_v21  ;;  %v11282_v16 = vld [vmem:[#allocation2 + $0x1a8] sm:$0xff] }
 0x70e   : > { %1717 = vst.msk [vmem:[#allocation4 + $0x68] sm:$0xf] %vm1562_vm11, %v1685_v45  ;;  %v14166_v22 = vpop.f32.mrf.mxu3  ;;  %v14168_v19 = vpop.f32.mrf.mxu0  ;;  %3338 = vmax.xlane.f32.xlu1 %v3337_v24 }
 0x70f   : > { %1701 = vst.msk [vmem:[#allocation4 + $0x28] sm:$0xf] %vm1562_vm11, %v1669_v17  ;;  %3350 = vmax.xlane.f32.xlu0 %v3349_v6  ;;  %v11275_v17 = vld [vmem:[#allocation2 + $0x130] sm:$0xff]  ;;  %v3307_v24 = vmax.f32 %v14154_v41, %v14166_v22 }
 0x710   : > { %17713 = vst [vmem:[#allocation34_spill] sm:$0xff] %v14166_v22  ;;  %v11323_v42 = vld [vmem:[#allocation4 + $0xf0] sm:$0xff] }
 0x711   : > { %1979 = vst.msk [vmem:[#allocation4 + $0xf8] sm:$0xf] %vm1562_vm11, %v1946_v34  ;;  %v11844_v2 = vpop.trf.xlu2  ;;  %3347 = vmax.xlane.f32.xlu2 %v3346_v18  ;;  %10388 = vmatmul.msk.bf16.gmra.mxu0 %vm2635_vm12, %v11282_v16  ;;  %v3295_v18 = vmax.f32 %v14086_v5, %v14094_v60 }
 0x712   : > { %1963 = vst.msk [vmem:[#allocation4 + $0xb8] sm:$0xf] %vm1562_vm11, %v1930_v0  ;;  %v11848_v50 = vunpack.i.h.bf16 %v11844_v2  ;;  %v11845_v45 = vunpack.i.l.bf16 %v11844_v2  ;;  %10396 = vmatmul.msk.bf16.gmra.mxu2 %vm2635_vm12, %v11282_v16  ;;  %v11948_v56 = vpop.trf.xlu0  ;;  %v3304_v0 = vmax.f32 %v14134_v61, %v14148_v1 }
 0x713   : > { %v11952_v27 = vunpack.i.h.bf16 %v11948_v56  ;;  %v11949_v12 = vunpack.i.l.bf16 %v11948_v56  ;;  %10341 = vmatmul.msk.bf16.gmra.mxu3 %vm2635_vm12, %v11275_v17  ;;  %10333 = vmatmul.msk.bf16.gmra.mxu1 %vm2635_vm12, %v11275_v17  ;;  %v14185_v56 = vpop.f32.mrf.mxu1 }
 0x714   : > { %v1686_v34 = vpack.c.bf16 %v11848_v50, %v11848_v50  ;;  %v1670_v6 = vpack.c.bf16 %v11845_v45, %v11845_v45  ;;  %v14182_v53 = vpop.f32.mrf.mxu2  ;;  %17714 = vst [vmem:[#allocation35_spill] sm:$0xff] %v14185_v56 }
 0x715   : > { %v1947_v16 = vpack.c.bf16 %v11952_v27, %v11952_v27  ;;  %v1931_v2 = vpack.c.bf16 %v11949_v12, %v11949_v12 }
 0x716   : > { %1718 = vst.msk [vmem:[#allocation4 + $0x6c] sm:$0xf] %vm1562_vm11, %v1686_v34  ;;  %v14188_v50 = vpop.f32.mrf.mxu3  ;;  %v14190_v45 = vpop.f32.mrf.mxu0  ;;  %3296 = vmax.xlane.f32.xlu1 %v3295_v18 }
 0x717   : > { %1702 = vst.msk [vmem:[#allocation4 + $0x2c] sm:$0xf] %vm1562_vm11, %v1670_v6  ;;  %3308 = vmax.xlane.f32.xlu0 %v3307_v24 }
 0x718   : > { %17715 = vst [vmem:[#allocation36_spill] sm:$0xff] %v14188_v50 }
 0x719   : > { %17716 = vst [vmem:[#allocation37_spill] sm:$0xff] %v14190_v45  ;;  %v11849_v17 = vpop.trf.xlu2  ;;  %3305 = vmax.xlane.f32.xlu2 %v3304_v0 }
 0x71a   : > { %1980 = vst.msk [vmem:[#allocation4 + $0xfc] sm:$0xf] %vm1562_vm11, %v1947_v16  ;;  %v11853_v12 = vunpack.i.h.bf16 %v11849_v17  ;;  %v11850_v27 = vunpack.i.l.bf16 %v11849_v17 }
 0x71b   : > { %1964 = vst.msk [vmem:[#allocation4 + $0xbc] sm:$0xf] %vm1562_vm11, %v1931_v2  ;;  %v14202_v16 = vpop.f32.mrf.mxu1  ;;  %v11283_v2 = vld [vmem:[#allocation2 + $0x1b0] sm:$0xff] }
 0x71c   : > { %v1687_v40 = vpack.c.bf16 %v11853_v12, %v11853_v12  ;;  %v1671_v34 = vpack.c.bf16 %v11850_v27, %v11850_v27  ;;  %v14196_v6 = vpop.f32.mrf.mxu2  ;;  %17718 = vst [vmem:[#allocation39_spill] sm:$0xff] %v14202_v16 }
 0x71d   : > { %17717 = vst [vmem:[#allocation38_spill] sm:$0xff] %v14196_v6  ;;  %v3355_v18 = vmax.f32 %v14190_v45, %v14196_v6  ;;  %v11322_v45 = vld [vmem:[#allocation4 + $0xe8] sm:$0xff] }
 0x71e   : > { %1719 = vst.msk [vmem:[#allocation4 + $0x70] sm:$0xf] %vm1562_vm11, %v1687_v40  ;;  %3341 = vmax.xlane.f32.xlu1 %v3340_v51  ;;  %v14204_v0 = vpop.f32.mrf.mxu3  ;;  %v14206_v12 = vpop.f32.mrf.mxu0  ;;  %v11315_v51 = vld [vmem:[#allocation4 + $0xb0] sm:$0xff] }
 0x71f   : > { %1703 = vst.msk [vmem:[#allocation4 + $0x30] sm:$0xf] %vm1562_vm11, %v1671_v34 }
 0x720   : > { %17719 = vst [vmem:[#allocation40_spill] sm:$0xff] %v14204_v0 }
 0x721   : > { %v11324_v24 = vld [vmem:[#allocation4 + $0xf8] sm:$0xff]  ;;  %17720 = vst [vmem:[#allocation41_spill] sm:$0xff] %v14206_v12  ;;  %v11854_v27 = vpop.trf.xlu2  ;;  %3356 = vmax.xlane.f32.xlu2 %v3355_v18  ;;  %10389 = vmatmul.msk.bf16.gmra.mxu0 %vm2635_vm12, %v11283_v2  ;;  %v3313_v18 = vmax.f32 %v14202_v16, %v14204_v0 }
 0x722   : > { %v11316_v17 = vld [vmem:[#allocation4 + $0xb8] sm:$0xff]  ;;  %4925 = vmatpush.bf16.msrb.mxu2 %v11324_v24  ;;  %v11858_v40 = vunpack.i.h.bf16 %v11854_v27  ;;  %v11855_v44 = vunpack.i.l.bf16 %v11854_v27  ;;  %v3343_v24 = vmax.f32 %v14114_v52, %v14122_v35 }
 0x723   : > { %10397 = vmatmul.msk.bf16.gmra.mxu2 %vm2635_vm12, %v11283_v2  ;;  %4876 = vmatpush.bf16.msrb.mxu0 %v11316_v17  ;;  %v11321_v17 = vld [vmem:[#allocation4 + $0xe0] sm:$0xff] }
 0x724   : > { %v1688_v34 = vpack.c.bf16 %v11858_v40, %v11858_v40  ;;  %v1672_v6 = vpack.c.bf16 %v11855_v44, %v11855_v44  ;;  %10342 = vmatmul.msk.bf16.gmra.mxu3 %vm2635_vm12, %v11276_v26  ;;  %10334 = vmatmul.msk.bf16.gmra.mxu1 %vm2635_vm12, %v11276_v26  ;;  %v14216_v27 = vpop.f32.mrf.mxu2  ;;  %v11314_v26 = vld [vmem:[#allocation4 + $0xa8] sm:$0xff]  ;;  %v14222_v40 = vpop.f32.mrf.mxu1 }
 0x725   : > { %17721 = vst [vmem:[#allocation42_spill] sm:$0xff] %v14216_v27  ;;  %v3358_v2 = vmax.f32 %v14206_v12, %v14216_v27  ;;  %v11313_v27 = vld [vmem:[#allocation4 + $0xa0] sm:$0xff] }
 0x726   : > { %4926 = vmatpush.bf16.msrb.mxu2 %v11323_v42  ;;  %1720 = vst.msk [vmem:[#allocation4 + $0x74] sm:$0xf] %vm1562_vm11, %v1688_v34  ;;  %3344 = vmax.xlane.f32.xlu1 %v3343_v24  ;;  %v14224_v16 = vpop.f32.mrf.mxu3  ;;  %v14226_v34 = vpop.f32.mrf.mxu0 }
 0x727   : > { %1704 = vst.msk [vmem:[#allocation4 + $0x34] sm:$0xf] %vm1562_vm11, %v1672_v6  ;;  %4877 = vmatpush.bf16.msrb.mxu0 %v11315_v51  ;;  %3359 = vmax.xlane.f32.xlu0 %v3358_v2  ;;  %v3316_v6 = vmax.f32 %v14222_v40, %v14224_v16  ;;  %v11320_v2 = vld [vmem:[#allocation4 + $0xd8] sm:$0xff] }
 0x728   : > { %17722 = vst [vmem:[#allocation43_spill] sm:$0xff] %v14222_v40  ;;  %v11311_v40 = vld [vmem:[#allocation4 + $0x90] sm:$0xff] }
 0x729   : > { %v11859_v44 = vpop.trf.xlu2  ;;  %3314 = vmax.xlane.f32.xlu2 %v3313_v18  ;;  %17723 = vst [vmem:[#allocation44_spill] sm:$0xff] %v14224_v16 }
 0x72a   : > { %4927 = vmatpush.bf16.msrb.mxu2 %v11322_v45  ;;  %v11863_v0 = vunpack.i.h.bf16 %v11859_v44  ;;  %v11860_v42 = vunpack.i.l.bf16 %v11859_v44  ;;  %17724 = vst [vmem:[#allocation45_spill] sm:$0xff] %v14226_v34  ;;  %v3301_v45 = vmax.f32 %v14120_v15, %v14128_v62  ;;  %v11284_v44 = vld [vmem:[#allocation2 + $0x1b8] sm:$0xff] }
 0x72b   : > { %4878 = vmatpush.bf16.msrb.mxu0 %v11314_v26  ;;  %v11312_v26 = vld [vmem:[#allocation4 + $0x98] sm:$0xff] }
 0x72c   : > { %v1689_v51 = vpack.c.bf16 %v11863_v0, %v11863_v0  ;;  %v1673_v24 = vpack.c.bf16 %v11860_v42, %v11860_v42  ;;  %v14232_v18 = vpop.f32.mrf.mxu2 }
 0x72d   : > { %17725 = vst [vmem:[#allocation46_spill] sm:$0xff] %v14232_v18 }
 0x72e   : > { %4928 = vmatpush.bf16.msrb.mxu2 %v11321_v17  ;;  %1721 = vst.msk [vmem:[#allocation4 + $0x78] sm:$0xf] %vm1562_vm11, %v1689_v51  ;;  %3302 = vmax.xlane.f32.xlu1 %v3301_v45  ;;  %v3352_v17 = vmax.f32 %v14168_v19, %v14182_v53  ;;  %v11319_v51 = vld [vmem:[#allocation4 + $0xd0] sm:$0xff]  ;;  %v14240_v45 = vpop.f32.mrf.mxu0 }
 0x72f   : > { %1705 = vst.msk [vmem:[#allocation4 + $0x38] sm:$0xf] %vm1562_vm11, %v1673_v24  ;;  %4879 = vmatpush.bf16.msrb.mxu0 %v11313_v27  ;;  %3317 = vmax.xlane.f32.xlu0 %v3316_v6 }
 0x730   : > { %17726 = vst [vmem:[#allocation47_spill] sm:$0xff] %v14240_v45 }
 0x731   : > { %v11864_v12 = vpop.trf.xlu2  ;;  %10390 = vmatmul.msk.bf16.gmra.mxu0 %vm2635_vm12, %v11284_v44  ;;  %v3279_v16 = vpop.xlane.xlu1 %3278 }
 0x732   : > { %4929 = vmatpush.bf16.msrb.mxu2 %v11320_v2  ;;  %v11868_v0 = vunpack.i.h.bf16 %v11864_v12  ;;  %v11865_v42 = vunpack.i.l.bf16 %v11864_v12  ;;  %v11318_v2 = vld [vmem:[#allocation4 + $0xc8] sm:$0xff] }
 0x733   : > { %10398 = vmatmul.msk.bf16.gmra.mxu2 %vm2635_vm12, %v11284_v44  ;;  %4880 = vmatpush.bf16.msrb.mxu0 %v11312_v26  ;;  %v11310_v26 = vld [vmem:[#allocation4 + $0x88] sm:$0xff] }
 0x734   : > { %v1690_v24 = vpack.c.bf16 %v11868_v0, %v11868_v0  ;;  %v1674_v27 = vpack.c.bf16 %v11865_v42, %v11865_v42  ;;  %v14242_v6 = vpop.f32.mrf.mxu2  ;;  %v3310_v0 = vmax.f32 %v14185_v56, %v14188_v50  ;;  %v11317_v42 = vld [vmem:[#allocation4 + $0xc0] sm:$0xff] }
 0x735   : > { %17727 = vst [vmem:[#allocation48_spill] sm:$0xff] %v14242_v6  ;;  %v3364_v12 = vmax.f32 %v14240_v45, %v14242_v6  ;;  %v3361_v6 = vmax.f32 %v14226_v34, %v14232_v18  ;;  %v11305_v18 = vld [vmem:[#allocation4 + $0x60] sm:$0xff] }
 0x736   : > { %4930 = vmatpush.bf16.msrb.mxu2 %v11319_v51  ;;  %1722 = vst.msk [vmem:[#allocation4 + $0x7c] sm:$0xf] %vm1562_vm11, %v1690_v24  ;;  %3353 = vmax.xlane.f32.xlu1 %v3352_v17  ;;  %v11309_v51 = vld [vmem:[#allocation4 + $0x80] sm:$0xff]  ;;  %v11307_v17 = vld [vmem:[#allocation4 + $0x70] sm:$0xff] }
 0x737   : > { %1706 = vst.msk [vmem:[#allocation4 + $0x3c] sm:$0xf] %vm1562_vm11, %v1674_v27  ;;  %4881 = vmatpush.bf16.msrb.mxu0 %v11311_v40  ;;  %3365 = vmax.xlane.f32.xlu2 %v3364_v12  ;;  %v11299_v40 = vld [vmem:[#allocation4 + $0x30] sm:$0xff]  ;;  %v14254_v12 = vpop.f32.mrf.mxu0 }
 0x738   : > { %17729 = vst [vmem:[#allocation50_spill] sm:$0xff] %v14254_v12 }
 0x739   : > { %v14248_v44 = vpop.xlane.xlu1 %3323 }
 0x73a   : > { %4931 = vmatpush.bf16.msrb.mxu2 %v11318_v2 }
 0x73b   : > { %4882 = vmatpush.bf16.msrb.mxu0 %v11310_v26  ;;  %v3468_v26 = vsub.f32 %v13985_v49, %v3279_v16  ;;  %v11297_v49 = vld [vmem:[#allocation4 + $0x20] sm:$0xff] }
 0x73c   : > { %v14252_v27 = vpop.f32.mrf.mxu2 }
 0x73d   : > { %v11308_v24 = vld [vmem:[#allocation4 + $0x78] sm:$0xff]  ;;  %17728 = vst [vmem:[#allocation49_spill] sm:$0xff] %v14252_v27  ;;  %v3598_v56 = vmul.f32 1.442695, %v3468_v26 }
 0x73e   : > { %4932 = vmatpush.bf16.msrb.mxu2 %v11317_v42  ;;  %v11300_v22 = vld [vmem:[#allocation4 + $0x38] sm:$0xff]  ;;  %3311 = vmax.xlane.f32.xlu1 %v3310_v0  ;;  %v3469_v0 = vsub.f32 %v13992_v8, %v3279_v16 }
 0x73f   : > { %4883 = vmatpush.bf16.msrb.mxu0 %v11309_v51  ;;  %4602 = vmatpush.bf16.msrb.mxu1 %v11300_v22  ;;  %v11298_v22 = vld [vmem:[#allocation4 + $0x28] sm:$0xff] }
 0x740   : > { %4651 = vmatpush.bf16.msrb.mxu3 %v11308_v24  ;;  %v11306_v51 = vld [vmem:[#allocation4 + $0x68] sm:$0xff]  ;;  %v3600_v41 = vmul.f32 1.442695, %v3469_v0  ;;  %v11295_v0 = vld [vmem:[#allocation4 + $0x10] sm:$0xff] }
 0x741   : > { %v3282_v2 = vpop.xlane.xlu1 %3281 }
 0x742   : > { %v3470_v42 = vsub.f32 %v14001_v33, %v3282_v2  ;;  %v3471_v45 = vsub.f32 %v14013_v58, %v3282_v2  ;;  %v14262_v33 = vpop.f32.mrf.mxu1  ;;  %v14264_v58 = vpop.f32.mrf.mxu3  ;;  %v11304_v2 = vld [vmem:[#allocation4 + $0x58] sm:$0xff] }
 0x743   : > { %4603 = vmatpush.bf16.msrb.mxu1 %v11299_v40  ;;  %17730 = vst [vmem:[#allocation51_spill] sm:$0xff] %v14262_v33 }
 0x744   : > { %4652 = vmatpush.bf16.msrb.mxu3 %v11307_v17  ;;  %v3602_v24 = vmul.f32 1.442695, %v3470_v42  ;;  %v3604_v50 = vmul.f32 1.442695, %v3471_v45  ;;  %17731 = vst [vmem:[#allocation52_spill] sm:$0xff] %v14264_v58  ;;  %v14266_v8 = vpop.f32.mrf.mxu2  ;;  %v3319_v45 = vmax.f32 %v14262_v33, %v14264_v58  ;;  %v11296_v17 = vld [vmem:[#allocation4 + $0x18] sm:$0xff] }
 0x745   : > { %17732 = vst [vmem:[#allocation53_spill] sm:$0xff] %v14266_v8 }
 0x746   : > { %12221 = vpow2.f32 %v3602_v24  ;;  %3362 = vmax.xlane.f32.xlu1 %v3361_v6  ;;  %v14272_v6 = vpop.f32.mrf.mxu0 }
 0x747   : > { %12223 = vpow2.f32 %v3604_v50  ;;  %4604 = vmatpush.bf16.msrb.mxu1 %v11298_v22  ;;  %17733 = vst [vmem:[#allocation54_spill] sm:$0xff] %v14272_v6  ;;  %v3498_v22 = vsub.f32 %v13997_v29, %v14248_v44 }
 0x748   : > { %4653 = vmatpush.bf16.msrb.mxu3 %v11306_v51  ;;  %12225 = vpow2.f32 %v3598_v56  ;;  %v3499_v51 = vsub.f32 %v14007_v38, %v14248_v44  ;;  %v11293_v44 = vld [vmem:[#allocation4] sm:$0xff] }
 0x749   : > { %v14268_v16 = vpop.xlane.xlu1 %3284  ;;  %12227 = vpow2.f32 %v3600_v41 }
 0x74a   : > { %v3660_v29 = vmul.f32 1.442695, %v3499_v51 }
 0x74b   : > { %4605 = vmatpush.bf16.msrb.mxu1 %v11297_v49 }
 0x74c   : > { %4654 = vmatpush.bf16.msrb.mxu3 %v11305_v18  ;;  %v14274_v50 = vpop.eup %12221  ;;  %v11303_v18 = vld [vmem:[#allocation4 + $0x50] sm:$0xff]  ;;  %v14288_v24 = vpop.f32.mrf.mxu2 }
 0x74d   : > { %v14276_v40 = vpop.eup %12223  ;;  %17734 = vst [vmem:[#allocation55_spill] sm:$0xff] %v14288_v24 }
 0x74e   : > { %3320 = vmax.xlane.f32.xlu1 %v3319_v45  ;;  %v3856_v26 = vadd.f32 %v14276_v40, %v14274_v50  ;;  %v14280_v42 = vpop.eup %12225  ;;  %v14292_v45 = vpop.f32.mrf.mxu0 }
 0x74f   : > { %4606 = vmatpush.bf16.msrb.mxu1 %v11296_v17  ;;  %v14282_v41 = vpop.eup %12227  ;;  %17735 = vst [vmem:[#allocation56_spill] sm:$0xff] %v14292_v45  ;;  %v11294_v17 = vld [vmem:[#allocation4 + $0x8] sm:$0xff]  ;;  %v3421_v58 = vmax.f32 %v14292_v45, %v14288_v24 }
 0x750   : > { %4655 = vmatpush.bf16.msrb.mxu3 %v11304_v2  ;;  %3857 = vadd.xlane.f32.xlu2 %v3856_v26  ;;  %v3853_v49 = vadd.f32 %v14282_v41, %v14280_v42  ;;  %v11302_v2 = vld [vmem:[#allocation4 + $0x48] sm:$0xff]  ;;  %v3658_v26 = vmul.f32 1.442695, %v3498_v22  ;;  %v3418_v22 = vmax.f32 %v14272_v6, %v14266_v8  ;;  %v17752_v8 = vld [vmem:[#allocation37_spill] sm:$0xff] }
 0x751   : > { %v3330_v56 = vpop.xlane.xlu1 %3329  ;;  %v17753_v6 = vld [vmem:[#allocation38_spill] sm:$0xff] }
 0x752   : > { %v3327_v33 = vpop.xlane.xlu0 %3326  ;;  %12229 = vpow2.f32 %v3658_v26  ;;  %v3502_v26 = vsub.f32 %v14030_v63, %v3330_v56 }
 0x753   : > { %4607 = vmatpush.bf16.msrb.mxu1 %v11295_v0  ;;  %v11301_v0 = vld [vmem:[#allocation4 + $0x40] sm:$0xff]  ;;  %12231 = vpow2.f32 %v3660_v29  ;;  %v3501_v34 = vsub.f32 %v14022_v28, %v3327_v33 }
 0x754   : > { %4656 = vmatpush.bf16.msrb.mxu3 %v11303_v18  ;;  %v3500_v18 = vsub.f32 %v14015_v3, %v3327_v33  ;;  %v3503_v33 = vsub.f32 %v14040_v32, %v3330_v56 }
 0x755   : > { %v3664_v51 = vmul.f32 1.442695, %v3501_v34 }
 0x756   : > { %3854 = vadd.xlane.f32.xlu1 %v3853_v49  ;;  %v3662_v49 = vmul.f32 1.442695, %v3500_v18  ;;  %v3668_v18 = vmul.f32 1.442695, %v3503_v33 }
 0x757   : > { %4608 = vmatpush.bf16.msrb.mxu1 %v11294_v17 }
 0x758   : > { %4657 = vmatpush.bf16.msrb.mxu3 %v11302_v2  ;;  %3422 = vmax.xlane.f32.xlu2 %v3421_v58  ;;  %v14300_v17 = vpop.eup %12229  ;;  %12233 = vpow2.f32 %v3662_v49 }
 0x759   : > { %v3288_v38 = vpop.xlane.xlu1 %3287  ;;  %v14302_v58 = vpop.eup %12231  ;;  %12235 = vpow2.f32 %v3664_v51 }
 0x75a   : > { %v3898_v34 = vadd.f32 %v14302_v58, %v14300_v17  ;;  %v3475_v49 = vsub.f32 %v14046_v7, %v3288_v38 }
 0x75b   : > { %4609 = vmatpush.bf16.msrb.mxu1 %v11293_v44 }
 0x75c   : > { %4658 = vmatpush.bf16.msrb.mxu3 %v11301_v0  ;;  %v3666_v0 = vmul.f32 1.442695, %v3502_v26 }
 0x75e   : > { %3419 = vmax.xlane.f32.xlu1 %v3418_v22  ;;  %v14310_v22 = vpop.eup %12233 }
 0x75f   : > { %v14312_v63 = vpop.eup %12235 }
 0x761   : > { %v3333_v2 = vpop.xlane.xlu1 %3332 }
 0x762   : > { %v3504_v3 = vsub.f32 %v14048_v25, %v3333_v2  ;;  %v3505_v28 = vsub.f32 %v14056_v46, %v3333_v2  ;;  %v3474_v46 = vsub.f32 %v14034_v39, %v3288_v38 }
 0x764   : > { %v3670_v29 = vmul.f32 1.442695, %v3504_v3  ;;  %v3672_v44 = vmul.f32 1.442695, %v3505_v28  ;;  %v3901_v3 = vadd.f32 %v14312_v63, %v14310_v22  ;;  %v3610_v33 = vmul.f32 1.442695, %v3474_v46 }
 0x766   : > { %12237 = vpow2.f32 %v3670_v29  ;;  %3899 = vadd.xlane.f32.xlu1 %v3898_v34 }
 0x767   : > { %12239 = vpow2.f32 %v3672_v44 }
 0x768   : > { %12241 = vpow2.f32 %v3666_v0 }
 0x769   : > { %v3291_v25 = vpop.xlane.xlu1 %3290  ;;  %12243 = vpow2.f32 %v3668_v18 }
 0x76a   : > { %v3476_v32 = vsub.f32 %v14052_v47, %v3291_v25  ;;  %v3477_v56 = vsub.f32 %v14062_v30, %v3291_v25  ;;  %v3612_v47 = vmul.f32 1.442695, %v3475_v49 }
 0x76c   : > { %v14318_v51 = vpop.eup %12237  ;;  %v3614_v2 = vmul.f32 1.442695, %v3476_v32  ;;  %v3616_v26 = vmul.f32 1.442695, %v3477_v56 }
 0x76d   : > { %v14322_v28 = vpop.eup %12239 }
 0x76e   : > { %12245 = vpow2.f32 %v3614_v2  ;;  %3902 = vadd.xlane.f32.xlu1 %v3901_v3  ;;  %v3907_v39 = vadd.f32 %v14322_v28, %v14318_v51  ;;  %v14326_v30 = vpop.eup %12241 }
 0x76f   : > { %12247 = vpow2.f32 %v3616_v26  ;;  %v14328_v7 = vpop.eup %12243 }
 0x770   : > { %3908 = vadd.xlane.f32.xlu2 %v3907_v39  ;;  %12249 = vpow2.f32 %v3610_v33  ;;  %v3904_v44 = vadd.f32 %v14328_v7, %v14326_v30 }
 0x771   : > { %v3336_v38 = vpop.xlane.xlu1 %3335  ;;  %12251 = vpow2.f32 %v3612_v47 }
 0x774   : > { %v14330_v29 = vpop.eup %12245 }
 0x775   : > { %v14334_v34 = vpop.eup %12247 }
 0x776   : > { %3905 = vadd.xlane.f32.xlu1 %v3904_v44  ;;  %v3865_v0 = vadd.f32 %v14334_v34, %v14330_v29  ;;  %v14338_v18 = vpop.eup %12249  ;;  %v3472_v44 = vsub.f32 %v14019_v23, %v14268_v16 }
 0x777   : > { %v14340_v25 = vpop.eup %12251 }
 0x778   : > { %3866 = vadd.xlane.f32.xlu2 %v3865_v0  ;;  %v3862_v2 = vadd.f32 %v14340_v25, %v14338_v18 }
 0x779   : > { %v14342_v46 = vpop.xlane.xlu1 %3293 }
 0x77c   : > { %v3276_v32 = vpop.xlane.xlu2 %3275 }
 0x77d   : > { %v3466_v56 = vsub.f32 %v13971_v20, %v3276_v32  ;;  %v3467_v49 = vsub.f32 %v13979_v10, %v3276_v32  ;;  %v3473_v10 = vsub.f32 %v14027_v48, %v14268_v16  ;;  %v3506_v48 = vsub.f32 %v14064_v13, %v3336_v38 }
 0x77e   : > { %3863 = vadd.xlane.f32.xlu1 %v3862_v2 }
 0x77f   : > { %v3594_v26 = vmul.f32 1.442695, %v3466_v56  ;;  %v3596_v3 = vmul.f32 1.442695, %v3467_v49  ;;  %v3606_v49 = vmul.f32 1.442695, %v3472_v44 }
 0x780   : > { %v3608_v2 = vmul.f32 1.442695, %v3473_v10 }
 0x781   : > { %12253 = vpow2.f32 %v3594_v26  ;;  %v3339_v33 = vpop.xlane.xlu1 %3338 }
 0x782   : > { %12255 = vpow2.f32 %v3596_v3  ;;  %v3508_v39 = vsub.f32 %v14082_v43, %v3339_v33  ;;  %v3509_v47 = vsub.f32 %v14088_v14, %v3339_v33 }
 0x784   : > { %v3678_v0 = vmul.f32 1.442695, %v3508_v39  ;;  %v3680_v20 = vmul.f32 1.442695, %v3509_v47  ;;  %v3507_v47 = vsub.f32 %v14074_v4, %v3336_v38  ;;  %v3348_v13 = vpop.xlane.xlu2 %3347 }
 0x786   : > { %12257 = vpow2.f32 %v3678_v0  ;;  %v3674_v0 = vmul.f32 1.442695, %v3506_v48 }
 0x787   : > { %v14354_v32 = vpop.eup %12253  ;;  %12259 = vpow2.f32 %v3680_v20  ;;  %v3676_v20 = vmul.f32 1.442695, %v3507_v47 }
 0x788   : > { %v14356_v56 = vpop.eup %12255  ;;  %12261 = vpow2.f32 %v3606_v49 }
 0x789   : > { %v3850_v43 = vadd.f32 %v14356_v56, %v14354_v32  ;;  %v3297_v14 = vpop.xlane.xlu1 %3296  ;;  %12263 = vpow2.f32 %v3608_v2 }
 0x78a   : > { %v3480_v26 = vsub.f32 %v14086_v5, %v3297_v14  ;;  %v3481_v23 = vsub.f32 %v14094_v60, %v3297_v14  ;;  %v3300_v5 = vpop.xlane.xlu0 %3299  ;;  %v3367_v60 = vmax.f32 %v14254_v12, %v14252_v27 }
 0x78b   : > { %3851 = vadd.xlane.f32.xlu0 %v3850_v43  ;;  %v3482_v43 = vsub.f32 %v14100_v57, %v3300_v5  ;;  %v3483_v14 = vsub.f32 %v14112_v11, %v3300_v5  ;;  %v3515_v57 = vsub.f32 %v14140_v59, %v3348_v13 }
 0x78c   : > { %v14362_v3 = vpop.eup %12257  ;;  %v3622_v16 = vmul.f32 1.442695, %v3480_v26  ;;  %v3624_v33 = vmul.f32 1.442695, %v3481_v23  ;;  %v3514_v23 = vsub.f32 %v14130_v9, %v3348_v13  ;;  %v14398_v13 = vpop.f32.mrf.mxu3 }
 0x78d   : > { %v14365_v39 = vpop.eup %12259  ;;  %v3628_v47 = vmul.f32 1.442695, %v3483_v14  ;;  %17736 = vst [vmem:[#allocation57_spill] sm:$0xff] %v14398_v13 }
 0x78e   : > { %12265 = vpow2.f32 %v3622_v16  ;;  %v3913_v44 = vadd.f32 %v14365_v39, %v14362_v3  ;;  %v14372_v49 = vpop.eup %12261  ;;  %v3690_v9 = vmul.f32 1.442695, %v3514_v23 }
 0x78f   : > { %12267 = vpow2.f32 %v3624_v33  ;;  %v14377_v2 = vpop.eup %12263 }
 0x790   : > { %3914 = vadd.xlane.f32.xlu1 %v3913_v44  ;;  %12269 = vpow2.f32 %v3674_v0  ;;  %v3479_v44 = vsub.f32 %v14080_v37, %v14342_v46  ;;  %v3859_v5 = vadd.f32 %v14377_v2, %v14372_v49 }
 0x791   : > { %v3342_v10 = vpop.xlane.xlu1 %3341  ;;  %12271 = vpow2.f32 %v3676_v20 }
 0x792   : > { %v3510_v4 = vsub.f32 %v14096_v36, %v3342_v10  ;;  %v3511_v38 = vsub.f32 %v14106_v31, %v3342_v10  ;;  %v3626_v36 = vmul.f32 1.442695, %v3482_v43  ;;  %v3478_v31 = vsub.f32 %v14068_v55, %v14342_v46  ;;  %v14404_v43 = vpop.f32.mrf.mxu1  ;;  %v3351_v23 = vpop.xlane.xlu0 %3350 }
 0x793   : > { %3368 = vmax.xlane.f32.xlu0 %v3367_v60  ;;  %v3692_v60 = vmul.f32 1.442695, %v3515_v57  ;;  %v3620_v10 = vmul.f32 1.442695, %v3479_v44  ;;  %17737 = vst [vmem:[#allocation58_spill] sm:$0xff] %v14404_v43 }
 0x794   : > { %v14380_v26 = vpop.eup %12265  ;;  %v3682_v48 = vmul.f32 1.442695, %v3510_v4  ;;  %v3684_v16 = vmul.f32 1.442695, %v3511_v38  ;;  %v3618_v55 = vmul.f32 1.442695, %v3478_v31  ;;  %v3370_v4 = vmax.f32 %v14404_v43, %v14398_v13 }
 0x795   : > { %v14383_v33 = vpop.eup %12267 }
 0x796   : > { %12273 = vpow2.f32 %v3682_v48  ;;  %v3871_v11 = vadd.f32 %v14383_v33, %v14380_v26  ;;  %v14394_v0 = vpop.eup %12269 }
 0x797   : > { %12275 = vpow2.f32 %v3684_v16  ;;  %v14396_v20 = vpop.eup %12271 }
 0x798   : > { %3872 = vadd.xlane.f32.xlu1 %v3871_v11  ;;  %12277 = vpow2.f32 %v3626_v36  ;;  %v3910_v57 = vadd.f32 %v14396_v20, %v14394_v0 }
 0x799   : > { %v3345_v59 = vpop.xlane.xlu1 %3344  ;;  %12279 = vpow2.f32 %v3628_v47 }
 0x79a   : > { %12281 = vpow2.f32 %v3690_v9  ;;  %v3512_v38 = vsub.f32 %v14114_v52, %v3345_v59  ;;  %v3513_v48 = vsub.f32 %v14122_v35, %v3345_v59  ;;  %v3516_v52 = vsub.f32 %v14150_v54, %v3351_v23 }
 0x79b   : > { %3860 = vadd.xlane.f32.xlu0 %v3859_v5  ;;  %12283 = vpow2.f32 %v3692_v60  ;;  %v3517_v35 = vsub.f32 %v14158_v21, %v3351_v23 }
 0x79c   : > { %v14400_v37 = vpop.eup %12273  ;;  %12285 = vpow2.f32 %v3618_v55  ;;  %v3686_v47 = vmul.f32 1.442695, %v3512_v38  ;;  %v3688_v9 = vmul.f32 1.442695, %v3513_v48 }
 0x79d   : > { %v14402_v46 = vpop.eup %12275  ;;  %12287 = vpow2.f32 %v3620_v10  ;;  %v3694_v10 = vmul.f32 1.442695, %v3516_v52  ;;  %v3696_v38 = vmul.f32 1.442695, %v3517_v35 }
 0x79e   : > { %v3916_v14 = vadd.f32 %v14402_v46, %v14400_v37  ;;  %v14412_v16 = vpop.eup %12277  ;;  %12289 = vpow2.f32 %v3686_v47 }
 0x79f   : > { %v14416_v36 = vpop.eup %12279  ;;  %12291 = vpow2.f32 %v3688_v9 }
 0x7a0   : > { %3917 = vadd.xlane.f32.xlu2 %v3916_v14  ;;  %3371 = vmax.xlane.f32.xlu1 %v3370_v4  ;;  %v14418_v11 = vpop.eup %12281  ;;  %v3874_v54 = vadd.f32 %v14416_v36, %v14412_v16  ;;  %v3306_v14 = vpop.xlane.xlu2 %3305  ;;  %12293 = vpow2.f32 %v3694_v10 }
 0x7a1   : > { %v3303_v31 = vpop.xlane.xlu1 %3302  ;;  %v14421_v44 = vpop.eup %12283  ;;  %12295 = vpow2.f32 %v3696_v38  ;;  %v3486_v47 = vsub.f32 %v14134_v61, %v3306_v14  ;;  %v3487_v10 = vsub.f32 %v14148_v1, %v3306_v14 }
 0x7a2   : > { %v14424_v5 = vpop.eup %12285  ;;  %v3484_v60 = vsub.f32 %v14120_v15, %v3303_v31  ;;  %v3485_v55 = vsub.f32 %v14128_v62, %v3303_v31  ;;  %v3922_v4 = vadd.f32 %v14421_v44, %v14418_v11  ;;  %v14438_v31 = vpop.f32.mrf.mxu3 }
 0x7a3   : > { %3911 = vadd.xlane.f32.xlu0 %v3910_v57  ;;  %v14427_v59 = vpop.eup %12287  ;;  %17738 = vst [vmem:[#allocation59_spill] sm:$0xff] %v14438_v31  ;;  %v3309_v38 = vpop.xlane.xlu0 %3308 }
 0x7a4   : > { %v3630_v21 = vmul.f32 1.442695, %v3484_v60  ;;  %v3868_v15 = vadd.f32 %v14427_v59, %v14424_v5  ;;  %v3632_v23 = vmul.f32 1.442695, %v3485_v55  ;;  %v14440_v52 = vpop.eup %12289  ;;  %v14445_v55 = vpop.f32.mrf.mxu1 }
 0x7a5   : > { %v14443_v60 = vpop.eup %12291  ;;  %17739 = vst [vmem:[#allocation60_spill] sm:$0xff] %v14445_v55 }
 0x7a6   : > { %12297 = vpow2.f32 %v3630_v21  ;;  %v3919_v61 = vadd.f32 %v14443_v60, %v14440_v52  ;;  %v3636_v21 = vmul.f32 1.442695, %v3487_v10 }
 0x7a7   : > { %12299 = vpow2.f32 %v3632_v23 }
 0x7a8   : > { %3875 = vadd.xlane.f32.xlu2 %v3874_v54  ;;  %3923 = vadd.xlane.f32.xlu1 %v3922_v4  ;;  %v3634_v54 = vmul.f32 1.442695, %v3486_v47  ;;  %v17743_v47 = vld [vmem:[#allocation34_spill] sm:$0xff] }
 0x7a9   : > { %v3354_v48 = vpop.xlane.xlu1 %3353 }
 0x7aa   : > { %v3518_v62 = vsub.f32 %v14168_v19, %v3354_v48  ;;  %v3519_v57 = vsub.f32 %v14182_v53, %v3354_v48  ;;  %v3373_v53 = vmax.f32 %v14445_v55, %v14438_v31  ;;  %v14450_v19 = vpop.eup %12293  ;;  %v17741_v48 = vld [vmem:[#allocation33_spill] sm:$0xff] }
 0x7ab   : > { %3869 = vadd.xlane.f32.xlu0 %v3868_v15  ;;  %v14454_v4 = vpop.eup %12295 }
 0x7ac   : > { %v3698_v35 = vmul.f32 1.442695, %v3518_v62  ;;  %v3700_v9 = vmul.f32 1.442695, %v3519_v57  ;;  %v14458_v1 = vpop.eup %12297  ;;  %v3488_v62 = vsub.f32 %v17741_v48, %v3309_v38  ;;  %v3925_v10 = vadd.f32 %v14454_v4, %v14450_v19 }
 0x7ad   : > { %v14460_v14 = vpop.eup %12299 }
 0x7ae   : > { %12301 = vpow2.f32 %v3698_v35  ;;  %v3489_v35 = vsub.f32 %v17743_v47, %v3309_v38 }
 0x7af   : > { %12303 = vpow2.f32 %v3700_v9 }
 0x7b0   : > { %3374 = vmax.xlane.f32.xlu2 %v3373_v53  ;;  %12305 = vpow2.f32 %v3634_v54  ;;  %v3638_v53 = vmul.f32 1.442695, %v3488_v62  ;;  %v3640_v24 = vmul.f32 1.442695, %v3489_v35 }
 0x7b1   : > { %v14456_v15 = vpop.xlane.xlu1 %3311  ;;  %12307 = vpow2.f32 %v3636_v21  ;;  %v3357_v21 = vpop.xlane.xlu2 %3356 }
 0x7b2   : > { %12309 = vpow2.f32 %v3638_v53  ;;  %v14496_v53 = vpop.f32.mrf.mxu0  ;;  %v3521_v31 = vsub.f32 %v17753_v6, %v3357_v21 }
 0x7b3   : > { %3920 = vadd.xlane.f32.xlu0 %v3919_v61  ;;  %v3877_v61 = vadd.f32 %v14460_v14, %v14458_v1  ;;  %12311 = vpow2.f32 %v3640_v24  ;;  %17751 = vst [vmem:[#allocation68_spill] sm:$0xff] %v14496_v53 }
 0x7b4   : > { %v14462_v23 = vpop.eup %12301  ;;  %v3704_v13 = vmul.f32 1.442695, %v3521_v31 }
 0x7b5   : > { %17740 = vst [vmem:[#allocation61_spill] sm:$0xff] %v14462_v23  ;;  %v14465_v57 = vpop.eup %12303 }
 0x7b6   : > { %17742 = vst [vmem:[#allocation33_spill] sm:$0xff] %v14465_v57  ;;  %v3928_v9 = vadd.f32 %v14465_v57, %v14462_v23  ;;  %v14476_v54 = vpop.eup %12305  ;;  %v17768_v23 = vld [vmem:[#allocation23_spill] sm:$0xff] }
 0x7b7   : > { %17745 = vst [vmem:[#allocation62_spill] sm:$0xff] %v14476_v54  ;;  %v14478_v38 = vpop.eup %12307 }
 0x7b8   : > { %3929 = vadd.xlane.f32.xlu1 %v3928_v9  ;;  %3926 = vadd.xlane.f32.xlu2 %v3925_v10  ;;  %17746 = vst [vmem:[#allocation63_spill] sm:$0xff] %v14478_v38  ;;  %v3880_v47 = vadd.f32 %v14478_v38, %v14476_v54  ;;  %v14484_v9 = vpop.eup %12309  ;;  %v17769_v38 = vld [vmem:[#allocation28_spill] sm:$0xff] }
 0x7b9   : > { %v14474_v48 = vpop.xlane.xlu1 %3362  ;;  %v14486_v10 = vpop.eup %12311 }
 0x7ba   : > { %17744 = vst [vmem:[#allocation34_spill] sm:$0xff] %v14474_v48  ;;  %v3883_v35 = vadd.f32 %v14486_v10, %v14484_v9  ;;  %v14490_v45 = vpop.xlane.xlu2 %3314  ;;  %v14508_v43 = vpop.f32.mrf.mxu0 }
 0x7bb   : > { %3878 = vadd.xlane.f32.xlu0 %v3877_v61  ;;  %17748 = vst [vmem:[#allocation65_spill] sm:$0xff] %v14486_v10  ;;  %v14492_v61 = vpop.f32.mrf.mxu2 }
 0x7bc   : > { %17749 = vst [vmem:[#allocation66_spill] sm:$0xff] %v14490_v45  ;;  %v3424_v55 = vmax.f32 %v14496_v53, %v14492_v61 }
 0x7bd   : > { %17750 = vst [vmem:[#allocation67_spill] sm:$0xff] %v14492_v61 }
 0x7be   : > { %17757 = vst [vmem:[#allocation70_spill] sm:$0xff] %v14508_v43 }
 0x7c0   : > { %3881 = vadd.xlane.f32.xlu2 %v3880_v47  ;;  %v3520_v47 = vsub.f32 %v17752_v8, %v3357_v21 }
 0x7c1   : > { %v14482_v62 = vpop.xlane.xlu1 %3320 }
 0x7c2   : > { %17747 = vst [vmem:[#allocation64_spill] sm:$0xff] %v14482_v62  ;;  %v14502_v27 = vpop.xlane.xlu2 %3365  ;;  %v3702_v12 = vmul.f32 1.442695, %v3520_v47  ;;  %v17764_v62 = vld [vmem:[#allocation32_spill] sm:$0xff] }
 0x7c3   : > { %17754 = vst [vmem:[#allocation37_spill] sm:$0xff] %v14502_v27 }
 0x7c4   : > { %12313 = vpow2.f32 %v3702_v12  ;;  %v17760_v12 = vld [vmem:[#allocation35_spill] sm:$0xff] }
 0x7c5   : > { %12315 = vpow2.f32 %v3704_v13  ;;  %v3490_v13 = vsub.f32 %v17760_v12, %v14456_v15 }
 0x7c7   : > { %v3642_v57 = vmul.f32 1.442695, %v3490_v13 }
 0x7c8   : > { %3884 = vadd.xlane.f32.xlu2 %v3883_v35  ;;  %v14506_v35 = vpop.f32.mrf.mxu2 }
 0x7c9   : > { %v14494_v24 = vpop.xlane.xlu1 %3854  ;;  %17756 = vst [vmem:[#allocation69_spill] sm:$0xff] %v14506_v35  ;;  %v3427_v8 = vmax.f32 %v14508_v43, %v14506_v35 }
 0x7ca   : > { %v14512_v6 = vpop.xlane.xlu2 %3857  ;;  %v14514_v61 = vpop.eup %12313 }
 0x7cb   : > { %17758 = vst [vmem:[#allocation71_spill] sm:$0xff] %v14514_v61  ;;  %v14516_v47 = vpop.eup %12315 }
 0x7cc   : > { %17759 = vst [vmem:[#allocation72_spill] sm:$0xff] %v14516_v47  ;;  %v3931_v31 = vadd.f32 %v14516_v47, %v14514_v61  ;;  %v17766_v47 = vld [vmem:[#allocation21_spill] sm:$0xff] }
 0x7cd   : > { %v17767_v61 = vld [vmem:[#allocation17_spill] sm:$0xff] }
 0x7d0   : > { %3425 = vmax.xlane.f32.xlu2 %v3424_v55  ;;  %v14520_v55 = vpop.f32.mrf.mxu3 }
 0x7d1   : > { %v14504_v45 = vpop.xlane.xlu1 %3419 }
 0x7d2   : > { %17755 = vst [vmem:[#allocation38_spill] sm:$0xff] %v14504_v45  ;;  %v14524_v53 = vpop.xlane.xlu2 %3422  ;;  %v17762_v45 = vld [vmem:[#allocation36_spill] sm:$0xff] }
 0x7d3   : > { %17761 = vst [vmem:[#allocation35_spill] sm:$0xff] %v14524_v53  ;;  %v3491_v27 = vsub.f32 %v17762_v45, %v14456_v15 }
 0x7d5   : > { %v3644_v10 = vmul.f32 1.442695, %v3491_v27 }
 0x7d8   : > { %3428 = vmax.xlane.f32.xlu2 %v3427_v8  ;;  %v14526_v8 = vpop.f32.mrf.mxu1 }
 0x7d9   : > { %v3900_v21 = vpop.xlane.xlu1 %3899  ;;  %v3376_v54 = vmax.f32 %v14526_v8, %v14520_v55 }
 0x7da   : > { %12317 = vrcp.f32 %v3900_v21  ;;  %v17763_v21 = vld [vmem:[#allocation31_spill] sm:$0xff] }
 0x7db   : > { %v17765_v48 = vpack.i.bf16 %v17763_v21, %v17764_v62 }
 0x7e0   : > { %3932 = vadd.xlane.f32.xlu2 %v3931_v31  ;;  %v12318_v43 = vpop.eup %12317  ;;  %v1464_v31 = vadd.f32 %v17767_v61, %v17766_v47  ;;  %v14547_v27 = vpop.f32.mrf.mxu1 }
 0x7e1   : > { %v3903_v35 = vpop.xlane.xlu1 %3902  ;;  %v4138_v12 = vmul.f32 %v12318_v43, %v14300_v17  ;;  %v4139_v53 = vmul.f32 %v12318_v43, %v14302_v58  ;;  %v14543_v58 = vpop.f32.mrf.mxu3 }
 0x7e2   : > { %12319 = vrcp.f32 %v3903_v35  ;;  %v1459_v35 = vadd.f32 %v17769_v38, %v17768_v23  ;;  %v14545_v43 = vpop.xlane.xlu0 %3359 }
 0x7e3   : > { %12321 = vpow2.f32 %v3642_v57  ;;  %v3909_v13 = vpop.xlane.xlu2 %3908 }
 0x7e4   : > { %11954 = vxpose.xlu0.b32.start [1/2] (short) %v17765_v48, 128  ;;  %v11955_v15 = vpack.i.bf16 %v1459_v35, %v1464_v31  ;;  %v4250_v48 = vpack.c.bf16 %v4139_v53, %v4138_v12 }
 0x7e6   : > { %v4717_v57 = vunpack.c.h.b16 %v4250_v48 }
 0x7e8   : > { %v12320_v45 = vpop.eup %12319  ;;  %3377 = vmax.xlane.f32.xlu2 %v3376_v54  ;;  %v4716_v54 = vunpack.c.l.b16 %v4250_v48 }
 0x7e9   : > { %v4140_v62 = vmul.f32 %v12320_v45, %v14310_v22  ;;  %v4141_v61 = vmul.f32 %v12320_v45, %v14312_v63  ;;  %v3906_v17 = vpop.xlane.xlu1 %3905  ;;  %v3379_v22 = vmax.f32 %v14547_v27, %v14543_v58  ;;  %v14551_v63 = vpop.eup %12321 }
 0x7ea   : > { %12323 = vrcp.f32 %v3906_v17  ;;  %17770 = vst [vmem:[#allocation36_spill] sm:$0xff] %v14551_v63  ;;  %v17775_v17 = vld [vmem:[#allocation20_spill] sm:$0xff] }
 0x7eb   : > { %12325 = vpow2.f32 %v3644_v10  ;;  %v4251_v38 = vpack.c.bf16 %v4141_v61, %v4140_v62  ;;  %v17773_v62 = vld [vmem:[#allocation30_spill] sm:$0xff] }
 0x7ec   : > { %11956 = vxpose.xlu0.b32.end [2/2] (short) %v11955_v15, 128  ;;  %12327 = vrcp.f32 %v3909_v13  ;;  %v17772_v15 = vld [vmem:[#allocation29_spill] sm:$0xff] }
 0x7ed   : > { %v4718_v53 = vunpack.c.l.b16 %v4251_v38  ;;  %v4719_v21 = vunpack.c.h.b16 %v4251_v38  ;;  %v17774_v61 = vpack.i.bf16 %v17772_v15, %v17773_v62  ;;  %v1435_v38 = vadd.f32 %v17775_v17, %v17766_v47  ;;  %v14573_v47 = vpop.f32.mrf.mxu0 }
 0x7ee   : > { %12329 = vrcp.f32 %v14494_v24 }
 0x7ef   : > { %v4748_v31 = vpack.c.b16 %v4718_v53, %v4716_v54  ;;  %v4749_v12 = vpack.c.b16 %v4719_v21, %v4717_v57  ;;  %v14562_v54 = vpop.xlane.xlu0 %3317  ;;  %v17776_v21 = vld [vmem:[#allocation27_spill] sm:$0xff] }
 0x7f0   : > { %v12324_v35 = vpop.eup %12323  ;;  %3380 = vmax.xlane.f32.xlu2 %v3379_v22  ;;  %v1430_v22 = vadd.f32 %v17776_v21, %v17768_v23 }
 0x7f1   : > { %v14553_v45 = vpop.eup %12325  ;;  %4884 = vmatmul.bf16.vlgmr.msrb.gmra.mxu0 %v4748_v31  ;;  %4933 = vmatmul.bf16.vlgmr.msrb.gmra.mxu2 %v4749_v12  ;;  %v4142_v48 = vmul.f32 %v12324_v35, %v14326_v30  ;;  %v4143_v13 = vmul.f32 %v12324_v35, %v14328_v7  ;;  %v14571_v30 = vpop.f32.mrf.mxu2 }
 0x7f2   : > { %17771 = vst [vmem:[#allocation31_spill] sm:$0xff] %v14553_v45  ;;  %v12328_v10 = vpop.eup %12327  ;;  %12038 = vxpose.xlu1.b32.start [1/2] (short) %v17774_v61, 128  ;;  %v3886_v31 = vadd.f32 %v14553_v45, %v14551_v63  ;;  %v12039_v15 = vpack.i.bf16 %v1430_v22, %v1435_v38  ;;  %v3430_v61 = vmax.f32 %v14573_v47, %v14571_v30  ;;  %v3864_v22 = vpop.xlane.xlu1 %3863 }
 0x7f3   : > { %v4144_v57 = vmul.f32 %v12328_v10, %v14318_v51  ;;  %v4145_v53 = vmul.f32 %v12328_v10, %v14322_v28  ;;  %v4252_v12 = vpack.c.bf16 %v4143_v13, %v4142_v48 }
 0x7f4   : > { %v12330_v23 = vpop.eup %12329 }
 0x7f5   : > { %v4253_v7 = vpack.c.bf16 %v4145_v53, %v4144_v57  ;;  %v4720_v51 = vunpack.c.l.b16 %v4252_v12  ;;  %v4721_v35 = vunpack.c.h.b16 %v4252_v12  ;;  %v4108_v24 = vmul.f32 %v12330_v23, %v14280_v42  ;;  %v14581_v53 = vpop.f32.mrf.mxu0 }
 0x7f6   : > { %v4109_v17 = vmul.f32 %v12330_v23, %v14282_v41 }
 0x7f7   : > { %v4722_v10 = vunpack.c.l.b16 %v4253_v7  ;;  %v4723_v62 = vunpack.c.h.b16 %v4253_v7  ;;  %v14590_v7 = vpop.f32.mrf.mxu3 }
 0x7f8   : > { %3887 = vadd.xlane.f32.xlu2 %v3886_v31  ;;  %v4235_v21 = vpack.c.bf16 %v4109_v17, %v4108_v24 }
 0x7f9   : > { %v4750_v48 = vpack.c.b16 %v4722_v10, %v4720_v51  ;;  %v4751_v13 = vpack.c.b16 %v4723_v62, %v4721_v35  ;;  %v14579_v38 = vpop.f32.mrf.mxu2  ;;  %v14592_v62 = vpop.f32.mrf.mxu1 }
 0x7fa   : > { %12040 = vxpose.xlu1.b32.end [2/2] (short) %v12039_v15, 128  ;;  %v3433_v42 = vmax.f32 %v14581_v53, %v14579_v38  ;;  %v4444_v51 = vunpack.c.l.b16 %v4235_v21  ;;  %v4445_v10 = vunpack.c.h.b16 %v4235_v21 }
 0x7fd   : > { %v14596_v24 = vpop.f32.mrf.mxu0 }
 0x7fe   : > { %v3852_v28 = vpop.xlane.xlu0 %3851 }
 0x7ff   : > { %12331 = vrcp.f32 %v3852_v28 }
 0x800   : > { %3431 = vmax.xlane.f32.xlu2 %v3430_v61  ;;  %12333 = vrcp.f32 %v14512_v6  ;;  %v3382_v6 = vmax.f32 %v14592_v62, %v14590_v7 }
 0x801   : > { %4889 = vmatmul.bf16.gmra.mxu0 %v4750_v48  ;;  %4938 = vmatmul.bf16.gmra.mxu2 %v4751_v13  ;;  %v14600_v21 = vpop.f32.mrf.mxu2 }
 0x802   : > { %17777 = vst [vmem:[#allocation32_spill] sm:$0xff] %v14600_v21 }
 0x803   : > { %v3915_v48 = vpop.xlane.xlu1 %3914 }
 0x805   : > { %v12332_v57 = vpop.eup %12331 }
 0x806   : > { %v4106_v31 = vmul.f32 %v12332_v57, %v14354_v32  ;;  %v4107_v12 = vmul.f32 %v12332_v57, %v14356_v56  ;;  %v14585_v15 = vpop.xlane.xlu0 %3368  ;;  %v3867_v32 = vpop.xlane.xlu2 %3866 }
 0x807   : > { %v12334_v61 = vpop.eup %12333 }
 0x808   : > { %v4234_v41 = vpack.c.bf16 %v4107_v12, %v4106_v31  ;;  %3434 = vmax.xlane.f32.xlu2 %v3433_v42  ;;  %v4110_v17 = vmul.f32 %v12334_v61, %v14274_v50  ;;  %v4111_v57 = vmul.f32 %v12334_v61, %v14276_v40  ;;  %v14602_v31 = vpop.f32.mrf.mxu3 }
 0x80a   : > { %v4442_v35 = vunpack.c.l.b16 %v4234_v41  ;;  %v4443_v28 = vunpack.c.h.b16 %v4234_v41  ;;  %v4236_v41 = vpack.c.bf16 %v4111_v57, %v4110_v17 }
 0x80c   : > { %v4474_v23 = vpack.c.b16 %v4444_v51, %v4442_v35  ;;  %v4475_v56 = vpack.c.b16 %v4445_v10, %v4443_v28  ;;  %v14604_v51 = vpop.f32.mrf.mxu1  ;;  %v4446_v61 = vunpack.c.l.b16 %v4236_v41 }
 0x80d   : > { %v3385_v40 = vmax.f32 %v14604_v51, %v14602_v31 }
 0x80e   : > { %v3861_v13 = vpop.xlane.xlu0 %3860  ;;  %4610 = vmatmul.bf16.vlgmr.msrb.gmra.mxu1 %v4474_v23  ;;  %4659 = vmatmul.bf16.vlgmr.msrb.gmra.mxu3 %v4475_v56  ;;  %v14610_v56 = vpop.f32.mrf.mxu0 }
 0x80f   : > { %12335 = vrcp.f32 %v3861_v13 }
 0x810   : > { %12337 = vrcp.f32 %v3915_v48  ;;  %3383 = vmax.xlane.f32.xlu2 %v3382_v6  ;;  %v4447_v48 = vunpack.c.h.b16 %v4236_v41 }
 0x811   : > { %12339 = vrcp.f32 %v3864_v22 }
 0x813   : > { %v3918_v12 = vpop.xlane.xlu2 %3917 }
 0x815   : > { %v12336_v42 = vpop.eup %12335 }
 0x816   : > { %v4112_v35 = vmul.f32 %v12336_v42, %v14372_v49  ;;  %v4113_v28 = vmul.f32 %v12336_v42, %v14377_v2  ;;  %v3912_v10 = vpop.xlane.xlu0 %3911  ;;  %v12338_v50 = vpop.eup %12337 }
 0x817   : > { %12341 = vrcp.f32 %v3912_v10  ;;  %v4148_v13 = vmul.f32 %v12338_v50, %v14362_v3  ;;  %v4149_v22 = vmul.f32 %v12338_v50, %v14365_v39  ;;  %v3873_v49 = vpop.xlane.xlu1 %3872  ;;  %v12340_v17 = vpop.eup %12339  ;;  %v3436_v39 = vmax.f32 %v14596_v24, %v14600_v21 }
 0x818   : > { %12343 = vrcp.f32 %v3867_v32  ;;  %v4237_v23 = vpack.c.bf16 %v4113_v28, %v4112_v35  ;;  %3386 = vmax.xlane.f32.xlu2 %v3385_v40  ;;  %v14616_v32 = vpop.f32.mrf.mxu2  ;;  %v4114_v50 = vmul.f32 %v12340_v17, %v14338_v18 }
 0x819   : > { %v4255_v3 = vpack.c.bf16 %v4149_v22, %v4148_v13  ;;  %12345 = vrcp.f32 %v3918_v12  ;;  %v14626_v13 = vpop.f32.mrf.mxu0  ;;  %v3439_v12 = vmax.f32 %v14610_v56, %v14616_v32 }
 0x81a   : > { %v4448_v6 = vunpack.c.l.b16 %v4237_v23  ;;  %v4449_v2 = vunpack.c.h.b16 %v4237_v23  ;;  %v4115_v23 = vmul.f32 %v12340_v17, %v14340_v25 }
 0x81b   : > { %v14614_v57 = vpop.xlane.xlu2 %3875 }
 0x81c   : > { %v4476_v42 = vpack.c.b16 %v4448_v6, %v4446_v61  ;;  %v4477_v45 = vpack.c.b16 %v4449_v2, %v4447_v48  ;;  %v4238_v25 = vpack.c.bf16 %v4115_v23, %v4114_v50 }
 0x81d   : > { %v12342_v10 = vpop.eup %12341 }
 0x81e   : > { %v12344_v35 = vpop.eup %12343  ;;  %v4146_v28 = vmul.f32 %v12342_v10, %v14394_v0  ;;  %v4147_v41 = vmul.f32 %v12342_v10, %v14396_v20  ;;  %v3870_v40 = vpop.xlane.xlu0 %3869  ;;  %4615 = vmatmul.bf16.gmra.mxu1 %v4476_v42  ;;  %4664 = vmatmul.bf16.gmra.mxu3 %v4477_v45  ;;  %v4726_v20 = vunpack.c.l.b16 %v4255_v3  ;;  %v4727_v42 = vunpack.c.h.b16 %v4255_v3 }
 0x81f   : > { %v4116_v48 = vmul.f32 %v12344_v35, %v14330_v29  ;;  %v4117_v6 = vmul.f32 %v12344_v35, %v14334_v34  ;;  %v14628_v22 = vpop.xlane.xlu1 %3371  ;;  %12347 = vrcp.f32 %v3870_v40  ;;  %v12346_v34 = vpop.eup %12345 }
 0x820   : > { %v4254_v61 = vpack.c.bf16 %v4147_v41, %v4146_v28  ;;  %3437 = vmax.xlane.f32.xlu2 %v3436_v39  ;;  %v14634_v35 = vpop.f32.mrf.mxu2  ;;  %v4450_v28 = vunpack.c.l.b16 %v4238_v25  ;;  %v14636_v41 = vpop.f32.mrf.mxu1  ;;  %v4451_v39 = vunpack.c.h.b16 %v4238_v25  ;;  %v4150_v40 = vmul.f32 %v12346_v34, %v14400_v37 }
 0x821   : > { %v4239_v29 = vpack.c.bf16 %v4117_v6, %v4116_v48  ;;  %v14638_v3 = vpop.f32.mrf.mxu3  ;;  %v4151_v50 = vmul.f32 %v12346_v34, %v14402_v46 }
 0x822   : > { %v4724_v0 = vunpack.c.l.b16 %v4254_v61  ;;  %v4725_v2 = vunpack.c.h.b16 %v4254_v61  ;;  %v3388_v37 = vmax.f32 %v14636_v41, %v14638_v3 }
 0x823   : > { %v14630_v45 = vpop.xlane.xlu2 %3374  ;;  %v4452_v23 = vunpack.c.l.b16 %v4239_v29  ;;  %v4453_v61 = vunpack.c.h.b16 %v4239_v29  ;;  %v4256_v25 = vpack.c.bf16 %v4151_v50, %v4150_v40 }
 0x824   : > { %v4752_v18 = vpack.c.b16 %v4726_v20, %v4724_v0  ;;  %v4753_v10 = vpack.c.b16 %v4727_v42, %v4725_v2  ;;  %v14642_v2 = vpop.f32.mrf.mxu0 }
 0x825   : > { %v12348_v48 = vpop.eup %12347  ;;  %v4478_v0 = vpack.c.b16 %v4452_v23, %v4450_v28  ;;  %17778 = vst [vmem:[#allocation21_spill] sm:$0xff] %v14642_v2  ;;  %v4729_v40 = vunpack.c.h.b16 %v4256_v25 }
 0x826   : > { %v3921_v17 = vpop.xlane.xlu0 %3920  ;;  %4894 = vmatmul.bf16.gmra.mxu0 %v4752_v18  ;;  %4943 = vmatmul.bf16.gmra.mxu2 %v4753_v10  ;;  %v4118_v46 = vmul.f32 %v12348_v48, %v14424_v5  ;;  %v4119_v29 = vmul.f32 %v12348_v48, %v14427_v59 }
 0x827   : > { %12349 = vrcp.f32 %v3921_v17  ;;  %v3924_v18 = vpop.xlane.xlu1 %3923 }
 0x828   : > { %12351 = vrcp.f32 %v3873_v49  ;;  %3440 = vmax.xlane.f32.xlu2 %v3439_v12  ;;  %v4479_v49 = vpack.c.b16 %v4453_v61, %v4451_v39  ;;  %v14650_v12 = vpop.f32.mrf.mxu2  ;;  %v14654_v23 = vpop.f32.mrf.mxu1 }
 0x829   : > { %17779 = vst [vmem:[#allocation17_spill] sm:$0xff] %v14650_v12  ;;  %v14656_v61 = vpop.f32.mrf.mxu3 }
 0x82b   : > { %v3927_v6 = vpop.xlane.xlu2 %3926 }
 0x82c   : > { %12353 = vrcp.f32 %v3927_v6 }
 0x82d   : > { %v12350_v20 = vpop.eup %12349  ;;  %12355 = vrcp.f32 %v3924_v18 }
 0x82e   : > { %v12352_v42 = vpop.eup %12351  ;;  %v4152_v10 = vmul.f32 %v12350_v20, %v14440_v52  ;;  %v4153_v17 = vmul.f32 %v12350_v20, %v14443_v60  ;;  %4620 = vmatmul.bf16.gmra.mxu1 %v4478_v0  ;;  %4669 = vmatmul.bf16.gmra.mxu3 %v4479_v49  ;;  %v4728_v60 = vunpack.c.l.b16 %v4256_v25  ;;  %v3879_v5 = vpop.xlane.xlu0 %3878  ;;  %v4240_v0 = vpack.c.bf16 %v4119_v29, %v4118_v46 }
 0x82f   : > { %v4120_v28 = vmul.f32 %v12352_v42, %v14380_v26  ;;  %v4121_v52 = vmul.f32 %v12352_v42, %v14383_v33  ;;  %v3391_v49 = vmax.f32 %v14654_v23, %v14656_v61  ;;  %v14660_v42 = vpop.f32.mrf.mxu0  ;;  %12357 = vrcp.f32 %v3879_v5 }
 0x830   : > { %v4257_v34 = vpack.c.bf16 %v4153_v17, %v4152_v10  ;;  %3389 = vmax.xlane.f32.xlu2 %v3388_v37  ;;  %v4454_v17 = vunpack.c.l.b16 %v4240_v0  ;;  %12359 = vrcp.f32 %v14614_v57  ;;  %v4455_v25 = vunpack.c.h.b16 %v4240_v0 }
 0x831   : > { %v4241_v26 = vpack.c.bf16 %v4121_v52, %v4120_v28  ;;  %v3442_v5 = vmax.f32 %v14626_v13, %v14634_v35 }
 0x832   : > { %v4730_v39 = vunpack.c.l.b16 %v4257_v34  ;;  %v4731_v50 = vunpack.c.h.b16 %v4257_v34  ;;  %v12354_v20 = vpop.eup %12353  ;;  %v14667_v34 = vpop.f32.mrf.mxu2 }
 0x833   : > { %v3882_v6 = vpop.xlane.xlu2 %3881  ;;  %v12356_v33 = vpop.eup %12355  ;;  %v4156_v18 = vmul.f32 %v12354_v20, %v14450_v19  ;;  %v4157_v10 = vmul.f32 %v12354_v20, %v14454_v4  ;;  %v4456_v29 = vunpack.c.l.b16 %v4241_v26  ;;  %v4457_v28 = vunpack.c.h.b16 %v4241_v26 }
 0x834   : > { %v4754_v59 = vpack.c.b16 %v4730_v39, %v4728_v60  ;;  %v4755_v48 = vpack.c.b16 %v4731_v50, %v4729_v40  ;;  %v4154_v37 = vmul.f32 %v12356_v33, %v14418_v11  ;;  %v4155_v46 = vmul.f32 %v12356_v33, %v14421_v44  ;;  %v14669_v19 = vpop.f32.mrf.mxu1 }
 0x835   : > { %v4480_v60 = vpack.c.b16 %v4456_v29, %v4454_v17  ;;  %v4259_v39 = vpack.c.bf16 %v4157_v10, %v4156_v18  ;;  %v12358_v40 = vpop.eup %12357  ;;  %17780 = vst [vmem:[#allocation23_spill] sm:$0xff] %v14669_v19  ;;  %v4481_v4 = vpack.c.b16 %v4457_v28, %v4455_v25  ;;  %v14679_v18 = vpop.f32.mrf.mxu3 }
 0x836   : > { %4899 = vmatmul.bf16.gmra.mxu0 %v4754_v59  ;;  %4948 = vmatmul.bf16.gmra.mxu2 %v4755_v48  ;;  %v4258_v50 = vpack.c.bf16 %v4155_v46, %v4154_v37  ;;  %v12360_v57 = vpop.eup %12359  ;;  %v4124_v11 = vmul.f32 %v12358_v40, %v14458_v1  ;;  %v4125_v44 = vmul.f32 %v12358_v40, %v14460_v14  ;;  %v3930_v40 = vpop.xlane.xlu1 %3929 }
 0x837   : > { %v4734_v59 = vunpack.c.l.b16 %v4259_v39  ;;  %v4735_v48 = vunpack.c.h.b16 %v4259_v39  ;;  %v14675_v0 = vpop.f32.mrf.mxu0  ;;  %v4122_v20 = vmul.f32 %v12360_v57, %v14412_v16  ;;  %v4123_v26 = vmul.f32 %v12360_v57, %v14416_v36  ;;  %17782 = vst [vmem:[#allocation29_spill] sm:$0xff] %v14679_v18 }
 0x838   : > { %3392 = vmax.xlane.f32.xlu2 %v3391_v49  ;;  %17781 = vst [vmem:[#allocation28_spill] sm:$0xff] %v14675_v0  ;;  %v4732_v33 = vunpack.c.l.b16 %v4258_v50  ;;  %v4733_v49 = vunpack.c.h.b16 %v4258_v50  ;;  %v4243_v1 = vpack.c.bf16 %v4125_v44, %v4124_v11  ;;  %v3445_v16 = vmax.f32 %v14642_v2, %v14650_v12 }
 0x839   : > { %v4242_v14 = vpack.c.bf16 %v4123_v26, %v4122_v20 }
 0x83a   : > { %v4756_v17 = vpack.c.b16 %v4734_v59, %v4732_v33  ;;  %v4757_v25 = vpack.c.b16 %v4735_v48, %v4733_v49  ;;  %v14683_v37 = vpop.f32.mrf.mxu2  ;;  %v4460_v36 = vunpack.c.l.b16 %v4243_v1  ;;  %v4461_v29 = vunpack.c.h.b16 %v4243_v1  ;;  %v17786_v48 = vld [vmem:[#allocation65_spill] sm:$0xff]  ;;  %v17787_v33 = vld [vmem:[#allocation62_spill] sm:$0xff] }
 0x83b   : > { %v3885_v52 = vpop.xlane.xlu2 %3884  ;;  %17783 = vst [vmem:[#allocation30_spill] sm:$0xff] %v14683_v37  ;;  %v4458_v28 = vunpack.c.l.b16 %v4242_v14  ;;  %v4459_v39 = vunpack.c.h.b16 %v4242_v14 }
 0x83c   : > { %v14685_v46 = vpop.f32.mrf.mxu1  ;;  %12361 = vrcp.f32 %v3885_v52  ;;  %v3394_v52 = vmax.f32 %v14669_v19, %v14679_v18  ;;  %v17794_v18 = vld [vmem:[#allocation72_spill] sm:$0xff] }
 0x83d   : > { %17784 = vst [vmem:[#allocation20_spill] sm:$0xff] %v14685_v46  ;;  %12363 = vrcp.f32 %v3882_v6  ;;  %v4482_v50 = vpack.c.b16 %v4460_v36, %v4458_v28  ;;  %v14693_v11 = vpop.f32.mrf.mxu3  ;;  %v17789_v36 = vld [vmem:[#allocation43_spill] sm:$0xff] }
 0x83e   : > { %4625 = vmatmul.bf16.gmra.mxu1 %v4480_v60  ;;  %4674 = vmatmul.bf16.gmra.mxu3 %v4481_v4  ;;  %17785 = vst [vmem:[#allocation27_spill] sm:$0xff] %v14693_v11  ;;  %12365 = vrcp.f32 %v3930_v40 }
 0x83f   : > { %v14689_v60 = vpop.f32.mrf.mxu0 }
 0x840   : > { %3443 = vmax.xlane.f32.xlu2 %v3442_v5  ;;  %v4483_v5 = vpack.c.b16 %v4461_v29, %v4459_v39  ;;  %v3494_v29 = vsub.f32 %v17789_v36, %v14562_v54 }
 0x842   : > { %v12362_v57 = vpop.eup %12361  ;;  %v14697_v6 = vpop.f32.mrf.mxu2 }
 0x843   : > { %v14681_v10 = vpop.xlane.xlu2 %3425  ;;  %v12364_v44 = vpop.eup %12363  ;;  %v4128_v59 = vmul.f32 %v12362_v57, %v14484_v9  ;;  %v4129_v20 = vmul.f32 %v12362_v57, %v17786_v48  ;;  %v17790_v9 = vld [vmem:[#allocation44_spill] sm:$0xff] }
 0x844   : > { %v14701_v26 = vpop.f32.mrf.mxu1  ;;  %v4126_v49 = vmul.f32 %v12364_v44, %v17787_v33  ;;  %v3495_v39 = vsub.f32 %v17790_v9, %v14562_v54 }
 0x845   : > { %v4245_v14 = vpack.c.bf16 %v4129_v20, %v4128_v59  ;;  %v14713_v57 = vpop.f32.mrf.mxu3  ;;  %v3650_v20 = vmul.f32 1.442695, %v3494_v29  ;;  %v17795_v29 = vld [vmem:[#allocation34_spill] sm:$0xff] }
 0x846   : > { %4904 = vmatmul.bf16.gmra.mxu0 %v4756_v17  ;;  %4953 = vmatmul.bf16.gmra.mxu2 %v4757_v25  ;;  %v17788_v17 = vld [vmem:[#allocation63_spill] sm:$0xff] }
 0x847   : > { %v4127_v25 = vmul.f32 %v12364_v44, %v17788_v17  ;;  %v14707_v28 = vpop.f32.mrf.mxu0  ;;  %v4464_v48 = vunpack.c.l.b16 %v4245_v14  ;;  %v4465_v17 = vunpack.c.h.b16 %v4245_v14  ;;  %v17797_v14 = vld [vmem:[#allocation46_spill] sm:$0xff] }
 0x848   : > { %3446 = vmax.xlane.f32.xlu2 %v3445_v16  ;;  %v12366_v16 = vpop.eup %12365 }
 0x849   : > { %v4244_v40 = vpack.c.bf16 %v4127_v25, %v4126_v49  ;;  %v17793_v25 = vld [vmem:[#allocation71_spill] sm:$0xff] }
 0x84a   : > { %v14717_v33 = vpop.f32.mrf.mxu2 }
 0x84b   : > { %v14691_v4 = vpop.xlane.xlu2 %3428  ;;  %v4462_v36 = vunpack.c.l.b16 %v4244_v40  ;;  %v4463_v49 = vunpack.c.h.b16 %v4244_v40  ;;  %v3451_v40 = vmax.f32 %v14675_v0, %v14683_v37 }
 0x84c   : > { %v14719_v54 = vpop.f32.mrf.mxu1 }
 0x84e   : > { %4630 = vmatmul.bf16.gmra.mxu1 %v4482_v50  ;;  %4679 = vmatmul.bf16.gmra.mxu3 %v4483_v5  ;;  %v3397_v50 = vmax.f32 %v14685_v46, %v14693_v11  ;;  %v17791_v5 = vld [vmem:[#allocation61_spill] sm:$0xff] }
 0x84f   : > { %v4158_v44 = vmul.f32 %v12366_v16, %v17791_v5  ;;  %v4484_v5 = vpack.c.b16 %v4464_v48, %v4462_v36 }
 0x850   : > { %3395 = vmax.xlane.f32.xlu2 %v3394_v52  ;;  %v17792_v52 = vld [vmem:[#allocation33_spill] sm:$0xff] }
 0x851   : > { %v4159_v59 = vmul.f32 %v12366_v16, %v17792_v52  ;;  %v17796_v52 = vld [vmem:[#allocation45_spill] sm:$0xff] }
 0x852   : > { %v3524_v2 = vsub.f32 %v17796_v52, %v17795_v29  ;;  %v17804_v52 = vld [vmem:[#allocation52_spill] sm:$0xff] }
 0x853   : > { %v3933_v1 = vpop.xlane.xlu2 %3932  ;;  %v4260_v16 = vpack.c.bf16 %v4159_v59, %v4158_v44 }
 0x854   : > { %12367 = vrcp.f32 %v3933_v1  ;;  %v3652_v1 = vmul.f32 1.442695, %v3495_v39  ;;  %v3525_v39 = vsub.f32 %v17797_v14, %v17795_v29  ;;  %v3710_v48 = vmul.f32 1.442695, %v3524_v2  ;;  %v14743_v29 = vpop.f32.mrf.mxu1  ;;  %v17802_v2 = vld [vmem:[#allocation64_spill] sm:$0xff] }
 0x855   : > { %12369 = vpow2.f32 %v3650_v20  ;;  %v4737_v44 = vunpack.c.h.b16 %v4260_v16  ;;  %v14733_v20 = vpop.f32.mrf.mxu3 }
 0x856   : > { %12371 = vpow2.f32 %v3652_v1 }
 0x857   : > { %12373 = vpow2.f32 %v3710_v48 }
 0x858   : > { %3398 = vmax.xlane.f32.xlu2 %v3397_v50  ;;  %v4485_v50 = vpack.c.b16 %v4465_v17, %v4463_v49  ;;  %v3712_v17 = vmul.f32 1.442695, %v3525_v39 }
 0x85a   : > { %v12368_v63 = vpop.eup %12367  ;;  %12375 = vpow2.f32 %v3712_v17  ;;  %v17809_v17 = vld [vmem:[#allocation37_spill] sm:$0xff] }
 0x85b   : > { %v4160_v9 = vmul.f32 %v12368_v63, %v17793_v25  ;;  %v4161_v19 = vmul.f32 %v12368_v63, %v17794_v18  ;;  %v14723_v12 = vpop.xlane.xlu2 %3377  ;;  %v14731_v25 = vpop.f32.mrf.mxu0  ;;  %v4736_v63 = vunpack.c.l.b16 %v4260_v16 }
 0x85c   : > { %17798 = vst [vmem:[#allocation65_spill] sm:$0xff] %v14731_v25  ;;  %v14735_v49 = vpop.eup %12369 }
 0x85d   : > { %v4261_v11 = vpack.c.bf16 %v4161_v19, %v4160_v9  ;;  %17799 = vst [vmem:[#allocation62_spill] sm:$0xff] %v14735_v49  ;;  %v14737_v19 = vpop.f32.mrf.mxu2  ;;  %v14739_v9 = vpop.eup %12371 }
 0x85e   : > { %4635 = vmatmul.bf16.gmra.mxu1 %v4484_v5  ;;  %4684 = vmatmul.bf16.gmra.mxu3 %v4485_v50  ;;  %17800 = vst [vmem:[#allocation63_spill] sm:$0xff] %v14737_v19  ;;  %v3497_v50 = vsub.f32 %v17804_v52, %v17802_v2  ;;  %v3892_v14 = vadd.f32 %v14739_v9, %v14735_v49 }
 0x85f   : > { %v4738_v18 = vunpack.c.l.b16 %v4261_v11  ;;  %v4739_v59 = vunpack.c.h.b16 %v4261_v11  ;;  %17801 = vst [vmem:[#allocation43_spill] sm:$0xff] %v14739_v9  ;;  %v17803_v11 = vld [vmem:[#allocation51_spill] sm:$0xff] }
 0x860   : > { %3452 = vmax.xlane.f32.xlu2 %v3451_v40  ;;  %v3496_v16 = vsub.f32 %v17803_v11, %v17802_v2  ;;  %v17812_v11 = vld [vmem:[#allocation48_spill] sm:$0xff] }
 0x861   : > { %v4758_v1 = vpack.c.b16 %v4738_v18, %v4736_v63  ;;  %v4759_v36 = vpack.c.b16 %v4739_v59, %v4737_v44  ;;  %v3656_v63 = vmul.f32 1.442695, %v3497_v50  ;;  %v14753_v18 = vpop.eup %12373  ;;  %v14757_v59 = vpop.f32.mrf.mxu3  ;;  %v3527_v52 = vsub.f32 %v17812_v11, %v17809_v17 }
 0x862   : > { %v3654_v40 = vmul.f32 1.442695, %v3496_v16  ;;  %17806 = vst [vmem:[#allocation61_spill] sm:$0xff] %v14753_v18  ;;  %v14755_v44 = vpop.eup %12375  ;;  %v14767_v16 = vpop.f32.mrf.mxu1 }
 0x863   : > { %4909 = vmatmul.bf16.gmra.mxu0 %v4758_v1  ;;  %4958 = vmatmul.bf16.gmra.mxu2 %v4759_v36  ;;  %v14741_v5 = vpop.xlane.xlu2 %3380  ;;  %v14751_v39 = vpop.f32.mrf.mxu0  ;;  %17807 = vst [vmem:[#allocation33_spill] sm:$0xff] %v14755_v44  ;;  %v17810_v1 = vld [vmem:[#allocation47_spill] sm:$0xff]  ;;  %v3937_v50 = vadd.f32 %v14755_v44, %v14753_v18  ;;  %v3716_v49 = vmul.f32 1.442695, %v3527_v52  ;;  %v17818_v44 = vld [vmem:[#allocation57_spill] sm:$0xff] }
 0x864   : > { %17805 = vst [vmem:[#allocation44_spill] sm:$0xff] %v14751_v39  ;;  %v3526_v36 = vsub.f32 %v17810_v1, %v17809_v17  ;;  %12377 = vpow2.f32 %v3654_v40  ;;  %v17816_v40 = vld [vmem:[#allocation58_spill] sm:$0xff] }
 0x865   : > { %v14763_v2 = vpop.f32.mrf.mxu2  ;;  %12379 = vpow2.f32 %v3656_v63  ;;  %17813 = vst [vmem:[#allocation34_spill] sm:$0xff] %v14767_v16  ;;  %v3530_v17 = vsub.f32 %v17816_v40, %v14628_v22 }
 0x866   : > { %17811 = vst [vmem:[#allocation72_spill] sm:$0xff] %v14763_v2 }
 0x867   : > { %v3722_v0 = vmul.f32 1.442695, %v3530_v17 }
 0x868   : > { %3893 = vadd.xlane.f32.xlu2 %v3892_v14  ;;  %v3714_v14 = vmul.f32 1.442695, %v3526_v36  ;;  %v3531_v36 = vsub.f32 %v17818_v44, %v14628_v22  ;;  %v17824_v22 = vld [vmem:[#allocation50_spill] sm:$0xff] }
 0x869   : > { %v14779_v11 = vpop.f32.mrf.mxu3 }
 0x86a   : > { %12381 = vpow2.f32 %v3714_v14  ;;  %17817 = vst [vmem:[#allocation64_spill] sm:$0xff] %v14779_v11  ;;  %v3724_v14 = vmul.f32 1.442695, %v3531_v36 }
 0x86b   : > { %v14759_v48 = vpop.xlane.xlu2 %3887  ;;  %12383 = vpow2.f32 %v3716_v49 }
 0x86c   : > { %17808 = vst [vmem:[#allocation71_spill] sm:$0xff] %v14759_v48  ;;  %v14771_v48 = vpop.eup %12377  ;;  %12385 = vpow2.f32 %v3722_v0 }
 0x86d   : > { %17814 = vst [vmem:[#allocation45_spill] sm:$0xff] %v14771_v48  ;;  %v14773_v37 = vpop.eup %12379  ;;  %12387 = vpow2.f32 %v3724_v14 }
 0x86e   : > { %v4885_v9 = vpop.f32.mrf.mxu0  ;;  %17815 = vst [vmem:[#allocation46_spill] sm:$0xff] %v14773_v37  ;;  %v3895_v52 = vadd.f32 %v14773_v37, %v14771_v48 }
 0x870   : > { %3938 = vadd.xlane.f32.xlu2 %v3937_v50  ;;  %v14787_v50 = vpop.f32.mrf.mxu1  ;;  %v14789_v25 = vpop.eup %12381 }
 0x871   : > { %17820 = vst [vmem:[#allocation52_spill] sm:$0xff] %v14787_v50  ;;  %v14793_v19 = vpop.eup %12383  ;;  %v14805_v36 = vpop.f32.mrf.mxu3 }
 0x872   : > { %17821 = vst [vmem:[#allocation37_spill] sm:$0xff] %v14789_v25  ;;  %v3940_v17 = vadd.f32 %v14793_v19, %v14789_v25  ;;  %v14807_v37 = vpop.eup %12385 }
 0x873   : > { %v14775_v1 = vpop.xlane.xlu2 %3431  ;;  %17823 = vst [vmem:[#allocation48_spill] sm:$0xff] %v14793_v19  ;;  %v17832_v19 = vld [vmem:[#allocation59_spill] sm:$0xff] }
 0x874   : > { %v4934_v63 = vpop.f32.mrf.mxu2  ;;  %17827 = vst [vmem:[#allocation57_spill] sm:$0xff] %v14805_v36 }
 0x875   : > { %v14783_v18 = vadd.f32 %v4934_v63, %v4885_v9  ;;  %v3528_v9 = vsub.f32 %v17824_v22, %v14585_v15  ;;  %v17826_v63 = vld [vmem:[#allocation49_spill] sm:$0xff]  ;;  %17828 = vst [vmem:[#allocation50_spill] sm:$0xff] %v14807_v37  ;;  %v14811_v22 = vpop.eup %12387 }
 0x876   : > { %v14791_v40 = vpop.f32.mrf.mxu0  ;;  %17830 = vst [vmem:[#allocation73_spill] sm:$0xff] %v14811_v22 }
 0x877   : > { %17819 = vst [vmem:[#allocation51_spill] sm:$0xff] %v14783_v18  ;;  %v3529_v18 = vsub.f32 %v17826_v63, %v14585_v15  ;;  %v17831_v15 = vld [vmem:[#allocation60_spill] sm:$0xff] }
 0x878   : > { %3896 = vadd.xlane.f32.xlu2 %v3895_v52  ;;  %17822 = vst [vmem:[#allocation47_spill] sm:$0xff] %v14791_v40  ;;  %v3718_v52 = vmul.f32 1.442695, %v3528_v9  ;;  %v14809_v48 = vpop.f32.mrf.mxu1  ;;  %v3532_v14 = vsub.f32 %v17831_v15, %v14630_v45  ;;  %v3533_v9 = vsub.f32 %v17832_v19, %v14630_v45 }
 0x879   : > { %v3720_v40 = vmul.f32 1.442695, %v3529_v18  ;;  %17829 = vst [vmem:[#allocation49_spill] sm:$0xff] %v14809_v48  ;;  %v3946_v18 = vadd.f32 %v14811_v22, %v14807_v37  ;;  %v14823_v36 = vpop.f32.mrf.mxu3 }
 0x87a   : > { %12389 = vpow2.f32 %v3718_v52  ;;  %v3726_v48 = vmul.f32 1.442695, %v3532_v14  ;;  %17834 = vst [vmem:[#allocation59_spill] sm:$0xff] %v14823_v36  ;;  %v3728_v52 = vmul.f32 1.442695, %v3533_v9  ;;  %v17839_v14 = vld [vmem:[#allocation53_spill] sm:$0xff] }
 0x87b   : > { %v14795_v49 = vpop.xlane.xlu2 %3434  ;;  %12391 = vpow2.f32 %v3720_v40 }
 0x87c   : > { %v14799_v44 = vpop.f32.mrf.mxu2  ;;  %12393 = vpow2.f32 %v3726_v48 }
 0x87d   : > { %17825 = vst [vmem:[#allocation58_spill] sm:$0xff] %v14799_v44  ;;  %12395 = vpow2.f32 %v3728_v52 }
 0x87e   : > { %v4890_v63 = vpop.f32.mrf.mxu0 }
 0x880   : > { %3941 = vadd.xlane.f32.xlu2 %v3940_v17  ;;  %v14825_v15 = vpop.eup %12389 }
 0x881   : > { %17835 = vst [vmem:[#allocation74_spill] sm:$0xff] %v14825_v15  ;;  %v14827_v39 = vpop.eup %12391 }
 0x882   : > { %17836 = vst [vmem:[#allocation75_spill] sm:$0xff] %v14827_v39 }
 0x883   : > { %v14813_v0 = vpop.xlane.xlu2 %3383 }
 0x884   : > { %v4939_v44 = vpop.f32.mrf.mxu2 }
 0x885   : > { %v14819_v17 = vadd.f32 %v4939_v44, %v4890_v63  ;;  %v17837_v44 = vld [vmem:[#allocation38_spill] sm:$0xff] }
 0x886   : > { %v17838_v63 = vld [vmem:[#allocation54_spill] sm:$0xff] }
 0x887   : > { %17833 = vst [vmem:[#allocation60_spill] sm:$0xff] %v14819_v17  ;;  %v3562_v17 = vsub.f32 %v17838_v63, %v17837_v44  ;;  %v14839_v63 = vpop.eup %12393 }
 0x888   : > { %v11957_v25 = vpop.trf.xlu0  ;;  %3947 = vadd.xlane.f32.xlu2 %v3946_v18  ;;  %v3563_v18 = vsub.f32 %v17839_v14, %v17837_v44  ;;  %17840 = vst [vmem:[#allocation38_spill] sm:$0xff] %v14839_v63  ;;  %v14845_v52 = vpop.eup %12395  ;;  %v3535_v14 = vsub.f32 %v14520_v55, %v14723_v12 }
 0x889   : > { %v11961_v50 = vunpack.i.h.bf16 %v11957_v25  ;;  %v11958_v16 = vunpack.i.l.bf16 %v11957_v25  ;;  %v3943_v25 = vadd.f32 %v14827_v39, %v14825_v15  ;;  %v3786_v9 = vmul.f32 1.442695, %v3562_v17  ;;  %17843 = vst [vmem:[#allocation76_spill] sm:$0xff] %v14845_v52  ;;  %v14861_v55 = vpop.f32.mrf.mxu0 }
 0x88a   : > { %v3788_v22 = vmul.f32 1.442695, %v3563_v18  ;;  %v3534_v17 = vsub.f32 %v14526_v8, %v14723_v12  ;;  %17846 = vst [vmem:[#allocation79_spill] sm:$0xff] %v14861_v55 }
 0x88b   : > { %v2190_v11 = vpack.c.bf16 %v11961_v50, %v11961_v50  ;;  %v4611_v40 = vpop.f32.mrf.mxu1  ;;  %v2448_v45 = vpack.c.bf16 %v11958_v16, %v11958_v16  ;;  %v14829_v19 = vpop.xlane.xlu2 %3386  ;;  %12397 = vpow2.f32 %v3786_v9 }
 0x88c   : > { %12399 = vpow2.f32 %v3788_v22 }
 0x88d   : > { %2223 = vst.msk [vmem:[#allocation4 + $0x140] sm:$0xf] %vm1562_vm11, %v2190_v11 }
 0x88e   : > { %2481 = vst.msk [vmem:[#allocation4 + $0x1c0] sm:$0xf] %vm1562_vm11, %v2448_v45 }
 0x890   : > { %v11962_v50 = vpop.trf.xlu0  ;;  %3944 = vadd.xlane.f32.xlu2 %v3943_v25 }
 0x891   : > { %v11966_v16 = vunpack.i.h.bf16 %v11962_v50  ;;  %v11963_v37 = vunpack.i.l.bf16 %v11962_v50  ;;  %v4660_v36 = vpop.f32.mrf.mxu3  ;;  %v3730_v50 = vmul.f32 1.442695, %v3534_v17 }
 0x892   : > { %v14841_v11 = vadd.f32 %v4660_v36, %v4611_v40  ;;  %v3949_v40 = vadd.f32 %v14845_v52, %v14839_v63 }
 0x893   : > { %v2191_v48 = vpack.c.bf16 %v11966_v16, %v11966_v16  ;;  %v14843_v2 = vpop.f32.mrf.mxu1  ;;  %v2449_v45 = vpack.c.bf16 %v11963_v37, %v11963_v37  ;;  %v14847_v44 = vpop.xlane.xlu2 %3437  ;;  %v3732_v16 = vmul.f32 1.442695, %v3535_v14  ;;  %v17849_v14 = vld [vmem:[#allocation56_spill] sm:$0xff]  ;;  %12401 = vpow2.f32 %v3730_v50 }
 0x894   : > { %17841 = vst [vmem:[#allocation54_spill] sm:$0xff] %v14841_v11 }
 0x895   : > { %17842 = vst [vmem:[#allocation53_spill] sm:$0xff] %v14843_v2  ;;  %v14859_v2 = vpop.eup %12397  ;;  %12403 = vpow2.f32 %v3732_v16 }
 0x896   : > { %2224 = vst.msk [vmem:[#allocation4 + $0x144] sm:$0xf] %vm1562_vm11, %v2191_v48  ;;  %v12041_v36 = vpop.trf.xlu1  ;;  %v14863_v39 = vpop.eup %12399 }
 0x897   : > { %2482 = vst.msk [vmem:[#allocation4 + $0x1c4] sm:$0xf] %vm1562_vm11, %v2449_v45  ;;  %v12045_v18 = vunpack.i.h.bf16 %v12041_v36  ;;  %v12042_v37 = vunpack.i.l.bf16 %v12041_v36 }
 0x898   : > { %v11967_v25 = vpop.trf.xlu0  ;;  %3950 = vadd.xlane.f32.xlu2 %v3949_v40  ;;  %17845 = vst [vmem:[#allocation78_spill] sm:$0xff] %v14859_v2  ;;  %v17848_v40 = vld [vmem:[#allocation35_spill] sm:$0xff] }
 0x899   : > { %v11971_v9 = vunpack.i.h.bf16 %v11967_v25  ;;  %v2174_v8 = vpack.c.bf16 %v12045_v18, %v12045_v18  ;;  %v2432_v11 = vpack.c.bf16 %v12042_v37, %v12042_v37  ;;  %v11968_v48 = vunpack.i.l.bf16 %v11967_v25  ;;  %v14857_v22 = vpop.f32.mrf.mxu3  ;;  %17847 = vst [vmem:[#allocation80_spill] sm:$0xff] %v14863_v39  ;;  %v17850_v37 = vld [vmem:[#allocation55_spill] sm:$0xff] }
 0x89a   : > { %17844 = vst [vmem:[#allocation77_spill] sm:$0xff] %v14857_v22  ;;  %v3564_v18 = vsub.f32 %v17849_v14, %v17848_v40  ;;  %v3565_v25 = vsub.f32 %v17850_v37, %v17848_v40  ;;  %v14877_v14 = vpop.f32.mrf.mxu2  ;;  %v14879_v37 = vpop.eup %12401 }
 0x89b   : > { %v2192_v12 = vpack.c.bf16 %v11971_v9, %v11971_v9  ;;  %v4616_v45 = vpop.f32.mrf.mxu1  ;;  %2207 = vst.msk [vmem:[#allocation4 + $0x100] sm:$0xf] %vm1562_vm11, %v2174_v8  ;;  %v2450_v36 = vpack.c.bf16 %v11968_v48, %v11968_v48  ;;  %v14866_v17 = vpop.xlane.xlu2 %3440  ;;  %v3994_v8 = vadd.f32 %v14863_v39, %v14859_v2 }
 0x89c   : > { %2465 = vst.msk [vmem:[#allocation4 + $0x180] sm:$0xf] %vm1562_vm11, %v2432_v11  ;;  %v3790_v52 = vmul.f32 1.442695, %v3564_v18  ;;  %v3792_v11 = vmul.f32 1.442695, %v3565_v25 }
 0x89d   : > { %2225 = vst.msk [vmem:[#allocation4 + $0x148] sm:$0xf] %vm1562_vm11, %v2192_v12 }
 0x89e   : > { %2483 = vst.msk [vmem:[#allocation4 + $0x1c8] sm:$0xf] %vm1562_vm11, %v2450_v36  ;;  %v12046_v9 = vpop.trf.xlu1  ;;  %12405 = vpow2.f32 %v3790_v52 }
 0x89f   : > { %v12050_v48 = vunpack.i.h.bf16 %v12046_v9  ;;  %v12047_v55 = vunpack.i.l.bf16 %v12046_v9  ;;  %17851 = vst [vmem:[#allocation35_spill] sm:$0xff] %v14877_v14  ;;  %v14885_v9 = vpop.eup %12403  ;;  %12407 = vpow2.f32 %v3792_v11 }
 0x8a0   : > { %v11972_v22 = vpop.trf.xlu0  ;;  %3995 = vadd.xlane.f32.xlu2 %v3994_v8  ;;  %17852 = vst [vmem:[#allocation56_spill] sm:$0xff] %v14879_v37 }
 0x8a1   : > { %v11976_v50 = vunpack.i.h.bf16 %v11972_v22  ;;  %v2175_v63 = vpack.c.bf16 %v12050_v48, %v12050_v48  ;;  %v2433_v40 = vpack.c.bf16 %v12047_v55, %v12047_v55  ;;  %v4665_v16 = vpop.f32.mrf.mxu3  ;;  %v11973_v36 = vunpack.i.l.bf16 %v11972_v22  ;;  %17855 = vst [vmem:[#allocation82_spill] sm:$0xff] %v14885_v9 }
 0x8a2   : > { %v14881_v15 = vadd.f32 %v4665_v16, %v4616_v45  ;;  %v3536_v55 = vsub.f32 %v14547_v27, %v14741_v5  ;;  %v3537_v22 = vsub.f32 %v14543_v58, %v14741_v5 }
 0x8a3   : > { %v2193_v12 = vpack.c.bf16 %v11976_v50, %v11976_v50  ;;  %v14883_v46 = vpop.f32.mrf.mxu1  ;;  %v4895_v39 = vpop.f32.mrf.mxu0  ;;  %2208 = vst.msk [vmem:[#allocation4 + $0x104] sm:$0xf] %vm1562_vm11, %v2175_v63  ;;  %v2451_v25 = vpack.c.bf16 %v11973_v36, %v11973_v36  ;;  %v3952_v63 = vadd.f32 %v14885_v9, %v14879_v37 }
 0x8a4   : > { %17853 = vst [vmem:[#allocation55_spill] sm:$0xff] %v14881_v15  ;;  %v14888_v18 = vpop.xlane.xlu2 %3389  ;;  %v3734_v50 = vmul.f32 1.442695, %v3536_v55  ;;  %v14901_v5 = vpop.eup %12405 }
 0x8a5   : > { %17854 = vst [vmem:[#allocation81_spill] sm:$0xff] %v14883_v46  ;;  %v14905_v14 = vpop.eup %12407 }
 0x8a6   : > { %2466 = vst.msk [vmem:[#allocation4 + $0x184] sm:$0xf] %vm1562_vm11, %v2433_v40  ;;  %v12051_v45 = vpop.trf.xlu1  ;;  %v3736_v40 = vmul.f32 1.442695, %v3537_v22  ;;  %v17861_v22 = vld [vmem:[#allocation68_spill] sm:$0xff]  ;;  %12409 = vpow2.f32 %v3734_v50 }
 0x8a7   : > { %2226 = vst.msk [vmem:[#allocation4 + $0x14c] sm:$0xf] %vm1562_vm11, %v2193_v12  ;;  %v12055_v8 = vunpack.i.h.bf16 %v12051_v45  ;;  %v12052_v52 = vunpack.i.l.bf16 %v12051_v45 }
 0x8a8   : > { %2484 = vst.msk [vmem:[#allocation4 + $0x1cc] sm:$0xf] %vm1562_vm11, %v2451_v25  ;;  %v11977_v48 = vpop.trf.xlu0  ;;  %3953 = vadd.xlane.f32.xlu2 %v3952_v63  ;;  %12411 = vpow2.f32 %v3736_v40 }
 0x8a9   : > { %v11981_v27 = vunpack.i.h.bf16 %v11977_v48  ;;  %v4944_v16 = vpop.f32.mrf.mxu2  ;;  %v2176_v11 = vpack.c.bf16 %v12055_v8, %v12055_v8  ;;  %v2434_v36 = vpack.c.bf16 %v12052_v52, %v12052_v52  ;;  %v11978_v15 = vunpack.i.l.bf16 %v11977_v48  ;;  %v14899_v58 = vpop.f32.mrf.mxu3  ;;  %17857 = vst [vmem:[#allocation84_spill] sm:$0xff] %v14901_v5  ;;  %v17862_v52 = vld [vmem:[#allocation67_spill] sm:$0xff] }
 0x8aa   : > { %17856 = vst [vmem:[#allocation83_spill] sm:$0xff] %v14899_v58  ;;  %v14903_v25 = vadd.f32 %v4944_v16, %v4895_v39  ;;  %v3566_v8 = vsub.f32 %v17861_v22, %v14681_v10  ;;  %v3567_v39 = vsub.f32 %v17862_v52, %v14681_v10 }
 0x8ab   : > { %v2194_v12 = vpack.c.bf16 %v11981_v27, %v11981_v27  ;;  %v4621_v46 = vpop.f32.mrf.mxu1  ;;  %17859 = vst [vmem:[#allocation86_spill] sm:$0xff] %v14905_v14  ;;  %v2452_v55 = vpack.c.bf16 %v11978_v15, %v11978_v15  ;;  %v14908_v45 = vpop.f32.mrf.mxu0  ;;  %v3997_v15 = vadd.f32 %v14905_v14, %v14901_v5 }
 0x8ac   : > { %17858 = vst [vmem:[#allocation85_spill] sm:$0xff] %v14903_v25  ;;  %v14910_v63 = vpop.xlane.xlu2 %3392  ;;  %v3794_v25 = vmul.f32 1.442695, %v3566_v8  ;;  %v14923_v52 = vpop.eup %12409 }
 0x8ad   : > { %2209 = vst.msk [vmem:[#allocation4 + $0x108] sm:$0xf] %vm1562_vm11, %v2176_v11 }
 0x8ae   : > { %17860 = vst [vmem:[#allocation87_spill] sm:$0xff] %v14908_v45  ;;  %v12056_v48 = vpop.trf.xlu1  ;;  %v14929_v37 = vpop.eup %12411  ;;  %12413 = vpow2.f32 %v3794_v25 }
 0x8af   : > { %2467 = vst.msk [vmem:[#allocation4 + $0x188] sm:$0xf] %vm1562_vm11, %v2434_v36  ;;  %v12060_v27 = vunpack.i.h.bf16 %v12056_v48  ;;  %v12057_v16 = vunpack.i.l.bf16 %v12056_v48  ;;  %v3796_v36 = vmul.f32 1.442695, %v3567_v39  ;;  %v17868_v48 = vld [vmem:[#allocation66_spill] sm:$0xff] }
 0x8b0   : > { %2227 = vst.msk [vmem:[#allocation4 + $0x150] sm:$0xf] %vm1562_vm11, %v2194_v12  ;;  %v11982_v11 = vpop.trf.xlu0  ;;  %3998 = vadd.xlane.f32.xlu2 %v3997_v15  ;;  %v17869_v15 = vld [vmem:[#allocation39_spill] sm:$0xff] }
 0x8b1   : > { %2485 = vst.msk [vmem:[#allocation4 + $0x1d0] sm:$0xf] %vm1562_vm11, %v2452_v55  ;;  %v11986_v22 = vunpack.i.h.bf16 %v11982_v11  ;;  %v14921_v50 = vpop.f32.mrf.mxu2  ;;  %v2177_v45 = vpack.c.bf16 %v12060_v27, %v12060_v27  ;;  %v2435_v10 = vpack.c.bf16 %v12057_v16, %v12057_v16  ;;  %v4670_v40 = vpop.f32.mrf.mxu3  ;;  %v11983_v55 = vunpack.i.l.bf16 %v11982_v11  ;;  %v17870_v27 = vld [vmem:[#allocation70_spill] sm:$0xff] }
 0x8b2   : > { %17863 = vst [vmem:[#allocation68_spill] sm:$0xff] %v14921_v50  ;;  %v14925_v58 = vadd.f32 %v4670_v40, %v4621_v46  ;;  %v3492_v39 = vsub.f32 %v17869_v15, %v17868_v48  ;;  %v3568_v16 = vsub.f32 %v17870_v27, %v14691_v4  ;;  %12415 = vpow2.f32 %v3796_v36  ;;  %v17871_v46 = vld [vmem:[#allocation69_spill] sm:$0xff]  ;;  %v17874_v36 = vld [vmem:[#allocation40_spill] sm:$0xff] }
 0x8b3   : > { %17864 = vst [vmem:[#allocation67_spill] sm:$0xff] %v14923_v52  ;;  %v2195_v12 = vpack.c.bf16 %v11986_v22, %v11986_v22  ;;  %v14927_v9 = vpop.f32.mrf.mxu1  ;;  %v2453_v11 = vpack.c.bf16 %v11983_v55, %v11983_v55  ;;  %v3569_v22 = vsub.f32 %v17871_v46, %v14691_v4  ;;  %v4900_v40 = vpop.f32.mrf.mxu0  ;;  %v3493_v55 = vsub.f32 %v17874_v36, %v17868_v48 }
 0x8b4   : > { %17865 = vst [vmem:[#allocation88_spill] sm:$0xff] %v14925_v58  ;;  %v14932_v8 = vpop.xlane.xlu2 %3443  ;;  %v3646_v46 = vmul.f32 1.442695, %v3492_v39 }
 0x8b5   : > { %17866 = vst [vmem:[#allocation89_spill] sm:$0xff] %v14927_v9  ;;  %v17873_v9 = vld [vmem:[#allocation42_spill] sm:$0xff]  ;;  %v3648_v39 = vmul.f32 1.442695, %v3493_v55 }
 0x8b6   : > { %17867 = vst [vmem:[#allocation90_spill] sm:$0xff] %v14929_v37  ;;  %v3523_v15 = vsub.f32 %v17873_v9, %v14545_v43  ;;  %v12061_v25 = vpop.trf.xlu1  ;;  %v14953_v9 = vpop.eup %12413 }
 0x8b7   : > { %2210 = vst.msk [vmem:[#allocation4 + $0x10c] sm:$0xf] %vm1562_vm11, %v2177_v45  ;;  %v17872_v45 = vld [vmem:[#allocation41_spill] sm:$0xff]  ;;  %v12065_v27 = vunpack.i.h.bf16 %v12061_v25  ;;  %v12062_v50 = vunpack.i.l.bf16 %v12061_v25 }
 0x8b8   : > { %2468 = vst.msk [vmem:[#allocation4 + $0x18c] sm:$0xf] %vm1562_vm11, %v2435_v10  ;;  %v3522_v58 = vsub.f32 %v17872_v45, %v14545_v43  ;;  %v3955_v10 = vadd.f32 %v14929_v37, %v14923_v52  ;;  %v11987_v4 = vpop.trf.xlu0  ;;  %v3800_v45 = vmul.f32 1.442695, %v3569_v22  ;;  %v14957_v36 = vpop.eup %12415  ;;  %v3538_v22 = vsub.f32 %v14592_v62, %v14813_v0 }
 0x8b9   : > { %2228 = vst.msk [vmem:[#allocation4 + $0x154] sm:$0xf] %vm1562_vm11, %v2195_v12  ;;  %v3798_v12 = vmul.f32 1.442695, %v3568_v16  ;;  %v11991_v2 = vunpack.i.h.bf16 %v11987_v4  ;;  %v4949_v14 = vpop.f32.mrf.mxu2  ;;  %v2178_v5 = vpack.c.bf16 %v12065_v27, %v12065_v27  ;;  %v14951_v43 = vpop.f32.mrf.mxu3  ;;  %v11988_v37 = vunpack.i.l.bf16 %v11987_v4 }
 0x8ba   : > { %2486 = vst.msk [vmem:[#allocation4 + $0x1d4] sm:$0xf] %vm1562_vm11, %v2453_v11  ;;  %3956 = vadd.xlane.f32.xlu2 %v3955_v10  ;;  %v2436_v11 = vpack.c.bf16 %v12062_v50, %v12062_v50  ;;  %v14955_v52 = vadd.f32 %v4949_v14, %v4900_v40  ;;  %v3706_v50 = vmul.f32 1.442695, %v3522_v58  ;;  %v3708_v14 = vmul.f32 1.442695, %v3523_v15 }
 0x8bb   : > { %17875 = vst [vmem:[#allocation66_spill] sm:$0xff] %v14951_v43  ;;  %v2196_v21 = vpack.c.bf16 %v11991_v2, %v11991_v2  ;;  %v4626_v48 = vpop.f32.mrf.mxu1  ;;  %12417 = vpow2.f32 %v3798_v12  ;;  %v2454_v25 = vpack.c.bf16 %v11988_v37, %v11988_v37  ;;  %v3539_v2 = vsub.f32 %v14590_v7, %v14813_v0  ;;  %v14971_v62 = vpop.f32.mrf.mxu0 }
 0x8bc   : > { %17876 = vst [vmem:[#allocation39_spill] sm:$0xff] %v14955_v52  ;;  %v14960_v16 = vpop.xlane.xlu2 %3446  ;;  %12419 = vpow2.f32 %v3800_v45  ;;  %v4000_v40 = vadd.f32 %v14957_v36, %v14953_v9  ;;  %v3738_v58 = vmul.f32 1.442695, %v3538_v22 }
 0x8bd   : > { %2211 = vst.msk [vmem:[#allocation4 + $0x110] sm:$0xf] %vm1562_vm11, %v2178_v5  ;;  %12421 = vpow2.f32 %v3646_v46  ;;  %v3740_v7 = vmul.f32 1.442695, %v3539_v2  ;;  %v3572_v2 = vsub.f32 %v14581_v53, %v14795_v49 }
 0x8be   : > { %2469 = vst.msk [vmem:[#allocation4 + $0x190] sm:$0xf] %vm1562_vm11, %v2436_v11  ;;  %v12066_v5 = vpop.trf.xlu1  ;;  %12423 = vpow2.f32 %v3648_v39 }
 0x8bf   : > { %2229 = vst.msk [vmem:[#allocation4 + $0x158] sm:$0xf] %vm1562_vm11, %v2196_v21  ;;  %v12070_v10 = vunpack.i.h.bf16 %v12066_v5  ;;  %v12067_v55 = vunpack.i.l.bf16 %v12066_v5  ;;  %12425 = vpow2.f32 %v3706_v50 }
 0x8c0   : > { %2487 = vst.msk [vmem:[#allocation4 + $0x1d8] sm:$0xf] %vm1562_vm11, %v2454_v25  ;;  %v11992_v37 = vpop.trf.xlu0  ;;  %12427 = vpow2.f32 %v3708_v14 }
 0x8c1   : > { %17877 = vst [vmem:[#allocation70_spill] sm:$0xff] %v14971_v62  ;;  %v11996_v27 = vunpack.i.h.bf16 %v11992_v37  ;;  %v14973_v4 = vpop.f32.mrf.mxu2  ;;  %v2179_v21 = vpack.c.bf16 %v12070_v10, %v12070_v10  ;;  %v4675_v0 = vpop.f32.mrf.mxu3  ;;  %v2437_v46 = vpack.c.bf16 %v12067_v55, %v12067_v55  ;;  %v11993_v45 = vunpack.i.l.bf16 %v11992_v37 }
 0x8c2   : > { %17878 = vst [vmem:[#allocation69_spill] sm:$0xff] %v14973_v4  ;;  %4001 = vadd.xlane.f32.xlu2 %v4000_v40  ;;  %v14975_v15 = vpop.eup %12417  ;;  %v14980_v39 = vadd.f32 %v4675_v0, %v4626_v48  ;;  %12429 = vpow2.f32 %v3738_v58  ;;  %v3573_v40 = vsub.f32 %v14579_v38, %v14795_v49 }
 0x8c3   : > { %v2197_v12 = vpack.c.bf16 %v11996_v27, %v11996_v27  ;;  %v14977_v11 = vpop.eup %12419  ;;  %2212 = vst.msk [vmem:[#allocation4 + $0x114] sm:$0xf] %vm1562_vm11, %v2179_v21  ;;  %v14982_v22 = vpop.f32.mrf.mxu1  ;;  %v2455_v14 = vpack.c.bf16 %v11993_v45, %v11993_v45  ;;  %12431 = vpow2.f32 %v3740_v7  ;;  %v3806_v27 = vmul.f32 1.442695, %v3572_v2 }
 0x8c4   : > { %17879 = vst [vmem:[#allocation41_spill] sm:$0xff] %v14980_v39  ;;  %v14984_v25 = vpop.xlane.xlu2 %3395  ;;  %v14986_v50 = vpop.eup %12421  ;;  %v4003_v10 = vadd.f32 %v14977_v11, %v14975_v15  ;;  %v3808_v49 = vmul.f32 1.442695, %v3573_v40 }
 0x8c5   : > { %17880 = vst [vmem:[#allocation42_spill] sm:$0xff] %v14982_v22  ;;  %v14991_v5 = vpop.eup %12423  ;;  %v4905_v7 = vpop.f32.mrf.mxu0  ;;  %12433 = vpow2.f32 %v3806_v27 }
 0x8c6   : > { %2470 = vst.msk [vmem:[#allocation4 + $0x194] sm:$0xf] %vm1562_vm11, %v2437_v46  ;;  %v12071_v48 = vpop.trf.xlu1  ;;  %v14999_v37 = vpop.eup %12425  ;;  %v3889_v38 = vadd.f32 %v14991_v5, %v14986_v50  ;;  %12435 = vpow2.f32 %v3808_v49 }
 0x8c7   : > { %2230 = vst.msk [vmem:[#allocation4 + $0x15c] sm:$0xf] %vm1562_vm11, %v2197_v12  ;;  %v12075_v53 = vunpack.i.h.bf16 %v12071_v48  ;;  %v15001_v55 = vpop.eup %12427  ;;  %v12072_v21 = vunpack.i.l.bf16 %v12071_v48 }
 0x8c8   : > { %2488 = vst.msk [vmem:[#allocation4 + $0x1dc] sm:$0xf] %vm1562_vm11, %v2455_v14  ;;  %v11997_v58 = vpop.trf.xlu0  ;;  %v15007_v14 = vpop.eup %12429  ;;  %v3934_v40 = vadd.f32 %v15001_v55, %v14999_v37 }
 0x8c9   : > { %v12001_v0 = vunpack.i.h.bf16 %v11997_v58  ;;  %v4954_v46 = vpop.f32.mrf.mxu2  ;;  %v2180_v12 = vpack.c.bf16 %v12075_v53, %v12075_v53  ;;  %v15005_v45 = vpop.f32.mrf.mxu3  ;;  %v2438_v39 = vpack.c.bf16 %v12072_v21, %v12072_v21  ;;  %v11998_v22 = vunpack.i.l.bf16 %v11997_v58 }
 0x8ca   : > { %4004 = vadd.xlane.f32.xlu2 %v4003_v10  ;;  %17881 = vst [vmem:[#allocation40_spill] sm:$0xff] %v15005_v45  ;;  %v15009_v4 = vadd.f32 %v4954_v46, %v4905_v7  ;;  %3890 = vadd.xlane.f32.xlu1 %v3889_v38  ;;  %v15011_v2 = vpop.eup %12431  ;;  %v3540_v53 = vsub.f32 %v14604_v51, %v14829_v19 }
 0x8cb   : > { %v2198_v52 = vpack.c.bf16 %v12001_v0, %v12001_v0  ;;  %17883 = vst [vmem:[#allocation92_spill] sm:$0xff] %v15011_v2  ;;  %v2456_v10 = vpack.c.bf16 %v11998_v22, %v11998_v22  ;;  %v4631_v58 = vpop.f32.mrf.mxu1  ;;  %v3403_v21 = vmax.f32 %v14719_v54, %v14733_v20  ;;  %v3542_v0 = vsub.f32 %v14636_v41, %v14888_v18 }
 0x8cc   : > { %17882 = vst [vmem:[#allocation91_spill] sm:$0xff] %v15009_v4  ;;  %v15014_v48 = vpop.xlane.xlu2 %3398  ;;  %v3543_v22 = vsub.f32 %v14638_v3, %v14888_v18  ;;  %v3570_v41 = vsub.f32 %v14573_v47, %v14775_v1  ;;  %v3742_v7 = vmul.f32 1.442695, %v3540_v53 }
 0x8cd   : > { %2213 = vst.msk [vmem:[#allocation4 + $0x118] sm:$0xf] %vm1562_vm11, %v2180_v12  ;;  %3935 = vadd.xlane.f32.xlu0 %v3934_v40  ;;  %v3746_v4 = vmul.f32 1.442695, %v3542_v0  ;;  %v3576_v0 = vsub.f32 %v14610_v56, %v14866_v17 }
 0x8ce   : > { %2471 = vst.msk [vmem:[#allocation4 + $0x198] sm:$0xf] %vm1562_vm11, %v2438_v39  ;;  %v12076_v27 = vpop.trf.xlu1  ;;  %v3958_v39 = vadd.f32 %v15011_v2, %v15007_v14  ;;  %12437 = vpow2.f32 %v3742_v7 }
 0x8cf   : > { %2231 = vst.msk [vmem:[#allocation4 + $0x160] sm:$0xf] %vm1562_vm11, %v2198_v52  ;;  %v12080_v51 = vunpack.i.h.bf16 %v12076_v27  ;;  %v3541_v52 = vsub.f32 %v14602_v31, %v14829_v19  ;;  %v12077_v38 = vunpack.i.l.bf16 %v12076_v27  ;;  %v3448_v31 = vmax.f32 %v14660_v42, %v14667_v34 }
 0x8d0   : > { %2489 = vst.msk [vmem:[#allocation4 + $0x1e0] sm:$0xf] %vm1562_vm11, %v2456_v10  ;;  %v12002_v46 = vpop.trf.xlu0  ;;  %v15035_v10 = vpop.eup %12433  ;;  %v3748_v19 = vmul.f32 1.442695, %v3543_v22  ;;  %v3577_v22 = vsub.f32 %v14616_v32, %v14866_v17  ;;  %12439 = vpow2.f32 %v3746_v4  ;;  %v3814_v32 = vmul.f32 1.442695, %v3576_v0 }
 0x8d1   : > { %v12006_v49 = vunpack.i.h.bf16 %v12002_v46  ;;  %v2181_v12 = vpack.c.bf16 %v12080_v51, %v12080_v51  ;;  %v4680_v40 = vpop.f32.mrf.mxu3  ;;  %17884 = vst [vmem:[#allocation93_spill] sm:$0xff] %v15035_v10  ;;  %v2439_v45 = vpack.c.bf16 %v12077_v38, %v12077_v38  ;;  %v12003_v3 = vunpack.i.l.bf16 %v12002_v46  ;;  %v15037_v18 = vpop.eup %12435 }
 0x8d2   : > { %3959 = vadd.xlane.f32.xlu2 %v3958_v39  ;;  %3404 = vmax.xlane.f32.xlu1 %v3403_v21  ;;  %17885 = vst [vmem:[#allocation94_spill] sm:$0xff] %v15037_v18  ;;  %v15042_v27 = vadd.f32 %v4680_v40, %v4631_v58  ;;  %v3744_v53 = vmul.f32 1.442695, %v3541_v52  ;;  %v3454_v21 = vmax.f32 %v14689_v60, %v14697_v6  ;;  %v3802_v51 = vmul.f32 1.442695, %v3570_v41 }
 0x8d3   : > { %v2199_v62 = vpack.c.bf16 %v12006_v49, %v12006_v49  ;;  %2214 = vst.msk [vmem:[#allocation4 + $0x11c] sm:$0xf] %vm1562_vm11, %v2181_v12  ;;  %v2457_v39 = vpack.c.bf16 %v12003_v3, %v12003_v3  ;;  %v3571_v58 = vsub.f32 %v14571_v30, %v14775_v1  ;;  %12441 = vpow2.f32 %v3748_v19  ;;  %v15059_v46 = vpop.f32.mrf.mxu1 }
 0x8d4   : > { %17886 = vst [vmem:[#allocation95_spill] sm:$0xff] %v15042_v27  ;;  %v15044_v47 = vpop.xlane.xlu2 %3452  ;;  %12443 = vpow2.f32 %v3744_v53  ;;  %v3816_v49 = vmul.f32 1.442695, %v3577_v22  ;;  %v3544_v4 = vsub.f32 %v14654_v23, %v14910_v63  ;;  %v15065_v40 = vpop.eup %12437  ;;  %v3400_v3 = vmax.f32 %v14701_v26, %v14713_v57 }
 0x8d5   : > { %2472 = vst.msk [vmem:[#allocation4 + $0x19c] sm:$0xf] %vm1562_vm11, %v2439_v45  ;;  %3449 = vmax.xlane.f32.xlu0 %v3448_v31  ;;  %v4009_v45 = vadd.f32 %v15037_v18, %v15035_v10  ;;  %12445 = vpow2.f32 %v3814_v32  ;;  %v3545_v0 = vsub.f32 %v14656_v61, %v14910_v63  ;;  %v3804_v22 = vmul.f32 1.442695, %v3571_v58 }
 0x8d6   : > { %2232 = vst.msk [vmem:[#allocation4 + $0x164] sm:$0xf] %vm1562_vm11, %v2199_v62  ;;  %v12081_v56 = vpop.trf.xlu1  ;;  %v15072_v19 = vpop.eup %12439  ;;  %12447 = vpow2.f32 %v3816_v49 }
 0x8d7   : > { %2490 = vst.msk [vmem:[#allocation4 + $0x1e4] sm:$0xf] %vm1562_vm11, %v2457_v39  ;;  %v12085_v52 = vunpack.i.h.bf16 %v12081_v56  ;;  %v12082_v17 = vunpack.i.l.bf16 %v12081_v56  ;;  %12449 = vpow2.f32 %v3802_v51  ;;  %v3750_v56 = vmul.f32 1.442695, %v3544_v4 }
 0x8d8   : > { %17887 = vst [vmem:[#allocation96_spill] sm:$0xff] %v15059_v46  ;;  %v12007_v38 = vpop.trf.xlu0  ;;  %v3752_v49 = vmul.f32 1.442695, %v3545_v0  ;;  %12451 = vpow2.f32 %v3804_v22  ;;  %v3406_v22 = vmax.f32 %v14743_v29, %v14757_v59 }
 0x8d9   : > { %v12011_v62 = vunpack.i.h.bf16 %v12007_v38  ;;  %v2182_v30 = vpack.c.bf16 %v12085_v52, %v12085_v52  ;;  %v15061_v1 = vpop.f32.mrf.mxu3  ;;  %v2440_v41 = vpack.c.bf16 %v12082_v17, %v12082_v17  ;;  %v12008_v12 = vunpack.i.l.bf16 %v12007_v38  ;;  %17889 = vst [vmem:[#allocation98_spill] sm:$0xff] %v15072_v19  ;;  %v15075_v23 = vpop.eup %12441 }
 0x8da   : > { %4010 = vadd.xlane.f32.xlu2 %v4009_v45  ;;  %17888 = vst [vmem:[#allocation97_spill] sm:$0xff] %v15061_v1  ;;  %3455 = vmax.xlane.f32.xlu1 %v3454_v21  ;;  %v15080_v39 = vpop.eup %12443  ;;  %v3457_v21 = vmax.f32 %v14707_v28, %v14717_v33  ;;  %v15084_v45 = vpop.f32.mrf.mxu2  ;;  %12453 = vpow2.f32 %v3750_v56 }
 0x8db   : > { %v2200_v7 = vpack.c.bf16 %v12011_v62, %v12011_v62  ;;  %2215 = vst.msk [vmem:[#allocation4 + $0x120] sm:$0xf] %vm1562_vm11, %v2182_v30  ;;  %v2458_v53 = vpack.c.bf16 %v12008_v12, %v12008_v12  ;;  %v15087_v38 = vpop.f32.mrf.mxu0  ;;  %v3964_v62 = vadd.f32 %v15075_v23, %v15072_v19  ;;  %v4636_v30 = vpop.f32.mrf.mxu1  ;;  %v3578_v12 = vsub.f32 %v14626_v13, %v14932_v8 }
 0x8dc   : > { %v15070_v31 = vpop.xlane.xlu2 %3893  ;;  %2473 = vst.msk [vmem:[#allocation4 + $0x1a0] sm:$0xf] %vm1562_vm11, %v2440_v41  ;;  %12455 = vpow2.f32 %v3752_v49  ;;  %v3579_v13 = vsub.f32 %v14634_v35, %v14932_v8 }
 0x8dd   : > { %17890 = vst [vmem:[#allocation99_spill] sm:$0xff] %v15075_v23  ;;  %3401 = vmax.xlane.f32.xlu0 %v3400_v3 }
 0x8de   : > { %2233 = vst.msk [vmem:[#allocation4 + $0x168] sm:$0xf] %vm1562_vm11, %v2200_v7  ;;  %v12086_v52 = vpop.trf.xlu1  ;;  %v15091_v7 = vpop.eup %12445 }
 0x8df   : > { %17891 = vst [vmem:[#allocation100_spill] sm:$0xff] %v15084_v45  ;;  %v12090_v32 = vunpack.i.h.bf16 %v12086_v52  ;;  %v12087_v61 = vunpack.i.l.bf16 %v12086_v52  ;;  %v17909_v45 = vld [vmem:[#allocation34_spill] sm:$0xff] }
 0x8e0   : > { %2491 = vst.msk [vmem:[#allocation4 + $0x1e8] sm:$0xf] %vm1562_vm11, %v2458_v53  ;;  %v12012_v63 = vpop.trf.xlu0 }
 0x8e1   : > { %17892 = vst [vmem:[#allocation101_spill] sm:$0xff] %v15087_v38  ;;  %v12016_v17 = vunpack.i.h.bf16 %v12012_v63  ;;  %v2183_v51 = vpack.c.bf16 %v12090_v32, %v12090_v32  ;;  %v2441_v58 = vpack.c.bf16 %v12087_v61, %v12087_v61  ;;  %v12013_v4 = vunpack.i.l.bf16 %v12012_v63  ;;  %v4685_v41 = vpop.f32.mrf.mxu3 }
 0x8e2   : > { %3458 = vmax.xlane.f32.xlu2 %v3457_v21  ;;  %17893 = vst [vmem:[#allocation102_spill] sm:$0xff] %v15091_v7  ;;  %v15095_v53 = vadd.f32 %v4685_v41, %v4636_v30  ;;  %3965 = vadd.xlane.f32.xlu1 %v3964_v62  ;;  %v15097_v21 = vpop.eup %12447  ;;  %v3961_v32 = vadd.f32 %v15080_v39, %v15065_v40 }
 0x8e3   : > { %v2201_v3 = vpack.c.bf16 %v12016_v17, %v12016_v17  ;;  %17895 = vst [vmem:[#allocation104_spill] sm:$0xff] %v15097_v21  ;;  %v2459_v0 = vpack.c.bf16 %v12013_v4, %v12013_v4  ;;  %v15104_v61 = vpop.eup %12449  ;;  %v3574_v63 = vsub.f32 %v14596_v24, %v14847_v44  ;;  %v3818_v17 = vmul.f32 1.442695, %v3578_v12  ;;  %v4910_v30 = vpop.f32.mrf.mxu0 }
 0x8e4   : > { %17894 = vst [vmem:[#allocation103_spill] sm:$0xff] %v15095_v53  ;;  %v15100_v52 = vpop.xlane.xlu2 %3938  ;;  %v4015_v49 = vadd.f32 %v15097_v21, %v15091_v7  ;;  %v17900_v53 = vld [vmem:[#allocation32_spill] sm:$0xff] }
 0x8e5   : > { %2216 = vst.msk [vmem:[#allocation4 + $0x124] sm:$0xf] %vm1562_vm11, %v2183_v51  ;;  %3962 = vadd.xlane.f32.xlu0 %v3961_v32  ;;  %v3575_v27 = vsub.f32 %v17900_v53, %v14847_v44  ;;  %v3810_v1 = vmul.f32 1.442695, %v3574_v63  ;;  %12457 = vpow2.f32 %v3818_v17  ;;  %v17904_v53 = vld [vmem:[#allocation72_spill] sm:$0xff] }
 0x8e6   : > { %17896 = vst [vmem:[#allocation105_spill] sm:$0xff] %v15104_v61  ;;  %v12091_v62 = vpop.trf.xlu1  ;;  %v4959_v56 = vpop.f32.mrf.mxu2  ;;  %v17905_v63 = vld [vmem:[#allocation44_spill] sm:$0xff] }
 0x8e7   : > { %2474 = vst.msk [vmem:[#allocation4 + $0x1a4] sm:$0xf] %vm1562_vm11, %v2441_v58  ;;  %v12095_v51 = vunpack.i.h.bf16 %v12091_v62  ;;  %v12092_v35 = vunpack.i.l.bf16 %v12091_v62  ;;  %v15117_v58 = vpop.eup %12451  ;;  %v15119_v4 = vadd.f32 %v4959_v56, %v4910_v30 }
 0x8e8   : > { %2234 = vst.msk [vmem:[#allocation4 + $0x16c] sm:$0xf] %vm1562_vm11, %v2201_v3  ;;  %v12017_v8 = vpop.trf.xlu0  ;;  %v3820_v3 = vmul.f32 1.442695, %v3579_v13  ;;  %v4006_v13 = vadd.f32 %v15117_v58, %v15104_v61 }
 0x8e9   : > { %2492 = vst.msk [vmem:[#allocation4 + $0x1ec] sm:$0xf] %vm1562_vm11, %v2459_v0  ;;  %v12021_v41 = vunpack.i.h.bf16 %v12017_v8  ;;  %v2184_v24 = vpack.c.bf16 %v12095_v51, %v12095_v51  ;;  %v2442_v12 = vpack.c.bf16 %v12092_v35, %v12092_v35  ;;  %v12018_v32 = vunpack.i.l.bf16 %v12017_v8  ;;  %v15121_v0 = vpop.eup %12453  ;;  %v17903_v35 = vld [vmem:[#allocation27_spill] sm:$0xff] }
 0x8ea   : > { %17897 = vst [vmem:[#allocation106_spill] sm:$0xff] %v15117_v58  ;;  %3407 = vmax.xlane.f32.xlu2 %v3406_v22  ;;  %4016 = vadd.xlane.f32.xlu1 %v4015_v49  ;;  %v15125_v62 = vpop.eup %12455  ;;  %v17902_v22 = vld [vmem:[#allocation20_spill] sm:$0xff]  ;;  %v3549_v44 = vsub.f32 %v17903_v35, %v15014_v48  ;;  %12459 = vpow2.f32 %v3820_v3  ;;  %v3463_v49 = vmax.f32 %v17905_v63, %v17904_v53  ;;  %v3812_v8 = vmul.f32 1.442695, %v3575_v27 }
 0x8eb   : > { %17898 = vst [vmem:[#allocation107_spill] sm:$0xff] %v15119_v4  ;;  %v2202_v46 = vpack.c.bf16 %v12021_v41, %v12021_v41  ;;  %v2460_v56 = vpack.c.bf16 %v12018_v32, %v12018_v32  ;;  %v3548_v51 = vsub.f32 %v17902_v22, %v15014_v48  ;;  %12461 = vpow2.f32 %v3810_v1  ;;  %v15143_v4 = vpop.eup %12457 }
 0x8ec   : > { %17899 = vst [vmem:[#allocation108_spill] sm:$0xff] %v15121_v0  ;;  %v15128_v30 = vpop.xlane.xlu2 %3896  ;;  %v3967_v41 = vadd.f32 %v15125_v62, %v15121_v0  ;;  %12463 = vpow2.f32 %v3812_v8  ;;  %v17912_v8 = vld [vmem:[#allocation52_spill] sm:$0xff] }
 0x8ed   : > { %17901 = vst [vmem:[#allocation32_spill] sm:$0xff] %v15125_v62  ;;  %4007 = vadd.xlane.f32.xlu0 %v4006_v13  ;;  %v3758_v22 = vmul.f32 1.442695, %v3548_v51 }
 0x8ee   : > { %2217 = vst.msk [vmem:[#allocation4 + $0x128] sm:$0xf] %vm1562_vm11, %v2184_v24  ;;  %v12096_v17 = vpop.trf.xlu1 }
 0x8ef   : > { %2475 = vst.msk [vmem:[#allocation4 + $0x1a8] sm:$0xf] %vm1562_vm11, %v2442_v12  ;;  %v12100_v24 = vunpack.i.h.bf16 %v12096_v17  ;;  %v12097_v32 = vunpack.i.l.bf16 %v12096_v17  ;;  %v3760_v12 = vmul.f32 1.442695, %v3549_v44  ;;  %12465 = vpow2.f32 %v3758_v22 }
 0x8f0   : > { %2235 = vst.msk [vmem:[#allocation4 + $0x170] sm:$0xf] %vm1562_vm11, %v2202_v46  ;;  %v12022_v48 = vpop.trf.xlu0  ;;  %v15145_v1 = vpop.eup %12459 }
 0x8f1   : > { %2493 = vst.msk [vmem:[#allocation4 + $0x1f0] sm:$0xf] %vm1562_vm11, %v2460_v56  ;;  %v12026_v3 = vunpack.i.h.bf16 %v12022_v48  ;;  %v2185_v46 = vpack.c.bf16 %v12100_v24, %v12100_v24  ;;  %v2443_v13 = vpack.c.bf16 %v12097_v32, %v12097_v32  ;;  %v12023_v35 = vunpack.i.l.bf16 %v12022_v48  ;;  %v17908_v56 = vld [vmem:[#allocation64_spill] sm:$0xff]  ;;  %v15152_v44 = vpop.eup %12461 }
 0x8f2   : > { %3968 = vadd.xlane.f32.xlu2 %v3967_v41  ;;  %17906 = vst [vmem:[#allocation20_spill] sm:$0xff] %v15143_v4  ;;  %3464 = vmax.xlane.f32.xlu1 %v3463_v49  ;;  %v3409_v38 = vmax.f32 %v17909_v45, %v17908_v56  ;;  %12467 = vpow2.f32 %v3760_v12  ;;  %v17911_v49 = vld [vmem:[#allocation57_spill] sm:$0xff]  ;;  %v4018_v32 = vadd.f32 %v15145_v1, %v15143_v4 }
 0x8f3   : > { %v2203_v27 = vpack.c.bf16 %v12026_v3, %v12026_v3  ;;  %17907 = vst [vmem:[#allocation27_spill] sm:$0xff] %v15145_v1  ;;  %v2461_v17 = vpack.c.bf16 %v12023_v35, %v12023_v35  ;;  %v3412_v41 = vmax.f32 %v17912_v8, %v17911_v49  ;;  %v15161_v35 = vpop.eup %12463  ;;  %v17914_v12 = vld [vmem:[#allocation21_spill] sm:$0xff] }
 0x8f4   : > { %2218 = vst.msk [vmem:[#allocation4 + $0x12c] sm:$0xf] %vm1562_vm11, %v2185_v46  ;;  %v15150_v51 = vpop.xlane.xlu2 %3941 }
 0x8f5   : > { %17910 = vst [vmem:[#allocation72_spill] sm:$0xff] %v15152_v44  ;;  %3410 = vmax.xlane.f32.xlu0 %v3409_v38  ;;  %v3580_v38 = vsub.f32 %v17914_v12, %v14960_v16  ;;  %v15165_v21 = vpop.eup %12465 }
 0x8f6   : > { %2476 = vst.msk [vmem:[#allocation4 + $0x1ac] sm:$0xf] %vm1562_vm11, %v2443_v13  ;;  %v12101_v24 = vpop.trf.xlu1 }
 0x8f7   : > { %2236 = vst.msk [vmem:[#allocation4 + $0x174] sm:$0xf] %vm1562_vm11, %v2203_v27  ;;  %v12105_v48 = vunpack.i.h.bf16 %v12101_v24  ;;  %v12102_v3 = vunpack.i.l.bf16 %v12101_v24 }
 0x8f8   : > { %2494 = vst.msk [vmem:[#allocation4 + $0x1f4] sm:$0xf] %vm1562_vm11, %v2461_v17  ;;  %v12027_v46 = vpop.trf.xlu0  ;;  %v17916_v17 = vld [vmem:[#allocation17_spill] sm:$0xff]  ;;  %v15169_v24 = vpop.eup %12467 }
 0x8f9   : > { %17913 = vst [vmem:[#allocation44_spill] sm:$0xff] %v15161_v35  ;;  %v12031_v22 = vunpack.i.h.bf16 %v12027_v46  ;;  %v12028_v13 = vunpack.i.l.bf16 %v12027_v46  ;;  %v2186_v27 = vpack.c.bf16 %v12105_v48, %v12105_v48  ;;  %v2444_v43 = vpack.c.bf16 %v12102_v3, %v12102_v3  ;;  %v17918_v3 = vld [vmem:[#allocation59_spill] sm:$0xff] }
 0x8fa   : > { %4019 = vadd.xlane.f32.xlu2 %v4018_v32  ;;  %17915 = vst [vmem:[#allocation64_spill] sm:$0xff] %v15165_v21  ;;  %v3581_v7 = vsub.f32 %v17916_v17, %v14960_v16  ;;  %3413 = vmax.xlane.f32.xlu1 %v3412_v41  ;;  %v4012_v32 = vadd.f32 %v15161_v35, %v15152_v44  ;;  %v3822_v48 = vmul.f32 1.442695, %v3580_v38  ;;  %v17919_v16 = vld [vmem:[#allocation49_spill] sm:$0xff] }
 0x8fb   : > { %v2204_v23 = vpack.c.bf16 %v12031_v22, %v12031_v22  ;;  %v2462_v1 = vpack.c.bf16 %v12028_v13, %v12028_v13  ;;  %17917 = vst [vmem:[#allocation34_spill] sm:$0xff] %v15169_v24  ;;  %v3415_v46 = vmax.f32 %v17919_v16, %v17918_v3  ;;  %v3973_v13 = vadd.f32 %v15169_v24, %v15165_v21  ;;  %v17922_v24 = vld [vmem:[#allocation63_spill] sm:$0xff]  ;;  %v17923_v21 = vld [vmem:[#allocation65_spill] sm:$0xff] }
 0x8fc   : > { %2219 = vst.msk [vmem:[#allocation4 + $0x130] sm:$0xf] %vm1562_vm11, %v2186_v27  ;;  %v15172_v4 = vpop.xlane.xlu2 %3947  ;;  %v3824_v22 = vmul.f32 1.442695, %v3581_v7  ;;  %12469 = vpow2.f32 %v3822_v48  ;;  %v17921_v7 = vld [vmem:[#allocation29_spill] sm:$0xff] }
 0x8fd   : > { %2477 = vst.msk [vmem:[#allocation4 + $0x1b0] sm:$0xf] %vm1562_vm11, %v2444_v43  ;;  %4013 = vadd.xlane.f32.xlu0 %v4012_v32  ;;  %v17920_v43 = vld [vmem:[#allocation23_spill] sm:$0xff] }
 0x8fe   : > { %2237 = vst.msk [vmem:[#allocation4 + $0x178] sm:$0xf] %vm1562_vm11, %v2204_v23  ;;  %v12106_v41 = vpop.trf.xlu1  ;;  %v3546_v23 = vsub.f32 %v17920_v43, %v14984_v25  ;;  %12471 = vpow2.f32 %v3824_v22 }
 0x8ff   : > { %2495 = vst.msk [vmem:[#allocation4 + $0x1f8] sm:$0xf] %vm1562_vm11, %v2462_v1  ;;  %v12110_v12 = vunpack.i.h.bf16 %v12106_v41  ;;  %v12107_v27 = vunpack.i.l.bf16 %v12106_v41  ;;  %v3547_v1 = vsub.f32 %v17921_v7, %v14984_v25  ;;  %v3460_v41 = vmax.f32 %v17923_v21, %v17922_v24 }
 0x900   : > { %v12032_v17 = vpop.trf.xlu0  ;;  %v3754_v48 = vmul.f32 1.442695, %v3546_v23  ;;  %v17927_v23 = vld [vmem:[#allocation30_spill] sm:$0xff] }
 0x901   : > { %v12036_v35 = vunpack.i.h.bf16 %v12032_v17  ;;  %v12033_v44 = vunpack.i.l.bf16 %v12032_v17  ;;  %v2187_v38 = vpack.c.bf16 %v12110_v12, %v12110_v12  ;;  %v2445_v32 = vpack.c.bf16 %v12107_v27, %v12107_v27  ;;  %v17926_v12 = vld [vmem:[#allocation28_spill] sm:$0xff] }
 0x902   : > { %3416 = vmax.xlane.f32.xlu2 %v3415_v46  ;;  %3974 = vadd.xlane.f32.xlu1 %v3973_v13  ;;  %v3756_v46 = vmul.f32 1.442695, %v3547_v1  ;;  %12473 = vpow2.f32 %v3754_v48  ;;  %v3584_v27 = vsub.f32 %v17926_v12, %v15044_v47  ;;  %v11355_v12 = vld [vmem:[#allocation4 + $0x1f0] sm:$0xff] }
 0x903   : > { %v2205_v19 = vpack.c.bf16 %v12036_v35, %v12036_v35  ;;  %v2463_v62 = vpack.c.bf16 %v12033_v44, %v12033_v44  ;;  %2220 = vst.msk [vmem:[#allocation4 + $0x134] sm:$0xf] %vm1562_vm11, %v2187_v38  ;;  %v15195_v35 = vpop.eup %12469 }
 0x904   : > { %v15190_v17 = vpop.xlane.xlu2 %3944  ;;  %2478 = vst.msk [vmem:[#allocation4 + $0x1b4] sm:$0xf] %vm1562_vm11, %v2445_v32  ;;  %v15197_v22 = vpop.eup %12471  ;;  %12475 = vpow2.f32 %v3756_v46  ;;  %v3830_v1 = vmul.f32 1.442695, %v3584_v27  ;;  %v11338_v27 = vld [vmem:[#allocation4 + $0x168] sm:$0xff] }
 0x905   : > { %2238 = vst.msk [vmem:[#allocation4 + $0x17c] sm:$0xf] %vm1562_vm11, %v2205_v19  ;;  %3461 = vmax.xlane.f32.xlu0 %v3460_v41  ;;  %v3585_v19 = vsub.f32 %v17927_v23, %v15044_v47  ;;  %v4021_v32 = vadd.f32 %v15197_v22, %v15195_v35 }
 0x906   : > { %2496 = vst.msk [vmem:[#allocation4 + $0x1fc] sm:$0xf] %vm1562_vm11, %v2463_v62  ;;  %v12111_v25 = vpop.trf.xlu1  ;;  %12477 = vpow2.f32 %v3830_v1 }
 0x907   : > { %17924 = vst [vmem:[#allocation57_spill] sm:$0xff] %v15195_v35  ;;  %v12115_v44 = vunpack.i.h.bf16 %v12111_v25  ;;  %v12112_v13 = vunpack.i.l.bf16 %v12111_v25  ;;  %v3832_v48 = vmul.f32 1.442695, %v3585_v19  ;;  %v11339_v25 = vld [vmem:[#allocation4 + $0x170] sm:$0xff] }
 0x908   : > { %17925 = vst [vmem:[#allocation52_spill] sm:$0xff] %v15197_v22 }
 0x909   : > { %v2188_v43 = vpack.c.bf16 %v12115_v44, %v12115_v44  ;;  %v2446_v38 = vpack.c.bf16 %v12112_v13, %v12112_v13  ;;  %v15209_v44 = vpop.eup %12473  ;;  %12479 = vpow2.f32 %v3832_v48  ;;  %v11353_v48 = vld [vmem:[#allocation4 + $0x1e0] sm:$0xff] }
 0x90a   : > { %17928 = vst [vmem:[#allocation21_spill] sm:$0xff] %v15209_v44 }
 0x90b   : > { %2221 = vst.msk [vmem:[#allocation4 + $0x138] sm:$0xf] %vm1562_vm11, %v2188_v43  ;;  %v15211_v43 = vpop.eup %12475 }
 0x90c   : > { %v15204_v62 = vpop.xlane.xlu2 %3950  ;;  %2479 = vst.msk [vmem:[#allocation4 + $0x1b8] sm:$0xf] %vm1562_vm11, %v2446_v38  ;;  %v11340_v7 = vld [vmem:[#allocation4 + $0x178] sm:$0xff]  ;;  %v3970_v38 = vadd.f32 %v15211_v43, %v15209_v44 }
 0x90d   : > { %4022 = vadd.xlane.f32.xlu0 %v4021_v32  ;;  %v11356_v41 = vld [vmem:[#allocation4 + $0x1f8] sm:$0xff]  ;;  %5199 = vmatpush.bf16.msra.mxu3 %v11340_v7  ;;  %17929 = vst [vmem:[#allocation17_spill] sm:$0xff] %v15211_v43  ;;  %v11354_v32 = vld [vmem:[#allocation4 + $0x1e8] sm:$0xff]  ;;  %v15219_v7 = vpop.eup %12477 }
 0x90e   : > { %v12116_v46 = vpop.trf.xlu1  ;;  %5473 = vmatpush.bf16.msra.mxu2 %v11356_v41  ;;  %17930 = vst [vmem:[#allocation59_spill] sm:$0xff] %v15219_v7  ;;  %v11337_v41 = vld [vmem:[#allocation4 + $0x160] sm:$0xff] }
 0x90f   : > { %v12120_v47 = vunpack.i.h.bf16 %v12116_v46  ;;  %v12117_v13 = vunpack.i.l.bf16 %v12116_v46  ;;  %v15221_v1 = vpop.eup %12479 }
 0x910   : > { %17931 = vst [vmem:[#allocation49_spill] sm:$0xff] %v15221_v1 }
 0x911   : > { %v2189_v23 = vpack.c.bf16 %v12120_v47, %v12120_v47  ;;  %v2447_v22 = vpack.c.bf16 %v12117_v13, %v12117_v13  ;;  %5200 = vmatpush.bf16.msra.mxu3 %v11339_v25  ;;  %v4027_v47 = vadd.f32 %v15221_v1, %v15219_v7  ;;  %v11350_v1 = vld [vmem:[#allocation4 + $0x1c8] sm:$0xff]  ;;  %v17933_v7 = vld [vmem:[#allocation36_spill] sm:$0xff] }
 0x912   : > { %5474 = vmatpush.bf16.msra.mxu2 %v11355_v12  ;;  %v11331_v12 = vld [vmem:[#allocation4 + $0x130] sm:$0xff] }
 0x913   : > { %2222 = vst.msk [vmem:[#allocation4 + $0x13c] sm:$0xf] %vm1562_vm11, %v2189_v23  ;;  %v11352_v23 = vld [vmem:[#allocation4 + $0x1d8] sm:$0xff] }
 0x914   : > { %v15214_v19 = vpop.xlane.xlu2 %3995  ;;  %2480 = vst.msk [vmem:[#allocation4 + $0x1bc] sm:$0xf] %vm1562_vm11, %v2447_v22  ;;  %v11336_v22 = vld [vmem:[#allocation4 + $0x158] sm:$0xff] }
 0x915   : > { %3971 = vadd.xlane.f32.xlu0 %v3970_v38  ;;  %5201 = vmatpush.bf16.msra.mxu3 %v11338_v27  ;;  %v11347_v27 = vld [vmem:[#allocation4 + $0x1b0] sm:$0xff] }
 0x916   : > { %5475 = vmatpush.bf16.msra.mxu2 %v11354_v32  ;;  %v11335_v38 = vld [vmem:[#allocation4 + $0x150] sm:$0xff]  ;;  %v11330_v32 = vld [vmem:[#allocation4 + $0x128] sm:$0xff] }
 0x919   : > { %5202 = vmatpush.bf16.msra.mxu3 %v11337_v41  ;;  %v11351_v41 = vld [vmem:[#allocation4 + $0x1d0] sm:$0xff] }
 0x91a   : > { %v11332_v46 = vld [vmem:[#allocation4 + $0x138] sm:$0xff]  ;;  %5476 = vmatpush.bf16.msra.mxu2 %v11353_v48  ;;  %v11346_v48 = vld [vmem:[#allocation4 + $0x1a8] sm:$0xff] }
 0x91b   : > { %v11348_v13 = vld [vmem:[#allocation4 + $0x1b8] sm:$0xff]  ;;  %5150 = vmatpush.bf16.msra.mxu1 %v11332_v46  ;;  %v11334_v46 = vld [vmem:[#allocation4 + $0x148] sm:$0xff] }
 0x91c   : > { %v15223_v25 = vpop.xlane.xlu2 %3953  ;;  %5424 = vmatpush.bf16.msra.mxu0 %v11348_v13  ;;  %v11345_v13 = vld [vmem:[#allocation4 + $0x1a0] sm:$0xff] }
 0x91d   : > { %4028 = vadd.xlane.f32.xlu0 %v4027_v47  ;;  %5203 = vmatpush.bf16.msra.mxu3 %v11336_v22  ;;  %v11329_v47 = vld [vmem:[#allocation4 + $0x120] sm:$0xff] }
 0x91e   : > { %5477 = vmatpush.bf16.msra.mxu2 %v11352_v23  ;;  %v11333_v22 = vld [vmem:[#allocation4 + $0x140] sm:$0xff]  ;;  %v11328_v23 = vld [vmem:[#allocation4 + $0x118] sm:$0xff] }
 0x91f   : > { %5151 = vmatpush.bf16.msra.mxu1 %v11331_v12  ;;  %v11349_v12 = vld [vmem:[#allocation4 + $0x1c0] sm:$0xff] }
 0x920   : > { %5425 = vmatpush.bf16.msra.mxu0 %v11347_v27 }
 0x921   : > { %5204 = vmatpush.bf16.msra.mxu3 %v11335_v38  ;;  %v11344_v38 = vld [vmem:[#allocation4 + $0x198] sm:$0xff] }
 0x922   : > { %5478 = vmatpush.bf16.msra.mxu2 %v11351_v41  ;;  %v11343_v41 = vld [vmem:[#allocation4 + $0x190] sm:$0xff] }
 0x923   : > { %5152 = vmatpush.bf16.msra.mxu1 %v11330_v32  ;;  %v11327_v32 = vld [vmem:[#allocation4 + $0x110] sm:$0xff] }
 0x924   : > { %v15227_v35 = vpop.xlane.xlu2 %3998  ;;  %5426 = vmatpush.bf16.msra.mxu0 %v11346_v48  ;;  %v11326_v48 = vld [vmem:[#allocation4 + $0x108] sm:$0xff] }
 0x925   : > { %5205 = vmatpush.bf16.msra.mxu3 %v11334_v46 }
 0x926   : > { %5479 = vmatpush.bf16.msra.mxu2 %v11350_v1  ;;  %v11342_v1 = vld [vmem:[#allocation4 + $0x188] sm:$0xff] }
 0x927   : > { %5153 = vmatpush.bf16.msra.mxu1 %v11329_v47  ;;  %v11325_v47 = vld [vmem:[#allocation4 + $0x100] sm:$0xff] }
 0x928   : > { %5427 = vmatpush.bf16.msra.mxu0 %v11345_v13  ;;  %v11341_v13 = vld [vmem:[#allocation4 + $0x180] sm:$0xff] }
 0x929   : > { %5206 = vmatpush.bf16.msra.mxu3 %v11333_v22  ;;  %v17932_v22 = vld [vmem:[#allocation71_spill] sm:$0xff] }
 0x92a   : > { %5480 = vmatpush.bf16.msra.mxu2 %v11349_v12  ;;  %12481 = vrcp.f32 %v17932_v22  ;;  %v17936_v22 = vld [vmem:[#allocation33_spill] sm:$0xff] }
 0x92b   : > { %5154 = vmatpush.bf16.msra.mxu1 %v11328_v23  ;;  %12483 = vrcp.f32 %v15100_v52 }
 0x92c   : > { %5428 = vmatpush.bf16.msra.mxu0 %v11344_v38 }
 0x92d   : > { %v15229_v27 = vpop.xlane.xlu2 %3956 }
 0x92f   : > { %5155 = vmatpush.bf16.msra.mxu1 %v11327_v32 }
 0x930   : > { %5429 = vmatpush.bf16.msra.mxu0 %v11343_v41  ;;  %v12482_v38 = vpop.eup %12481 }
 0x931   : > { %v12484_v32 = vpop.eup %12483  ;;  %v4130_v43 = vmul.f32 %v12482_v38, %v17933_v7 }
 0x933   : > { %5156 = vmatpush.bf16.msra.mxu1 %v11326_v48  ;;  %v17934_v48 = vld [vmem:[#allocation31_spill] sm:$0xff] }
 0x934   : > { %5430 = vmatpush.bf16.msra.mxu0 %v11342_v1  ;;  %v4131_v1 = vmul.f32 %v12482_v38, %v17934_v48 }
 0x935   : > { %v15231_v46 = vpop.xlane.xlu2 %4001 }
 0x937   : > { %5157 = vmatpush.bf16.msra.mxu1 %v11325_v47  ;;  %v17935_v47 = vld [vmem:[#allocation61_spill] sm:$0xff] }
 0x938   : > { %5431 = vmatpush.bf16.msra.mxu0 %v11341_v13  ;;  %v4164_v44 = vmul.f32 %v12484_v32, %v17935_v47  ;;  %v4165_v13 = vmul.f32 %v12484_v32, %v17936_v22 }
 0x93a   : > { %v4263_v38 = vpack.c.bf16 %v4165_v13, %v4164_v44 }
 0x93d   : > { %v15235_v12 = vpop.xlane.xlu2 %4004  ;;  %v3891_v23 = vpop.xlane.xlu1 %3890 }
 0x93e   : > { %12485 = vrcp.f32 %v3891_v23 }
 0x940   : > { %v3936_v41 = vpop.xlane.xlu0 %3935 }
 0x941   : > { %12487 = vrcp.f32 %v3936_v41  ;;  %v4246_v41 = vpack.c.bf16 %v4131_v1, %v4130_v43  ;;  %v17937_v1 = vld [vmem:[#allocation45_spill] sm:$0xff] }
 0x942   : > { %12489 = vrcp.f32 %v15128_v30 }
 0x943   : > { %12491 = vrcp.f32 %v15070_v31  ;;  %v4467_v44 = vunpack.c.h.b16 %v4246_v41 }
 0x944   : > { %v12486_v52 = vpop.eup %12485  ;;  %12493 = vrcp.f32 %v15190_v17 }
 0x945   : > { %v15242_v0 = vpop.xlane.xlu2 %3959  ;;  %v4132_v18 = vmul.f32 %v12486_v52, %v14986_v50  ;;  %v4133_v23 = vmul.f32 %v12486_v52, %v14991_v5  ;;  %v3405_v10 = vpop.xlane.xlu1 %3404  ;;  %12495 = vrcp.f32 %v15150_v51 }
 0x946   : > { %v3552_v47 = vsub.f32 %v14719_v54, %v3405_v10 }
 0x947   : > { %v12488_v7 = vpop.eup %12487  ;;  %v4247_v58 = vpack.c.bf16 %v4133_v23, %v4132_v18  ;;  %v4466_v18 = vunpack.c.l.b16 %v4246_v41  ;;  %v4743_v23 = vunpack.c.h.b16 %v4263_v38 }
 0x948   : > { %v12490_v48 = vpop.eup %12489  ;;  %v4162_v30 = vmul.f32 %v12488_v7, %v14999_v37  ;;  %v4163_v32 = vmul.f32 %v12488_v7, %v15001_v55  ;;  %v3450_v22 = vpop.xlane.xlu0 %3449  ;;  %v4742_v55 = vunpack.c.l.b16 %v4263_v38  ;;  %v3553_v7 = vsub.f32 %v14733_v20, %v3405_v10  ;;  %v11249_v20 = vld [vmem:[%s17430_s11] sm:$0xff]  ;;  %v11250_v10 = vld [vmem:[%s17430_s11 + $0x8] sm:$0xff] }
 0x949   : > { %v3582_v50 = vsub.f32 %v14660_v42, %v3450_v22  ;;  %v3583_v5 = vsub.f32 %v14667_v34, %v3450_v22  ;;  %v4468_v52 = vunpack.c.l.b16 %v4247_v58  ;;  %v4469_v31 = vunpack.c.h.b16 %v4247_v58  ;;  %v12492_v54 = vpop.eup %12491  ;;  %5663 = vmatpush.bf16.msrb.mxu1 %v11249_v20  ;;  %5782 = vmatpush.bf16.msrb.mxu3 %v11250_v10 }
 0x94a   : > { %v4262_v43 = vpack.c.bf16 %v4163_v32, %v4162_v30  ;;  %v4136_v17 = vmul.f32 %v12490_v48, %v17937_v1  ;;  %v3766_v22 = vmul.f32 1.442695, %v3552_v47  ;;  %v12494_v41 = vpop.eup %12493  ;;  %v17938_v30 = vld [vmem:[#allocation46_spill] sm:$0xff] }
 0x94b   : > { %v3826_v13 = vmul.f32 1.442695, %v3582_v50  ;;  %v3828_v42 = vmul.f32 1.442695, %v3583_v5  ;;  %v4486_v61 = vpack.c.b16 %v4468_v52, %v4466_v18  ;;  %v4487_v34 = vpack.c.b16 %v4469_v31, %v4467_v44  ;;  %v17939_v47 = vld [vmem:[#allocation62_spill] sm:$0xff] }
 0x94c   : > { %v4740_v51 = vunpack.c.l.b16 %v4262_v43  ;;  %v4741_v2 = vunpack.c.h.b16 %v4262_v43  ;;  %v4137_v32 = vmul.f32 %v12490_v48, %v17938_v30  ;;  %v4134_v5 = vmul.f32 %v12492_v54, %v17939_v47  ;;  %v12496_v48 = vpop.eup %12495 }
 0x94d   : > { %v15255_v37 = vpop.xlane.xlu2 %4010  ;;  %12497 = vpow2.f32 %v3826_v13  ;;  %v3456_v58 = vpop.xlane.xlu1 %3455  ;;  %4640 = vmatmul.bf16.gmra.mxu1 %v4486_v61  ;;  %4689 = vmatmul.bf16.gmra.mxu3 %v4487_v34  ;;  %v3768_v61 = vmul.f32 1.442695, %v3553_v7  ;;  %v17942_v7 = vld [vmem:[#allocation75_spill] sm:$0xff] }
 0x94e   : > { %12499 = vpow2.f32 %v3828_v42  ;;  %v3586_v50 = vsub.f32 %v14689_v60, %v3456_v58  ;;  %v3587_v38 = vsub.f32 %v14697_v6, %v3456_v58  ;;  %v4760_v52 = vpack.c.b16 %v4742_v55, %v4740_v51  ;;  %v17940_v6 = vld [vmem:[#allocation43_spill] sm:$0xff]  ;;  %v17941_v55 = vld [vmem:[#allocation74_spill] sm:$0xff]  ;;  %v17944_v58 = vld [vmem:[#allocation48_spill] sm:$0xff] }
 0x94f   : > { %v4761_v31 = vpack.c.b16 %v4743_v23, %v4741_v2  ;;  %12501 = vrcp.f32 %v15204_v62  ;;  %v4135_v43 = vmul.f32 %v12492_v54, %v17940_v6  ;;  %v11251_v2 = vld [vmem:[%s17430_s11 + $0x10] sm:$0xff]  ;;  %v11252_v62 = vld [vmem:[%s17430_s11 + $0x18] sm:$0xff]  ;;  %v4168_v23 = vmul.f32 %v12494_v41, %v17941_v55 }
 0x950   : > { %v3834_v18 = vmul.f32 1.442695, %v3586_v50  ;;  %v3836_v60 = vmul.f32 1.442695, %v3587_v38  ;;  %v3402_v44 = vpop.xlane.xlu0 %3401  ;;  %12503 = vpow2.f32 %v3766_v22  ;;  %4914 = vmatmul.bf16.gmra.mxu0 %v4760_v52  ;;  %v4169_v42 = vmul.f32 %v12494_v41, %v17942_v7  ;;  %v17943_v22 = vld [vmem:[#allocation37_spill] sm:$0xff]  ;;  %6020 = vmatpush.bf16.msrb.mxu2 %v11252_v62 }
 0x951   : > { %4963 = vmatmul.bf16.gmra.mxu2 %v4761_v31  ;;  %v3550_v1 = vsub.f32 %v14701_v26, %v3402_v44  ;;  %v3551_v13 = vsub.f32 %v14713_v57, %v3402_v44  ;;  %v4249_v54 = vpack.c.bf16 %v4137_v32, %v4136_v17  ;;  %v4166_v26 = vmul.f32 %v12496_v48, %v17943_v22 }
 0x952   : > { %12505 = vpow2.f32 %v3834_v18  ;;  %v4167_v57 = vmul.f32 %v12496_v48, %v17944_v58  ;;  %5901 = vmatpush.bf16.msrb.mxu0 %v11251_v2  ;;  %v4248_v10 = vpack.c.bf16 %v4135_v43, %v4134_v5  ;;  %v4265_v52 = vpack.c.bf16 %v4169_v42, %v4168_v23 }
 0x953   : > { %v15280_v34 = vpop.eup %12497  ;;  %12507 = vpow2.f32 %v3836_v60  ;;  %v3762_v51 = vmul.f32 1.442695, %v3550_v1  ;;  %v3764_v38 = vmul.f32 1.442695, %v3551_v13  ;;  %v4473_v18 = vunpack.c.h.b16 %v4249_v54 }
 0x954   : > { %v15284_v50 = vpop.eup %12499  ;;  %12509 = vpow2.f32 %v3768_v61  ;;  %v4472_v61 = vunpack.c.l.b16 %v4249_v54  ;;  %v4264_v44 = vpack.c.bf16 %v4167_v57, %v4166_v26  ;;  %v4470_v5 = vunpack.c.l.b16 %v4248_v10 }
 0x955   : > { %v3459_v30 = vpop.xlane.xlu2 %3458  ;;  %12511 = vpow2.f32 %v3762_v51  ;;  %v15288_v17 = vpop.xlane.xlu1 %3965  ;;  %v4024_v32 = vadd.f32 %v15284_v50, %v15280_v34  ;;  %v4471_v43 = vunpack.c.h.b16 %v4248_v10  ;;  %v4746_v2 = vunpack.c.l.b16 %v4265_v52 }
 0x956   : > { %v3588_v20 = vsub.f32 %v14707_v28, %v3459_v30  ;;  %v3589_v41 = vsub.f32 %v14717_v33, %v3459_v30  ;;  %v12502_v47 = vpop.eup %12501  ;;  %12513 = vpow2.f32 %v3764_v38  ;;  %v4488_v55 = vpack.c.b16 %v4472_v61, %v4470_v5 }
 0x957   : > { %v15292_v31 = vpop.eup %12503  ;;  %4025 = vadd.xlane.f32.xlu2 %v4024_v32  ;;  %12515 = vrcp.f32 %v15172_v4  ;;  %v4489_v23 = vpack.c.b16 %v4473_v18, %v4471_v43  ;;  %v4747_v7 = vunpack.c.h.b16 %v4265_v52  ;;  %v4745_v57 = vunpack.c.h.b16 %v4264_v44  ;;  %v17946_v32 = vld [vmem:[#allocation76_spill] sm:$0xff]  ;;  %v17948_v43 = vld [vmem:[#allocation73_spill] sm:$0xff] }
 0x958   : > { %v3838_v48 = vmul.f32 1.442695, %v3588_v20  ;;  %v15294_v60 = vpop.eup %12505  ;;  %v3840_v28 = vmul.f32 1.442695, %v3589_v41  ;;  %v15297_v33 = vpop.xlane.xlu0 %3962  ;;  %12517 = vrcp.f32 %v15214_v19  ;;  %v17945_v41 = vld [vmem:[#allocation38_spill] sm:$0xff]  ;;  %v4173_v10 = vmul.f32 %v12502_v47, %v17946_v32 }
 0x959   : > { %v15299_v6 = vpop.eup %12507  ;;  %12519 = vrcp.f32 %v15227_v35  ;;  %v4744_v35 = vunpack.c.l.b16 %v4264_v44  ;;  %v4763_v52 = vpack.c.b16 %v4747_v7, %v4745_v57  ;;  %v17947_v44 = vld [vmem:[#allocation50_spill] sm:$0xff] }
 0x95a   : > { %v15302_v1 = vpop.eup %12509  ;;  %v4030_v13 = vadd.f32 %v15299_v6, %v15294_v60  ;;  %12521 = vpow2.f32 %v3838_v48 }
 0x95b   : > { %v15307_v62 = vpop.eup %12511  ;;  %12523 = vpow2.f32 %v3840_v28  ;;  %v3979_v58 = vadd.f32 %v15302_v1, %v15292_v31  ;;  %v4762_v20 = vpack.c.b16 %v4746_v2, %v4744_v35  ;;  %v17952_v35 = vld [vmem:[#allocation80_spill] sm:$0xff] }
 0x95c   : > { %v15309_v42 = vpop.eup %12513  ;;  %4031 = vadd.xlane.f32.xlu0 %v4030_v13 }
 0x95d   : > { %v3408_v4 = vpop.xlane.xlu2 %3407  ;;  %v15313_v22 = vpop.xlane.xlu1 %4016  ;;  %v3976_v26 = vadd.f32 %v15309_v42, %v15307_v62  ;;  %4645 = vmatmul.bf16.gmra.mxu1 %v4488_v55  ;;  %4694 = vmatmul.bf16.gmra.mxu3 %v4489_v23  ;;  %v17950_v55 = vld [vmem:[#allocation86_spill] sm:$0xff] }
 0x95e   : > { %v3554_v19 = vsub.f32 %v14743_v29, %v3408_v4  ;;  %v3555_v54 = vsub.f32 %v14757_v59, %v3408_v4  ;;  %v12516_v51 = vpop.eup %12515  ;;  %v4172_v59 = vmul.f32 %v12502_v47, %v17945_v41  ;;  %v17949_v47 = vld [vmem:[#allocation84_spill] sm:$0xff] }
 0x95f   : > { %v12518_v29 = vpop.eup %12517  ;;  %3977 = vadd.xlane.f32.xlu1 %v3976_v26  ;;  %3980 = vadd.xlane.f32.xlu2 %v3979_v58  ;;  %v4170_v5 = vmul.f32 %v12516_v51, %v17947_v44  ;;  %v4171_v13 = vmul.f32 %v12516_v51, %v17948_v43 }
 0x960   : > { %v3770_v30 = vmul.f32 1.442695, %v3554_v19  ;;  %v3772_v38 = vmul.f32 1.442695, %v3555_v54  ;;  %v12520_v48 = vpop.eup %12519  ;;  %v15321_v61 = vpop.xlane.xlu0 %4007  ;;  %4919 = vmatmul.bf16.gmra.mxu0 %v4762_v20  ;;  %v4267_v2 = vpack.c.bf16 %v4173_v10, %v4172_v59  ;;  %v17951_v19 = vld [vmem:[#allocation78_spill] sm:$0xff]  ;;  %v4203_v26 = vmul.f32 %v12518_v29, %v17952_v35 }
 0x961   : > { %v15323_v18 = vpop.eup %12521  ;;  %4968 = vmatmul.bf16.gmra.mxu2 %v4763_v52  ;;  %v4204_v4 = vmul.f32 %v12520_v48, %v17949_v47  ;;  %v4205_v23 = vmul.f32 %v12520_v48, %v17950_v55  ;;  %v4202_v54 = vmul.f32 %v12518_v29, %v17951_v19  ;;  %v11390_v29 = vld [vmem:[#allocation3 + $0x4] sm:$0xf0]  ;;  %v11392_v19 = vld [vmem:[#allocation3 + $0x14] sm:$0xf0] }
 0x962   : > { %12525 = vpow2.f32 %v3770_v30  ;;  %v15325_v28 = vpop.eup %12523  ;;  %v4992_v59 = vunpack.c.l.b16 %v4267_v2  ;;  %v4993_v32 = vunpack.c.h.b16 %v4267_v2 }
 0x963   : > { %12527 = vpow2.f32 %v3772_v38  ;;  %v4033_v57 = vadd.f32 %v15325_v28, %v15323_v18  ;;  %v4266_v38 = vpack.c.bf16 %v4171_v13, %v4170_v5  ;;  %v4283_v10 = vpack.c.bf16 %v4205_v23, %v4204_v4  ;;  %v10737_v13 = vld [vmem:[#allocation3] sm:$0xf] }
 0x964   : > { %12529 = vrcp.f32 %v15229_v27  ;;  %v10738_v47 = vor.u32 %v11390_v29, %v10737_v13 }
 0x965   : > { %v15331_v7 = vpop.xlane.xlu2 %3968  ;;  %v3465_v58 = vpop.xlane.xlu1 %3464  ;;  %12531 = vrcp.f32 %v15223_v25  ;;  %v4990_v2 = vunpack.c.l.b16 %v4266_v38  ;;  %v4991_v27 = vunpack.c.h.b16 %v4266_v38  ;;  %v10739_v25 = vld [vmem:[#allocation3 + $0x8] sm:$0xf0]  ;;  %v5266_v4 = vunpack.c.l.b16 %v4283_v10 }
 0x966   : > { %v3592_v51 = vsub.f32 %v17905_v63, %v3465_v58  ;;  %v3593_v20 = vsub.f32 %v17904_v53, %v3465_v58  ;;  %v4282_v63 = vpack.c.bf16 %v4203_v26, %v4202_v54  ;;  %12533 = vrcp.f32 %v15235_v12  ;;  %v10795_v26 = vld [vmem:[#allocation3 + $0x18] sm:$0xf0] }
 0x967   : > { %4034 = vadd.xlane.f32.xlu1 %v4033_v57  ;;  %v5267_v55 = vunpack.c.h.b16 %v4283_v10  ;;  %v5022_v12 = vpack.c.b16 %v4992_v59, %v4990_v2  ;;  %v5023_v35 = vpack.c.b16 %v4993_v32, %v4991_v27  ;;  %v17954_v2 = vld [vmem:[#allocation90_spill] sm:$0xff] }
 0x968   : > { %v15337_v30 = vpop.eup %12525  ;;  %v3846_v52 = vmul.f32 1.442695, %v3592_v51  ;;  %v3848_v48 = vmul.f32 1.442695, %v3593_v20  ;;  %v3411_v44 = vpop.xlane.xlu0 %3410  ;;  %v5264_v58 = vunpack.c.l.b16 %v4282_v63  ;;  %v5265_v57 = vunpack.c.h.b16 %v4282_v63  ;;  %v10793_v20 = vld [vmem:[#allocation3 + $0x10] sm:$0xf] }
 0x969   : > { %v15341_v41 = vpop.eup %12527  ;;  %v3556_v53 = vsub.f32 %v17909_v45, %v3411_v44  ;;  %v3557_v43 = vsub.f32 %v17908_v56, %v3411_v44  ;;  %v11389_v45 = vld [vmem:[#allocation3 + $0x4] sm:$0xf]  ;;  %v10794_v32 = vor.u32 %v11392_v19, %v10793_v20 }
 0x96a   : > { %v3982_v5 = vadd.f32 %v15341_v41, %v15337_v30  ;;  %12535 = vpow2.f32 %v3846_v52  ;;  %v12530_v56 = vpop.eup %12529  ;;  %v10742_v38 = vor.u32 %v11389_v45, %v10739_v25  ;;  %v11391_v52 = vld [vmem:[#allocation3 + $0x14] sm:$0xf]  ;;  %v5296_v44 = vpack.c.b16 %v5266_v4, %v5264_v58 }
 0x96b   : > { %12537 = vpow2.f32 %v3848_v48  ;;  %v3774_v23 = vmul.f32 1.442695, %v3556_v53  ;;  %v3776_v54 = vmul.f32 1.442695, %v3557_v43  ;;  %v12532_v29 = vpop.eup %12531  ;;  %v10798_v63 = vor.u32 %v11391_v52, %v10795_v26  ;;  %v17953_v43 = vld [vmem:[#allocation67_spill] sm:$0xff] }
 0x96c   : > { %3983 = vadd.xlane.f32.xlu2 %v3982_v5  ;;  %12539 = vrcp.f32 %v15231_v46  ;;  %v12534_v48 = vpop.eup %12533  ;;  %v5297_v5 = vpack.c.b16 %v5267_v55, %v5265_v57  ;;  %v4176_v13 = vmul.f32 %v12530_v56, %v17953_v43  ;;  %v4177_v27 = vmul.f32 %v12530_v56, %v17954_v2 }
 0x96d   : > { %12541 = vpow2.f32 %v3774_v23  ;;  %v3414_v51 = vpop.xlane.xlu1 %3413  ;;  %v15351_v10 = vpop.xlane.xlu2 %4019  ;;  %5158 = vmatmul.bf16.vlgmr.msra.gmra.mxu1 %v5022_v12  ;;  %5207 = vmatmul.bf16.vlgmr.msra.gmra.mxu3 %v5023_v35  ;;  %v17956_v12 = vld [vmem:[#allocation82_spill] sm:$0xff]  ;;  %v4208_v55 = vmul.f32 %v12534_v48, %v14975_v15  ;;  %v4209_v35 = vmul.f32 %v12534_v48, %v14977_v11 }
 0x96e   : > { %12543 = vpow2.f32 %v3776_v54  ;;  %v3558_v46 = vsub.f32 %v17912_v8, %v3414_v51  ;;  %v3559_v59 = vsub.f32 %v17911_v49, %v3414_v51  ;;  %6432 = vmatpush.bf16.msra.mxu1 %v10738_v47  ;;  %6481 = vmatpush.bf16.msra.mxu3 %v10742_v38  ;;  %v17955_v49 = vld [vmem:[#allocation56_spill] sm:$0xff]  ;;  %v4175_v47 = vmul.f32 %v12532_v29, %v17956_v12 }
 0x96f   : > { %v4174_v19 = vmul.f32 %v12532_v29, %v17955_v49  ;;  %v4269_v58 = vpack.c.bf16 %v4177_v27, %v4176_v13  ;;  %v4285_v51 = vpack.c.bf16 %v4209_v35, %v4208_v55 }
 0x970   : > { %v15355_v53 = vpop.eup %12535  ;;  %v3778_v25 = vmul.f32 1.442695, %v3558_v46  ;;  %v3780_v23 = vmul.f32 1.442695, %v3559_v59  ;;  %v15359_v54 = vpop.xlane.xlu0 %4013  ;;  %5432 = vmatmul.bf16.vlgmr.msra.gmra.mxu0 %v5296_v44 }
 0x971   : > { %v15361_v8 = vpop.eup %12537  ;;  %5481 = vmatmul.bf16.vlgmr.msra.gmra.mxu2 %v5297_v5  ;;  %6604 = vmatpush.bf16.msra.mxu0 %v10794_v32  ;;  %v4268_v11 = vpack.c.bf16 %v4175_v47, %v4174_v19  ;;  %v4996_v46 = vunpack.c.l.b16 %v4269_v58  ;;  %v4997_v59 = vunpack.c.h.b16 %v4269_v58  ;;  %v5270_v5 = vunpack.c.l.b16 %v4285_v51 }
 0x972   : > { %v12540_v4 = vpop.eup %12539  ;;  %6653 = vmatpush.bf16.msra.mxu2 %v10798_v63  ;;  %v4039_v45 = vadd.f32 %v15361_v8, %v15355_v53  ;;  %12545 = vpow2.f32 %v3778_v25  ;;  %v5271_v2 = vunpack.c.h.b16 %v4285_v51 }
 0x973   : > { %v15369_v26 = vpop.eup %12541  ;;  %12547 = vpow2.f32 %v3780_v23  ;;  %v4206_v57 = vmul.f32 %v12540_v4, %v14953_v9  ;;  %v4207_v38 = vmul.f32 %v12540_v4, %v14957_v36  ;;  %v4994_v44 = vunpack.c.l.b16 %v4268_v11 }
 0x974   : > { %v15371_v56 = vpop.eup %12543  ;;  %4040 = vadd.xlane.f32.xlu2 %v4039_v45  ;;  %12549 = vrcp.f32 %v15297_v33  ;;  %v4995_v33 = vunpack.c.h.b16 %v4268_v11  ;;  %v17957_v45 = vld [vmem:[#allocation92_spill] sm:$0xff]  ;;  %v17959_v11 = vld [vmem:[#allocation106_spill] sm:$0xff] }
 0x975   : > { %v3985_v15 = vadd.f32 %v15371_v56, %v15369_v26  ;;  %v3417_v20 = vpop.xlane.xlu2 %3416  ;;  %12551 = vrcp.f32 %v15242_v0  ;;  %v4284_v52 = vpack.c.bf16 %v4207_v38, %v4206_v57  ;;  %v17958_v38 = vld [vmem:[#allocation105_spill] sm:$0xff] }
 0x976   : > { %12553 = vrcp.f32 %v15321_v61  ;;  %v3560_v63 = vsub.f32 %v17919_v16, %v3417_v20  ;;  %v3561_v0 = vsub.f32 %v17918_v3, %v3417_v20  ;;  %v5025_v27 = vpack.c.b16 %v4997_v59, %v4995_v33 }
 0x977   : > { %3986 = vadd.xlane.f32.xlu0 %v3985_v15  ;;  %12555 = vrcp.f32 %v15255_v37  ;;  %v5268_v61 = vunpack.c.l.b16 %v4284_v52  ;;  %v5269_v23 = vunpack.c.h.b16 %v4284_v52 }
 0x978   : > { %v3462_v29 = vpop.xlane.xlu0 %3461  ;;  %v15378_v32 = vpop.eup %12545  ;;  %v3782_v49 = vmul.f32 1.442695, %v3560_v63  ;;  %v3784_v4 = vmul.f32 1.442695, %v3561_v0 }
 0x979   : > { %v3590_v9 = vsub.f32 %v17923_v21, %v3462_v29  ;;  %v3591_v36 = vsub.f32 %v17922_v24, %v3462_v29  ;;  %v15383_v48 = vpop.eup %12547  ;;  %v5024_v21 = vpack.c.b16 %v4996_v46, %v4994_v44  ;;  %v5298_v19 = vpack.c.b16 %v5270_v5, %v5268_v61  ;;  %v17961_v46 = vld [vmem:[#allocation94_spill] sm:$0xff] }
 0x97a   : > { %v12550_v24 = vpop.eup %12549  ;;  %v3988_v25 = vadd.f32 %v15383_v48, %v15378_v32  ;;  %v5299_v12 = vpack.c.b16 %v5271_v2, %v5269_v23 }
 0x97b   : > { %v3842_v43 = vmul.f32 1.442695, %v3590_v9  ;;  %v3844_v13 = vmul.f32 1.442695, %v3591_v36  ;;  %v12552_v16 = vpop.eup %12551  ;;  %v4180_v3 = vmul.f32 %v12550_v24, %v15065_v40  ;;  %v4181_v47 = vmul.f32 %v12550_v24, %v15080_v39  ;;  %v17960_v39 = vld [vmem:[#allocation93_spill] sm:$0xff] }
 0x97c   : > { %v12554_v37 = vpop.eup %12553  ;;  %v4178_v35 = vmul.f32 %v12552_v16, %v15007_v14  ;;  %v4179_v58 = vmul.f32 %v12552_v16, %v17957_v45  ;;  %v17966_v45 = vld [vmem:[#allocation72_spill] sm:$0xff] }
 0x97d   : > { %12557 = vpow2.f32 %v3842_v43  ;;  %5163 = vmatmul.bf16.gmra.mxu1 %v5024_v21  ;;  %5212 = vmatmul.bf16.gmra.mxu3 %v5025_v27  ;;  %v12556_v55 = vpop.eup %12555  ;;  %v4210_v15 = vmul.f32 %v12554_v37, %v17958_v38  ;;  %v4211_v51 = vmul.f32 %v12554_v37, %v17959_v11  ;;  %v4271_v40 = vpack.c.bf16 %v4181_v47, %v4180_v3  ;;  %v17963_v37 = vld [vmem:[#allocation32_spill] sm:$0xff]  ;;  %v17964_v47 = vld [vmem:[#allocation98_spill] sm:$0xff] }
 0x97e   : > { %12559 = vpow2.f32 %v3844_v13  ;;  %v4212_v29 = vmul.f32 %v12556_v55, %v17960_v39  ;;  %v4213_v59 = vmul.f32 %v12556_v55, %v17961_v46  ;;  %v4270_v9 = vpack.c.bf16 %v4179_v58, %v4178_v35  ;;  %v17965_v55 = vld [vmem:[#allocation99_spill] sm:$0xff]  ;;  %v17967_v38 = vld [vmem:[#allocation44_spill] sm:$0xff] }
 0x97f   : > { %3989 = vadd.xlane.f32.xlu0 %v3988_v25  ;;  %12561 = vpow2.f32 %v3782_v49  ;;  %v4286_v36 = vpack.c.bf16 %v4211_v51, %v4210_v15  ;;  %v5000_v52 = vunpack.c.l.b16 %v4271_v40  ;;  %v5001_v44 = vunpack.c.h.b16 %v4271_v40  ;;  %v17968_v40 = vld [vmem:[#allocation102_spill] sm:$0xff] }
 0x980   : > { %5437 = vmatmul.bf16.gmra.mxu0 %v5298_v19  ;;  %12563 = vpow2.f32 %v3784_v4  ;;  %v4287_v5 = vpack.c.bf16 %v4213_v59, %v4212_v29  ;;  %v4023_v43 = vpop.xlane.xlu0 %4022  ;;  %v4998_v13 = vunpack.c.l.b16 %v4270_v9  ;;  %v4999_v2 = vunpack.c.h.b16 %v4270_v9  ;;  %v17962_v19 = vld [vmem:[#allocation108_spill] sm:$0xff]  ;;  %v3975_v59 = vpop.xlane.xlu1 %3974 }
 0x981   : > { %5486 = vmatmul.bf16.gmra.mxu2 %v5299_v12  ;;  %12565 = vrcp.f32 %v15331_v7  ;;  %v5272_v0 = vunpack.c.l.b16 %v4286_v36  ;;  %v5273_v21 = vunpack.c.h.b16 %v4286_v36  ;;  %v17969_v29 = vld [vmem:[#allocation104_spill] sm:$0xff] }
 0x982   : > { %12567 = vrcp.f32 %v15288_v17  ;;  %v5026_v7 = vpack.c.b16 %v5000_v52, %v4998_v13  ;;  %v5027_v27 = vpack.c.b16 %v5001_v44, %v4999_v2  ;;  %v5274_v61 = vunpack.c.l.b16 %v4287_v5 }
 0x983   : > { %v15395_v57 = vpop.eup %12557  ;;  %12569 = vrcp.f32 %v15359_v54  ;;  %v5275_v17 = vunpack.c.h.b16 %v4287_v5 }
 0x984   : > { %v15399_v20 = vpop.eup %12559  ;;  %12571 = vrcp.f32 %v15313_v22  ;;  %v5300_v54 = vpack.c.b16 %v5274_v61, %v5272_v0 }
 0x985   : > { %v4036_v14 = vadd.f32 %v15399_v20, %v15395_v57  ;;  %v15406_v33 = vpop.eup %12561  ;;  %v5301_v16 = vpack.c.b16 %v5275_v17, %v5273_v21 }
 0x986   : > { %v15409_v63 = vpop.eup %12563 }
 0x987   : > { %4037 = vadd.xlane.f32.xlu1 %v4036_v14  ;;  %v12566_v24 = vpop.eup %12565  ;;  %v3991_v25 = vadd.f32 %v15409_v63, %v15406_v33 }
 0x988   : > { %v12568_v23 = vpop.eup %12567  ;;  %v4184_v12 = vmul.f32 %v12566_v24, %v17962_v19  ;;  %v4185_v3 = vmul.f32 %v12566_v24, %v17963_v37  ;;  %v3972_v11 = vpop.xlane.xlu0 %3971  ;;  %v17970_v24 = vld [vmem:[#allocation25_spill] sm:$0xff] }
 0x989   : > { %v12570_v49 = vpop.eup %12569  ;;  %v4182_v4 = vmul.f32 %v12568_v23, %v17964_v47  ;;  %v4183_v35 = vmul.f32 %v12568_v23, %v17965_v55  ;;  %12573 = vrcp.f32 %v3972_v11  ;;  %v17978_v55 = vld [vmem:[#allocation24_spill] sm:$0xff] }
 0x98a   : > { %v12572_v22 = vpop.eup %12571  ;;  %v4214_v58 = vmul.f32 %v12570_v49, %v17966_v45  ;;  %v4215_v15 = vmul.f32 %v12570_v49, %v17967_v38  ;;  %v4273_v51 = vpack.c.bf16 %v4185_v3, %v4184_v12  ;;  %12575 = vrcp.f32 %v3975_v59  ;;  %v17975_v3 = vld [vmem:[#allocation21_spill] sm:$0xff] }
 0x98b   : > { %v4216_v39 = vmul.f32 %v12572_v22, %v17968_v40  ;;  %v4217_v46 = vmul.f32 %v12572_v22, %v17969_v29  ;;  %v4272_v14 = vpack.c.bf16 %v4183_v35, %v4182_v4  ;;  %12577 = vrcp.f32 %v4023_v43  ;;  %v17974_v43 = vld [vmem:[#allocation22_spill] sm:$0xff]  ;;  %v17976_v22 = vld [vmem:[#allocation17_spill] sm:$0xff]  ;;  %v17982_v29 = vld [vmem:[#allocation52_spill] sm:$0xff] }
 0x98c   : > { %v4288_v9 = vpack.c.bf16 %v4215_v15, %v4214_v58  ;;  %v5004_v36 = vunpack.c.l.b16 %v4273_v51  ;;  %v5005_v52 = vunpack.c.h.b16 %v4273_v51  ;;  %12579 = vrcp.f32 %v15351_v10  ;;  %v17977_v4 = vld [vmem:[#allocation18_spill] sm:$0xff]  ;;  %v17979_v58 = vld [vmem:[#allocation64_spill] sm:$0xff]  ;;  %v17981_v40 = vld [vmem:[#allocation57_spill] sm:$0xff] }
 0x98d   : > { %5168 = vmatmul.bf16.gmra.mxu1 %v5026_v7  ;;  %5217 = vmatmul.bf16.gmra.mxu3 %v5027_v27  ;;  %v4289_v44 = vpack.c.bf16 %v4217_v46, %v4216_v39  ;;  %v5002_v5 = vunpack.c.l.b16 %v4272_v14  ;;  %v5003_v13 = vunpack.c.h.b16 %v4272_v14  ;;  %v1313_v35 = vadd.f32 %v17978_v55, %v17977_v4  ;;  %v17980_v15 = vld [vmem:[#allocation34_spill] sm:$0xff]  ;;  %v17983_v14 = vld [vmem:[#allocation20_spill] sm:$0xff]  ;;  %v17986_v55 = vld [vmem:[#allocation49_spill] sm:$0xff] }
 0x98e   : > { %v5276_v2 = vunpack.c.l.b16 %v4288_v9  ;;  %v5277_v0 = vunpack.c.h.b16 %v4288_v9 }
 0x98f   : > { %3992 = vadd.xlane.f32.xlu1 %v3991_v25  ;;  %v5028_v21 = vpack.c.b16 %v5004_v36, %v5002_v5  ;;  %v5029_v7 = vpack.c.b16 %v5005_v52, %v5003_v13  ;;  %v12574_v27 = vpop.eup %12573  ;;  %v17971_v25 = vld [vmem:[#allocation26_spill] sm:$0xff]  ;;  %v5278_v17 = vunpack.c.l.b16 %v4289_v44  ;;  %v5279_v23 = vunpack.c.h.b16 %v4289_v44  ;;  %v17984_v36 = vld [vmem:[#allocation27_spill] sm:$0xff] }
 0x990   : > { %5442 = vmatmul.bf16.gmra.mxu0 %v5300_v54  ;;  %v17972_v61 = vpack.i.bf16 %v17970_v24, %v17971_v25  ;;  %v12576_v54 = vpop.eup %12575  ;;  %v4186_v10 = vmul.f32 %v12574_v27, %v17975_v3  ;;  %v4187_v47 = vmul.f32 %v12574_v27, %v17976_v22  ;;  %v15445_v22 = vpop.f32.mrf.mxu2 }
 0x991   : > { %5491 = vmatmul.bf16.gmra.mxu2 %v5301_v16  ;;  %v17973_v16 = vld [vmem:[#allocation19_spill] sm:$0xff]  ;;  %v5302_v19 = vpack.c.b16 %v5278_v17, %v5276_v2  ;;  %v5303_v12 = vpack.c.b16 %v5279_v23, %v5277_v0  ;;  %v12578_v37 = vpop.eup %12577  ;;  %v4188_v38 = vmul.f32 %v12576_v54, %v17979_v58  ;;  %v4189_v11 = vmul.f32 %v12576_v54, %v17980_v15 }
 0x992   : > { %v1318_v49 = vadd.f32 %v17974_v43, %v17973_v16  ;;  %v12580_v45 = vpop.eup %12579  ;;  %v4220_v39 = vmul.f32 %v12578_v37, %v17981_v40  ;;  %v4221_v46 = vmul.f32 %v12578_v37, %v17982_v29  ;;  %v4274_v59 = vpack.c.bf16 %v4187_v47, %v4186_v10  ;;  %v4029_v43 = vpop.xlane.xlu0 %4028  ;;  %v17985_v47 = vld [vmem:[#allocation59_spill] sm:$0xff] }
 0x993   : > { %v4218_v9 = vmul.f32 %v12580_v45, %v17983_v14  ;;  %v4219_v52 = vmul.f32 %v12580_v45, %v17984_v36  ;;  %v4275_v44 = vpack.c.bf16 %v4189_v11, %v4188_v38  ;;  %12581 = vrcp.f32 %v4029_v43 }
 0x994   : > { %v12123_v51 = vpack.i.bf16 %v1313_v35, %v1318_v49  ;;  %v4291_v5 = vpack.c.bf16 %v4221_v46, %v4220_v39  ;;  %v5006_v13 = vunpack.c.l.b16 %v4274_v59  ;;  %v5007_v2 = vunpack.c.h.b16 %v4274_v59  ;;  %v15439_v49 = vpop.f32.mrf.mxu1 }
 0x995   : > { %v4290_v0 = vpack.c.bf16 %v4219_v52, %v4218_v9 }
 0x996   : > { %v5282_v27 = vunpack.c.l.b16 %v4291_v5  ;;  %v5283_v24 = vunpack.c.h.b16 %v4291_v5 }
 0x997   : > { %v5280_v17 = vunpack.c.l.b16 %v4290_v0  ;;  %v5281_v23 = vunpack.c.h.b16 %v4290_v0 }
 0x999   : > { %v5304_v54 = vpack.c.b16 %v5282_v27, %v5280_v17  ;;  %v5305_v16 = vpack.c.b16 %v5283_v24, %v5281_v23  ;;  %v12582_v3 = vpop.eup %12581 }
 0x99a   : > { %v4224_v4 = vmul.f32 %v12582_v3, %v17985_v47  ;;  %v4225_v35 = vmul.f32 %v12582_v3, %v17986_v55 }
 0x99c   : > { %v4293_v46 = vpack.c.bf16 %v4225_v35, %v4224_v4 }
 0x99d   : > { %12122 = vxpose.xlu2.b32.start [1/2] (short) %v17972_v61, 128  ;;  %5173 = vmatmul.bf16.gmra.mxu1 %v5028_v21  ;;  %v5008_v21 = vunpack.c.l.b16 %v4275_v44 }
 0x99e   : > { %5222 = vmatmul.bf16.gmra.mxu3 %v5029_v7  ;;  %v5009_v7 = vunpack.c.h.b16 %v4275_v44 }
 0x99f   : > { %v5030_v25 = vpack.c.b16 %v5008_v21, %v5006_v13 }
 0x9a0   : > { %5447 = vmatmul.bf16.gmra.mxu0 %v5302_v19  ;;  %v5031_v61 = vpack.c.b16 %v5009_v7, %v5007_v2  ;;  %v15441_v19 = vpop.f32.mrf.mxu0 }
 0x9a1   : > { %5496 = vmatmul.bf16.gmra.mxu2 %v5303_v12  ;;  %v15443_v12 = vpop.f32.mrf.mxu3 }
 0x9a5   : > { %12124 = vxpose.xlu2.b32.end [2/2] (short) %v12123_v51, 128 }
 0x9ad   : > { %5178 = vmatmul.bf16.gmra.mxu1 %v5030_v25 }
 0x9ae   : > { %5227 = vmatmul.bf16.gmra.mxu3 %v5031_v61 }
 0x9b0   : > { %5452 = vmatmul.bf16.gmra.mxu0 %v5304_v54 }
 0x9b1   : > { %5501 = vmatmul.bf16.gmra.mxu2 %v5305_v16 }
 0x9ca   : > { %v4026_v37 = vpop.xlane.xlu2 %4025  ;;  %v4641_v10 = vpop.f32.mrf.mxu1 }
 0x9cb   : > { %12583 = vrcp.f32 %v4026_v37 }
 0x9cd   : > { %v4915_v45 = vpop.f32.mrf.mxu0 }
 0x9cf   : > { %v4032_v38 = vpop.xlane.xlu0 %4031 }
 0x9d0   : > { %v4690_v15 = vpop.f32.mrf.mxu3 }
 0x9d1   : > { %v12584_v58 = vpop.eup %12583  ;;  %v15451_v39 = vadd.f32 %v4690_v15, %v4641_v10 }
 0x9d2   : > { %v4222_v11 = vmul.f32 %v12584_v58, %v15280_v34  ;;  %v4223_v51 = vmul.f32 %v12584_v58, %v15284_v50  ;;  %v3978_v40 = vpop.xlane.xlu1 %3977  ;;  %v3981_v29 = vpop.xlane.xlu2 %3980  ;;  %v5286_v34 = vunpack.c.l.b16 %v4293_v46  ;;  %v5287_v50 = vunpack.c.h.b16 %v4293_v46 }
 0x9d3   : > { %12585 = vrcp.f32 %v3978_v40  ;;  %v15453_v59 = vpop.f32.mrf.mxu1 }
 0x9d4   : > { %12587 = vrcp.f32 %v3981_v29  ;;  %v4964_v14 = vpop.f32.mrf.mxu2  ;;  %v4292_v9 = vpack.c.bf16 %v4223_v51, %v4222_v11 }
 0x9d5   : > { %12589 = vrcp.f32 %v4032_v38  ;;  %v15455_v36 = vadd.f32 %v4964_v14, %v4915_v45  ;;  %v15457_v52 = vpop.f32.mrf.mxu0 }
 0x9d6   : > { %v5284_v44 = vunpack.c.l.b16 %v4292_v9  ;;  %v5285_v5 = vunpack.c.h.b16 %v4292_v9 }
 0x9d8   : > { %v5306_v13 = vpack.c.b16 %v5286_v34, %v5284_v44  ;;  %v5307_v2 = vpack.c.b16 %v5287_v50, %v5285_v5  ;;  %v15459_v21 = vpop.f32.mrf.mxu3 }
 0x9d9   : > { %v12586_v0 = vpop.eup %12585 }
 0x9da   : > { %v12588_v7 = vpop.eup %12587  ;;  %v4190_v27 = vmul.f32 %v12586_v0, %v15307_v62  ;;  %v4191_v24 = vmul.f32 %v12586_v0, %v15309_v42  ;;  %v4035_v25 = vpop.xlane.xlu1 %4034  ;;  %5457 = vmatmul.bf16.gmra.mxu0 %v5306_v13  ;;  %5506 = vmatmul.bf16.gmra.mxu2 %v5307_v2 }
 0x9db   : > { %v12590_v61 = vpop.eup %12589  ;;  %v4192_v17 = vmul.f32 %v12588_v7, %v15292_v31  ;;  %v4193_v23 = vmul.f32 %v12588_v7, %v15302_v1  ;;  %12591 = vrcp.f32 %v4035_v25  ;;  %v4646_v54 = vpop.f32.mrf.mxu1 }
 0x9dc   : > { %v15465_v16 = vpop.f32.mrf.mxu2  ;;  %v4276_v43 = vpack.c.bf16 %v4191_v24, %v4190_v27  ;;  %v4226_v3 = vmul.f32 %v12590_v61, %v15294_v60  ;;  %v4227_v62 = vmul.f32 %v12590_v61, %v15299_v6 }
 0x9dd   : > { %v4277_v37 = vpack.c.bf16 %v4193_v23, %v4192_v17  ;;  %v4920_v10 = vpop.f32.mrf.mxu0 }
 0x9de   : > { %v5010_v42 = vunpack.c.l.b16 %v4276_v43  ;;  %v5011_v47 = vunpack.c.h.b16 %v4276_v43  ;;  %v4294_v51 = vpack.c.bf16 %v4227_v62, %v4226_v3 }
 0x9df   : > { %v5012_v4 = vunpack.c.l.b16 %v4277_v37  ;;  %v5013_v55 = vunpack.c.h.b16 %v4277_v37  ;;  %v3984_v15 = vpop.xlane.xlu2 %3983 }
 0x9e0   : > { %v4695_v45 = vpop.f32.mrf.mxu3  ;;  %12593 = vrcp.f32 %v3984_v15  ;;  %v5288_v46 = vunpack.c.l.b16 %v4294_v51  ;;  %v5289_v9 = vunpack.c.h.b16 %v4294_v51 }
 0x9e1   : > { %v12592_v35 = vpop.eup %12591  ;;  %v5032_v31 = vpack.c.b16 %v5012_v4, %v5010_v42  ;;  %v5033_v58 = vpack.c.b16 %v5013_v55, %v5011_v47  ;;  %v15471_v11 = vadd.f32 %v4695_v45, %v4646_v54 }
 0x9e2   : > { %v4228_v1 = vmul.f32 %v12592_v35, %v15323_v18  ;;  %v4229_v38 = vmul.f32 %v12592_v35, %v15325_v28 }
 0x9e3   : > { %5183 = vmatmul.bf16.gmra.mxu1 %v5032_v31  ;;  %5232 = vmatmul.bf16.gmra.mxu3 %v5033_v58  ;;  %v15475_v29 = vpop.f32.mrf.mxu1 }
 0x9e4   : > { %v4969_v60 = vpop.f32.mrf.mxu2  ;;  %v4295_v6 = vpack.c.bf16 %v4229_v38, %v4228_v1 }
 0x9e5   : > { %v15473_v40 = vadd.f32 %v4969_v60, %v4920_v10  ;;  %v15477_v18 = vpop.f32.mrf.mxu0 }
 0x9e6   : > { %v5290_v14 = vunpack.c.l.b16 %v4295_v6  ;;  %v5291_v44 = vunpack.c.h.b16 %v4295_v6  ;;  %v12594_v13 = vpop.eup %12593 }
 0x9e7   : > { %v4194_v0 = vmul.f32 %v12594_v13, %v15337_v30  ;;  %v4195_v7 = vmul.f32 %v12594_v13, %v15341_v41  ;;  %v4041_v27 = vpop.xlane.xlu2 %4040 }
 0x9e8   : > { %v5308_v28 = vpack.c.b16 %v5290_v14, %v5288_v46  ;;  %v5309_v34 = vpack.c.b16 %v5291_v44, %v5289_v9  ;;  %v15479_v5 = vpop.f32.mrf.mxu3 }
 0x9e9   : > { %v4278_v43 = vpack.c.bf16 %v4195_v7, %v4194_v0 }
 0x9ea   : > { %v3987_v50 = vpop.xlane.xlu0 %3986  ;;  %5462 = vmatmul.bf16.gmra.mxu0 %v5308_v28  ;;  %5511 = vmatmul.bf16.gmra.mxu2 %v5309_v34 }
 0x9eb   : > { %12595 = vrcp.f32 %v3987_v50  ;;  %v5159_v24 = vpop.f32.mrf.mxu1  ;;  %v5014_v62 = vunpack.c.l.b16 %v4278_v43  ;;  %v5015_v42 = vunpack.c.h.b16 %v4278_v43 }
 0x9ec   : > { %v15481_v2 = vpop.f32.mrf.mxu2  ;;  %12597 = vrcp.f32 %v4041_v27 }
 0x9ed   : > { %v5433_v61 = vpop.f32.mrf.mxu0 }
 0x9f0   : > { %v5208_v17 = vpop.f32.mrf.mxu3 }
 0x9f1   : > { %v12596_v25 = vpop.eup %12595 }
 0x9f2   : > { %v4196_v23 = vmul.f32 %v12596_v25, %v15369_v26  ;;  %v4197_v54 = vmul.f32 %v12596_v25, %v15371_v56  ;;  %v12598_v55 = vpop.eup %12597  ;;  %v3990_v35 = vpop.xlane.xlu0 %3989 }
 0x9f3   : > { %v5161_v31 = vpop.f32.mrf.mxu1  ;;  %v4232_v58 = vmul.f32 %v12598_v55, %v15355_v53  ;;  %v4233_v1 = vmul.f32 %v12598_v55, %v15361_v8 }
 0x9f4   : > { %v5482_v37 = vpop.f32.mrf.mxu2  ;;  %v4279_v3 = vpack.c.bf16 %v4197_v54, %v4196_v23 }
 0x9f5   : > { %v5435_v26 = vpop.f32.mrf.mxu0  ;;  %v4297_v15 = vpack.c.bf16 %v4233_v1, %v4232_v58 }
 0x9f6   : > { %v5016_v10 = vunpack.c.l.b16 %v4279_v3  ;;  %v5017_v47 = vunpack.c.h.b16 %v4279_v3 }
 0x9f7   : > { %v5294_v8 = vunpack.c.l.b16 %v4297_v15  ;;  %v5295_v34 = vunpack.c.h.b16 %v4297_v15 }
 0x9f8   : > { %v5034_v30 = vpack.c.b16 %v5016_v10, %v5014_v62  ;;  %v5035_v4 = vpack.c.b16 %v5017_v47, %v5015_v42  ;;  %v5210_v41 = vpop.f32.mrf.mxu3  ;;  %v5209_v10 = vadd.f32 %v5208_v17, %v5159_v24  ;;  %v5483_v42 = vadd.f32 %v5482_v37, %v5433_v61  ;;  %v17989_v61 = vld [vmem:[#allocation53_spill] sm:$0xff] }
 0x9f9   : > { %v5211_v43 = vadd.f32 %v5210_v41, %v5161_v31  ;;  %v17987_v41 = vld [vmem:[#allocation47_spill] sm:$0xff]  ;;  %v17988_v31 = vld [vmem:[#allocation58_spill] sm:$0xff]  ;;  %v17990_v17 = vld [vmem:[#allocation77_spill] sm:$0xff] }
 0x9fa   : > { %v4038_v45 = vpop.xlane.xlu1 %4037  ;;  %5188 = vmatmul.bf16.gmra.mxu1 %v5034_v30  ;;  %5237 = vmatmul.bf16.gmra.mxu3 %v5035_v4  ;;  %v5570_v15 = vpack.c.bf16 %v5483_v42, %v5483_v42  ;;  %v4937_v24 = vadd.f32 %v17988_v31, %v17987_v41  ;;  %v4663_v37 = vadd.f32 %v17990_v17, %v17989_v61  ;;  %v11393_v61 = vld [vmem:[#allocation3 + $0x24] sm:$0xf] }
 0x9fb   : > { %12599 = vrcp.f32 %v4038_v45  ;;  %v15495_v28 = vpop.f32.mrf.mxu1  ;;  %v5555_v58 = vpack.c.bf16 %v5211_v43, %v5211_v43 }
 0x9fc   : > { %v5484_v56 = vpop.f32.mrf.mxu2  ;;  %12601 = vrcp.f32 %v3990_v35 }
 0x9fd   : > { %v15497_v53 = vpop.f32.mrf.mxu0  ;;  %v5485_v3 = vadd.f32 %v5484_v56, %v5435_v26  ;;  %v5841_v26 = vunpack.c.l.b16 %v5555_v58 }
 0xa00   : > { %v15491_v14 = vpop.f32.mrf.mxu3 }
 0xa01   : > { %v12600_v38 = vpop.eup %12599  ;;  %v5214_v58 = vadd.f32 %v15491_v14, %v15495_v28  ;;  %v17993_v28 = vld [vmem:[#allocation79_spill] sm:$0xff] }
 0xa02   : > { %v4230_v51 = vmul.f32 %v12600_v38, %v15395_v57  ;;  %v4231_v60 = vmul.f32 %v12600_v38, %v15399_v20  ;;  %v3993_v6 = vpop.xlane.xlu1 %3992  ;;  %v12602_v46 = vpop.eup %12601  ;;  %v5554_v38 = vpack.c.bf16 %v5209_v10, %v5209_v10 }
 0xa03   : > { %12603 = vrcp.f32 %v3993_v6  ;;  %v4198_v50 = vmul.f32 %v12602_v46, %v15378_v32  ;;  %v4199_v57 = vmul.f32 %v12602_v46, %v15383_v48  ;;  %v5166_v35 = vpop.f32.mrf.mxu1  ;;  %v11396_v6 = vld [vmem:[#allocation3 + $0x34] sm:$0xf0]  ;;  %v10907_v46 = vld [vmem:[#allocation3 + $0x38] sm:$0xf0] }
 0xa04   : > { %v15493_v9 = vpop.f32.mrf.mxu2  ;;  %v4296_v44 = vpack.c.bf16 %v4231_v60, %v4230_v51  ;;  %v5840_v51 = vunpack.c.l.b16 %v5554_v38  ;;  %v5959_v60 = vunpack.c.l.b16 %v5570_v15 }
 0xa05   : > { %v4280_v54 = vpack.c.bf16 %v4199_v57, %v4198_v50  ;;  %v5440_v45 = vpop.f32.mrf.mxu0  ;;  %v5523_v50 = vpack.c.bf16 %v4663_v37, %v4663_v37 }
 0xa06   : > { %v5292_v13 = vunpack.c.l.b16 %v4296_v44  ;;  %v5293_v20 = vunpack.c.h.b16 %v4296_v44  ;;  %v5856_v57 = vpack.c.b16 %v5841_v26, %v5840_v51  ;;  %v17996_v51 = vld [vmem:[#allocation83_spill] sm:$0xff] }
 0xa07   : > { %v5018_v48 = vunpack.c.l.b16 %v4280_v54  ;;  %v5019_v4 = vunpack.c.h.b16 %v4280_v54  ;;  %v17991_v54 = vld [vmem:[#allocation51_spill] sm:$0xff]  ;;  %v5603_v42 = vunpack.c.l.b16 %v5523_v50 }
 0xa08   : > { %v5310_v0 = vpack.c.b16 %v5294_v8, %v5292_v13  ;;  %v5311_v7 = vpack.c.b16 %v5295_v34, %v5293_v20  ;;  %v5215_v32 = vpop.f32.mrf.mxu3  ;;  %v5539_v34 = vpack.c.bf16 %v4937_v24, %v4937_v24  ;;  %v10905_v20 = vld [vmem:[#allocation3 + $0x30] sm:$0xf]  ;;  %v5538_v43 = vpack.c.bf16 %v17991_v54, %v17991_v54  ;;  %v10849_v24 = vld [vmem:[#allocation3 + $0x20] sm:$0xf] }
 0xa09   : > { %v12604_v27 = vpop.eup %12603  ;;  %v17998_v54 = vld [vmem:[#allocation55_spill] sm:$0xff] }
 0xa0a   : > { %v4200_v25 = vmul.f32 %v12604_v27, %v15406_v33  ;;  %v4201_v23 = vmul.f32 %v12604_v27, %v15409_v63  ;;  %5467 = vmatmul.bf16.gmra.mxu0 %v5310_v0  ;;  %5516 = vmatmul.bf16.gmra.mxu2 %v5311_v7  ;;  %v5571_v33 = vpack.c.bf16 %v5485_v3, %v5485_v3  ;;  %v11395_v0 = vld [vmem:[#allocation3 + $0x34] sm:$0xf]  ;;  %v17992_v3 = vld [vmem:[#allocation54_spill] sm:$0xff]  ;;  %v5722_v10 = vunpack.c.l.b16 %v5539_v34 }
 0xa0b   : > { %v5169_v7 = vpop.f32.mrf.mxu1 }
 0xa0c   : > { %v4281_v62 = vpack.c.bf16 %v4201_v23, %v4200_v25  ;;  %v5489_v47 = vpop.f32.mrf.mxu2  ;;  %v5960_v56 = vunpack.c.l.b16 %v5571_v33  ;;  %v10906_v25 = vor.u32 %v11396_v6, %v10905_v20  ;;  %v10910_v23 = vor.u32 %v11395_v0, %v10907_v46 }
 0xa0d   : > { %v5443_v27 = vpop.f32.mrf.mxu0  ;;  %v5488_v33 = vadd.f32 %v15493_v9, %v15497_v53  ;;  %v17994_v53 = vld [vmem:[#allocation35_spill] sm:$0xff] }
 0xa0e   : > { %v5020_v30 = vunpack.c.l.b16 %v4281_v62  ;;  %v5021_v55 = vunpack.c.h.b16 %v4281_v62  ;;  %v5975_v13 = vpack.c.b16 %v5960_v56, %v5959_v60  ;;  %v5522_v62 = vpack.c.bf16 %v17992_v3, %v17992_v3  ;;  %v17995_v56 = vld [vmem:[#allocation81_spill] sm:$0xff] }
 0xa0f   : > { %v4942_v26 = vadd.f32 %v17994_v53, %v17993_v28  ;;  %v4668_v60 = vadd.f32 %v17996_v51, %v17995_v56 }
 0xa10   : > { %v5036_v1 = vpack.c.b16 %v5020_v30, %v5018_v48  ;;  %v5037_v63 = vpack.c.b16 %v5021_v55, %v5019_v4  ;;  %v15507_v44 = vpop.f32.mrf.mxu3  ;;  %v5216_v48 = vadd.f32 %v5215_v32, %v5166_v35  ;;  %v5490_v30 = vadd.f32 %v5489_v47, %v5440_v45 }
 0xa11   : > { %v5721_v4 = vunpack.c.l.b16 %v5538_v43  ;;  %v5602_v55 = vunpack.c.l.b16 %v5522_v62  ;;  %v5556_v35 = vpack.c.bf16 %v5214_v58, %v5214_v58  ;;  %v5572_v45 = vpack.c.bf16 %v5488_v33, %v5488_v33 }
 0xa12   : > { %5193 = vmatmul.bf16.gmra.mxu1 %v5036_v1  ;;  %5242 = vmatmul.bf16.gmra.mxu3 %v5037_v63  ;;  %v11394_v1 = vld [vmem:[#allocation3 + $0x24] sm:$0xf0]  ;;  %v10851_v63 = vld [vmem:[#allocation3 + $0x28] sm:$0xf0]  ;;  %v5557_v41 = vpack.c.bf16 %v5216_v48, %v5216_v48  ;;  %v5573_v31 = vpack.c.bf16 %v5490_v30, %v5490_v30  ;;  %v5524_v43 = vpack.c.bf16 %v17998_v54, %v17998_v54 }
 0xa13   : > { %v5737_v38 = vpack.c.b16 %v5722_v10, %v5721_v4  ;;  %v5618_v15 = vpack.c.b16 %v5603_v42, %v5602_v55  ;;  %v10850_v32 = vor.u32 %v11394_v1, %v10849_v24  ;;  %v10854_v47 = vor.u32 %v11393_v61, %v10851_v63  ;;  %v5171_v14 = vpop.f32.mrf.mxu1 }
 0xa14   : > { %v15509_v8 = vpop.f32.mrf.mxu2  ;;  %v5843_v6 = vunpack.c.l.b16 %v5557_v41  ;;  %v5962_v46 = vunpack.c.l.b16 %v5573_v31  ;;  %v5842_v34 = vunpack.c.l.b16 %v5556_v35  ;;  %v5961_v50 = vunpack.c.l.b16 %v5572_v45  ;;  %v18002_v35 = vld [vmem:[#allocation66_spill] sm:$0xff] }
 0xa15   : > { %v5445_v9 = vpop.f32.mrf.mxu0  ;;  %v5604_v33 = vunpack.c.l.b16 %v5524_v43  ;;  %v5219_v1 = vadd.f32 %v15507_v44, %v5169_v7  ;;  %v5493_v63 = vadd.f32 %v15509_v8, %v5443_v27 }
 0xa16   : > { %v5857_v20 = vpack.c.b16 %v5843_v6, %v5842_v34  ;;  %v5976_v0 = vpack.c.b16 %v5962_v46, %v5961_v50  ;;  %v18003_v6 = vld [vmem:[#allocation85_spill] sm:$0xff]  ;;  %v18004_v34 = vld [vmem:[#allocation88_spill] sm:$0xff] }
 0xa17   : > { %v5558_v24 = vpack.c.bf16 %v5219_v1, %v5219_v1  ;;  %v5574_v61 = vpack.c.bf16 %v5493_v63, %v5493_v63  ;;  %v5542_v46 = vpack.c.bf16 %v18003_v6, %v18003_v6  ;;  %v5526_v50 = vpack.c.bf16 %v18004_v34, %v18004_v34 }
 0xa18   : > { %v5220_v17 = vpop.f32.mrf.mxu3 }
 0xa19   : > { %v5221_v48 = vadd.f32 %v5220_v17, %v5171_v14  ;;  %v17999_v17 = vld [vmem:[#allocation87_spill] sm:$0xff]  ;;  %v5844_v27 = vunpack.c.l.b16 %v5558_v24 }
 0xa1a   : > { %10683 = vmatmul.msk.bf16.vlgmr.msrb.gmra.mxu0 %vm2635_vm12, %v5856_v57  ;;  %10695 = vmatmul.msk.bf16.vlgmr.msrb.gmra.mxu2 %vm2635_vm12, %v5975_v13  ;;  %v5541_v57 = vpack.c.bf16 %v4942_v26, %v4942_v26  ;;  %v5525_v13 = vpack.c.bf16 %v4668_v60, %v4668_v60 }
 0xa1b   : > { %6948 = vmatpush.bf16.msrb.mxu0 %v10906_v25  ;;  %6997 = vmatpush.bf16.msrb.mxu2 %v10910_v23  ;;  %v17997_v25 = vld [vmem:[#allocation60_spill] sm:$0xff]  ;;  %v5174_v4 = vpop.f32.mrf.mxu1  ;;  %v5559_v41 = vpack.c.bf16 %v5221_v48, %v5221_v48 }
 0xa1c   : > { %v5494_v37 = vpop.f32.mrf.mxu2  ;;  %v5540_v23 = vpack.c.bf16 %v17997_v25, %v17997_v25  ;;  %v5724_v10 = vunpack.c.l.b16 %v5541_v57  ;;  %v5605_v42 = vunpack.c.l.b16 %v5525_v13  ;;  %v5725_v25 = vunpack.c.l.b16 %v5542_v46 }
 0xa1d   : > { %v5495_v30 = vadd.f32 %v5494_v37, %v5445_v9  ;;  %v5448_v55 = vpop.f32.mrf.mxu0  ;;  %v18000_v37 = vld [vmem:[#allocation68_spill] sm:$0xff]  ;;  %v5845_v14 = vunpack.c.l.b16 %v5559_v41  ;;  %v5963_v9 = vunpack.c.l.b16 %v5574_v61  ;;  %v18005_v41 = vld [vmem:[#allocation70_spill] sm:$0xff] }
 0xa1e   : > { %v5723_v58 = vunpack.c.l.b16 %v5540_v23  ;;  %v5606_v23 = vunpack.c.l.b16 %v5526_v50  ;;  %v18007_v61 = vld [vmem:[#allocation42_spill] sm:$0xff] }
 0xa1f   : > { %v5575_v31 = vpack.c.bf16 %v5495_v30, %v5495_v30  ;;  %v5858_v51 = vpack.c.b16 %v5845_v14, %v5844_v27  ;;  %v18010_v27 = vld [vmem:[#allocation41_spill] sm:$0xff] }
 0xa21   : > { %v5223_v3 = vpop.f32.mrf.mxu3  ;;  %v5964_v44 = vunpack.c.l.b16 %v5575_v31  ;;  %v18006_v31 = vld [vmem:[#allocation69_spill] sm:$0xff] }
 0xa22   : > { %10659 = vmatmul.msk.bf16.vlgmr.msrb.gmra.mxu1 %vm2635_vm12, %v5618_v15  ;;  %10671 = vmatmul.msk.bf16.vlgmr.msrb.gmra.mxu3 %vm2635_vm12, %v5737_v38  ;;  %v5738_v38 = vpack.c.b16 %v5724_v10, %v5723_v58  ;;  %v5619_v15 = vpack.c.b16 %v5605_v42, %v5604_v33  ;;  %v5224_v54 = vadd.f32 %v5223_v3, %v5174_v4  ;;  %v18008_v3 = vld [vmem:[#allocation40_spill] sm:$0xff] }
 0xa23   : > { %6776 = vmatpush.bf16.msrb.mxu1 %v10850_v32  ;;  %6825 = vmatpush.bf16.msrb.mxu3 %v10854_v47  ;;  %v4947_v32 = vadd.f32 %v18000_v37, %v17999_v17  ;;  %v18001_v47 = vld [vmem:[#allocation89_spill] sm:$0xff]  ;;  %v5176_v28 = vpop.f32.mrf.mxu1  ;;  %v5977_v60 = vpack.c.b16 %v5964_v44, %v5963_v9  ;;  %v4952_v24 = vadd.f32 %v18006_v31, %v18005_v41 }
 0xa24   : > { %v5497_v62 = vpop.f32.mrf.mxu2  ;;  %v4673_v45 = vadd.f32 %v18002_v35, %v18001_v47  ;;  %v5528_v9 = vpack.c.bf16 %v18010_v27, %v18010_v27 }
 0xa25   : > { %v5450_v53 = vpop.f32.mrf.mxu0  ;;  %v5543_v26 = vpack.c.bf16 %v4947_v32, %v4947_v32  ;;  %v5498_v43 = vadd.f32 %v5497_v62, %v5448_v55  ;;  %v4678_v62 = vadd.f32 %v18008_v3, %v18007_v61  ;;  %v5545_v32 = vpack.c.bf16 %v4952_v24, %v4952_v24  ;;  %v18015_v61 = vld [vmem:[#allocation91_spill] sm:$0xff] }
 0xa26   : > { %v5527_v56 = vpack.c.bf16 %v4673_v45, %v4673_v45  ;;  %v5608_v46 = vunpack.c.l.b16 %v5528_v9  ;;  %v5546_v3 = vpack.c.bf16 %v18015_v61, %v18015_v61 }
 0xa27   : > { %v5726_v57 = vunpack.c.l.b16 %v5543_v26  ;;  %v5529_v47 = vpack.c.bf16 %v4678_v62, %v4678_v62  ;;  %v5728_v26 = vunpack.c.l.b16 %v5545_v32  ;;  %v18016_v62 = vld [vmem:[#allocation95_spill] sm:$0xff] }
 0xa28   : > { %v5607_v13 = vunpack.c.l.b16 %v5527_v56  ;;  %v5729_v32 = vunpack.c.l.b16 %v5546_v3 }
 0xa29   : > { %v5225_v7 = vpop.f32.mrf.mxu3  ;;  %v5739_v48 = vpack.c.b16 %v5726_v57, %v5725_v25  ;;  %v5609_v56 = vunpack.c.l.b16 %v5529_v47 }
 0xa2a   : > { %10684 = vmatmul.msk.bf16.gmra.mxu0 %vm2635_vm12, %v5857_v20  ;;  %10696 = vmatmul.msk.bf16.gmra.mxu2 %vm2635_vm12, %v5976_v0  ;;  %v5226_v20 = vadd.f32 %v5225_v7, %v5176_v28  ;;  %v5620_v30 = vpack.c.b16 %v5607_v13, %v5606_v23  ;;  %v18009_v7 = vld [vmem:[#allocation39_spill] sm:$0xff] }
 0xa2b   : > { %v5179_v1 = vpop.f32.mrf.mxu1  ;;  %v5621_v13 = vpack.c.b16 %v5609_v56, %v5608_v46 }
 0xa2c   : > { %v5499_v8 = vpop.f32.mrf.mxu2  ;;  %v5561_v58 = vpack.c.bf16 %v5226_v20, %v5226_v20 }
 0xa2d   : > { %v5500_v0 = vadd.f32 %v5499_v8, %v5450_v53  ;;  %v5453_v63 = vpop.f32.mrf.mxu0  ;;  %v5544_v8 = vpack.c.bf16 %v18009_v7, %v18009_v7  ;;  %v4688_v7 = vadd.f32 %v15443_v12, %v15439_v49 }
 0xa2e   : > { %v5847_v4 = vunpack.c.l.b16 %v5561_v58  ;;  %v18014_v58 = vld [vmem:[#allocation97_spill] sm:$0xff] }
 0xa2f   : > { %v5577_v33 = vpack.c.bf16 %v5500_v0, %v5500_v0  ;;  %v5727_v6 = vunpack.c.l.b16 %v5544_v8  ;;  %v4962_v8 = vadd.f32 %v15445_v22, %v15441_v19  ;;  %v5533_v56 = vpack.c.bf16 %v4688_v7, %v4688_v7 }
 0xa31   : > { %v5228_v10 = vpop.f32.mrf.mxu3  ;;  %v5966_v55 = vunpack.c.l.b16 %v5577_v33  ;;  %v5740_v57 = vpack.c.b16 %v5728_v26, %v5727_v6  ;;  %v18017_v6 = vld [vmem:[#allocation103_spill] sm:$0xff] }
 0xa32   : > { %10660 = vmatmul.msk.bf16.gmra.mxu1 %vm2635_vm12, %v5619_v15  ;;  %10672 = vmatmul.msk.bf16.gmra.mxu3 %vm2635_vm12, %v5738_v38  ;;  %v5560_v38 = vpack.c.bf16 %v5224_v54, %v5224_v54  ;;  %v5576_v15 = vpack.c.bf16 %v5498_v43, %v5498_v43  ;;  %v5229_v34 = vadd.f32 %v5228_v10, %v5179_v1  ;;  %v18011_v54 = vld [vmem:[#allocation101_spill] sm:$0xff]  ;;  %v18012_v43 = vld [vmem:[#allocation100_spill] sm:$0xff] }
 0xa33   : > { %v5181_v28 = vpop.f32.mrf.mxu1  ;;  %v5532_v46 = vpack.c.bf16 %v18017_v6, %v18017_v6  ;;  %v5536_v6 = vpack.c.bf16 %v15471_v11, %v15471_v11 }
 0xa34   : > { %v5502_v42 = vpop.f32.mrf.mxu2  ;;  %v5846_v17 = vunpack.c.l.b16 %v5560_v38  ;;  %v5965_v37 = vunpack.c.l.b16 %v5576_v15  ;;  %v5562_v25 = vpack.c.bf16 %v5229_v34, %v5229_v34  ;;  %v18018_v34 = vld [vmem:[#allocation107_spill] sm:$0xff] }
 0xa35   : > { %v5455_v53 = vpop.f32.mrf.mxu0  ;;  %v5503_v50 = vadd.f32 %v5502_v42, %v5453_v63 }
 0xa36   : > { %v5859_v35 = vpack.c.b16 %v5847_v4, %v5846_v17  ;;  %v5978_v45 = vpack.c.b16 %v5966_v55, %v5965_v37  ;;  %v5848_v10 = vunpack.c.l.b16 %v5562_v25  ;;  %v5530_v4 = vpack.c.bf16 %v18016_v62, %v18016_v62 }
 0xa37   : > { %v5578_v23 = vpack.c.bf16 %v5503_v50, %v5503_v50  ;;  %v5548_v50 = vpack.c.bf16 %v18018_v34, %v18018_v34  ;;  %v5612_v25 = vunpack.c.l.b16 %v5532_v46  ;;  %v5552_v46 = vpack.c.bf16 %v15473_v40, %v15473_v40 }
 0xa38   : > { %v5610_v47 = vunpack.c.l.b16 %v5530_v4 }
 0xa39   : > { %v5230_v14 = vpop.f32.mrf.mxu3  ;;  %v5967_v42 = vunpack.c.l.b16 %v5578_v23  ;;  %v5731_v23 = vunpack.c.l.b16 %v5548_v50 }
 0xa3a   : > { %10685 = vmatmul.msk.bf16.gmra.mxu0 %vm2635_vm12, %v5858_v51  ;;  %10697 = vmatmul.msk.bf16.gmra.mxu2 %vm2635_vm12, %v5977_v60  ;;  %v5231_v51 = vadd.f32 %v5230_v14, %v5181_v28 }
 0xa3c   : > { %v5504_v44 = vpop.f32.mrf.mxu2  ;;  %v5563_v20 = vpack.c.bf16 %v5231_v51, %v5231_v51  ;;  %v5549_v51 = vpack.c.bf16 %v4962_v8, %v4962_v8 }
 0xa3d   : > { %v5505_v60 = vadd.f32 %v5504_v44, %v5455_v53 }
 0xa3e   : > { %v5849_v38 = vunpack.c.l.b16 %v5563_v20  ;;  %v5613_v20 = vunpack.c.l.b16 %v5533_v56  ;;  %v5732_v19 = vunpack.c.l.b16 %v5549_v51 }
 0xa3f   : > { %v5579_v0 = vpack.c.bf16 %v5505_v60, %v5505_v60 }
 0xa40   : > { %v5860_v31 = vpack.c.b16 %v5849_v38, %v5848_v10 }
 0xa41   : > { %v5968_v15 = vunpack.c.l.b16 %v5579_v0 }
 0xa42   : > { %10661 = vmatmul.msk.bf16.gmra.mxu1 %vm2635_vm12, %v5620_v30  ;;  %10673 = vmatmul.msk.bf16.gmra.mxu3 %vm2635_vm12, %v5739_v48  ;;  %v4957_v48 = vadd.f32 %v18012_v43, %v18011_v54  ;;  %v18013_v30 = vld [vmem:[#allocation96_spill] sm:$0xff] }
 0xa43   : > { %v4683_v33 = vadd.f32 %v18014_v58, %v18013_v30  ;;  %v5979_v24 = vpack.c.b16 %v5968_v15, %v5967_v42  ;;  %v5623_v58 = vpack.c.b16 %v5613_v20, %v5612_v25 }
 0xa44   : > { %v5547_v63 = vpack.c.bf16 %v4957_v48, %v4957_v48 }
 0xa45   : > { %v5531_v41 = vpack.c.bf16 %v4683_v33, %v4683_v33  ;;  %v5742_v33 = vpack.c.b16 %v5732_v19, %v5731_v23 }
 0xa46   : > { %v5730_v55 = vunpack.c.l.b16 %v5547_v63  ;;  %v4967_v63 = vadd.f32 %v15465_v16, %v15457_v52 }
 0xa47   : > { %v5611_v17 = vunpack.c.l.b16 %v5531_v41 }
 0xa48   : > { %v5551_v4 = vpack.c.bf16 %v4967_v63, %v4967_v63 }
 0xa4a   : > { %10686 = vmatmul.msk.bf16.gmra.mxu0 %vm2635_vm12, %v5859_v35  ;;  %10698 = vmatmul.msk.bf16.gmra.mxu2 %vm2635_vm12, %v5978_v45  ;;  %v5741_v35 = vpack.c.b16 %v5730_v55, %v5729_v32  ;;  %v5622_v45 = vpack.c.b16 %v5611_v17, %v5610_v47  ;;  %v5534_v17 = vpack.c.bf16 %v15451_v39, %v15451_v39  ;;  %v5734_v16 = vunpack.c.l.b16 %v5551_v4 }
 0xa4b   : > { %v4698_v39 = vadd.f32 %v15479_v5, %v15475_v29 }
 0xa4d   : > { %v5537_v56 = vpack.c.bf16 %v4698_v39, %v4698_v39  ;;  %v11365_v39 = vld [vmem:[#allocation2 + $0xc0] sm:$0xff] }
 0xa4f   : > { %v5617_v29 = vunpack.c.l.b16 %v5537_v56  ;;  %v11428_v56 = vld [vmem:[#allocation4 + $0xf8] sm:$0xff] }
 0xa52   : > { %10662 = vmatmul.msk.bf16.gmra.mxu1 %vm2635_vm12, %v5621_v13  ;;  %10674 = vmatmul.msk.bf16.gmra.mxu3 %vm2635_vm12, %v5740_v57 }
 0xa57   : > { %v5458_v1 = vpop.f32.mrf.mxu0 }
 0xa5a   : > { %10687 = vmatmul.msk.bf16.gmra.mxu0 %vm2635_vm12, %v5860_v31  ;;  %10699 = vmatmul.msk.bf16.gmra.mxu2 %vm2635_vm12, %v5979_v24 }
 0xa5d   : > { %v5507_v37 = vpop.f32.mrf.mxu2 }
 0xa5e   : > { %v5508_v44 = vadd.f32 %v5507_v37, %v5458_v1  ;;  %v4693_v1 = vadd.f32 %v15459_v21, %v15453_v59  ;;  %v5550_v37 = vpack.c.bf16 %v15455_v36, %v15455_v36  ;;  %v4972_v36 = vadd.f32 %v15481_v2, %v15477_v18 }
 0xa5f   : > { %v5460_v14 = vpop.f32.mrf.mxu0  ;;  %v5616_v2 = vunpack.c.l.b16 %v5536_v6  ;;  %v11358_v6 = vld [vmem:[#allocation2 + $0x48] sm:$0xff] }
 0xa60   : > { %v5184_v27 = vpop.f32.mrf.mxu1  ;;  %v5580_v28 = vpack.c.bf16 %v5508_v44, %v5508_v44  ;;  %v5535_v62 = vpack.c.bf16 %v4693_v1, %v4693_v1  ;;  %v5553_v51 = vpack.c.bf16 %v4972_v36, %v4972_v36 }
 0xa61   : > { %v5625_v20 = vpack.c.b16 %v5617_v29, %v5616_v2  ;;  %v11427_v29 = vld [vmem:[#allocation4 + $0xf0] sm:$0xff] }
 0xa62   : > { %10663 = vmatmul.msk.bf16.gmra.mxu1 %vm2635_vm12, %v5622_v45  ;;  %10675 = vmatmul.msk.bf16.gmra.mxu3 %vm2635_vm12, %v5741_v35  ;;  %v5969_v57 = vunpack.c.l.b16 %v5580_v28  ;;  %v5615_v52 = vunpack.c.l.b16 %v5535_v62  ;;  %v5614_v45 = vunpack.c.l.b16 %v5534_v17  ;;  %v5736_v5 = vunpack.c.l.b16 %v5553_v51  ;;  %v11407_v2 = vld [vmem:[#allocation4 + $0x50] sm:$0xff] }
 0xa64   : > { %v5624_v44 = vpack.c.b16 %v5615_v52, %v5614_v45 }
 0xa65   : > { %v5509_v9 = vpop.f32.mrf.mxu2 }
 0xa66   : > { %v5233_v53 = vpop.f32.mrf.mxu3  ;;  %v5510_v26 = vadd.f32 %v5509_v9, %v5460_v14  ;;  %v5733_v14 = vunpack.c.l.b16 %v5550_v37  ;;  %v11403_v37 = vld [vmem:[#allocation4 + $0x30] sm:$0xff] }
 0xa67   : > { %v5234_v49 = vadd.f32 %v5233_v53, %v5184_v27  ;;  %v5463_v12 = vpop.f32.mrf.mxu0 }
 0xa68   : > { %v5581_v60 = vpack.c.bf16 %v5510_v26, %v5510_v26  ;;  %v5186_v54 = vpop.f32.mrf.mxu1  ;;  %v5743_v7 = vpack.c.b16 %v5734_v16, %v5733_v14  ;;  %v11402_v14 = vld [vmem:[#allocation4 + $0x28] sm:$0xff] }
 0xa69   : > { %v5564_v48 = vpack.c.bf16 %v5234_v49, %v5234_v49 }
 0xa6a   : > { %v5970_v13 = vunpack.c.l.b16 %v5581_v60 }
 0xa6b   : > { %v5850_v10 = vunpack.c.l.b16 %v5564_v48 }
 0xa6c   : > { %v5980_v22 = vpack.c.b16 %v5970_v13, %v5969_v57  ;;  %v5735_v13 = vunpack.c.l.b16 %v5552_v46 }
 0xa6d   : > { %v5512_v0 = vpop.f32.mrf.mxu2 }
 0xa6e   : > { %v5235_v43 = vpop.f32.mrf.mxu3  ;;  %10700 = vmatmul.msk.bf16.gmra.mxu2 %vm2635_vm12, %v5980_v22  ;;  %v5513_v15 = vadd.f32 %v5512_v0, %v5463_v12  ;;  %v5744_v19 = vpack.c.b16 %v5736_v5, %v5735_v13 }
 0xa6f   : > { %v5236_v30 = vadd.f32 %v5235_v43, %v5186_v54  ;;  %v5465_v31 = vpop.f32.mrf.mxu0 }
 0xa70   : > { %v5582_v61 = vpack.c.bf16 %v5513_v15, %v5513_v15 }
 0xa71   : > { %v5565_v38 = vpack.c.bf16 %v5236_v30, %v5236_v30 }
 0xa72   : > { %10664 = vmatmul.msk.bf16.gmra.mxu1 %vm2635_vm12, %v5623_v58  ;;  %10676 = vmatmul.msk.bf16.gmra.mxu3 %vm2635_vm12, %v5742_v33  ;;  %v5971_v59 = vunpack.c.l.b16 %v5582_v61  ;;  %v11412_v61 = vld [vmem:[#allocation4 + $0x78] sm:$0xff] }
 0xa73   : > { %v5851_v42 = vunpack.c.l.b16 %v5565_v38 }
 0xa75   : > { %v5861_v41 = vpack.c.b16 %v5851_v42, %v5850_v10  ;;  %v5514_v24 = vpop.f32.mrf.mxu2 }
 0xa76   : > { %v5515_v3 = vadd.f32 %v5514_v24, %v5465_v31  ;;  %v11357_v31 = vld [vmem:[#allocation2 + $0x40] sm:$0xff]  ;;  %v11404_v24 = vld [vmem:[#allocation4 + $0x38] sm:$0xff] }
 0xa77   : > { %10688 = vmatmul.msk.bf16.gmra.mxu0 %vm2635_vm12, %v5861_v41  ;;  %v5189_v32 = vpop.f32.mrf.mxu1 }
 0xa78   : > { %v5583_v55 = vpack.c.bf16 %v5515_v3, %v5515_v3 }
 0xa7a   : > { %v5972_v21 = vunpack.c.l.b16 %v5583_v55 }
 0xa7c   : > { %v5981_v47 = vpack.c.b16 %v5972_v21, %v5971_v59  ;;  %v11411_v59 = vld [vmem:[#allocation4 + $0x70] sm:$0xff] }
 0xa7d   : > { %v5238_v35 = vpop.f32.mrf.mxu3 }
 0xa7e   : > { %10701 = vmatmul.msk.bf16.gmra.mxu2 %vm2635_vm12, %v5981_v47  ;;  %v5239_v8 = vadd.f32 %v5238_v35, %v5189_v32 }
 0xa7f   : > { %v5191_v27 = vpop.f32.mrf.mxu1 }
 0xa80   : > { %v5566_v28 = vpack.c.bf16 %v5239_v8, %v5239_v8 }
 0xa82   : > { %10665 = vmatmul.msk.bf16.gmra.mxu1 %vm2635_vm12, %v5624_v44  ;;  %10677 = vmatmul.msk.bf16.gmra.mxu3 %vm2635_vm12, %v5743_v7  ;;  %v5852_v34 = vunpack.c.l.b16 %v5566_v28  ;;  %v11410_v44 = vld [vmem:[#allocation4 + $0x68] sm:$0xff]  ;;  %v11409_v28 = vld [vmem:[#allocation4 + $0x60] sm:$0xff] }
 0xa85   : > { %v5240_v9 = vpop.f32.mrf.mxu3 }
 0xa86   : > { %v5241_v53 = vadd.f32 %v5240_v9, %v5191_v27  ;;  %v11401_v9 = vld [vmem:[#allocation4 + $0x20] sm:$0xff] }
 0xa87   : > { %v5468_v26 = vpop.f32.mrf.mxu0 }
 0xa88   : > { %v5567_v60 = vpack.c.bf16 %v5241_v53, %v5241_v53 }
 0xa8a   : > { %v5853_v50 = vunpack.c.l.b16 %v5567_v60 }
 0xa8c   : > { %v5862_v57 = vpack.c.b16 %v5853_v50, %v5852_v34  ;;  %v11400_v34 = vld [vmem:[#allocation4 + $0x18] sm:$0xff] }
 0xa8d   : > { %v5517_v18 = vpop.f32.mrf.mxu2  ;;  %v11408_v50 = vld [vmem:[#allocation4 + $0x58] sm:$0xff] }
 0xa8e   : > { %10689 = vmatmul.msk.bf16.gmra.mxu0 %vm2635_vm12, %v5862_v57  ;;  %v5518_v22 = vadd.f32 %v5517_v18, %v5468_v26  ;;  %v11399_v18 = vld [vmem:[#allocation4 + $0x10] sm:$0xff] }
 0xa8f   : > { %v5194_v49 = vpop.f32.mrf.mxu1  ;;  %v5470_v12 = vpop.f32.mrf.mxu0 }
 0xa90   : > { %v5584_v0 = vpack.c.bf16 %v5518_v22, %v5518_v22 }
 0xa92   : > { %10666 = vmatmul.msk.bf16.gmra.mxu1 %vm2635_vm12, %v5625_v20  ;;  %10678 = vmatmul.msk.bf16.gmra.mxu3 %vm2635_vm12, %v5744_v19  ;;  %v5973_v48 = vunpack.c.l.b16 %v5584_v0  ;;  %v11426_v20 = vld [vmem:[#allocation4 + $0xe8] sm:$0xff] }
 0xa93   : > { %v11398_v0 = vld [vmem:[#allocation4 + $0x8] sm:$0xff] }
 0xa95   : > { %v5243_v11 = vpop.f32.mrf.mxu3  ;;  %v5519_v40 = vpop.f32.mrf.mxu2 }
 0xa96   : > { %v5520_v25 = vadd.f32 %v5519_v40, %v5470_v12  ;;  %v5244_v30 = vadd.f32 %v5243_v11, %v5194_v49  ;;  %v11420_v12 = vld [vmem:[#allocation4 + $0xb8] sm:$0xff] }
 0xa97   : > { %v5196_v23 = vpop.f32.mrf.mxu1  ;;  %v5903_v54 = vpop.f32.mrf.mxu0 }
 0xa98   : > { %v5585_v43 = vpack.c.bf16 %v5520_v25, %v5520_v25  ;;  %v5568_v10 = vpack.c.bf16 %v5244_v30, %v5244_v30  ;;  %v6065_v35 = vsel %vm514_vm0, %v5903_v54, 0.0  ;;  %v11406_v25 = vld [vmem:[#allocation4 + $0x48] sm:$0xff]  ;;  %v11419_v54 = vld [vmem:[#allocation4 + $0xb0] sm:$0xff] }
 0xa9a   : > { %v5974_v58 = vunpack.c.l.b16 %v5585_v43  ;;  %v5854_v3 = vunpack.c.l.b16 %v5568_v10  ;;  %v11425_v43 = vld [vmem:[#allocation4 + $0xe0] sm:$0xff] }
 0xa9b   : > { %v11405_v10 = vld [vmem:[#allocation4 + $0x40] sm:$0xff] }
 0xa9c   : > { %v5982_v33 = vpack.c.b16 %v5974_v58, %v5973_v48  ;;  %v11366_v58 = vld [vmem:[#allocation2 + $0xc8] sm:$0xff] }
 0xa9d   : > { %v5245_v38 = vpop.f32.mrf.mxu3  ;;  %v6022_v15 = vpop.f32.mrf.mxu2 }
 0xa9e   : > { %v5246_v42 = vadd.f32 %v5245_v38, %v5196_v23  ;;  %10702 = vmatmul.msk.bf16.gmra.mxu2 %vm2635_vm12, %v5982_v33  ;;  %v6067_v7 = vsel %vm514_vm0, %v6022_v15, 0.0  ;;  %v11397_v15 = vld [vmem:[#allocation4] sm:$0xff] }
 0xa9f   : > { %v5665_v1 = vpop.f32.mrf.mxu1  ;;  %v15608_v63 = vpop.f32.mrf.mxu0 }
 0xaa0   : > { %18019 = vst [vmem:[#allocation23_spill] sm:$0xff] %v15608_v63  ;;  %v5569_v41 = vpack.c.bf16 %v5246_v42, %v5246_v42  ;;  %v6062_v21 = vsel %vm514_vm0, %v5665_v1, 0.0 }
 0xaa2   : > { %v5855_v62 = vunpack.c.l.b16 %v5569_v41  ;;  %10743 = vmatmul.msk.bf16.vlgmr.msra.gmra.mxu1 %vm2635_vm12, %v11357_v31  ;;  %10751 = vmatmul.msk.bf16.vlgmr.msra.gmra.mxu3 %vm2635_vm12, %v11357_v31  ;;  %v11418_v41 = vld [vmem:[#allocation4 + $0xa8] sm:$0xff]  ;;  %v11424_v31 = vld [vmem:[#allocation4 + $0xd8] sm:$0xff] }
 0xaa3   : > { %8367 = vmatpush.bf16.msra.mxu1 %v11404_v24  ;;  %8416 = vmatpush.bf16.msra.mxu3 %v11412_v61 }
 0xaa4   : > { %v5863_v4 = vpack.c.b16 %v5855_v62, %v5854_v3  ;;  %v11359_v3 = vld [vmem:[#allocation2 + $0x50] sm:$0xff]  ;;  %v11417_v62 = vld [vmem:[#allocation4 + $0xa0] sm:$0xff] }
 0xaa5   : > { %v5784_v55 = vpop.f32.mrf.mxu3  ;;  %v15612_v17 = vpop.f32.mrf.mxu2 }
 0xaa6   : > { %18020 = vst [vmem:[#allocation29_spill] sm:$0xff] %v15612_v17  ;;  %v6063_v32 = vsel %vm514_vm0, %v5784_v55, 0.0  ;;  %10690 = vmatmul.msk.bf16.gmra.mxu0 %vm2635_vm12, %v5863_v4  ;;  %v11423_v4 = vld [vmem:[#allocation4 + $0xd0] sm:$0xff] }
 0xaa7   : > { %v6064_v52 = vadd.f32 %v6063_v32, %v6062_v21  ;;  %8368 = vmatpush.bf16.msra.mxu1 %v11403_v37  ;;  %8417 = vmatpush.bf16.msra.mxu3 %v11411_v59  ;;  %v5667_v16 = vpop.f32.mrf.mxu1  ;;  %v5908_v47 = vpop.f32.mrf.mxu0 }
 0xaa8   : > { %v6069_v53 = vsel %vm514_vm0, %v5667_v16, 0.0  ;;  %v6079_v11 = vsel %vm514_vm0, %v5908_v47, 0.0  ;;  %v11422_v16 = vld [vmem:[#allocation4 + $0xc8] sm:$0xff] }
 0xaa9   : > { %v6066_v45 = vadd.f32 %v6065_v35, %v6064_v52  ;;  %v11416_v52 = vld [vmem:[#allocation4 + $0x98] sm:$0xff] }
 0xaab   : > { %v15619_v8 = vadd.f32 %v6067_v7, %v6066_v45  ;;  %8369 = vmatpush.bf16.msra.mxu1 %v11402_v14  ;;  %8418 = vmatpush.bf16.msra.mxu3 %v11410_v44  ;;  %v11415_v7 = vld [vmem:[#allocation4 + $0x90] sm:$0xff] }
 0xaad   : > { %18021 = vst [vmem:[#allocation63_spill] sm:$0xff] %v15619_v8  ;;  %v5786_v36 = vpop.f32.mrf.mxu3  ;;  %v6027_v27 = vpop.f32.mrf.mxu2 }
 0xaae   : > { %v6070_v26 = vsel %vm514_vm0, %v5786_v36, 0.0  ;;  %10807 = vmatmul.msk.bf16.vlgmr.msra.gmra.mxu2 %vm2635_vm12, %v11365_v39  ;;  %v6081_v23 = vsel %vm514_vm0, %v6027_v27, 0.0  ;;  %v11367_v27 = vld [vmem:[#allocation2 + $0xd0] sm:$0xff] }
 0xaaf   : > { %v15624_v51 = vadd.f32 %v6070_v26, %v6069_v53  ;;  %8370 = vmatpush.bf16.msra.mxu1 %v11401_v9  ;;  %8419 = vmatpush.bf16.msra.mxu3 %v11409_v28  ;;  %v5670_v60 = vpop.f32.mrf.mxu1  ;;  %v15626_v46 = vpop.f32.mrf.mxu0  ;;  %v11414_v26 = vld [vmem:[#allocation4 + $0x88] sm:$0xff] }
 0xab0   : > { %8690 = vmatpush.bf16.msra.mxu2 %v11428_v56  ;;  %18023 = vst [vmem:[#allocation28_spill] sm:$0xff] %v15626_v46  ;;  %v6076_v13 = vsel %vm514_vm0, %v5670_v60, 0.0 }
 0xab1   : > { %18022 = vst [vmem:[#allocation65_spill] sm:$0xff] %v15624_v51 }
 0xab2   : > { %10744 = vmatmul.msk.bf16.gmra.mxu1 %vm2635_vm12, %v11358_v6  ;;  %10752 = vmatmul.msk.bf16.gmra.mxu3 %vm2635_vm12, %v11358_v6 }
 0xab3   : > { %8371 = vmatpush.bf16.msra.mxu1 %v11400_v34  ;;  %8420 = vmatpush.bf16.msra.mxu3 %v11408_v50  ;;  %v11360_v50 = vld [vmem:[#allocation2 + $0x58] sm:$0xff] }
 0xab4   : > { %8691 = vmatpush.bf16.msra.mxu2 %v11427_v29  ;;  %v11413_v29 = vld [vmem:[#allocation4 + $0x80] sm:$0xff] }
 0xab5   : > { %v5789_v5 = vpop.f32.mrf.mxu3  ;;  %v15630_v57 = vpop.f32.mrf.mxu2 }
 0xab6   : > { %18024 = vst [vmem:[#allocation30_spill] sm:$0xff] %v15630_v57  ;;  %v6077_v49 = vsel %vm514_vm0, %v5789_v5, 0.0  ;;  %10799 = vmatmul.msk.bf16.vlgmr.msra.gmra.mxu0 %vm2635_vm12, %v11365_v39  ;;  %v11421_v39 = vld [vmem:[#allocation4 + $0xc0] sm:$0xff] }
 0xab7   : > { %v6078_v19 = vadd.f32 %v6077_v49, %v6076_v13  ;;  %8372 = vmatpush.bf16.msra.mxu1 %v11399_v18  ;;  %8421 = vmatpush.bf16.msra.mxu3 %v11407_v2  ;;  %v5672_v22 = vpop.f32.mrf.mxu1  ;;  %v5913_v30 = vpop.f32.mrf.mxu0 }
 0xab8   : > { %8641 = vmatpush.bf16.msra.mxu0 %v11420_v12  ;;  %8692 = vmatpush.bf16.msra.mxu2 %v11426_v20  ;;  %v6083_v42 = vsel %vm514_vm0, %v5672_v22, 0.0  ;;  %v6093_v45 = vsel %vm514_vm0, %v5913_v30, 0.0 }
 0xab9   : > { %v6080_v40 = vadd.f32 %v6079_v11, %v6078_v19 }
 0xabb   : > { %v15637_v48 = vadd.f32 %v6081_v23, %v6080_v40  ;;  %8373 = vmatpush.bf16.msra.mxu1 %v11398_v0  ;;  %8422 = vmatpush.bf16.msra.mxu3 %v11406_v25  ;;  %v11368_v0 = vld [vmem:[#allocation2 + $0xd8] sm:$0xff] }
 0xabc   : > { %8642 = vmatpush.bf16.msra.mxu0 %v11419_v54  ;;  %8693 = vmatpush.bf16.msra.mxu2 %v11425_v43 }
 0xabd   : > { %18025 = vst [vmem:[#allocation71_spill] sm:$0xff] %v15637_v48  ;;  %v5791_v33 = vpop.f32.mrf.mxu3  ;;  %v6032_v38 = vpop.f32.mrf.mxu2 }
 0xabe   : > { %v6084_v1 = vsel %vm514_vm0, %v5791_v33, 0.0  ;;  %10808 = vmatmul.msk.bf16.gmra.mxu2 %vm2635_vm12, %v11366_v58  ;;  %v6095_v44 = vsel %vm514_vm0, %v6032_v38, 0.0 }
 0xabf   : > { %v15642_v24 = vadd.f32 %v6084_v1, %v6083_v42  ;;  %8374 = vmatpush.bf16.msra.mxu1 %v11397_v15  ;;  %8423 = vmatpush.bf16.msra.mxu3 %v11405_v10  ;;  %v5675_v61 = vpop.f32.mrf.mxu1  ;;  %v15646_v55 = vpop.f32.mrf.mxu0 }
 0xac0   : > { %8643 = vmatpush.bf16.msra.mxu0 %v11418_v41  ;;  %8694 = vmatpush.bf16.msra.mxu2 %v11424_v31  ;;  %18027 = vst [vmem:[#allocation31_spill] sm:$0xff] %v15646_v55  ;;  %v6090_v59 = vsel %vm514_vm0, %v5675_v61, 0.0  ;;  %v12125_v31 = vpop.trf.xlu2 }
 0xac1   : > { %18026 = vst [vmem:[#allocation36_spill] sm:$0xff] %v15642_v24 }
 0xac2   : > { %10745 = vmatmul.msk.bf16.gmra.mxu1 %vm2635_vm12, %v11359_v3  ;;  %10753 = vmatmul.msk.bf16.gmra.mxu3 %vm2635_vm12, %v11359_v3 }
 0xac4   : > { %8644 = vmatpush.bf16.msra.mxu0 %v11417_v62  ;;  %8695 = vmatpush.bf16.msra.mxu2 %v11423_v4 }
 0xac5   : > { %v5794_v37 = vpop.f32.mrf.mxu3  ;;  %v15650_v32 = vpop.f32.mrf.mxu2 }
 0xac6   : > { %v6091_v21 = vsel %vm514_vm0, %v5794_v37, 0.0  ;;  %18028 = vst [vmem:[#allocation61_spill] sm:$0xff] %v15650_v32  ;;  %10800 = vmatmul.msk.bf16.gmra.mxu0 %vm2635_vm12, %v11366_v58  ;;  %v11361_v58 = vld [vmem:[#allocation2 + $0x60] sm:$0xff] }
 0xac7   : > { %v6092_v47 = vadd.f32 %v6091_v21, %v6090_v59  ;;  %v5677_v35 = vpop.f32.mrf.mxu1  ;;  %v5918_v56 = vpop.f32.mrf.mxu0  ;;  %v11369_v37 = vld [vmem:[#allocation2 + $0xe0] sm:$0xff] }
 0xac8   : > { %8645 = vmatpush.bf16.msra.mxu0 %v11416_v52  ;;  %8696 = vmatpush.bf16.msra.mxu2 %v11422_v16  ;;  %v6097_v28 = vsel %vm514_vm0, %v5677_v35, 0.0  ;;  %v6107_v12 = vsel %vm514_vm0, %v5918_v56, 0.0 }
 0xac9   : > { %v6094_v14 = vadd.f32 %v6093_v45, %v6092_v47 }
 0xacb   : > { %v15655_v36 = vadd.f32 %v6095_v44, %v6094_v14  ;;  %v12129_v14 = vunpack.i.h.bf16 %v12125_v31  ;;  %v12126_v44 = vunpack.i.l.bf16 %v12125_v31 }
 0xacc   : > { %8646 = vmatpush.bf16.msra.mxu0 %v11415_v7  ;;  %8697 = vmatpush.bf16.msra.mxu2 %v11421_v39  ;;  %v12130_v7 = vpop.trf.xlu2  ;;  %v11362_v39 = vld [vmem:[#allocation2 + $0x68] sm:$0xff] }
 0xacd   : > { %18029 = vst [vmem:[#allocation33_spill] sm:$0xff] %v15655_v36  ;;  %v5796_v9 = vpop.f32.mrf.mxu3  ;;  %v6037_v34 = vpop.f32.mrf.mxu2 }
 0xace   : > { %v6098_v53 = vsel %vm514_vm0, %v5796_v9, 0.0  ;;  %10809 = vmatmul.msk.bf16.gmra.mxu2 %vm2635_vm12, %v11367_v27  ;;  %v6109_v22 = vsel %vm514_vm0, %v6037_v34, 0.0  ;;  %v2061_v9 = vpack.c.bf16 %v12129_v14, %v12129_v14 }
 0xacf   : > { %v15660_v60 = vadd.f32 %v6098_v53, %v6097_v28  ;;  %v5680_v6 = vpop.f32.mrf.mxu1  ;;  %v15668_v20 = vpop.f32.mrf.mxu0  ;;  %v2319_v28 = vpack.c.bf16 %v12126_v44, %v12126_v44  ;;  %v12131_v53 = vunpack.i.l.bf16 %v12130_v7 }
 0xad0   : > { %8647 = vmatpush.bf16.msra.mxu0 %v11414_v26  ;;  %v6104_v18 = vsel %vm514_vm0, %v5680_v6, 0.0  ;;  %18031 = vst [vmem:[#allocation46_spill] sm:$0xff] %v15668_v20 }
 0xad1   : > { %18030 = vst [vmem:[#allocation45_spill] sm:$0xff] %v15660_v60  ;;  %v2320_v56 = vpack.c.bf16 %v12131_v53, %v12131_v53 }
 0xad2   : > { %10746 = vmatmul.msk.bf16.gmra.mxu1 %vm2635_vm12, %v11360_v50  ;;  %10754 = vmatmul.msk.bf16.gmra.mxu3 %vm2635_vm12, %v11360_v50  ;;  %2094 = vst.msk [vmem:[#allocation2 + $0x140] sm:$0xf] %vm1562_vm11, %v2061_v9 }
 0xad3   : > { %2352 = vst.msk [vmem:[#allocation2 + $0x1c0] sm:$0xf] %vm1562_vm11, %v2319_v28 }
 0xad4   : > { %8648 = vmatpush.bf16.msra.mxu0 %v11413_v29  ;;  %2353 = vst.msk [vmem:[#allocation2 + $0x1c4] sm:$0xf] %vm1562_vm11, %v2320_v56 }
 0xad5   : > { %v5799_v5 = vpop.f32.mrf.mxu3  ;;  %v15671_v11 = vpop.f32.mrf.mxu2 }
 0xad6   : > { %v6105_v2 = vsel %vm514_vm0, %v5799_v5, 0.0  ;;  %10801 = vmatmul.msk.bf16.gmra.mxu0 %vm2635_vm12, %v11367_v27  ;;  %18032 = vst [vmem:[#allocation62_spill] sm:$0xff] %v15671_v11  ;;  %v12134_v27 = vunpack.i.h.bf16 %v12130_v7 }
 0xad7   : > { %v6106_v13 = vadd.f32 %v6105_v2, %v6104_v18  ;;  %v5682_v49 = vpop.f32.mrf.mxu1  ;;  %v5923_v33 = vpop.f32.mrf.mxu0 }
 0xad8   : > { %v6111_v23 = vsel %vm514_vm0, %v5682_v49, 0.0  ;;  %v6121_v61 = vsel %vm514_vm0, %v5923_v33, 0.0  ;;  %v2062_v26 = vpack.c.bf16 %v12134_v27, %v12134_v27  ;;  %v11363_v33 = vld [vmem:[#allocation2 + $0x70] sm:$0xff] }
 0xad9   : > { %v6108_v19 = vadd.f32 %v6107_v12, %v6106_v13  ;;  %v11371_v27 = vld [vmem:[#allocation2 + $0xf0] sm:$0xff] }
 0xada   : > { %2095 = vst.msk [vmem:[#allocation2 + $0x144] sm:$0xf] %vm1562_vm11, %v2062_v26 }
 0xadb   : > { %v15673_v40 = vadd.f32 %v6109_v22, %v6108_v19  ;;  %v11370_v22 = vld [vmem:[#allocation2 + $0xe8] sm:$0xff] }
 0xadd   : > { %18033 = vst [vmem:[#allocation43_spill] sm:$0xff] %v15673_v40  ;;  %v5801_v25 = vpop.f32.mrf.mxu3  ;;  %v6042_v38 = vpop.f32.mrf.mxu2 }
 0xade   : > { %v6112_v54 = vsel %vm514_vm0, %v5801_v25, 0.0  ;;  %10810 = vmatmul.msk.bf16.gmra.mxu2 %vm2635_vm12, %v11368_v0  ;;  %v6123_v62 = vsel %vm514_vm0, %v6042_v38, 0.0 }
 0xadf   : > { %v15678_v43 = vadd.f32 %v6112_v54, %v6111_v23  ;;  %v5685_v30 = vpop.f32.mrf.mxu1  ;;  %v15689_v59 = vpop.f32.mrf.mxu0 }
 0xae0   : > { %v6118_v10 = vsel %vm514_vm0, %v5685_v30, 0.0  ;;  %18036 = vst [vmem:[#allocation37_spill] sm:$0xff] %v15689_v59 }
 0xae1   : > { %18034 = vst [vmem:[#allocation74_spill] sm:$0xff] %v15678_v43 }
 0xae2   : > { %10747 = vmatmul.msk.bf16.gmra.mxu1 %vm2635_vm12, %v11361_v58  ;;  %10755 = vmatmul.msk.bf16.gmra.mxu3 %vm2635_vm12, %v11361_v58  ;;  %v12135_v58 = vpop.trf.xlu2 }
 0xae5   : > { %v5804_v15 = vpop.f32.mrf.mxu3  ;;  %v15691_v52 = vpop.f32.mrf.mxu2 }
 0xae6   : > { %v6119_v42 = vsel %vm514_vm0, %v5804_v15, 0.0  ;;  %10802 = vmatmul.msk.bf16.gmra.mxu0 %vm2635_vm12, %v11368_v0  ;;  %18037 = vst [vmem:[#allocation48_spill] sm:$0xff] %v15691_v52 }
 0xae7   : > { %v6120_v1 = vadd.f32 %v6119_v42, %v6118_v10  ;;  %v5687_v41 = vpop.f32.mrf.mxu1 }
 0xae8   : > { %v6125_v16 = vsel %vm514_vm0, %v5687_v41, 0.0 }
 0xae9   : > { %v6122_v3 = vadd.f32 %v6121_v61, %v6120_v1  ;;  %v12139_v61 = vunpack.i.h.bf16 %v12135_v58 }
 0xaeb   : > { %v15687_v4 = vadd.f32 %v6123_v62, %v6122_v3  ;;  %v12136_v3 = vunpack.i.l.bf16 %v12135_v58  ;;  %v12140_v62 = vpop.trf.xlu2 }
 0xaed   : > { %18035 = vst [vmem:[#allocation75_spill] sm:$0xff] %v15687_v4  ;;  %v5806_v21 = vpop.f32.mrf.mxu3 }
 0xaee   : > { %v6126_v47 = vsel %vm514_vm0, %v5806_v21, 0.0  ;;  %10811 = vmatmul.msk.bf16.gmra.mxu2 %vm2635_vm12, %v11369_v37  ;;  %v2063_v21 = vpack.c.bf16 %v12139_v61, %v12139_v61 }
 0xaef   : > { %v15696_v35 = vadd.f32 %v6126_v47, %v6125_v16  ;;  %v5690_v45 = vpop.f32.mrf.mxu1  ;;  %v2321_v16 = vpack.c.bf16 %v12136_v3, %v12136_v3  ;;  %v12141_v47 = vunpack.i.l.bf16 %v12140_v62 }
 0xaf0   : > { %v6132_v50 = vsel %vm514_vm0, %v5690_v45, 0.0  ;;  %2096 = vst.msk [vmem:[#allocation2 + $0x148] sm:$0xf] %vm1562_vm11, %v2063_v21 }
 0xaf1   : > { %18038 = vst [vmem:[#allocation38_spill] sm:$0xff] %v15696_v35  ;;  %v6047_v5 = vpop.f32.mrf.mxu2  ;;  %v2322_v7 = vpack.c.bf16 %v12141_v47, %v12141_v47  ;;  %v11444_v47 = vld [vmem:[#allocation4 + $0x178] sm:$0xff] }
 0xaf2   : > { %10748 = vmatmul.msk.bf16.gmra.mxu1 %vm2635_vm12, %v11362_v39  ;;  %10756 = vmatmul.msk.bf16.gmra.mxu3 %vm2635_vm12, %v11362_v39  ;;  %v6137_v12 = vsel %vm514_vm0, %v6047_v5, 0.0  ;;  %2354 = vst.msk [vmem:[#allocation2 + $0x1c8] sm:$0xf] %vm1562_vm11, %v2321_v16  ;;  %v11436_v16 = vld [vmem:[#allocation4 + $0x138] sm:$0xff] }
 0xaf3   : > { %2355 = vst.msk [vmem:[#allocation2 + $0x1cc] sm:$0xf] %vm1562_vm11, %v2322_v7  ;;  %v12145_v5 = vpop.trf.xlu2 }
 0xaf4   : > { %v5928_v6 = vpop.f32.mrf.mxu0 }
 0xaf5   : > { %v5809_v34 = vpop.f32.mrf.mxu3  ;;  %v6135_v13 = vsel %vm514_vm0, %v5928_v6, 0.0 }
 0xaf6   : > { %v6133_v29 = vsel %vm514_vm0, %v5809_v34, 0.0  ;;  %10803 = vmatmul.msk.bf16.gmra.mxu0 %vm2635_vm12, %v11369_v37  ;;  %v12144_v37 = vunpack.i.h.bf16 %v12140_v62 }
 0xaf7   : > { %v6134_v18 = vadd.f32 %v6133_v29, %v6132_v50  ;;  %v5692_v2 = vpop.f32.mrf.mxu1  ;;  %v11364_v29 = vld [vmem:[#allocation2 + $0x78] sm:$0xff] }
 0xaf8   : > { %v6139_v25 = vsel %vm514_vm0, %v5692_v2, 0.0  ;;  %v2064_v45 = vpack.c.bf16 %v12144_v37, %v12144_v37  ;;  %v11373_v37 = vld [vmem:[#allocation2 + $0x140] sm:$0xff] }
 0xaf9   : > { %v6136_v49 = vadd.f32 %v6135_v13, %v6134_v18  ;;  %v15716_v38 = vpop.f32.mrf.mxu2 }
 0xafa   : > { %18041 = vst [vmem:[#allocation73_spill] sm:$0xff] %v15716_v38 }
 0xafb   : > { %v15709_v19 = vadd.f32 %v6137_v12, %v6136_v49  ;;  %2097 = vst.msk [vmem:[#allocation2 + $0x14c] sm:$0xf] %vm1562_vm11, %v2064_v45 }
 0xafc   : > { %v15720_v15 = vpop.f32.mrf.mxu0 }
 0xafd   : > { %18039 = vst [vmem:[#allocation76_spill] sm:$0xff] %v15709_v19  ;;  %v5811_v0 = vpop.f32.mrf.mxu3 }
 0xafe   : > { %v6140_v23 = vsel %vm514_vm0, %v5811_v0, 0.0  ;;  %10812 = vmatmul.msk.bf16.gmra.mxu2 %vm2635_vm12, %v11370_v22  ;;  %18042 = vst [vmem:[#allocation84_spill] sm:$0xff] %v15720_v15  ;;  %v12149_v0 = vunpack.i.h.bf16 %v12145_v5 }
 0xaff   : > { %v15714_v54 = vadd.f32 %v6140_v23, %v6139_v25  ;;  %v5695_v30 = vpop.f32.mrf.mxu1  ;;  %v12146_v25 = vunpack.i.l.bf16 %v12145_v5  ;;  %v12150_v23 = vpop.trf.xlu2  ;;  %v11434_v5 = vld [vmem:[#allocation4 + $0x128] sm:$0xff] }
 0xb00   : > { %v6146_v42 = vsel %vm514_vm0, %v5695_v30, 0.0  ;;  %v12154_v30 = vunpack.i.h.bf16 %v12150_v23  ;;  %v12151_v45 = vunpack.i.l.bf16 %v12150_v23 }
 0xb01   : > { %18040 = vst [vmem:[#allocation50_spill] sm:$0xff] %v15714_v54  ;;  %v6052_v14 = vpop.f32.mrf.mxu2 }
 0xb02   : > { %10749 = vmatmul.msk.bf16.gmra.mxu1 %vm2635_vm12, %v11363_v33  ;;  %10757 = vmatmul.msk.bf16.gmra.mxu3 %vm2635_vm12, %v11363_v33  ;;  %v6151_v53 = vsel %vm514_vm0, %v6052_v14, 0.0  ;;  %v2065_v33 = vpack.c.bf16 %v12149_v0, %v12149_v0  ;;  %v11441_v0 = vld [vmem:[#allocation4 + $0x160] sm:$0xff] }
 0xb04   : > { %2098 = vst.msk [vmem:[#allocation2 + $0x150] sm:$0xf] %vm1562_vm11, %v2065_v33  ;;  %v11374_v33 = vld [vmem:[#allocation2 + $0x148] sm:$0xff] }
 0xb05   : > { %v5814_v10 = vpop.f32.mrf.mxu3 }
 0xb06   : > { %v6147_v1 = vsel %vm514_vm0, %v5814_v10, 0.0  ;;  %10804 = vmatmul.msk.bf16.gmra.mxu0 %vm2635_vm12, %v11370_v22  ;;  %v2323_v10 = vpack.c.bf16 %v12146_v25, %v12146_v25 }
 0xb07   : > { %v6148_v41 = vadd.f32 %v6147_v1, %v6146_v42  ;;  %v5697_v31 = vpop.f32.mrf.mxu1  ;;  %v11372_v42 = vld [vmem:[#allocation2 + $0xf8] sm:$0xff]  ;;  %v2066_v1 = vpack.c.bf16 %v12154_v30, %v12154_v30  ;;  %v12155_v25 = vpop.trf.xlu2 }
 0xb08   : > { %v6153_v26 = vsel %vm514_vm0, %v5697_v31, 0.0  ;;  %2356 = vst.msk [vmem:[#allocation2 + $0x1d0] sm:$0xf] %vm1562_vm11, %v2323_v10  ;;  %v11460_v30 = vld [vmem:[#allocation4 + $0x1f8] sm:$0xff] }
 0xb09   : > { %v15743_v22 = vpop.f32.mrf.mxu2  ;;  %2099 = vst.msk [vmem:[#allocation2 + $0x154] sm:$0xf] %vm1562_vm11, %v2066_v1  ;;  %v11432_v1 = vld [vmem:[#allocation4 + $0x118] sm:$0xff] }
 0xb0a   : > { %18045 = vst [vmem:[#allocation80_spill] sm:$0xff] %v15743_v22 }
 0xb0b   : > { %v5933_v44 = vpop.f32.mrf.mxu0 }
 0xb0c   : > { %v6149_v39 = vsel %vm514_vm0, %v5933_v44, 0.0  ;;  %v2324_v44 = vpack.c.bf16 %v12151_v45, %v12151_v45 }
 0xb0d   : > { %v6150_v9 = vadd.f32 %v6149_v39, %v6148_v41  ;;  %v5816_v28 = vpop.f32.mrf.mxu3 }
 0xb0e   : > { %v6154_v56 = vsel %vm514_vm0, %v5816_v28, 0.0  ;;  %10813 = vmatmul.msk.bf16.gmra.mxu2 %vm2635_vm12, %v11371_v27  ;;  %v11443_v28 = vld [vmem:[#allocation4 + $0x170] sm:$0xff]  ;;  %2357 = vst.msk [vmem:[#allocation2 + $0x1d4] sm:$0xf] %vm1562_vm11, %v2324_v44  ;;  %v11458_v44 = vld [vmem:[#allocation4 + $0x1e8] sm:$0xff] }
 0xb0f   : > { %v15734_v6 = vadd.f32 %v6151_v53, %v6150_v9  ;;  %v15736_v34 = vadd.f32 %v6154_v56, %v6153_v26  ;;  %v5700_v50 = vpop.f32.mrf.mxu1  ;;  %v11435_v9 = vld [vmem:[#allocation4 + $0x130] sm:$0xff] }
 0xb10   : > { %v6160_v2 = vsel %vm514_vm0, %v5700_v50, 0.0 }
 0xb11   : > { %18043 = vst [vmem:[#allocation86_spill] sm:$0xff] %v15734_v6 }
 0xb12   : > { %18044 = vst [vmem:[#allocation78_spill] sm:$0xff] %v15736_v34  ;;  %10750 = vmatmul.msk.bf16.gmra.mxu1 %vm2635_vm12, %v11364_v29  ;;  %10758 = vmatmul.msk.bf16.gmra.mxu3 %vm2635_vm12, %v11364_v29 }
 0xb13   : > { %v15745_v58 = vpop.f32.mrf.mxu0 }
 0xb14   : > { %18046 = vst [vmem:[#allocation67_spill] sm:$0xff] %v15745_v58 }
 0xb15   : > { %v5819_v18 = vpop.f32.mrf.mxu3 }
 0xb16   : > { %v6161_v13 = vsel %vm514_vm0, %v5819_v18, 0.0  ;;  %10805 = vmatmul.msk.bf16.gmra.mxu0 %vm2635_vm12, %v11371_v27  ;;  %v11442_v18 = vld [vmem:[#allocation4 + $0x168] sm:$0xff] }
 0xb17   : > { %v6162_v49 = vadd.f32 %v6161_v13, %v6160_v2  ;;  %v5702_v12 = vpop.f32.mrf.mxu1  ;;  %v11381_v13 = vld [vmem:[#allocation2 + $0x1c0] sm:$0xff] }
 0xb18   : > { %v6167_v31 = vsel %vm514_vm0, %v5702_v12, 0.0  ;;  %v11433_v12 = vld [vmem:[#allocation4 + $0x120] sm:$0xff] }
 0xb1d   : > { %v5821_v41 = vpop.f32.mrf.mxu3 }
 0xb1e   : > { %v6168_v61 = vsel %vm514_vm0, %v5821_v41, 0.0  ;;  %10814 = vmatmul.msk.bf16.gmra.mxu2 %vm2635_vm12, %v11372_v42  ;;  %v11440_v41 = vld [vmem:[#allocation4 + $0x158] sm:$0xff] }
 0xb1f   : > { %v15752_v3 = vadd.f32 %v6168_v61, %v6167_v31  ;;  %v15754_v62 = vpop.f32.mrf.mxu1  ;;  %v11459_v31 = vld [vmem:[#allocation4 + $0x1f0] sm:$0xff] }
 0xb21   : > { %18047 = vst [vmem:[#allocation90_spill] sm:$0xff] %v15752_v3  ;;  %v6057_v21 = vpop.f32.mrf.mxu2 }
 0xb22   : > { %10855 = vmatmul.msk.bf16.vlgmr.msrb.gmra.mxu1 %vm2635_vm12, %v11373_v37  ;;  %10863 = vmatmul.msk.bf16.vlgmr.msrb.gmra.mxu3 %vm2635_vm12, %v11373_v37  ;;  %v6165_v53 = vsel %vm514_vm0, %v6057_v21, 0.0  ;;  %v11431_v21 = vld [vmem:[#allocation4 + $0x110] sm:$0xff] }
 0xb23   : > { %8915 = vmatpush.bf16.msrb.mxu1 %v11436_v16  ;;  %8964 = vmatpush.bf16.msrb.mxu3 %v11444_v47  ;;  %v5938_v14 = vpop.f32.mrf.mxu0  ;;  %v11439_v16 = vld [vmem:[#allocation4 + $0x150] sm:$0xff]  ;;  %v12160_v47 = vpop.trf.xlu2 }
 0xb24   : > { %v6163_v7 = vsel %vm514_vm0, %v5938_v14, 0.0  ;;  %v11452_v14 = vld [vmem:[#allocation4 + $0x1b8] sm:$0xff] }
 0xb25   : > { %v6164_v39 = vadd.f32 %v6163_v7, %v6162_v49  ;;  %v15760_v27 = vpop.f32.mrf.mxu3  ;;  %v12159_v7 = vunpack.i.h.bf16 %v12155_v25 }
 0xb26   : > { %v7039_v26 = vmax.f32 %v15754_v62, %v15760_v27  ;;  %10806 = vmatmul.msk.bf16.gmra.mxu0 %vm2635_vm12, %v11372_v42 }
 0xb27   : > { %v15767_v56 = vadd.f32 %v6165_v53, %v6164_v39  ;;  %8916 = vmatpush.bf16.msrb.mxu1 %v11435_v9  ;;  %8965 = vmatpush.bf16.msrb.mxu3 %v11443_v28  ;;  %v15769_v50 = vpop.f32.mrf.mxu1  ;;  %v12164_v39 = vunpack.i.h.bf16 %v12160_v47  ;;  %v2067_v28 = vpack.c.bf16 %v12159_v7, %v12159_v7  ;;  %v12161_v7 = vunpack.i.l.bf16 %v12160_v47  ;;  %v11448_v47 = vld [vmem:[#allocation4 + $0x198] sm:$0xff] }
 0xb28   : > { %7040 = vmax.xlane.f32.xlu0 %v7039_v26 }
 0xb29   : > { %18048 = vst [vmem:[#allocation56_spill] sm:$0xff] %v15767_v56  ;;  %v15771_v29 = vpop.f32.mrf.mxu2  ;;  %v2068_v53 = vpack.c.bf16 %v12164_v39, %v12164_v39  ;;  %v11449_v39 = vld [vmem:[#allocation4 + $0x1a0] sm:$0xff] }
 0xb2a   : > { %18049 = vst [vmem:[#allocation82_spill] sm:$0xff] %v15771_v29 }
 0xb2b   : > { %8917 = vmatpush.bf16.msrb.mxu1 %v11434_v5  ;;  %8966 = vmatpush.bf16.msrb.mxu3 %v11442_v18  ;;  %v15773_v2 = vpop.f32.mrf.mxu0  ;;  %v11430_v5 = vld [vmem:[#allocation4 + $0x108] sm:$0xff]  ;;  %2100 = vst.msk [vmem:[#allocation2 + $0x158] sm:$0xf] %vm1562_vm11, %v2067_v28  ;;  %v11455_v28 = vld [vmem:[#allocation4 + $0x1d0] sm:$0xff]  ;;  %v12165_v54 = vpop.trf.xlu2 }
 0xb2c   : > { %18050 = vst [vmem:[#allocation92_spill] sm:$0xff] %v15773_v2  ;;  %v11438_v18 = vld [vmem:[#allocation4 + $0x148] sm:$0xff]  ;;  %v12169_v19 = vunpack.i.h.bf16 %v12165_v54  ;;  %v12166_v15 = vunpack.i.l.bf16 %v12165_v54 }
 0xb2d   : > { %v15775_v49 = vpop.f32.mrf.mxu3  ;;  %2101 = vst.msk [vmem:[#allocation2 + $0x15c] sm:$0xf] %vm1562_vm11, %v2068_v53 }
 0xb2e   : > { %v7042_v23 = vmax.f32 %v15769_v50, %v15775_v49  ;;  %10919 = vmatmul.msk.bf16.vlgmr.msrb.gmra.mxu2 %vm2635_vm12, %v11381_v13  ;;  %v2327_v52 = vpack.c.bf16 %v12166_v15, %v12166_v15 }
 0xb2f   : > { %8918 = vmatpush.bf16.msrb.mxu1 %v11433_v12  ;;  %8967 = vmatpush.bf16.msrb.mxu3 %v11441_v0  ;;  %v15780_v10 = vpop.f32.mrf.mxu1  ;;  %v12156_v12 = vunpack.i.l.bf16 %v12155_v25  ;;  %v11451_v0 = vld [vmem:[#allocation4 + $0x1b0] sm:$0xff] }
 0xb30   : > { %9238 = vmatpush.bf16.msrb.mxu2 %v11460_v30  ;;  %7043 = vmax.xlane.f32.xlu1 %v7042_v23  ;;  %2360 = vst.msk [vmem:[#allocation2 + $0x1e0] sm:$0xf] %vm1562_vm11, %v2327_v52 }
 0xb31   : > { %v15782_v42 = vpop.f32.mrf.mxu2  ;;  %v2325_v30 = vpack.c.bf16 %v12156_v12, %v12156_v12 }
 0xb32   : > { %10864 = vmatmul.msk.bf16.gmra.mxu3 %vm2635_vm12, %v11374_v33  ;;  %10856 = vmatmul.msk.bf16.gmra.mxu1 %vm2635_vm12, %v11374_v33  ;;  %v11382_v33 = vld [vmem:[#allocation2 + $0x1c8] sm:$0xff] }
 0xb33   : > { %8919 = vmatpush.bf16.msrb.mxu1 %v11432_v1  ;;  %8968 = vmatpush.bf16.msrb.mxu3 %v11440_v41  ;;  %v15786_v61 = vpop.f32.mrf.mxu0  ;;  %v11429_v41 = vld [vmem:[#allocation4 + $0x100] sm:$0xff]  ;;  %2358 = vst.msk [vmem:[#allocation2 + $0x1d8] sm:$0xf] %vm1562_vm11, %v2325_v30 }
 0xb34   : > { %9239 = vmatpush.bf16.msrb.mxu2 %v11459_v31  ;;  %v11437_v31 = vld [vmem:[#allocation4 + $0x140] sm:$0xff] }
 0xb35   : > { %v15788_v37 = vpop.f32.mrf.mxu3 }
 0xb36   : > { %v7045_v45 = vmax.f32 %v15780_v10, %v15788_v37  ;;  %10911 = vmatmul.msk.bf16.vlgmr.msrb.gmra.mxu0 %vm2635_vm12, %v11381_v13  ;;  %v11457_v13 = vld [vmem:[#allocation4 + $0x1e0] sm:$0xff] }
 0xb37   : > { %8920 = vmatpush.bf16.msrb.mxu1 %v11431_v21  ;;  %8969 = vmatpush.bf16.msrb.mxu3 %v11439_v16  ;;  %v15793_v9 = vpop.f32.mrf.mxu1  ;;  %v11450_v21 = vld [vmem:[#allocation4 + $0x1a8] sm:$0xff]  ;;  %v11456_v16 = vld [vmem:[#allocation4 + $0x1d8] sm:$0xff] }
 0xb38   : > { %9189 = vmatpush.bf16.msrb.mxu0 %v11452_v14  ;;  %9240 = vmatpush.bf16.msrb.mxu2 %v11458_v44 }
 0xb39   : > { %7046 = vmax.xlane.f32.xlu0 %v7045_v45  ;;  %v15795_v26 = vpop.f32.mrf.mxu2  ;;  %v11375_v45 = vld [vmem:[#allocation2 + $0x150] sm:$0xff] }
 0xb3b   : > { %8921 = vmatpush.bf16.msrb.mxu1 %v11430_v5  ;;  %8970 = vmatpush.bf16.msrb.mxu3 %v11438_v18  ;;  %v15798_v23 = vpop.f32.mrf.mxu0  ;;  %v2326_v5 = vpack.c.bf16 %v12161_v7, %v12161_v7  ;;  %v11376_v7 = vld [vmem:[#allocation2 + $0x158] sm:$0xff] }
 0xb3c   : > { %9190 = vmatpush.bf16.msrb.mxu0 %v11451_v0  ;;  %9241 = vmatpush.bf16.msrb.mxu2 %v11457_v13  ;;  %v11454_v0 = vld [vmem:[#allocation4 + $0x1c8] sm:$0xff] }
 0xb3d   : > { %v15801_v1 = vpop.f32.mrf.mxu3  ;;  %2359 = vst.msk [vmem:[#allocation2 + $0x1dc] sm:$0xf] %vm1562_vm11, %v2326_v5 }
 0xb3e   : > { %v7048_v25 = vmax.f32 %v15793_v9, %v15801_v1  ;;  %10920 = vmatmul.msk.bf16.gmra.mxu2 %vm2635_vm12, %v11382_v33 }
 0xb3f   : > { %8922 = vmatpush.bf16.msrb.mxu1 %v11429_v41  ;;  %8971 = vmatpush.bf16.msrb.mxu3 %v11437_v31  ;;  %v15807_v14 = vpop.f32.mrf.mxu1  ;;  %v11447_v41 = vld [vmem:[#allocation4 + $0x190] sm:$0xff]  ;;  %v11453_v31 = vld [vmem:[#allocation4 + $0x1c0] sm:$0xff] }
 0xb40   : > { %9191 = vmatpush.bf16.msrb.mxu0 %v11450_v21  ;;  %9242 = vmatpush.bf16.msrb.mxu2 %v11456_v16 }
 0xb41   : > { %7049 = vmax.xlane.f32.xlu1 %v7048_v25  ;;  %v15809_v44 = vpop.f32.mrf.mxu2  ;;  %v11383_v25 = vld [vmem:[#allocation2 + $0x1d0] sm:$0xff] }
 0xb42   : > { %10865 = vmatmul.msk.bf16.gmra.mxu3 %vm2635_vm12, %v11375_v45  ;;  %10857 = vmatmul.msk.bf16.gmra.mxu1 %vm2635_vm12, %v11375_v45  ;;  %v11446_v45 = vld [vmem:[#allocation4 + $0x188] sm:$0xff] }
 0xb43   : > { %v15813_v53 = vpop.f32.mrf.mxu0 }
 0xb44   : > { %9192 = vmatpush.bf16.msrb.mxu0 %v11449_v39  ;;  %9243 = vmatpush.bf16.msrb.mxu2 %v11455_v28  ;;  %v7087_v39 = vmax.f32 %v15786_v61, %v15782_v42  ;;  %v11384_v4 = vld [vmem:[#allocation2 + $0x1d8] sm:$0xff] }
 0xb45   : > { %v15815_v18 = vpop.f32.mrf.mxu3 }
 0xb46   : > { %v7051_v12 = vmax.f32 %v15807_v14, %v15815_v18  ;;  %10912 = vmatmul.msk.bf16.gmra.mxu0 %vm2635_vm12, %v11382_v33 }
 0xb47   : > { %v15821_v13 = vpop.f32.mrf.mxu1 }
 0xb48   : > { %9193 = vmatpush.bf16.msrb.mxu0 %v11448_v47  ;;  %9244 = vmatpush.bf16.msrb.mxu2 %v11454_v0 }
 0xb49   : > { %7052 = vmax.xlane.f32.xlu0 %v7051_v12  ;;  %v15823_v30 = vpop.f32.mrf.mxu2  ;;  %v11445_v12 = vld [vmem:[#allocation4 + $0x180] sm:$0xff] }
 0xb4b   : > { %v15825_v21 = vpop.f32.mrf.mxu0 }
 0xb4c   : > { %9194 = vmatpush.bf16.msrb.mxu0 %v11447_v41  ;;  %9245 = vmatpush.bf16.msrb.mxu2 %v11453_v31  ;;  %v7090_v41 = vmax.f32 %v15798_v23, %v15795_v26  ;;  %v7093_v31 = vmax.f32 %v15813_v53, %v15809_v44 }
 0xb4d   : > { %v15827_v16 = vpop.f32.mrf.mxu3 }
 0xb4e   : > { %v7054_v33 = vmax.f32 %v15821_v13, %v15827_v16  ;;  %10921 = vmatmul.msk.bf16.gmra.mxu2 %vm2635_vm12, %v11383_v25 }
 0xb4f   : > { %v15834_v28 = vpop.f32.mrf.mxu1 }
 0xb50   : > { %9195 = vmatpush.bf16.msrb.mxu0 %v11446_v45  ;;  %7055 = vmax.xlane.f32.xlu1 %v7054_v33 }
 0xb51   : > { %7088 = vmax.xlane.f32.xlu0 %v7087_v39  ;;  %v15836_v5 = vpop.f32.mrf.mxu2 }
 0xb52   : > { %10866 = vmatmul.msk.bf16.gmra.mxu3 %vm2635_vm12, %v11376_v7  ;;  %10858 = vmatmul.msk.bf16.gmra.mxu1 %vm2635_vm12, %v11376_v7 }
 0xb53   : > { %v15840_v47 = vpop.f32.mrf.mxu0 }
 0xb54   : > { %9196 = vmatpush.bf16.msrb.mxu0 %v11445_v12  ;;  %v7096_v12 = vmax.f32 %v15825_v21, %v15823_v30  ;;  %v7099_v29 = vmax.f32 %v15840_v47, %v15836_v5 }
 0xb55   : > { %v15842_v0 = vpop.f32.mrf.mxu3 }
 0xb56   : > { %10913 = vmatmul.msk.bf16.gmra.mxu0 %vm2635_vm12, %v11383_v25  ;;  %v7057_v58 = vmax.f32 %v15834_v28, %v15842_v0 }
 0xb57   : > { %v15849_v33 = vpop.f32.mrf.mxu1 }
 0xb58   : > { %7091 = vmax.xlane.f32.xlu1 %v7090_v41 }
 0xb59   : > { %7094 = vmax.xlane.f32.xlu0 %v7093_v31  ;;  %v15851_v45 = vpop.f32.mrf.mxu2 }
 0xb5b   : > { %v15853_v7 = vpop.f32.mrf.mxu0 }
 0xb5c   : > { %v7102_v2 = vmax.f32 %v15853_v7, %v15851_v45 }
 0xb5d   : > { %v15855_v39 = vpop.f32.mrf.mxu3 }
 0xb5e   : > { %v7060_v22 = vmax.f32 %v15849_v33, %v15855_v39  ;;  %10922 = vmatmul.msk.bf16.gmra.mxu2 %vm2635_vm12, %v11384_v4 }
 0xb5f   : > { %v15861_v25 = vpop.f32.mrf.mxu1 }
 0xb60   : > { %7097 = vmax.xlane.f32.xlu1 %v7096_v12 }
 0xb61   : > { %7100 = vmax.xlane.f32.xlu0 %v7099_v29  ;;  %v15863_v3 = vpop.f32.mrf.mxu2 }
 0xb63   : > { %v15865_v41 = vpop.f32.mrf.mxu0 }
 0xb64   : > { %v7105_v31 = vmax.f32 %v15865_v41, %v15863_v3 }
 0xb65   : > { %v15869_v56 = vpop.f32.mrf.mxu3 }
 0xb66   : > { %7106 = vmax.xlane.f32.xlu2 %v7105_v31  ;;  %v7063_v11 = vmax.f32 %v15861_v25, %v15869_v56  ;;  %10914 = vmatmul.msk.bf16.gmra.mxu0 %vm2635_vm12, %v11384_v4 }
 0xb67   : > { %v15875_v34 = vpop.f32.mrf.mxu1 }
 0xb68   : > { %7103 = vmax.xlane.f32.xlu1 %v7102_v2  ;;  %v2069_v2 = vpack.c.bf16 %v12169_v19, %v12169_v19  ;;  %v12170_v19 = vpop.trf.xlu2 }
 0xb69   : > { %7061 = vmax.xlane.f32.xlu0 %v7060_v22  ;;  %v15877_v29 = vpop.f32.mrf.mxu2  ;;  %v12171_v15 = vunpack.i.l.bf16 %v12170_v19 }
 0xb6a   : > { %2102 = vst.msk [vmem:[#allocation2 + $0x160] sm:$0xf] %vm1562_vm11, %v2069_v2 }
 0xb6b   : > { %v15879_v12 = vpop.f32.mrf.mxu0  ;;  %v2328_v43 = vpack.c.bf16 %v12171_v15, %v12171_v15 }
 0xb6d   : > { %v15881_v6 = vpop.f32.mrf.mxu3  ;;  %2361 = vst.msk [vmem:[#allocation2 + $0x1e4] sm:$0xf] %vm1562_vm11, %v2328_v43  ;;  %v7108_v43 = vmax.f32 %v15879_v12, %v15877_v29 }
 0xb6e   : > { %v7066_v38 = vmax.f32 %v15875_v34, %v15881_v6 }
 0xb6f   : > { %v15887_v31 = vpop.f32.mrf.mxu1 }
 0xb70   : > { %7058 = vmax.xlane.f32.xlu1 %v7057_v58 }
 0xb71   : > { %7067 = vmax.xlane.f32.xlu0 %v7066_v38  ;;  %v15889_v22 = vpop.f32.mrf.mxu2  ;;  %v12174_v38 = vunpack.i.h.bf16 %v12170_v19 }
 0xb72   : > { %18051 = vst [vmem:[#allocation105_spill] sm:$0xff] %v15889_v22 }
 0xb73   : > { %v15891_v35 = vpop.f32.mrf.mxu0  ;;  %v2070_v2 = vpack.c.bf16 %v12174_v38, %v12174_v38 }
 0xb74   : > { %18052 = vst [vmem:[#allocation106_spill] sm:$0xff] %v15891_v35  ;;  %v11385_v15 = vld [vmem:[#allocation2 + $0x1e0] sm:$0xff]  ;;  %v7111_v17 = vmax.f32 %v15891_v35, %v15889_v22 }
 0xb75   : > { %v15894_v59 = vpop.f32.mrf.mxu3  ;;  %2103 = vst.msk [vmem:[#allocation2 + $0x164] sm:$0xf] %vm1562_vm11, %v2070_v2  ;;  %10923 = vmatmul.msk.bf16.gmra.mxu2 %vm2635_vm12, %v11385_v15 }
 0xb76   : > { %v7069_v4 = vmax.f32 %v15887_v31, %v15894_v59  ;;  %10915 = vmatmul.msk.bf16.gmra.mxu0 %vm2635_vm12, %v11385_v15 }
 0xb77   : > { %v15901_v54 = vpop.f32.mrf.mxu1 }
 0xb78   : > { %7064 = vmax.xlane.f32.xlu1 %v7063_v11 }
 0xb79   : > { %v15903_v58 = vpop.f32.mrf.mxu2 }
 0xb7a   : > { %18053 = vst [vmem:[#allocation93_spill] sm:$0xff] %v15903_v58 }
 0xb7b   : > { %v15905_v20 = vpop.f32.mrf.mxu0 }
 0xb7c   : > { %18054 = vst [vmem:[#allocation94_spill] sm:$0xff] %v15905_v20 }
 0xb7d   : > { %v15908_v52 = vpop.f32.mrf.mxu3 }
 0xb7e   : > { %v7072_v11 = vmax.f32 %v15901_v54, %v15908_v52 }
 0xb7f   : > { %v15915_v40 = vpop.f32.mrf.mxu1 }
 0xb80   : > { %18055 = vst [vmem:[#allocation108_spill] sm:$0xff] %v15915_v40  ;;  %7073 = vmax.xlane.f32.xlu0 %v7072_v11  ;;  %7070 = vmax.xlane.f32.xlu1 %v7069_v4  ;;  %v12175_v11 = vpop.trf.xlu2 }
 0xb81   : > { %v15917_v19 = vpop.f32.mrf.mxu2  ;;  %v12179_v55 = vunpack.i.h.bf16 %v12175_v11  ;;  %v12176_v36 = vunpack.i.l.bf16 %v12175_v11 }
 0xb82   : > { %18056 = vst [vmem:[#allocation32_spill] sm:$0xff] %v15917_v19 }
 0xb83   : > { %v15919_v38 = vpop.f32.mrf.mxu0  ;;  %v2071_v24 = vpack.c.bf16 %v12179_v55, %v12179_v55  ;;  %v2329_v46 = vpack.c.bf16 %v12176_v36, %v12176_v36 }
 0xb84   : > { %18057 = vst [vmem:[#allocation98_spill] sm:$0xff] %v15919_v38 }
 0xb85   : > { %v15921_v2 = vpop.f32.mrf.mxu3  ;;  %2104 = vst.msk [vmem:[#allocation2 + $0x168] sm:$0xf] %vm1562_vm11, %v2071_v24  ;;  %v7114_v24 = vmax.f32 %v15905_v20, %v15903_v58 }
 0xb86   : > { %18058 = vst [vmem:[#allocation99_spill] sm:$0xff] %v15921_v2  ;;  %v7075_v32 = vmax.f32 %v15915_v40, %v15921_v2 }
 0xb87   : > { %v15929_v60 = vpop.f32.mrf.mxu1  ;;  %2362 = vst.msk [vmem:[#allocation2 + $0x1e8] sm:$0xf] %vm1562_vm11, %v2329_v46 }
 0xb88   : > { %18059 = vst [vmem:[#allocation72_spill] sm:$0xff] %v15929_v60  ;;  %7076 = vmax.xlane.f32.xlu1 %v7075_v32  ;;  %7109 = vmax.xlane.f32.xlu0 %v7108_v43  ;;  %v12180_v55 = vpop.trf.xlu2 }
 0xb89   : > { %v15931_v4 = vpop.f32.mrf.mxu2  ;;  %v12184_v11 = vunpack.i.h.bf16 %v12180_v55  ;;  %v12181_v51 = vunpack.i.l.bf16 %v12180_v55 }
 0xb8a   : > { %18060 = vst [vmem:[#allocation44_spill] sm:$0xff] %v15931_v4 }
 0xb8b   : > { %v15933_v57 = vpop.f32.mrf.mxu0  ;;  %v2072_v8 = vpack.c.bf16 %v12184_v11, %v12184_v11  ;;  %v2330_v22 = vpack.c.bf16 %v12181_v51, %v12181_v51 }
 0xb8c   : > { %18061 = vst [vmem:[#allocation102_spill] sm:$0xff] %v15933_v57 }
 0xb8d   : > { %v15935_v48 = vpop.f32.mrf.mxu3  ;;  %2105 = vst.msk [vmem:[#allocation2 + $0x16c] sm:$0xf] %vm1562_vm11, %v2072_v8 }
 0xb8e   : > { %18062 = vst [vmem:[#allocation104_spill] sm:$0xff] %v15935_v48  ;;  %v7078_v15 = vmax.f32 %v15929_v60, %v15935_v48 }
 0xb8f   : > { %v15942_v32 = vpop.f32.mrf.mxu1  ;;  %2363 = vst.msk [vmem:[#allocation2 + $0x1ec] sm:$0xf] %vm1562_vm11, %v2330_v22 }
 0xb90   : > { %18063 = vst [vmem:[#allocation25_spill] sm:$0xff] %v15942_v32  ;;  %7079 = vmax.xlane.f32.xlu0 %v7078_v15  ;;  %7112 = vmax.xlane.f32.xlu1 %v7111_v17  ;;  %v12185_v15 = vpop.trf.xlu2 }
 0xb91   : > { %v15945_v43 = vpop.f32.mrf.mxu2  ;;  %v12189_v51 = vunpack.i.h.bf16 %v12185_v15  ;;  %v12186_v48 = vunpack.i.l.bf16 %v12185_v15 }
 0xb92   : > { %18064 = vst [vmem:[#allocation26_spill] sm:$0xff] %v15945_v43 }
 0xb93   : > { %v15947_v36 = vpop.f32.mrf.mxu0  ;;  %v2073_v8 = vpack.c.bf16 %v12189_v51, %v12189_v51  ;;  %v2331_v20 = vpack.c.bf16 %v12186_v48, %v12186_v48 }
 0xb94   : > { %18065 = vst [vmem:[#allocation19_spill] sm:$0xff] %v15947_v36 }
 0xb95   : > { %v15949_v63 = vpop.f32.mrf.mxu3  ;;  %2106 = vst.msk [vmem:[#allocation2 + $0x170] sm:$0xf] %vm1562_vm11, %v2073_v8 }
 0xb96   : > { %18066 = vst [vmem:[#allocation22_spill] sm:$0xff] %v15949_v63  ;;  %v7081_v35 = vmax.f32 %v15942_v32, %v15949_v63 }
 0xb97   : > { %v15956_v17 = vpop.f32.mrf.mxu1  ;;  %2364 = vst.msk [vmem:[#allocation2 + $0x1f0] sm:$0xf] %vm1562_vm11, %v2331_v20 }
 0xb98   : > { %7082 = vmax.xlane.f32.xlu1 %v7081_v35  ;;  %7115 = vmax.xlane.f32.xlu0 %v7114_v24  ;;  %v7117_v35 = vmax.f32 %v15919_v38, %v15917_v19 }
 0xb99   : > { %v15959_v46 = vpop.f32.mrf.mxu2 }
 0xb9a   : > { %18067 = vst [vmem:[#allocation21_spill] sm:$0xff] %v15959_v46 }
 0xb9b   : > { %v7041_v55 = vpop.xlane.xlu0 %7040  ;;  %v15961_v11 = vpop.f32.mrf.mxu0 }
 0xb9c   : > { %18068 = vst [vmem:[#allocation17_spill] sm:$0xff] %v15961_v11  ;;  %v7231_v58 = vsub.f32 %v15754_v62, %v7041_v55  ;;  %v7232_v63 = vsub.f32 %v15760_v27, %v7041_v55  ;;  %v12190_v55 = vpop.trf.xlu2 }
 0xb9d   : > { %v15965_v32 = vpop.f32.mrf.mxu3  ;;  %v12194_v19 = vunpack.i.h.bf16 %v12190_v55  ;;  %v12191_v38 = vunpack.i.l.bf16 %v12190_v55 }
 0xb9e   : > { %v7084_v22 = vmax.f32 %v15956_v17, %v15965_v32  ;;  %v7359_v24 = vmul.f32 1.442695, %v7231_v58  ;;  %v7361_v62 = vmul.f32 1.442695, %v7232_v63 }
 0xb9f   : > { %v15975_v27 = vpop.f32.mrf.mxu1  ;;  %v2074_v20 = vpack.c.bf16 %v12194_v19, %v12194_v19  ;;  %v2332_v63 = vpack.c.bf16 %v12191_v38, %v12191_v38 }
 0xba0   : > { %7085 = vmax.xlane.f32.xlu0 %v7084_v22  ;;  %7118 = vmax.xlane.f32.xlu1 %v7117_v35  ;;  %18070 = vst [vmem:[#allocation24_spill] sm:$0xff] %v15975_v27  ;;  %12605 = vpow2.f32 %v7359_v24  ;;  %v7120_v35 = vmax.f32 %v15933_v57, %v15931_v4 }
 0xba1   : > { %v15973_v15 = vpop.f32.mrf.mxu2  ;;  %12607 = vpow2.f32 %v7361_v62  ;;  %2107 = vst.msk [vmem:[#allocation2 + $0x174] sm:$0xf] %vm1562_vm11, %v2074_v20 }
 0xba2   : > { %18069 = vst [vmem:[#allocation18_spill] sm:$0xff] %v15973_v15 }
 0xba3   : > { %v7044_v48 = vpop.xlane.xlu1 %7043  ;;  %v15977_v51 = vpop.f32.mrf.mxu0  ;;  %2365 = vst.msk [vmem:[#allocation2 + $0x1f4] sm:$0xf] %vm1562_vm11, %v2332_v63 }
 0xba4   : > { %v7233_v60 = vsub.f32 %v15769_v50, %v7044_v48  ;;  %v7234_v58 = vsub.f32 %v15775_v49, %v7044_v48  ;;  %v12195_v62 = vpop.trf.xlu2  ;;  %v11377_v48 = vld [vmem:[#allocation2 + $0x160] sm:$0xff] }
 0xba5   : > { %v15981_v8 = vpop.f32.mrf.mxu3  ;;  %v12199_v55 = vunpack.i.h.bf16 %v12195_v62  ;;  %10867 = vmatmul.msk.bf16.gmra.mxu3 %vm2635_vm12, %v11377_v48  ;;  %10859 = vmatmul.msk.bf16.gmra.mxu1 %vm2635_vm12, %v11377_v48 }
 0xba6   : > { %18071 = vst [vmem:[#allocation64_spill] sm:$0xff] %v15981_v8  ;;  %v7135_v22 = vmax.f32 %v15975_v27, %v15981_v8  ;;  %v7363_v2 = vmul.f32 1.442695, %v7233_v60  ;;  %v7365_v50 = vmul.f32 1.442695, %v7234_v58  ;;  %v15991_v49 = vpop.eup %12605 }
 0xba7   : > { %18072 = vst [vmem:[#allocation34_spill] sm:$0xff] %v15991_v49  ;;  %v15993_v19 = vpop.eup %12607  ;;  %v15997_v20 = vpop.f32.mrf.mxu1 }
 0xba8   : > { %7121 = vmax.xlane.f32.xlu0 %v7120_v35  ;;  %7136 = vmax.xlane.f32.xlu1 %v7135_v22  ;;  %18073 = vst [vmem:[#allocation57_spill] sm:$0xff] %v15993_v19  ;;  %12609 = vpow2.f32 %v7363_v2  ;;  %v12196_v35 = vunpack.i.l.bf16 %v12195_v62  ;;  %v7615_v63 = vadd.f32 %v15993_v19, %v15991_v49  ;;  %v2075_v22 = vpack.c.bf16 %v12199_v55, %v12199_v55 }
 0xba9   : > { %v15989_v24 = vpop.f32.mrf.mxu2  ;;  %12611 = vpow2.f32 %v7365_v50  ;;  %18074 = vst [vmem:[#allocation52_spill] sm:$0xff] %v15997_v20 }
 0xbaa   : > { %v2333_v2 = vpack.c.bf16 %v12196_v35, %v12196_v35  ;;  %2108 = vst.msk [vmem:[#allocation2 + $0x178] sm:$0xf] %vm1562_vm11, %v2075_v22 }
 0xbab   : > { %v15995_v38 = vpop.f32.mrf.mxu0 }
 0xbac   : > { %v7047_v50 = vpop.xlane.xlu0 %7046  ;;  %2366 = vst.msk [vmem:[#allocation2 + $0x1f8] sm:$0xf] %vm1562_vm11, %v2333_v2  ;;  %v12200_v55 = vpop.trf.xlu2 }
 0xbad   : > { %v15999_v60 = vpop.f32.mrf.mxu3  ;;  %v7235_v27 = vsub.f32 %v15780_v10, %v7047_v50  ;;  %v12204_v48 = vunpack.i.h.bf16 %v12200_v55  ;;  %v7236_v35 = vsub.f32 %v15788_v37, %v7047_v50 }
 0xbae   : > { %18075 = vst [vmem:[#allocation20_spill] sm:$0xff] %v15999_v60  ;;  %v7138_v58 = vmax.f32 %v15997_v20, %v15999_v60  ;;  %v16011_v62 = vpop.eup %12609 }
 0xbaf   : > { %v16013_v60 = vpop.eup %12611  ;;  %v2076_v2 = vpack.c.bf16 %v12204_v48, %v12204_v48  ;;  %v7367_v57 = vmul.f32 1.442695, %v7235_v27  ;;  %v7369_v10 = vmul.f32 1.442695, %v7236_v35  ;;  %v16031_v50 = vpop.f32.mrf.mxu1 }
 0xbb0   : > { %7616 = vadd.xlane.f32.xlu1 %v7615_v63  ;;  %7139 = vmax.xlane.f32.xlu0 %v7138_v58  ;;  %v12201_v58 = vunpack.i.l.bf16 %v12200_v55  ;;  %v7123_v63 = vmax.f32 %v15947_v36, %v15945_v43  ;;  %v7618_v22 = vadd.f32 %v16013_v60, %v16011_v62  ;;  %18079 = vst [vmem:[#allocation47_spill] sm:$0xff] %v16031_v50 }
 0xbb1   : > { %v16008_v8 = vpop.f32.mrf.mxu2  ;;  %2109 = vst.msk [vmem:[#allocation2 + $0x17c] sm:$0xf] %vm1562_vm11, %v2076_v2  ;;  %12613 = vpow2.f32 %v7367_v57 }
 0xbb2   : > { %18076 = vst [vmem:[#allocation27_spill] sm:$0xff] %v16008_v8  ;;  %v2334_v4 = vpack.c.bf16 %v12201_v58, %v12201_v58  ;;  %12615 = vpow2.f32 %v7369_v10  ;;  %v7126_v58 = vmax.f32 %v15961_v11, %v15959_v46 }
 0xbb3   : > { %v16015_v20 = vpop.f32.mrf.mxu0 }
 0xbb4   : > { %18077 = vst [vmem:[#allocation59_spill] sm:$0xff] %v16015_v20  ;;  %v7050_v49 = vpop.xlane.xlu1 %7049 }
 0xbb5   : > { %v16023_v19 = vpop.f32.mrf.mxu3  ;;  %2367 = vst.msk [vmem:[#allocation2 + $0x1fc] sm:$0xf] %vm1562_vm11, %v2334_v4  ;;  %v7237_v55 = vsub.f32 %v15793_v9, %v7050_v49  ;;  %v7238_v48 = vsub.f32 %v15801_v1, %v7050_v49 }
 0xbb6   : > { %18078 = vst [vmem:[#allocation49_spill] sm:$0xff] %v16023_v19  ;;  %v7141_v35 = vmax.f32 %v16031_v50, %v16023_v19 }
 0xbb7   : > { %v7373_v4 = vmul.f32 1.442695, %v7238_v48  ;;  %v16041_v2 = vpop.eup %12613 }
 0xbb8   : > { %7124 = vmax.xlane.f32.xlu1 %v7123_v63  ;;  %7619 = vadd.xlane.f32.xlu0 %v7618_v22  ;;  %v7371_v63 = vmul.f32 1.442695, %v7237_v55  ;;  %18080 = vst [vmem:[#allocation58_spill] sm:$0xff] %v16041_v2  ;;  %v16045_v9 = vpop.eup %12615 }
 0xbb9   : > { %v16026_v40 = vpop.f32.mrf.mxu2  ;;  %18082 = vst [vmem:[#allocation77_spill] sm:$0xff] %v16045_v9 }
 0xbba   : > { %12617 = vpow2.f32 %v7371_v63 }
 0xbbb   : > { %v16029_v37 = vpop.f32.mrf.mxu0  ;;  %12619 = vpow2.f32 %v7373_v4 }
 0xbbc   : > { %v7053_v27 = vpop.xlane.xlu0 %7052 }
 0xbbd   : > { %v16043_v57 = vpop.f32.mrf.mxu3  ;;  %v7239_v49 = vsub.f32 %v15807_v14, %v7053_v27  ;;  %v7240_v55 = vsub.f32 %v15815_v18, %v7053_v27 }
 0xbbe   : > { %18081 = vst [vmem:[#allocation53_spill] sm:$0xff] %v16043_v57 }
 0xbbf   : > { %v7375_v19 = vmul.f32 1.442695, %v7239_v49  ;;  %v7377_v50 = vmul.f32 1.442695, %v7240_v55  ;;  %v7129_v49 = vmax.f32 %v15977_v51, %v15973_v15 }
 0xbc0   : > { %7127 = vmax.xlane.f32.xlu0 %v7126_v58  ;;  %7142 = vmax.xlane.f32.xlu1 %v7141_v35  ;;  %v16051_v58 = vpop.f32.mrf.mxu1  ;;  %v7621_v35 = vadd.f32 %v16045_v9, %v16041_v2  ;;  %v16059_v63 = vpop.eup %12617 }
 0xbc1   : > { %v16039_v22 = vpop.f32.mrf.mxu2  ;;  %18083 = vst [vmem:[#allocation51_spill] sm:$0xff] %v16051_v58  ;;  %v7144_v48 = vmax.f32 %v16051_v58, %v16043_v57  ;;  %v16061_v14 = vpop.eup %12619  ;;  %12621 = vpow2.f32 %v7375_v19 }
 0xbc2   : > { %18084 = vst [vmem:[#allocation54_spill] sm:$0xff] %v16059_v63  ;;  %12623 = vpow2.f32 %v7377_v50  ;;  %v7624_v55 = vadd.f32 %v16061_v14, %v16059_v63  ;;  %v11378_v63 = vld [vmem:[#allocation2 + $0x168] sm:$0xff] }
 0xbc3   : > { %v7056_v10 = vpop.xlane.xlu1 %7055  ;;  %v16047_v1 = vpop.f32.mrf.mxu0  ;;  %18085 = vst [vmem:[#allocation79_spill] sm:$0xff] %v16061_v14  ;;  %v11386_v14 = vld [vmem:[#allocation2 + $0x1e8] sm:$0xff]  ;;  %10868 = vmatmul.msk.bf16.gmra.mxu3 %vm2635_vm12, %v11378_v63  ;;  %10860 = vmatmul.msk.bf16.gmra.mxu1 %vm2635_vm12, %v11378_v63 }
 0xbc4   : > { %v7089_v46 = vpop.xlane.xlu0 %7088  ;;  %v7241_v58 = vsub.f32 %v15821_v13, %v7056_v10  ;;  %v7242_v43 = vsub.f32 %v15827_v16, %v7056_v10  ;;  %10924 = vmatmul.msk.bf16.gmra.mxu2 %vm2635_vm12, %v11386_v14  ;;  %10916 = vmatmul.msk.bf16.gmra.mxu0 %vm2635_vm12, %v11386_v14  ;;  %v7132_v13 = vmax.f32 %v15995_v38, %v15989_v24 }
 0xbc5   : > { %v7263_v2 = vsub.f32 %v15786_v61, %v7089_v46 }
 0xbc6   : > { %v7381_v10 = vmul.f32 1.442695, %v7242_v43 }
 0xbc7   : > { %v16077_v57 = vpop.eup %12621  ;;  %v7423_v61 = vmul.f32 1.442695, %v7263_v2  ;;  %v7183_v2 = vmax.f32 %v16015_v20, %v16008_v8 }
 0xbc8   : > { %7622 = vadd.xlane.f32.xlu1 %v7621_v35  ;;  %7145 = vmax.xlane.f32.xlu0 %v7144_v48  ;;  %v16073_v48 = vpop.f32.mrf.mxu1  ;;  %v16075_v35 = vpop.f32.mrf.mxu3  ;;  %18088 = vst [vmem:[#allocation83_spill] sm:$0xff] %v16077_v57 }
 0xbc9   : > { %v16057_v11 = vpop.f32.mrf.mxu2  ;;  %18086 = vst [vmem:[#allocation35_spill] sm:$0xff] %v16073_v48  ;;  %v16082_v50 = vpop.eup %12623  ;;  %v7147_v63 = vmax.f32 %v16073_v48, %v16075_v35 }
 0xbca   : > { %18087 = vst [vmem:[#allocation81_spill] sm:$0xff] %v16075_v35  ;;  %v7627_v16 = vadd.f32 %v16082_v50, %v16077_v57  ;;  %v11379_v35 = vld [vmem:[#allocation2 + $0x170] sm:$0xff] }
 0xbcb   : > { %v16063_v4 = vpop.xlane.xlu1 %7091  ;;  %v16065_v18 = vpop.f32.mrf.mxu0  ;;  %18089 = vst [vmem:[#allocation60_spill] sm:$0xff] %v16082_v50 }
 0xbcc   : > { %v16067_v27 = vpop.xlane.xlu0 %7094 }
 0xbd0   : > { %7130 = vmax.xlane.f32.xlu1 %v7129_v49  ;;  %7625 = vadd.xlane.f32.xlu0 %v7624_v55  ;;  %v7264_v49 = vsub.f32 %v15782_v42, %v7089_v46  ;;  %v7379_v55 = vmul.f32 1.442695, %v7241_v58  ;;  %v16101_v42 = vpop.f32.mrf.mxu1  ;;  %v16103_v46 = vpop.f32.mrf.mxu3 }
 0xbd1   : > { %v16080_v19 = vpop.f32.mrf.mxu2 }
 0xbd2   : > { %v7425_v14 = vmul.f32 1.442695, %v7264_v49  ;;  %12625 = vpow2.f32 %v7379_v55 }
 0xbd3   : > { %v16085_v36 = vpop.xlane.xlu1 %7097  ;;  %v16087_v9 = vpop.f32.mrf.mxu0  ;;  %12627 = vpow2.f32 %v7381_v10  ;;  %10869 = vmatmul.msk.bf16.gmra.mxu3 %vm2635_vm12, %v11379_v35  ;;  %10861 = vmatmul.msk.bf16.gmra.mxu1 %vm2635_vm12, %v11379_v35  ;;  %v7186_v35 = vmax.f32 %v16029_v37, %v16026_v40 }
 0xbd4   : > { %v16099_v15 = vpop.xlane.xlu0 %7100  ;;  %12629 = vpow2.f32 %v7423_v61 }
 0xbd5   : > { %12631 = vpow2.f32 %v7425_v14  ;;  %v7265_v14 = vsub.f32 %v15798_v23, %v16063_v4 }
 0xbd7   : > { %v7427_v23 = vmul.f32 1.442695, %v7265_v14 }
 0xbd8   : > { %7628 = vadd.xlane.f32.xlu1 %v7627_v16  ;;  %7133 = vmax.xlane.f32.xlu0 %v7132_v13  ;;  %v16117_v49 = vpop.eup %12625  ;;  %v16119_v13 = vpop.f32.mrf.mxu1 }
 0xbd9   : > { %v16109_v57 = vpop.f32.mrf.mxu2  ;;  %18092 = vst [vmem:[#allocation68_spill] sm:$0xff] %v16119_v13  ;;  %v16121_v55 = vpop.f32.mrf.mxu3  ;;  %12633 = vpow2.f32 %v7427_v23 }
 0xbda   : > { %18091 = vst [vmem:[#allocation87_spill] sm:$0xff] %v16109_v57  ;;  %v16123_v16 = vpop.eup %12627 }
 0xbdb   : > { %v16105_v58 = vpop.xlane.xlu1 %7103  ;;  %v16107_v50 = vpop.f32.mrf.mxu0  ;;  %18093 = vst [vmem:[#allocation89_spill] sm:$0xff] %v16121_v55  ;;  %v7630_v20 = vadd.f32 %v16123_v16, %v16117_v49 }
 0xbdc   : > { %18090 = vst [vmem:[#allocation55_spill] sm:$0xff] %v16107_v50  ;;  %v7198_v43 = vmax.f32 %v16107_v50, %v16109_v57  ;;  %v7062_v10 = vpop.xlane.xlu0 %7061  ;;  %v16125_v61 = vpop.eup %12629 }
 0xbdd   : > { %v16129_v57 = vpop.eup %12631 }
 0xbde   : > { %7199 = vmax.xlane.f32.xlu2 %v7198_v43  ;;  %v7266_v43 = vsub.f32 %v15795_v26, %v16063_v4  ;;  %v7663_v26 = vadd.f32 %v16129_v57, %v16125_v61 }
 0xbe0   : > { %7148 = vmax.xlane.f32.xlu0 %v7147_v63  ;;  %7184 = vmax.xlane.f32.xlu1 %v7183_v2  ;;  %v7153_v2 = vmax.f32 %v16119_v13, %v16121_v55  ;;  %v11387_v63 = vld [vmem:[#allocation2 + $0x1f0] sm:$0xff]  ;;  %v7429_v4 = vmul.f32 1.442695, %v7266_v43  ;;  %v7246_v55 = vsub.f32 %v15855_v39, %v7062_v10 }
 0xbe1   : > { %10925 = vmatmul.msk.bf16.gmra.mxu2 %vm2635_vm12, %v11387_v63  ;;  %10917 = vmatmul.msk.bf16.gmra.mxu0 %vm2635_vm12, %v11387_v63  ;;  %v7245_v63 = vsub.f32 %v15849_v33, %v7062_v10 }
 0xbe2   : > { %12635 = vpow2.f32 %v7429_v4  ;;  %v11380_v4 = vld [vmem:[#allocation2 + $0x178] sm:$0xff] }
 0xbe3   : > { %v7059_v50 = vpop.xlane.xlu1 %7058  ;;  %10862 = vmatmul.msk.bf16.gmra.mxu1 %vm2635_vm12, %v11380_v4  ;;  %10870 = vmatmul.msk.bf16.gmra.mxu3 %vm2635_vm12, %v11380_v4 }
 0xbe4   : > { %v7243_v48 = vsub.f32 %v15834_v28, %v7059_v50  ;;  %v7244_v8 = vsub.f32 %v15842_v0, %v7059_v50  ;;  %v16145_v50 = vpop.xlane.xlu0 %7067 }
 0xbe6   : > { %7154 = vmax.xlane.f32.xlu2 %v7153_v2  ;;  %v7383_v28 = vmul.f32 1.442695, %v7243_v48  ;;  %v7385_v0 = vmul.f32 1.442695, %v7244_v8  ;;  %v7150_v48 = vmax.f32 %v16101_v42, %v16103_v46  ;;  %v7387_v8 = vmul.f32 1.442695, %v7245_v63 }
 0xbe7   : > { %v7389_v2 = vmul.f32 1.442695, %v7246_v55 }
 0xbe8   : > { %7631 = vadd.xlane.f32.xlu0 %v7630_v20  ;;  %7664 = vadd.xlane.f32.xlu1 %v7663_v26  ;;  %12637 = vpow2.f32 %v7383_v28  ;;  %v16153_v20 = vpop.eup %12633  ;;  %v11388_v26 = vld [vmem:[#allocation2 + $0x1f8] sm:$0xff]  ;;  %v7267_v28 = vsub.f32 %v15813_v53, %v16067_v27 }
 0xbe9   : > { %12639 = vpow2.f32 %v7385_v0  ;;  %v16155_v43 = vpop.eup %12635  ;;  %v7268_v0 = vsub.f32 %v15809_v44, %v16067_v27  ;;  %v7269_v27 = vsub.f32 %v15825_v21, %v16085_v36 }
 0xbea   : > { %12641 = vpow2.f32 %v7387_v8  ;;  %v7666_v63 = vadd.f32 %v16155_v43, %v16153_v20  ;;  %v7431_v53 = vmul.f32 1.442695, %v7267_v28  ;;  %v7270_v8 = vsub.f32 %v15823_v30, %v16085_v36 }
 0xbeb   : > { %v7065_v14 = vpop.xlane.xlu1 %7064  ;;  %12643 = vpow2.f32 %v7389_v2 }
 0xbec   : > { %12645 = vpow2.f32 %v7431_v53  ;;  %v7247_v4 = vsub.f32 %v15861_v25, %v7065_v14  ;;  %v7248_v28 = vsub.f32 %v15869_v56, %v7065_v14  ;;  %v7249_v14 = vsub.f32 %v15875_v34, %v16145_v50 }
 0xbee   : > { %v16157_v23 = vpop.eup %12637  ;;  %v7391_v13 = vmul.f32 1.442695, %v7247_v4  ;;  %v7393_v30 = vmul.f32 1.442695, %v7248_v28  ;;  %v7395_v28 = vmul.f32 1.442695, %v7249_v14  ;;  %v7274_v14 = vsub.f32 %v15851_v45, %v16105_v58 }
 0xbef   : > { %v16159_v33 = vpop.eup %12639 }
 0xbf0   : > { %7151 = vmax.xlane.f32.xlu1 %v7150_v48  ;;  %7187 = vmax.xlane.f32.xlu0 %v7186_v35  ;;  %v7633_v55 = vadd.f32 %v16159_v33, %v16157_v23  ;;  %v7433_v35 = vmul.f32 1.442695, %v7268_v0  ;;  %v16177_v44 = vpop.eup %12641  ;;  %v7189_v0 = vmax.f32 %v16047_v1, %v16039_v22 }
 0xbf1   : > { %10926 = vmatmul.msk.bf16.gmra.mxu2 %vm2635_vm12, %v11388_v26  ;;  %10918 = vmatmul.msk.bf16.gmra.mxu0 %vm2635_vm12, %v11388_v26  ;;  %v16181_v48 = vpop.eup %12643 }
 0xbf2   : > { %12647 = vpow2.f32 %v7433_v35  ;;  %v7636_v21 = vadd.f32 %v16181_v48, %v16177_v44  ;;  %v16195_v36 = vpop.eup %12645  ;;  %v7250_v35 = vsub.f32 %v15881_v6, %v16145_v50  ;;  %v7271_v6 = vsub.f32 %v15840_v47, %v16099_v15 }
 0xbf3   : > { %v16161_v39 = vpop.xlane.xlu0 %7073  ;;  %v16163_v10 = vpop.xlane.xlu1 %7070  ;;  %v7272_v50 = vsub.f32 %v15836_v5, %v16099_v15 }
 0xbf4   : > { %v16235_v5 = vpop.f32.mrf.mxu0  ;;  %v16237_v15 = vpop.f32.mrf.mxu2  ;;  %v7253_v45 = vsub.f32 %v15901_v54, %v16161_v39  ;;  %v7195_v54 = vmax.f32 %v16087_v9, %v16080_v19 }
 0xbf5   : > { %18096 = vst [vmem:[#allocation88_spill] sm:$0xff] %v16235_v5 }
 0xbf6   : > { %18097 = vst [vmem:[#allocation70_spill] sm:$0xff] %v16237_v15 }
 0xbf8   : > { %7634 = vadd.xlane.f32.xlu1 %v7633_v55  ;;  %7667 = vadd.xlane.f32.xlu0 %v7666_v63  ;;  %v7435_v55 = vmul.f32 1.442695, %v7269_v27  ;;  %v7437_v63 = vmul.f32 1.442695, %v7270_v8  ;;  %v16197_v53 = vpop.eup %12647  ;;  %v7192_v27 = vmax.f32 %v16065_v18, %v16057_v11 }
 0xbf9   : > { %18094 = vst [vmem:[#allocation66_spill] sm:$0xff] %v16197_v53  ;;  %v7669_v8 = vadd.f32 %v16197_v53, %v16195_v36 }
 0xbfa   : > { %12649 = vpow2.f32 %v7435_v55  ;;  %v7397_v55 = vmul.f32 1.442695, %v7250_v35  ;;  %v7439_v35 = vmul.f32 1.442695, %v7271_v6 }
 0xbfb   : > { %v16185_v2 = vpop.xlane.xlu1 %7076  ;;  %v16187_v26 = vpop.xlane.xlu0 %7109  ;;  %12651 = vpow2.f32 %v7437_v63 }
 0xbfc   : > { %12653 = vpow2.f32 %v7391_v13 }
 0xbfd   : > { %12655 = vpow2.f32 %v7393_v30  ;;  %v7273_v30 = vsub.f32 %v15853_v7, %v16105_v58  ;;  %v7445_v7 = vmul.f32 1.442695, %v7274_v14 }
 0xbfe   : > { %12657 = vpow2.f32 %v7395_v28 }
 0xbff   : > { %12659 = vpow2.f32 %v7397_v55  ;;  %v7443_v53 = vmul.f32 1.442695, %v7273_v30  ;;  %v7254_v55 = vsub.f32 %v15908_v52, %v16161_v39 }
 0xc00   : > { %7637 = vadd.xlane.f32.xlu0 %v7636_v21  ;;  %7190 = vmax.xlane.f32.xlu1 %v7189_v0  ;;  %v16211_v4 = vpop.eup %12649  ;;  %12661 = vpow2.f32 %v7439_v35  ;;  %v7252_v35 = vsub.f32 %v15894_v59, %v16163_v10 }
 0xc01   : > { %v16213_v0 = vpop.eup %12651 }
 0xc02   : > { %v16215_v34 = vpop.eup %12653  ;;  %v7401_v59 = vmul.f32 1.442695, %v7252_v35  ;;  %v7278_v35 = vsub.f32 %v15877_v29, %v16187_v26 }
 0xc03   : > { %v16199_v25 = vpop.xlane.xlu0 %7079  ;;  %v16201_v56 = vpop.xlane.xlu1 %7112 }
 0xc04   : > { %v16219_v13 = vpop.eup %12655 }
 0xc05   : > { %18095 = vst [vmem:[#allocation85_spill] sm:$0xff] %v16219_v13  ;;  %v7639_v47 = vadd.f32 %v16219_v13, %v16215_v34  ;;  %v16239_v28 = vpop.eup %12657 }
 0xc06   : > { %v16243_v58 = vpop.eup %12659 }
 0xc07   : > { %18098 = vst [vmem:[#allocation69_spill] sm:$0xff] %v16243_v58 }
 0xc08   : > { %7670 = vadd.xlane.f32.xlu1 %v7669_v8  ;;  %7193 = vmax.xlane.f32.xlu0 %v7192_v27  ;;  %v7672_v27 = vadd.f32 %v16213_v0, %v16211_v4  ;;  %v7441_v8 = vmul.f32 1.442695, %v7272_v50  ;;  %v7251_v50 = vsub.f32 %v15887_v31, %v16163_v10  ;;  %v16259_v31 = vpop.eup %12661 }
 0xc09   : > { %18099 = vst [vmem:[#allocation42_spill] sm:$0xff] %v16259_v31 }
 0xc0a   : > { %12663 = vpow2.f32 %v7441_v8  ;;  %v7405_v8 = vmul.f32 1.442695, %v7254_v55 }
 0xc0b   : > { %v16223_v21 = vpop.xlane.xlu1 %7082  ;;  %v16225_v63 = vpop.xlane.xlu0 %7115  ;;  %12665 = vpow2.f32 %v7443_v53  ;;  %v7642_v53 = vadd.f32 %v16243_v58, %v16239_v28 }
 0xc0c   : > { %12667 = vpow2.f32 %v7445_v7  ;;  %v16263_v7 = vpop.f32.mrf.mxu0 }
 0xc10   : > { %7640 = vadd.xlane.f32.xlu1 %v7639_v47  ;;  %7673 = vadd.xlane.f32.xlu0 %v7672_v27  ;;  %v7403_v47 = vmul.f32 1.442695, %v7253_v45  ;;  %v7107_v27 = vpop.xlane.xlu2 %7106 }
 0xc11   : > { %v7275_v45 = vsub.f32 %v15865_v41, %v7107_v27 }
 0xc13   : > { %v7086_v6 = vpop.xlane.xlu0 %7085  ;;  %v16247_v13 = vpop.xlane.xlu1 %7118  ;;  %v7447_v41 = vmul.f32 1.442695, %v7275_v45 }
 0xc14   : > { %v7261_v30 = vsub.f32 %v15956_v17, %v7086_v6  ;;  %v7262_v14 = vsub.f32 %v15965_v32, %v7086_v6  ;;  %v7399_v17 = vmul.f32 1.442695, %v7251_v50  ;;  %v16261_v32 = vpop.f32.mrf.mxu2  ;;  %v16265_v6 = vpop.eup %12663  ;;  %v7276_v50 = vsub.f32 %v15863_v3, %v7107_v27 }
 0xc15   : > { %18100 = vst [vmem:[#allocation40_spill] sm:$0xff] %v16265_v6  ;;  %v16267_v10 = vpop.eup %12665  ;;  %v7675_v3 = vadd.f32 %v16265_v6, %v16259_v31  ;;  %v7453_v6 = vmul.f32 1.442695, %v7278_v35 }
 0xc16   : > { %v7419_v52 = vmul.f32 1.442695, %v7261_v30  ;;  %v7421_v39 = vmul.f32 1.442695, %v7262_v14  ;;  %18101 = vst [vmem:[#allocation39_spill] sm:$0xff] %v16267_v10  ;;  %v16270_v55 = vpop.eup %12667 }
 0xc17   : > { %18102 = vst [vmem:[#allocation41_spill] sm:$0xff] %v16270_v55 }
 0xc18   : > { %12669 = vpow2.f32 %v7419_v52  ;;  %7643 = vadd.xlane.f32.xlu0 %v7642_v53  ;;  %7196 = vmax.xlane.f32.xlu1 %v7195_v54  ;;  %v7277_v54 = vsub.f32 %v15879_v12, %v16187_v26  ;;  %v7449_v53 = vmul.f32 1.442695, %v7276_v50  ;;  %v18107_v26 = vld [vmem:[#allocation108_spill] sm:$0xff]  ;;  %v16301_v50 = vpop.f32.mrf.mxu0 }
 0xc19   : > { %12671 = vpow2.f32 %v7421_v39  ;;  %18110 = vst [vmem:[#allocation95_spill] sm:$0xff] %v16301_v50 }
 0xc1a   : > { %12673 = vpow2.f32 %v7403_v47  ;;  %v7678_v47 = vadd.f32 %v16270_v55, %v16267_v10 }
 0xc1b   : > { %12675 = vpow2.f32 %v7405_v8  ;;  %v16273_v30 = vpop.xlane.xlu0 %7121  ;;  %v16275_v14 = vpop.xlane.xlu1 %7136  ;;  %v7451_v8 = vmul.f32 1.442695, %v7277_v54 }
 0xc1c   : > { %12677 = vpow2.f32 %v7399_v17  ;;  %v7255_v17 = vsub.f32 %v18107_v26, %v16185_v2  ;;  %v16303_v54 = vpop.f32.mrf.mxu2 }
 0xc1d   : > { %12679 = vpow2.f32 %v7401_v59  ;;  %v18108_v59 = vld [vmem:[#allocation99_spill] sm:$0xff]  ;;  %18111 = vst [vmem:[#allocation103_spill] sm:$0xff] %v16303_v54 }
 0xc1e   : > { %v16281_v52 = vpop.eup %12669  ;;  %v7256_v45 = vsub.f32 %v18108_v59, %v16185_v2  ;;  %12681 = vpow2.f32 %v7447_v41  ;;  %v7407_v2 = vmul.f32 1.442695, %v7255_v17  ;;  %v18114_v41 = vld [vmem:[#allocation104_spill] sm:$0xff] }
 0xc1f   : > { %18103 = vst [vmem:[#allocation101_spill] sm:$0xff] %v16281_v52  ;;  %v16287_v39 = vpop.eup %12671  ;;  %12683 = vpow2.f32 %v7449_v53 }
 0xc20   : > { %18104 = vst [vmem:[#allocation100_spill] sm:$0xff] %v16287_v39  ;;  %v16289_v27 = vpop.eup %12673  ;;  %7679 = vadd.xlane.f32.xlu0 %v7678_v47  ;;  %7676 = vadd.xlane.f32.xlu1 %v7675_v3  ;;  %v7660_v29 = vadd.f32 %v16287_v39, %v16281_v52  ;;  %v18113_v3 = vld [vmem:[#allocation72_spill] sm:$0xff]  ;;  %12685 = vpow2.f32 %v7451_v8  ;;  %v7409_v35 = vmul.f32 1.442695, %v7256_v45 }
 0xc21   : > { %18105 = vst [vmem:[#allocation96_spill] sm:$0xff] %v16289_v27  ;;  %v16293_v12 = vpop.eup %12675  ;;  %v7257_v39 = vsub.f32 %v18113_v3, %v16199_v25  ;;  %12687 = vpow2.f32 %v7453_v6  ;;  %v7207_v3 = vmax.f32 %v16301_v50, %v16303_v54 }
 0xc22   : > { %18106 = vst [vmem:[#allocation97_spill] sm:$0xff] %v16293_v12  ;;  %v16299_v31 = vpop.eup %12677  ;;  %7661 = vadd.xlane.f32.xlu2 %v7660_v29  ;;  %v7258_v29 = vsub.f32 %v18114_v41, %v16199_v25  ;;  %v7648_v59 = vadd.f32 %v16293_v12, %v16289_v27  ;;  %v18125_v12 = vld [vmem:[#allocation57_spill] sm:$0xff] }
 0xc23   : > { %18109 = vst [vmem:[#allocation91_spill] sm:$0xff] %v16299_v31  ;;  %v16305_v47 = vpop.eup %12679  ;;  %v7617_v52 = vpop.xlane.xlu1 %7616  ;;  %v7411_v55 = vmul.f32 1.442695, %v7257_v39  ;;  %v18120_v39 = vld [vmem:[#allocation105_spill] sm:$0xff] }
 0xc24   : > { %18112 = vst [vmem:[#allocation107_spill] sm:$0xff] %v16305_v47  ;;  %v16309_v26 = vpop.xlane.xlu0 %7139  ;;  %12689 = vrcp.f32 %v7617_v52  ;;  %v7645_v53 = vadd.f32 %v16305_v47, %v16299_v31  ;;  %v16319_v10 = vpop.eup %12681  ;;  %v7413_v6 = vmul.f32 1.442695, %v7258_v29  ;;  %v18118_v52 = vld [vmem:[#allocation106_spill] sm:$0xff]  ;;  %v7280_v41 = vsub.f32 %v18120_v39, %v16201_v56 }
 0xc25   : > { %18115 = vst [vmem:[#allocation108_spill] sm:$0xff] %v16319_v10  ;;  %v16321_v8 = vpop.eup %12683  ;;  %12691 = vpow2.f32 %v7407_v2  ;;  %v7279_v17 = vsub.f32 %v18118_v52, %v16201_v56  ;;  %v18121_v2 = vld [vmem:[#allocation94_spill] sm:$0xff] }
 0xc26   : > { %18116 = vst [vmem:[#allocation99_spill] sm:$0xff] %v16321_v8  ;;  %v16323_v25 = vpop.eup %12685  ;;  %12693 = vpow2.f32 %v7409_v35  ;;  %v7281_v29 = vsub.f32 %v18121_v2, %v16225_v63  ;;  %v18122_v35 = vld [vmem:[#allocation93_spill] sm:$0xff]  ;;  %v7457_v39 = vmul.f32 1.442695, %v7280_v41  ;;  %v18124_v47 = vld [vmem:[#allocation34_spill] sm:$0xff] }
 0xc27   : > { %18117 = vst [vmem:[#allocation72_spill] sm:$0xff] %v16323_v25  ;;  %v16327_v45 = vpop.eup %12687  ;;  %12695 = vpow2.f32 %v7411_v55  ;;  %v7282_v50 = vsub.f32 %v18122_v35, %v16225_v63  ;;  %v7455_v52 = vmul.f32 1.442695, %v7279_v17  ;;  %v7681_v55 = vadd.f32 %v16321_v8, %v16319_v10 }
 0xc28   : > { %7649 = vadd.xlane.f32.xlu0 %v7648_v59  ;;  %7646 = vadd.xlane.f32.xlu1 %v7645_v53  ;;  %18119 = vst [vmem:[#allocation104_spill] sm:$0xff] %v16327_v45 }
 0xc29   : > { %v7461_v17 = vmul.f32 1.442695, %v7282_v50  ;;  %v18130_v50 = vld [vmem:[#allocation22_spill] sm:$0xff] }
 0xc2a   : > { %7208 = vmax.xlane.f32.xlu2 %v7207_v3  ;;  %v12690_v53 = vpop.eup %12689  ;;  %v7684_v3 = vadd.f32 %v16327_v45, %v16323_v25 }
 0xc2b   : > { %v16331_v54 = vpop.xlane.xlu1 %7124  ;;  %v16341_v56 = vpop.eup %12691  ;;  %v7871_v31 = vmul.f32 %v12690_v53, %v18124_v47  ;;  %v7872_v27 = vmul.f32 %v12690_v53, %v18125_v12  ;;  %v18129_v53 = vld [vmem:[#allocation25_spill] sm:$0xff] }
 0xc2c   : > { %v7620_v59 = vpop.xlane.xlu0 %7619  ;;  %18123 = vst [vmem:[#allocation106_spill] sm:$0xff] %v16341_v56  ;;  %v16345_v2 = vpop.eup %12693 }
 0xc2d   : > { %12697 = vrcp.f32 %v7620_v59  ;;  %18126 = vst [vmem:[#allocation105_spill] sm:$0xff] %v16345_v2  ;;  %v16347_v63 = vpop.eup %12695  ;;  %v7999_v8 = vpack.c.bf16 %v7872_v27, %v7871_v31 }
 0xc2e   : > { %12699 = vpow2.f32 %v7413_v6  ;;  %v7459_v6 = vmul.f32 1.442695, %v7281_v29  ;;  %18127 = vst [vmem:[#allocation94_spill] sm:$0xff] %v16347_v63  ;;  %v7259_v29 = vsub.f32 %v18129_v53, %v16223_v21 }
 0xc2f   : > { %12701 = vpow2.f32 %v7455_v52  ;;  %v8208_v27 = vunpack.c.h.b16 %v7999_v8 }
 0xc30   : > { %7685 = vadd.xlane.f32.xlu0 %v7684_v3  ;;  %7682 = vadd.xlane.f32.xlu1 %v7681_v55  ;;  %12703 = vpow2.f32 %v7457_v39  ;;  %v7260_v3 = vsub.f32 %v18130_v50, %v16223_v21  ;;  %v7415_v45 = vmul.f32 1.442695, %v7259_v29 }
 0xc31   : > { %12705 = vpow2.f32 %v7459_v6 }
 0xc32   : > { %12707 = vpow2.f32 %v7461_v17  ;;  %v7417_v21 = vmul.f32 1.442695, %v7260_v3  ;;  %v18133_v17 = vld [vmem:[#allocation98_spill] sm:$0xff] }
 0xc33   : > { %v12698_v59 = vpop.eup %12697  ;;  %v16355_v12 = vpop.xlane.xlu1 %7142  ;;  %12709 = vpow2.f32 %v7415_v45  ;;  %v12989_v3 = vld [vmem:[%s17430_s11 + $0x8] sm:$0xff] }
 0xc34   : > { %v16349_v35 = vpop.eup %12699  ;;  %v7873_v41 = vmul.f32 %v12698_v59, %v16011_v62  ;;  %v7874_v47 = vmul.f32 %v12698_v59, %v16013_v60  ;;  %v16353_v10 = vpop.xlane.xlu0 %7127  ;;  %v7651_v62 = vadd.f32 %v16345_v2, %v16341_v56  ;;  %v8207_v60 = vunpack.c.l.b16 %v7999_v8  ;;  %v18135_v2 = vld [vmem:[#allocation32_spill] sm:$0xff] }
 0xc35   : > { %18128 = vst [vmem:[#allocation93_spill] sm:$0xff] %v16349_v35  ;;  %v7654_v31 = vadd.f32 %v16349_v35, %v16347_v63  ;;  %v16365_v59 = vpop.eup %12701  ;;  %v7284_v8 = vsub.f32 %v18135_v2, %v16247_v13  ;;  %12711 = vpow2.f32 %v7417_v21 }
 0xc36   : > { %v8000_v52 = vpack.c.bf16 %v7874_v47, %v7873_v41  ;;  %18131 = vst [vmem:[#allocation34_spill] sm:$0xff] %v16365_v59  ;;  %v16367_v6 = vpop.eup %12703  ;;  %v7283_v41 = vsub.f32 %v18133_v17, %v16247_v13  ;;  %v12990_v13 = vld [vmem:[%s17430_s11] sm:$0xff] }
 0xc37   : > { %18132 = vst [vmem:[#allocation57_spill] sm:$0xff] %v16367_v6  ;;  %v16371_v50 = vpop.eup %12705 }
 0xc38   : > { %v8209_v55 = vunpack.c.l.b16 %v8000_v52  ;;  %v8210_v39 = vunpack.c.h.b16 %v8000_v52  ;;  %7655 = vadd.xlane.f32.xlu0 %v7654_v31  ;;  %7652 = vadd.xlane.f32.xlu1 %v7651_v62  ;;  %18134 = vst [vmem:[#allocation25_spill] sm:$0xff] %v16371_v50  ;;  %v16375_v56 = vpop.eup %12707  ;;  %v18137_v52 = vld [vmem:[#allocation102_spill] sm:$0xff]  ;;  %v7463_v2 = vmul.f32 1.442695, %v7283_v41 }
 0xc39   : > { %18136 = vst [vmem:[#allocation22_spill] sm:$0xff] %v16375_v56  ;;  %v7285_v29 = vsub.f32 %v18137_v52, %v16273_v30  ;;  %v7690_v45 = vadd.f32 %v16375_v56, %v16371_v50  ;;  %v16397_v41 = vpop.eup %12709  ;;  %v18152_v50 = vld [vmem:[#allocation21_spill] sm:$0xff] }
 0xc3a   : > { %v8239_v47 = vpack.c.b16 %v8209_v55, %v8207_v60  ;;  %v8240_v53 = vpack.c.b16 %v8210_v39, %v8208_v27  ;;  %v18138_v60 = vld [vmem:[#allocation44_spill] sm:$0xff]  ;;  %v7465_v55 = vmul.f32 1.442695, %v7284_v8  ;;  %v7687_v39 = vadd.f32 %v16367_v6, %v16365_v59  ;;  %18139 = vst [vmem:[#allocation98_spill] sm:$0xff] %v16397_v41  ;;  %v18143_v6 = vld [vmem:[#allocation77_spill] sm:$0xff] }
 0xc3b   : > { %v7623_v31 = vpop.xlane.xlu1 %7622  ;;  %v7286_v27 = vsub.f32 %v18138_v60, %v16273_v30  ;;  %v7467_v17 = vmul.f32 1.442695, %v7285_v29  ;;  %v16399_v30 = vpop.eup %12711  ;;  %v18141_v29 = vld [vmem:[#allocation18_spill] sm:$0xff]  ;;  %v7201_v60 = vmax.f32 %v16235_v5, %v16237_v15  ;;  %v7290_v35 = vsub.f32 %v18152_v50, %v16353_v10  ;;  %v18155_v50 = vld [vmem:[#allocation24_spill] sm:$0xff] }
 0xc3c   : > { %8375 = vmatmul.bf16.vlgmr.msra.gmra.mxu1 %v8239_v47  ;;  %8424 = vmatmul.bf16.vlgmr.msra.gmra.mxu3 %v8240_v53  ;;  %v16379_v62 = vpop.xlane.xlu0 %7145  ;;  %12713 = vrcp.f32 %v7623_v31  ;;  %v16393_v47 = vpop.f32.mrf.mxu1  ;;  %18140 = vst [vmem:[#allocation32_spill] sm:$0xff] %v16399_v30 }
 0xc3d   : > { %9535 = vmatpush.bf16.msra.mxu3 %v12989_v3  ;;  %9422 = vmatpush.bf16.msra.mxu1 %v12990_v13  ;;  %v16395_v53 = vpop.f32.mrf.mxu3  ;;  %12715 = vpow2.f32 %v7463_v2  ;;  %v7469_v21 = vmul.f32 1.442695, %v7286_v27 }
 0xc3e   : > { %12717 = vpow2.f32 %v7465_v55  ;;  %v7657_v55 = vadd.f32 %v16399_v30, %v16397_v41  ;;  %v18151_v41 = vld [vmem:[#allocation17_spill] sm:$0xff] }
 0xc3f   : > { %12719 = vpow2.f32 %v7467_v17 }
 0xc40   : > { %7691 = vadd.xlane.f32.xlu0 %v7690_v45  ;;  %7688 = vadd.xlane.f32.xlu1 %v7687_v39  ;;  %v18142_v39 = vld [vmem:[#allocation58_spill] sm:$0xff] }
 0xc42   : > { %v12714_v31 = vpop.eup %12713 }
 0xc43   : > { %v7131_v8 = vpop.xlane.xlu1 %7130  ;;  %v16407_v45 = vpop.eup %12715  ;;  %v7875_v17 = vmul.f32 %v12714_v31, %v18142_v39  ;;  %v7876_v59 = vmul.f32 %v12714_v31, %v18143_v6  ;;  %v18149_v31 = vld [vmem:[#allocation54_spill] sm:$0xff] }
 0xc44   : > { %v7626_v52 = vpop.xlane.xlu0 %7625  ;;  %v7291_v3 = vsub.f32 %v15977_v51, %v7131_v8  ;;  %v7292_v13 = vsub.f32 %v18141_v29, %v7131_v8  ;;  %v16411_v56 = vpop.eup %12717 }
 0xc45   : > { %12721 = vrcp.f32 %v7626_v52  ;;  %18144 = vst [vmem:[#allocation102_spill] sm:$0xff] %v16411_v56  ;;  %v16413_v51 = vpop.f32.mrf.mxu1  ;;  %v16417_v8 = vpop.eup %12719  ;;  %v8001_v30 = vpack.c.bf16 %v7876_v59, %v7875_v17 }
 0xc46   : > { %12723 = vpow2.f32 %v7469_v21  ;;  %v7479_v2 = vmul.f32 1.442695, %v7291_v3  ;;  %v7481_v27 = vmul.f32 1.442695, %v7292_v13  ;;  %v16415_v21 = vpop.f32.mrf.mxu3  ;;  %18145 = vst [vmem:[#allocation44_spill] sm:$0xff] %v16417_v8  ;;  %v18146_v3 = vld [vmem:[#allocation19_spill] sm:$0xff] }
 0xc47   : > { %v7287_v29 = vsub.f32 %v18146_v3, %v16331_v54  ;;  %v18147_v13 = vld [vmem:[#allocation26_spill] sm:$0xff]  ;;  %v8211_v59 = vunpack.c.l.b16 %v8001_v30  ;;  %v8212_v25 = vunpack.c.h.b16 %v8001_v30 }
 0xc48   : > { %12725 = vpow2.f32 %v7479_v2  ;;  %7658 = vadd.xlane.f32.xlu1 %v7657_v55  ;;  %7202 = vmax.xlane.f32.xlu0 %v7201_v60  ;;  %v7288_v39 = vsub.f32 %v18147_v13, %v16331_v54  ;;  %v18150_v55 = vld [vmem:[#allocation79_spill] sm:$0xff] }
 0xc49   : > { %12727 = vpow2.f32 %v7481_v27  ;;  %v7289_v27 = vsub.f32 %v18151_v41, %v16353_v10  ;;  %v7471_v54 = vmul.f32 1.442695, %v7287_v29  ;;  %v7295_v29 = vsub.f32 %v18155_v50, %v16275_v14 }
 0xc4a   : > { %v7473_v13 = vmul.f32 1.442695, %v7288_v39  ;;  %v7477_v39 = vmul.f32 1.442695, %v7290_v35  ;;  %v18158_v35 = vld [vmem:[#allocation20_spill] sm:$0xff] }
 0xc4b   : > { %v12722_v52 = vpop.eup %12721  ;;  %v7629_v15 = vpop.xlane.xlu1 %7628  ;;  %v7475_v58 = vmul.f32 1.442695, %v7289_v27  ;;  %12729 = vpow2.f32 %v7471_v54  ;;  %v18157_v27 = vld [vmem:[#allocation52_spill] sm:$0xff] }
 0xc4c   : > { %v16423_v6 = vpop.eup %12723  ;;  %v7877_v2 = vmul.f32 %v12722_v52, %v18149_v31  ;;  %v7878_v60 = vmul.f32 %v12722_v52, %v18150_v55  ;;  %v16427_v5 = vpop.xlane.xlu0 %7133  ;;  %v7693_v31 = vadd.f32 %v16411_v56, %v16407_v45  ;;  %12731 = vpow2.f32 %v7473_v13 }
 0xc4d   : > { %18148 = vst [vmem:[#allocation18_spill] sm:$0xff] %v16423_v6  ;;  %v7696_v52 = vadd.f32 %v16423_v6, %v16417_v8  ;;  %v18156_v6 = vld [vmem:[#allocation64_spill] sm:$0xff]  ;;  %v16447_v56 = vpop.f32.mrf.mxu1  ;;  %12733 = vpow2.f32 %v7475_v58 }
 0xc4e   : > { %v8002_v3 = vpack.c.bf16 %v7878_v60, %v7877_v2  ;;  %v16433_v63 = vpop.eup %12725  ;;  %v7296_v8 = vsub.f32 %v18156_v6, %v16275_v14  ;;  %v16449_v30 = vpop.f32.mrf.mxu3  ;;  %v7487_v14 = vmul.f32 1.442695, %v7295_v29  ;;  %v7204_v6 = vmax.f32 %v16263_v7, %v16261_v32 }
 0xc4f   : > { %18153 = vst [vmem:[#allocation58_spill] sm:$0xff] %v16433_v63  ;;  %v16439_v55 = vpop.eup %12727  ;;  %12735 = vpow2.f32 %v7477_v39  ;;  %v7162_v13 = vmax.f32 %v16447_v56, %v16449_v30  ;;  %v7293_v39 = vsub.f32 %v15995_v38, %v16427_v5  ;;  %v18164_v38 = vld [vmem:[#allocation59_spill] sm:$0xff] }
 0xc50   : > { %18154 = vst [vmem:[#allocation77_spill] sm:$0xff] %v16439_v55  ;;  %v8213_v17 = vunpack.c.l.b16 %v8002_v3  ;;  %v8214_v41 = vunpack.c.h.b16 %v8002_v3  ;;  %7694 = vadd.xlane.f32.xlu1 %v7693_v31  ;;  %7697 = vadd.xlane.f32.xlu0 %v7696_v52  ;;  %v7705_v10 = vadd.f32 %v16439_v55, %v16433_v63  ;;  %v7297_v3 = vsub.f32 %v18157_v27, %v16309_v26 }
 0xc51   : > { %v7489_v54 = vmul.f32 1.442695, %v7296_v8  ;;  %12737 = vrcp.f32 %v7629_v15 }
 0xc52   : > { %v8241_v2 = vpack.c.b16 %v8213_v17, %v8211_v59  ;;  %v8242_v60 = vpack.c.b16 %v8214_v41, %v8212_v25  ;;  %7706 = vadd.xlane.f32.xlu2 %v7705_v10  ;;  %v7298_v25 = vsub.f32 %v18158_v35, %v16309_v26  ;;  %v7156_v59 = vmax.f32 %v16393_v47, %v16395_v53  ;;  %v16463_v41 = vpop.eup %12729  ;;  %v18162_v35 = vld [vmem:[#allocation83_spill] sm:$0xff] }
 0xc53   : > { %v7185_v52 = vpop.xlane.xlu1 %7184  ;;  %v7491_v17 = vmul.f32 1.442695, %v7297_v3  ;;  %18159 = vst [vmem:[#allocation19_spill] sm:$0xff] %v16463_v41  ;;  %v16465_v58 = vpop.eup %12731  ;;  %12739 = vpow2.f32 %v7487_v14  ;;  %v18163_v14 = vld [vmem:[#allocation60_spill] sm:$0xff] }
 0xc54   : > { %8380 = vmatmul.bf16.gmra.mxu1 %v8241_v2  ;;  %v16453_v31 = vpop.xlane.xlu0 %7148  ;;  %8429 = vmatmul.bf16.gmra.mxu3 %v8242_v60  ;;  %v7493_v10 = vmul.f32 1.442695, %v7298_v25  ;;  %18160 = vst [vmem:[#allocation26_spill] sm:$0xff] %v16465_v58  ;;  %v16467_v26 = vpop.eup %12733  ;;  %12741 = vpow2.f32 %v7489_v54  ;;  %v7294_v2 = vsub.f32 %v15989_v24, %v16427_v5  ;;  %v7699_v27 = vadd.f32 %v16465_v58, %v16463_v41  ;;  %v18167_v41 = vld [vmem:[#allocation49_spill] sm:$0xff] }
 0xc55   : > { %v16469_v8 = vpop.eup %12735  ;;  %12743 = vpow2.f32 %v7491_v17  ;;  %v18165_v17 = vld [vmem:[#allocation27_spill] sm:$0xff] }
 0xc56   : > { %18161 = vst [vmem:[#allocation54_spill] sm:$0xff] %v16469_v8  ;;  %12745 = vpow2.f32 %v7493_v10  ;;  %v7702_v60 = vadd.f32 %v16469_v8, %v16467_v26  ;;  %v7485_v5 = vmul.f32 1.442695, %v7294_v2  ;;  %v7328_v10 = vsub.f32 %v18165_v17, %v7185_v52  ;;  %v18166_v17 = vld [vmem:[#allocation47_spill] sm:$0xff] }
 0xc57   : > { %v12738_v29 = vpop.eup %12737  ;;  %v7299_v58 = vsub.f32 %v18166_v17, %v16355_v12  ;;  %v7300_v8 = vsub.f32 %v18167_v41, %v16355_v12 }
 0xc58   : > { %7157 = vmax.xlane.f32.xlu0 %v7156_v59  ;;  %7205 = vmax.xlane.f32.xlu1 %v7204_v6  ;;  %v7879_v25 = vmul.f32 %v12738_v29, %v18162_v35  ;;  %v7880_v6 = vmul.f32 %v12738_v29, %v18163_v14  ;;  %v7483_v59 = vmul.f32 1.442695, %v7293_v39  ;;  %v7553_v2 = vmul.f32 1.442695, %v7328_v10 }
 0xc59   : > { %v16479_v3 = vpop.eup %12739 }
 0xc5a   : > { %7163 = vmax.xlane.f32.xlu2 %v7162_v13  ;;  %v16483_v54 = vpop.eup %12741  ;;  %v7327_v13 = vsub.f32 %v18164_v38, %v7185_v52  ;;  %v8003_v14 = vpack.c.bf16 %v7880_v6, %v7879_v25 }
 0xc5b   : > { %v7665_v50 = vpop.xlane.xlu1 %7664  ;;  %v16486_v24 = vpop.eup %12743  ;;  %v7711_v29 = vadd.f32 %v16483_v54, %v16479_v3 }
 0xc5c   : > { %v7632_v15 = vpop.xlane.xlu0 %7631  ;;  %v7551_v39 = vmul.f32 1.442695, %v7327_v13  ;;  %v16505_v13 = vpop.f32.mrf.mxu0 }
 0xc5d   : > { %12747 = vrcp.f32 %v7632_v15  ;;  %v16489_v15 = vpop.eup %12745 }
 0xc5e   : > { %12749 = vpow2.f32 %v7483_v59  ;;  %v7714_v25 = vadd.f32 %v16489_v15, %v16486_v24 }
 0xc5f   : > { %12751 = vpow2.f32 %v7485_v5  ;;  %v16507_v5 = vpop.f32.mrf.mxu2 }
 0xc60   : > { %7703 = vadd.xlane.f32.xlu0 %v7702_v60  ;;  %7700 = vadd.xlane.f32.xlu1 %v7699_v27  ;;  %12753 = vrcp.f32 %v7665_v50 }
 0xc61   : > { %12755 = vpow2.f32 %v7551_v39  ;;  %v18168_v39 = vld [vmem:[#allocation51_spill] sm:$0xff] }
 0xc62   : > { %12757 = vpow2.f32 %v7553_v2 }
 0xc63   : > { %v12748_v55 = vpop.eup %12747  ;;  %v16491_v63 = vpop.xlane.xlu1 %7151 }
 0xc64   : > { %v7188_v35 = vpop.xlane.xlu0 %7187  ;;  %v7881_v60 = vmul.f32 %v12748_v55, %v16117_v49  ;;  %v7882_v27 = vmul.f32 %v12748_v55, %v16123_v16  ;;  %v8215_v16 = vunpack.c.l.b16 %v8003_v14  ;;  %v8216_v55 = vunpack.c.h.b16 %v8003_v14  ;;  %v16509_v12 = vpop.eup %12749 }
 0xc65   : > { %v7329_v52 = vsub.f32 %v16029_v37, %v7188_v35  ;;  %v7330_v38 = vsub.f32 %v16026_v40, %v7188_v35  ;;  %v16511_v50 = vpop.eup %12751  ;;  %v7495_v35 = vmul.f32 1.442695, %v7299_v58 }
 0xc66   : > { %v8004_v6 = vpack.c.bf16 %v7882_v27, %v7881_v60  ;;  %v7497_v27 = vmul.f32 1.442695, %v7300_v8  ;;  %v12754_v2 = vpop.eup %12753  ;;  %v7708_v58 = vadd.f32 %v16511_v50, %v16509_v12 }
 0xc67   : > { %v7555_v49 = vmul.f32 1.442695, %v7329_v52  ;;  %v7557_v59 = vmul.f32 1.442695, %v7330_v38  ;;  %v7159_v52 = vmax.f32 %v16413_v51, %v16415_v21  ;;  %v18169_v38 = vld [vmem:[#allocation53_spill] sm:$0xff] }
 0xc68   : > { %7712 = vadd.xlane.f32.xlu0 %v7711_v29  ;;  %7715 = vadd.xlane.f32.xlu1 %v7714_v25  ;;  %v8217_v37 = vunpack.c.l.b16 %v8004_v6  ;;  %v8218_v40 = vunpack.c.h.b16 %v8004_v6  ;;  %v7301_v29 = vsub.f32 %v18168_v39, %v16379_v62  ;;  %v7302_v17 = vsub.f32 %v18169_v38, %v16379_v62  ;;  %v16519_v25 = vpop.eup %12755 }
 0xc69   : > { %12759 = vpow2.f32 %v7555_v49  ;;  %v16523_v6 = vpop.eup %12757 }
 0xc6a   : > { %v8243_v41 = vpack.c.b16 %v8217_v37, %v8215_v16  ;;  %v8244_v10 = vpack.c.b16 %v8218_v40, %v8216_v55  ;;  %12761 = vpow2.f32 %v7557_v59  ;;  %v7499_v8 = vmul.f32 1.442695, %v7301_v29 }
 0xc6b   : > { %v7635_v60 = vpop.xlane.xlu1 %7634  ;;  %v7903_v59 = vmul.f32 %v12754_v2, %v16125_v61  ;;  %v7904_v16 = vmul.f32 %v12754_v2, %v16129_v57  ;;  %v7501_v37 = vmul.f32 1.442695, %v7302_v17 }
 0xc6c   : > { %v7668_v14 = vpop.xlane.xlu0 %7667  ;;  %8385 = vmatmul.bf16.gmra.mxu1 %v8243_v41  ;;  %8434 = vmatmul.bf16.gmra.mxu3 %v8244_v10  ;;  %12763 = vrcp.f32 %v7635_v60  ;;  %v16533_v41 = vpop.f32.mrf.mxu0 }
 0xc6d   : > { %12765 = vrcp.f32 %v7668_v14  ;;  %v16535_v10 = vpop.f32.mrf.mxu2  ;;  %v8015_v61 = vpack.c.bf16 %v7904_v16, %v7903_v59 }
 0xc6e   : > { %12767 = vpow2.f32 %v7495_v35 }
 0xc6f   : > { %v16525_v49 = vpop.eup %12759  ;;  %12769 = vpow2.f32 %v7497_v27  ;;  %v7305_v27 = vsub.f32 %v16101_v42, %v16491_v63  ;;  %v8482_v59 = vunpack.c.h.b16 %v8015_v61 }
 0xc70   : > { %7709 = vadd.xlane.f32.xlu0 %v7708_v58  ;;  %7160 = vmax.xlane.f32.xlu1 %v7159_v52  ;;  %v16529_v62 = vpop.eup %12761  ;;  %12771 = vpow2.f32 %v7499_v8  ;;  %v7210_v52 = vmax.f32 %v16505_v13, %v16507_v5  ;;  %v7306_v58 = vsub.f32 %v16103_v46, %v16491_v63  ;;  %v8481_v8 = vunpack.c.l.b16 %v8015_v61 }
 0xc71   : > { %18170 = vst [vmem:[#allocation79_spill] sm:$0xff] %v16529_v62  ;;  %v7762_v40 = vadd.f32 %v16529_v62, %v16525_v49 }
 0xc72   : > { %v12764_v55 = vpop.eup %12763 }
 0xc73   : > { %v12766_v35 = vpop.eup %12765  ;;  %v7191_v29 = vpop.xlane.xlu1 %7190  ;;  %7763 = vadd.xlane.f32.xlu2 %v7762_v40  ;;  %v7883_v38 = vmul.f32 %v12764_v55, %v16157_v23  ;;  %v7884_v17 = vmul.f32 %v12764_v55, %v16159_v33  ;;  %v7507_v33 = vmul.f32 1.442695, %v7305_v27  ;;  %v7509_v27 = vmul.f32 1.442695, %v7306_v58 }
 0xc74   : > { %v7638_v39 = vpop.xlane.xlu0 %7637  ;;  %v7905_v57 = vmul.f32 %v12766_v35, %v16153_v20  ;;  %v7906_v60 = vmul.f32 %v12766_v35, %v16155_v43  ;;  %v16539_v14 = vpop.eup %12767  ;;  %v7759_v43 = vadd.f32 %v16523_v6, %v16519_v25  ;;  %v7331_v55 = vsub.f32 %v16047_v1, %v7191_v29 }
 0xc75   : > { %12773 = vrcp.f32 %v7638_v39  ;;  %v16545_v2 = vpop.eup %12769  ;;  %v16555_v40 = vpop.f32.mrf.mxu3  ;;  %v7332_v46 = vsub.f32 %v16039_v22, %v7191_v29  ;;  %v7213_v1 = vmax.f32 %v16533_v41, %v16535_v10 }
 0xc76   : > { %12775 = vpow2.f32 %v7501_v37  ;;  %18171 = vst [vmem:[#allocation17_spill] sm:$0xff] %v16545_v2  ;;  %v8016_v20 = vpack.c.bf16 %v7906_v60, %v7905_v57  ;;  %v16553_v37 = vpop.f32.mrf.mxu1  ;;  %v16557_v23 = vpop.eup %12771  ;;  %v7717_v35 = vadd.f32 %v16545_v2, %v16539_v14  ;;  %v8005_v57 = vpack.c.bf16 %v7884_v17, %v7883_v38  ;;  %v12991_v17 = vld [vmem:[%s17430_s11 + $0x10] sm:$0xff] }
 0xc77   : > { %12777 = vpow2.f32 %v7507_v33  ;;  %v7559_v29 = vmul.f32 1.442695, %v7331_v55  ;;  %v16571_v38 = vpop.f32.mrf.mxu0  ;;  %v7561_v58 = vmul.f32 1.442695, %v7332_v46 }
 0xc78   : > { %v8483_v16 = vunpack.c.l.b16 %v8016_v20  ;;  %v8484_v42 = vunpack.c.h.b16 %v8016_v20  ;;  %7760 = vadd.xlane.f32.xlu1 %v7759_v43  ;;  %7211 = vmax.xlane.f32.xlu0 %v7210_v52 }
 0xc7a   : > { %v8513_v63 = vpack.c.b16 %v8483_v16, %v8481_v8  ;;  %v8514_v61 = vpack.c.b16 %v8484_v42, %v8482_v59  ;;  %v8219_v8 = vunpack.c.l.b16 %v8005_v57  ;;  %v8220_v16 = vunpack.c.h.b16 %v8005_v57 }
 0xc7b   : > { %v12774_v39 = vpop.eup %12773  ;;  %v7671_v43 = vpop.xlane.xlu1 %7670  ;;  %7718 = vadd.xlane.f32.xlu2 %v7717_v35 }
 0xc7c   : > { %v16563_v60 = vpop.eup %12775  ;;  %v7885_v52 = vmul.f32 %v12774_v39, %v16177_v44  ;;  %v7886_v20 = vmul.f32 %v12774_v39, %v16181_v48  ;;  %v7194_v62 = vpop.xlane.xlu0 %7193  ;;  %8649 = vmatmul.bf16.vlgmr.msra.gmra.mxu0 %v8513_v63  ;;  %8698 = vmatmul.bf16.vlgmr.msra.gmra.mxu2 %v8514_v61  ;;  %12779 = vrcp.f32 %v7671_v43 }
 0xc7d   : > { %v7333_v2 = vsub.f32 %v16065_v18, %v7194_v62  ;;  %v7334_v22 = vsub.f32 %v16057_v11, %v7194_v62  ;;  %v16573_v44 = vpop.f32.mrf.mxu2  ;;  %9648 = vmatpush.bf16.msra.mxu0 %v12991_v17  ;;  %v7720_v18 = vadd.f32 %v16563_v60, %v16557_v23  ;;  %v12992_v11 = vld [vmem:[%s17430_s11 + $0x18] sm:$0xff]  ;;  %12781 = vpow2.f32 %v7509_v27  ;;  %v16587_v63 = vpop.f32.mrf.mxu3  ;;  %v18176_v27 = vld [vmem:[#allocation81_spill] sm:$0xff] }
 0xc7e   : > { %v8006_v48 = vpack.c.bf16 %v7886_v20, %v7885_v52  ;;  %9761 = vmatpush.bf16.msra.mxu2 %v12992_v11  ;;  %v7216_v55 = vmax.f32 %v16571_v38, %v16573_v44  ;;  %12783 = vpow2.f32 %v7559_v29  ;;  %v16585_v46 = vpop.f32.mrf.mxu1  ;;  %18173 = vst [vmem:[#allocation24_spill] sm:$0xff] %v16587_v63  ;;  %v16589_v61 = vpop.eup %12777  ;;  %v18179_v11 = vld [vmem:[#allocation66_spill] sm:$0xff] }
 0xc7f   : > { %v7563_v62 = vmul.f32 1.442695, %v7333_v2  ;;  %v7565_v33 = vmul.f32 1.442695, %v7334_v22  ;;  %12785 = vpow2.f32 %v7561_v58  ;;  %18172 = vst [vmem:[#allocation21_spill] sm:$0xff] %v16585_v46  ;;  %v18175_v2 = vld [vmem:[#allocation35_spill] sm:$0xff]  ;;  %v7200_v29 = vpop.xlane.xlu2 %7199  ;;  %v7168_v17 = vmax.f32 %v16585_v46, %v16587_v63 }
 0xc80   : > { %v8221_v59 = vunpack.c.l.b16 %v8006_v48  ;;  %v8222_v42 = vunpack.c.h.b16 %v8006_v48  ;;  %7721 = vadd.xlane.f32.xlu0 %v7720_v18  ;;  %7214 = vmax.xlane.f32.xlu1 %v7213_v1  ;;  %18174 = vst [vmem:[#allocation64_spill] sm:$0xff] %v16589_v61  ;;  %v7303_v57 = vsub.f32 %v18175_v2, %v16453_v31  ;;  %v7304_v1 = vsub.f32 %v18176_v27, %v16453_v31 }
 0xc81   : > { %12787 = vpow2.f32 %v7563_v62  ;;  %v7165_v48 = vmax.f32 %v16553_v37, %v16555_v40 }
 0xc82   : > { %v8245_v35 = vpack.c.b16 %v8221_v59, %v8219_v8  ;;  %v8246_v39 = vpack.c.b16 %v8222_v42, %v8220_v16  ;;  %v12780_v43 = vpop.eup %12779  ;;  %12789 = vpow2.f32 %v7565_v33  ;;  %v7503_v18 = vmul.f32 1.442695, %v7303_v57  ;;  %v18182_v16 = vld [vmem:[#allocation55_spill] sm:$0xff] }
 0xc83   : > { %v7641_v52 = vpop.xlane.xlu1 %7640  ;;  %7217 = vmax.xlane.f32.xlu2 %v7216_v55  ;;  %v16595_v22 = vpop.eup %12781  ;;  %v7907_v8 = vmul.f32 %v12780_v43, %v16195_v36  ;;  %v7908_v62 = vmul.f32 %v12780_v43, %v18179_v11  ;;  %v7337_v42 = vsub.f32 %v18182_v16, %v7200_v29  ;;  %v18183_v33 = vld [vmem:[#allocation87_spill] sm:$0xff] }
 0xc84   : > { %8390 = vmatmul.bf16.gmra.mxu1 %v8245_v35  ;;  %8439 = vmatmul.bf16.gmra.mxu3 %v8246_v39  ;;  %v7674_v20 = vpop.xlane.xlu0 %7673  ;;  %18177 = vst [vmem:[#allocation52_spill] sm:$0xff] %v16595_v22  ;;  %v16601_v58 = vpop.eup %12783  ;;  %v7338_v55 = vsub.f32 %v18183_v33, %v7200_v29  ;;  %v7505_v35 = vmul.f32 1.442695, %v7304_v1  ;;  %v7726_v2 = vadd.f32 %v16595_v22, %v16589_v61 }
 0xc85   : > { %12791 = vrcp.f32 %v7674_v20  ;;  %18178 = vst [vmem:[#allocation20_spill] sm:$0xff] %v16601_v58  ;;  %v16605_v59 = vpop.eup %12785  ;;  %v8017_v20 = vpack.c.bf16 %v7908_v62, %v7907_v8  ;;  %v7571_v1 = vmul.f32 1.442695, %v7337_v42 }
 0xc86   : > { %12793 = vrcp.f32 %v7641_v52  ;;  %18180 = vst [vmem:[#allocation83_spill] sm:$0xff] %v16605_v59 }
 0xc87   : > { %v16607_v31 = vpop.eup %12787  ;;  %12795 = vpow2.f32 %v7503_v18  ;;  %v7765_v18 = vadd.f32 %v16605_v59, %v16601_v58  ;;  %v8486_v42 = vunpack.c.h.b16 %v8017_v20 }
 0xc88   : > { %7166 = vmax.xlane.f32.xlu0 %v7165_v48  ;;  %7169 = vmax.xlane.f32.xlu1 %v7168_v17  ;;  %18181 = vst [vmem:[#allocation60_spill] sm:$0xff] %v16607_v31  ;;  %v16611_v39 = vpop.eup %12789  ;;  %v7573_v17 = vmul.f32 1.442695, %v7338_v55  ;;  %v16625_v55 = vpop.f32.mrf.mxu0 }
 0xc89   : > { %18184 = vst [vmem:[#allocation59_spill] sm:$0xff] %v16611_v39  ;;  %v7768_v8 = vadd.f32 %v16611_v39, %v16607_v31 }
 0xc8a   : > { %18186 = vst [vmem:[#allocation27_spill] sm:$0xff] %v16625_v55 }
 0xc8b   : > { %v12792_v57 = vpop.eup %12791  ;;  %v7197_v52 = vpop.xlane.xlu1 %7196  ;;  %7727 = vadd.xlane.f32.xlu2 %v7726_v2 }
 0xc8c   : > { %v7644_v36 = vpop.xlane.xlu0 %7643  ;;  %v12794_v43 = vpop.eup %12793  ;;  %v7909_v27 = vmul.f32 %v12792_v57, %v16211_v4  ;;  %v7910_v48 = vmul.f32 %v12792_v57, %v16213_v0  ;;  %v7335_v29 = vsub.f32 %v16087_v9, %v7197_v52  ;;  %v7336_v11 = vsub.f32 %v16080_v19, %v7197_v52  ;;  %v18185_v0 = vld [vmem:[#allocation85_spill] sm:$0xff] }
 0xc8d   : > { %12797 = vrcp.f32 %v7644_v36  ;;  %v7887_v4 = vmul.f32 %v12794_v43, %v16215_v34  ;;  %v7888_v33 = vmul.f32 %v12794_v43, %v18185_v0  ;;  %v8485_v57 = vunpack.c.l.b16 %v8017_v20  ;;  %v16629_v36 = vpop.eup %12795 }
 0xc8e   : > { %12799 = vpow2.f32 %v7505_v35  ;;  %v7567_v16 = vmul.f32 1.442695, %v7335_v29  ;;  %v8018_v62 = vpack.c.bf16 %v7910_v48, %v7909_v27  ;;  %v7569_v2 = vmul.f32 1.442695, %v7336_v11  ;;  %v16627_v35 = vpop.f32.mrf.mxu2  ;;  %18188 = vst [vmem:[#allocation49_spill] sm:$0xff] %v16629_v36  ;;  %v18190_v29 = vld [vmem:[#allocation69_spill] sm:$0xff] }
 0xc8f   : > { %18187 = vst [vmem:[#allocation47_spill] sm:$0xff] %v16627_v35 }
 0xc90   : > { %12801 = vpow2.f32 %v7567_v16  ;;  %7766 = vadd.xlane.f32.xlu0 %v7765_v18  ;;  %7769 = vadd.xlane.f32.xlu1 %v7768_v8  ;;  %v8487_v9 = vunpack.c.l.b16 %v8018_v62  ;;  %v8488_v19 = vunpack.c.h.b16 %v8018_v62  ;;  %v8007_v18 = vpack.c.bf16 %v7888_v33, %v7887_v4  ;;  %v7155_v8 = vpop.xlane.xlu2 %7154 }
 0xc91   : > { %12803 = vpow2.f32 %v7569_v2 }
 0xc92   : > { %12805 = vpow2.f32 %v7571_v1  ;;  %v8515_v34 = vpack.c.b16 %v8487_v9, %v8485_v57  ;;  %v8516_v27 = vpack.c.b16 %v8488_v19, %v8486_v42  ;;  %v7219_v1 = vmax.f32 %v16625_v55, %v16627_v35  ;;  %v16645_v42 = vpop.f32.mrf.mxu1 }
 0xc93   : > { %v12798_v52 = vpop.eup %12797  ;;  %12807 = vpow2.f32 %v7573_v17  ;;  %v7677_v16 = vpop.xlane.xlu1 %7676  ;;  %v8223_v2 = vunpack.c.l.b16 %v8007_v18  ;;  %v8224_v9 = vunpack.c.h.b16 %v8007_v18  ;;  %18194 = vst [vmem:[#allocation66_spill] sm:$0xff] %v16645_v42 }
 0xc94   : > { %v16631_v43 = vpop.eup %12799  ;;  %v7889_v48 = vmul.f32 %v12798_v52, %v16239_v28  ;;  %v7890_v11 = vmul.f32 %v12798_v52, %v18190_v29  ;;  %v7680_v20 = vpop.xlane.xlu0 %7679  ;;  %8654 = vmatmul.bf16.gmra.mxu0 %v8515_v34  ;;  %8703 = vmatmul.bf16.gmra.mxu2 %v8516_v27 }
 0xc95   : > { %18189 = vst [vmem:[#allocation51_spill] sm:$0xff] %v16631_v43  ;;  %12809 = vrcp.f32 %v7680_v20  ;;  %v7723_v17 = vadd.f32 %v16631_v43, %v16629_v36  ;;  %v16649_v52 = vpop.f32.mrf.mxu3  ;;  %v18201_v43 = vld [vmem:[#allocation39_spill] sm:$0xff] }
 0xc96   : > { %12811 = vrcp.f32 %v7677_v16  ;;  %v8008_v62 = vpack.c.bf16 %v7890_v11, %v7889_v48  ;;  %v16635_v0 = vpop.eup %12801  ;;  %18195 = vst [vmem:[#allocation55_spill] sm:$0xff] %v16649_v52  ;;  %v18197_v11 = vld [vmem:[#allocation68_spill] sm:$0xff]  ;;  %v16654_v16 = vpop.f32.mrf.mxu0 }
 0xc97   : > { %18191 = vst [vmem:[#allocation53_spill] sm:$0xff] %v16635_v0  ;;  %v16641_v28 = vpop.eup %12803  ;;  %v7307_v20 = vsub.f32 %v18197_v11, %v7155_v8  ;;  %v16656_v18 = vpop.f32.mrf.mxu2 }
 0xc98   : > { %18192 = vst [vmem:[#allocation35_spill] sm:$0xff] %v16641_v28  ;;  %v8225_v57 = vunpack.c.l.b16 %v8008_v62  ;;  %v8226_v4 = vunpack.c.h.b16 %v8008_v62  ;;  %v16643_v33 = vpop.eup %12805  ;;  %7724 = vadd.xlane.f32.xlu1 %v7723_v17  ;;  %7220 = vmax.xlane.f32.xlu0 %v7219_v1  ;;  %v7771_v19 = vadd.f32 %v16641_v28, %v16635_v0  ;;  %v18200_v17 = vld [vmem:[#allocation89_spill] sm:$0xff] }
 0xc99   : > { %18193 = vst [vmem:[#allocation81_spill] sm:$0xff] %v16643_v33  ;;  %v16651_v34 = vpop.eup %12807  ;;  %v7308_v1 = vsub.f32 %v18200_v17, %v7155_v8  ;;  %v18202_v28 = vld [vmem:[#allocation41_spill] sm:$0xff]  ;;  %v7511_v31 = vmul.f32 1.442695, %v7307_v20  ;;  %v7222_v8 = vmax.f32 %v16654_v16, %v16656_v18  ;;  %v7171_v17 = vmax.f32 %v16645_v42, %v16649_v52  ;;  %v18217_v42 = vld [vmem:[#allocation108_spill] sm:$0xff] }
 0xc9a   : > { %18196 = vst [vmem:[#allocation87_spill] sm:$0xff] %v16651_v34  ;;  %v8247_v27 = vpack.c.b16 %v8225_v57, %v8223_v2  ;;  %v8248_v48 = vpack.c.b16 %v8226_v4, %v8224_v9  ;;  %7772 = vadd.xlane.f32.xlu2 %v7771_v19  ;;  %v18203_v57 = vld [vmem:[#allocation42_spill] sm:$0xff]  ;;  %v18204_v4 = vld [vmem:[#allocation40_spill] sm:$0xff]  ;;  %v16663_v19 = vpop.xlane.xlu2 %7661 }
 0xc9b   : > { %v12810_v29 = vpop.eup %12809  ;;  %18198 = vst [vmem:[#allocation85_spill] sm:$0xff] %v16654_v16  ;;  %v7647_v2 = vpop.xlane.xlu1 %7646  ;;  %v18218_v16 = vld [vmem:[#allocation99_spill] sm:$0xff] }
 0xc9c   : > { %18199 = vst [vmem:[#allocation69_spill] sm:$0xff] %v16656_v18  ;;  %v12812_v62 = vpop.eup %12811  ;;  %v7913_v36 = vmul.f32 %v12810_v29, %v18201_v43  ;;  %v7914_v0 = vmul.f32 %v12810_v29, %v18202_v28  ;;  %8395 = vmatmul.bf16.gmra.mxu1 %v8247_v27  ;;  %8444 = vmatmul.bf16.gmra.mxu3 %v8248_v48  ;;  %v7650_v35 = vpop.xlane.xlu0 %7649  ;;  %v7513_v27 = vmul.f32 1.442695, %v7308_v1  ;;  %v18207_v1 = vld [vmem:[#allocation96_spill] sm:$0xff] }
 0xc9d   : > { %v7911_v9 = vmul.f32 %v12812_v62, %v18203_v57  ;;  %v7912_v11 = vmul.f32 %v12812_v62, %v18204_v4  ;;  %12813 = vrcp.f32 %v7650_v35  ;;  %v7774_v43 = vadd.f32 %v16651_v34, %v16643_v33  ;;  %v16673_v57 = vpop.f32.mrf.mxu3  ;;  %v18208_v4 = vld [vmem:[#allocation97_spill] sm:$0xff] }
 0xc9e   : > { %12815 = vrcp.f32 %v7647_v2  ;;  %v8020_v39 = vpack.c.bf16 %v7914_v0, %v7913_v36  ;;  %v16671_v36 = vpop.f32.mrf.mxu1  ;;  %18206 = vst [vmem:[#allocation89_spill] sm:$0xff] %v16673_v57 }
 0xc9f   : > { %v8019_v28 = vpack.c.bf16 %v7912_v11, %v7911_v9  ;;  %12817 = vpow2.f32 %v7511_v31  ;;  %18205 = vst [vmem:[#allocation68_spill] sm:$0xff] %v16671_v36 }
 0xca0   : > { %v8491_v48 = vunpack.c.l.b16 %v8020_v39  ;;  %v8492_v29 = vunpack.c.h.b16 %v8020_v39  ;;  %7775 = vadd.xlane.f32.xlu0 %v7774_v43  ;;  %7223 = vmax.xlane.f32.xlu1 %v7222_v8  ;;  %12819 = vpow2.f32 %v7513_v27  ;;  %v18209_v8 = vld [vmem:[#allocation91_spill] sm:$0xff] }
 0xca1   : > { %v8489_v35 = vunpack.c.l.b16 %v8019_v28  ;;  %v8490_v62 = vunpack.c.h.b16 %v8019_v28  ;;  %v18210_v28 = vld [vmem:[#allocation107_spill] sm:$0xff] }
 0xca2   : > { %7172 = vmax.xlane.f32.xlu2 %v7171_v17  ;;  %v7209_v27 = vpop.xlane.xlu2 %7208 }
 0xca3   : > { %v12814_v2 = vpop.eup %12813  ;;  %v8517_v0 = vpack.c.b16 %v8491_v48, %v8489_v35  ;;  %v8518_v20 = vpack.c.b16 %v8492_v29, %v8490_v62  ;;  %v7683_v43 = vpop.xlane.xlu1 %7682  ;;  %v7174_v48 = vmax.f32 %v16671_v36, %v16673_v57  ;;  %v18216_v57 = vld [vmem:[#allocation104_spill] sm:$0xff] }
 0xca4   : > { %v12816_v9 = vpop.eup %12815  ;;  %v7893_v39 = vmul.f32 %v12814_v2, %v18207_v1  ;;  %v7894_v11 = vmul.f32 %v12814_v2, %v18208_v4  ;;  %v7686_v34 = vpop.xlane.xlu0 %7685 }
 0xca5   : > { %v7891_v33 = vmul.f32 %v12816_v9, %v18209_v8  ;;  %v7892_v52 = vmul.f32 %v12816_v9, %v18210_v28  ;;  %12821 = vrcp.f32 %v7686_v34  ;;  %8659 = vmatmul.bf16.gmra.mxu0 %v8517_v0  ;;  %8708 = vmatmul.bf16.gmra.mxu2 %v8518_v20  ;;  %v16681_v62 = vpop.eup %12817  ;;  %v16683_v4 = vpop.f32.mrf.mxu0  ;;  %v18213_v20 = vld [vmem:[#allocation95_spill] sm:$0xff]  ;;  %v18215_v28 = vld [vmem:[#allocation72_spill] sm:$0xff] }
 0xca6   : > { %12823 = vrcp.f32 %v7683_v43  ;;  %v8010_v31 = vpack.c.bf16 %v7894_v11, %v7893_v39  ;;  %18211 = vst [vmem:[#allocation39_spill] sm:$0xff] %v16681_v62  ;;  %v16685_v9 = vpop.f32.mrf.mxu2  ;;  %v16687_v34 = vpop.eup %12819  ;;  %v7343_v39 = vsub.f32 %v18213_v20, %v7209_v27 }
 0xca7   : > { %v8009_v29 = vpack.c.bf16 %v7892_v52, %v7891_v33  ;;  %18212 = vst [vmem:[#allocation41_spill] sm:$0xff] %v16687_v34  ;;  %v18214_v52 = vld [vmem:[#allocation103_spill] sm:$0xff]  ;;  %v16695_v55 = vpop.f32.mrf.mxu1 }
 0xca8   : > { %v8229_v17 = vunpack.c.l.b16 %v8010_v31  ;;  %v8230_v35 = vunpack.c.h.b16 %v8010_v31  ;;  %7175 = vmax.xlane.f32.xlu0 %v7174_v48  ;;  %v7344_v8 = vsub.f32 %v18214_v52, %v7209_v27  ;;  %v7583_v27 = vmul.f32 1.442695, %v7343_v39 }
 0xca9   : > { %v8227_v2 = vunpack.c.l.b16 %v8009_v29  ;;  %v8228_v1 = vunpack.c.h.b16 %v8009_v29 }
 0xcab   : > { %v12822_v0 = vpop.eup %12821  ;;  %v8249_v11 = vpack.c.b16 %v8229_v17, %v8227_v2  ;;  %v8250_v43 = vpack.c.b16 %v8230_v35, %v8228_v1  ;;  %v7653_v29 = vpop.xlane.xlu1 %7652  ;;  %v7729_v2 = vadd.f32 %v16687_v34, %v16681_v62  ;;  %v7585_v1 = vmul.f32 1.442695, %v7344_v8 }
 0xcac   : > { %v12824_v33 = vpop.eup %12823  ;;  %v7917_v31 = vmul.f32 %v12822_v0, %v18215_v28  ;;  %v7918_v48 = vmul.f32 %v12822_v0, %v18216_v57  ;;  %v7656_v36 = vpop.xlane.xlu0 %7655  ;;  %v18221_v28 = vld [vmem:[#allocation94_spill] sm:$0xff] }
 0xcad   : > { %v7915_v18 = vmul.f32 %v12824_v33, %v18217_v42  ;;  %v7916_v22 = vmul.f32 %v12824_v33, %v18218_v16  ;;  %12825 = vrcp.f32 %v7656_v36  ;;  %8400 = vmatmul.bf16.gmra.mxu1 %v8249_v11  ;;  %8449 = vmatmul.bf16.gmra.mxu3 %v8250_v43  ;;  %v16697_v17 = vpop.f32.mrf.mxu3  ;;  %v16702_v33 = vpop.f32.mrf.mxu0 }
 0xcae   : > { %12827 = vrcp.f32 %v7653_v29  ;;  %v8022_v35 = vpack.c.bf16 %v7918_v48, %v7917_v31  ;;  %18219 = vst [vmem:[#allocation42_spill] sm:$0xff] %v16702_v33  ;;  %v16704_v52 = vpop.f32.mrf.mxu2  ;;  %v18223_v29 = vld [vmem:[#allocation106_spill] sm:$0xff] }
 0xcaf   : > { %v8021_v57 = vpack.c.bf16 %v7916_v22, %v7915_v18  ;;  %12829 = vrcp.f32 %v16663_v19  ;;  %18220 = vst [vmem:[#allocation40_spill] sm:$0xff] %v16704_v52  ;;  %v18222_v18 = vld [vmem:[#allocation93_spill] sm:$0xff] }
 0xcb0   : > { %v8495_v0 = vunpack.c.l.b16 %v8022_v35  ;;  %v8496_v20 = vunpack.c.h.b16 %v8022_v35  ;;  %7730 = vadd.xlane.f32.xlu0 %v7729_v2  ;;  %12831 = vpow2.f32 %v7583_v27  ;;  %v18224_v2 = vld [vmem:[#allocation105_spill] sm:$0xff] }
 0xcb1   : > { %v8493_v42 = vunpack.c.l.b16 %v8021_v57  ;;  %v8494_v16 = vunpack.c.h.b16 %v8021_v57  ;;  %12833 = vpow2.f32 %v7585_v1  ;;  %v16710_v57 = vpop.f32.mrf.mxu1  ;;  %v7228_v1 = vmax.f32 %v16702_v33, %v16704_v52 }
 0xcb3   : > { %v12826_v36 = vpop.eup %12825  ;;  %v8519_v11 = vpack.c.b16 %v8495_v0, %v8493_v42  ;;  %v8520_v43 = vpack.c.b16 %v8496_v20, %v8494_v16  ;;  %v7689_v48 = vpop.xlane.xlu1 %7688 }
 0xcb4   : > { %v12828_v39 = vpop.eup %12827  ;;  %v7897_v22 = vmul.f32 %v12826_v36, %v18221_v28  ;;  %v7898_v8 = vmul.f32 %v12826_v36, %v18222_v18  ;;  %v7692_v31 = vpop.xlane.xlu0 %7691 }
 0xcb5   : > { %v7895_v35 = vmul.f32 %v12828_v39, %v18223_v29  ;;  %v7896_v19 = vmul.f32 %v12828_v39, %v18224_v2  ;;  %12835 = vrcp.f32 %v7692_v31  ;;  %8664 = vmatmul.bf16.gmra.mxu0 %v8519_v11  ;;  %8713 = vmatmul.bf16.gmra.mxu2 %v8520_v43  ;;  %v16714_v0 = vpop.f32.mrf.mxu3  ;;  %v12830_v42 = vpop.eup %12829  ;;  %v18227_v2 = vld [vmem:[#allocation22_spill] sm:$0xff] }
 0xcb6   : > { %12837 = vrcp.f32 %v7689_v48  ;;  %v8012_v27 = vpack.c.bf16 %v7898_v8, %v7897_v22  ;;  %v16716_v28 = vpop.eup %12831  ;;  %v18226_v48 = vld [vmem:[#allocation25_spill] sm:$0xff] }
 0xcb7   : > { %v8011_v20 = vpack.c.bf16 %v7896_v19, %v7895_v35  ;;  %v16718_v11 = vpop.eup %12833  ;;  %v18228_v19 = vld [vmem:[#allocation34_spill] sm:$0xff] }
 0xcb8   : > { %v8233_v16 = vunpack.c.l.b16 %v8012_v27  ;;  %v8234_v36 = vunpack.c.h.b16 %v8012_v27  ;;  %7229 = vmax.xlane.f32.xlu0 %v7228_v1  ;;  %18225 = vst [vmem:[#allocation96_spill] sm:$0xff] %v16718_v11  ;;  %v18229_v27 = vld [vmem:[#allocation57_spill] sm:$0xff] }
 0xcb9   : > { %v8231_v39 = vunpack.c.l.b16 %v8011_v20  ;;  %v8232_v18 = vunpack.c.h.b16 %v8011_v20  ;;  %v18230_v20 = vld [vmem:[#allocation101_spill] sm:$0xff]  ;;  %v8376_v58 = vpop.f32.mrf.mxu1 }
 0xcba   : > { %v7901_v59 = vmul.f32 %v12830_v42, %v18230_v20  ;;  %v18233_v20 = vld [vmem:[#allocation32_spill] sm:$0xff] }
 0xcbb   : > { %v12836_v43 = vpop.eup %12835  ;;  %v8251_v22 = vpack.c.b16 %v8233_v16, %v8231_v39  ;;  %v8252_v8 = vpack.c.b16 %v8234_v36, %v8232_v18  ;;  %v7659_v62 = vpop.xlane.xlu1 %7658  ;;  %v7783_v36 = vadd.f32 %v16718_v11, %v16716_v28  ;;  %v18231_v18 = vld [vmem:[#allocation100_spill] sm:$0xff] }
 0xcbc   : > { %v12838_v31 = vpop.eup %12837  ;;  %v7921_v29 = vmul.f32 %v12836_v43, %v18226_v48  ;;  %v7922_v34 = vmul.f32 %v12836_v43, %v18227_v2  ;;  %v7203_v35 = vpop.xlane.xlu0 %7202  ;;  %12839 = vrcp.f32 %v7659_v62  ;;  %v7902_v43 = vmul.f32 %v12830_v42, %v18231_v18 }
 0xcbd   : > { %v7919_v52 = vmul.f32 %v12838_v31, %v18228_v19  ;;  %v7920_v33 = vmul.f32 %v12838_v31, %v18229_v27  ;;  %8405 = vmatmul.bf16.gmra.mxu1 %v8251_v22  ;;  %8454 = vmatmul.bf16.gmra.mxu3 %v8252_v8 }
 0xcbe   : > { %v8024_v1 = vpack.c.bf16 %v7922_v34, %v7921_v29  ;;  %v18232_v29 = vld [vmem:[#allocation98_spill] sm:$0xff]  ;;  %v8014_v11 = vpack.c.bf16 %v7902_v43, %v7901_v59 }
 0xcbf   : > { %v8425_v16 = vpop.f32.mrf.mxu3  ;;  %v8023_v39 = vpack.c.bf16 %v7920_v33, %v7919_v52  ;;  %v18234_v33 = vld [vmem:[#allocation88_spill] sm:$0xff] }
 0xcc0   : > { %v16728_v48 = vadd.f32 %v8425_v16, %v8376_v58  ;;  %v8499_v2 = vunpack.c.l.b16 %v8024_v1  ;;  %v8500_v19 = vunpack.c.h.b16 %v8024_v1  ;;  %7784 = vadd.xlane.f32.xlu0 %v7783_v36  ;;  %v7339_v52 = vsub.f32 %v18234_v33, %v7203_v35  ;;  %v18235_v58 = vld [vmem:[#allocation70_spill] sm:$0xff] }
 0xcc1   : > { %v8497_v31 = vunpack.c.l.b16 %v8023_v39  ;;  %v8498_v22 = vunpack.c.h.b16 %v8023_v39  ;;  %v7340_v42 = vsub.f32 %v18235_v58, %v7203_v35  ;;  %v8237_v39 = vunpack.c.l.b16 %v8014_v11 }
 0xcc2   : > { %v12840_v8 = vpop.eup %12839 }
 0xcc3   : > { %v8521_v62 = vpack.c.b16 %v8499_v2, %v8497_v31  ;;  %v8522_v34 = vpack.c.b16 %v8500_v19, %v8498_v22  ;;  %v7899_v27 = vmul.f32 %v12840_v8, %v18232_v29  ;;  %v7900_v61 = vmul.f32 %v12840_v8, %v18233_v20  ;;  %v7695_v63 = vpop.xlane.xlu1 %7694 }
 0xcc4   : > { %v7698_v46 = vpop.xlane.xlu0 %7697  ;;  %12841 = vrcp.f32 %v7695_v63  ;;  %v8238_v2 = vunpack.c.h.b16 %v8014_v11  ;;  %v7575_v19 = vmul.f32 1.442695, %v7339_v52  ;;  %v7577_v31 = vmul.f32 1.442695, %v7340_v42 }
 0xcc5   : > { %8669 = vmatmul.bf16.gmra.mxu0 %v8521_v62  ;;  %8718 = vmatmul.bf16.gmra.mxu2 %v8522_v34  ;;  %12843 = vrcp.f32 %v7698_v46  ;;  %v16734_v1 = vpop.xlane.xlu2 %7706  ;;  %v8013_v16 = vpack.c.bf16 %v7900_v61, %v7899_v27  ;;  %v18236_v34 = vld [vmem:[#allocation102_spill] sm:$0xff]  ;;  %v18237_v46 = vld [vmem:[#allocation44_spill] sm:$0xff] }
 0xcc6   : > { %12845 = vpow2.f32 %v7575_v19  ;;  %v18238_v61 = vld [vmem:[#allocation18_spill] sm:$0xff] }
 0xcc7   : > { %v8235_v36 = vunpack.c.l.b16 %v8013_v16  ;;  %v8236_v18 = vunpack.c.h.b16 %v8013_v16  ;;  %12847 = vpow2.f32 %v7577_v31 }
 0xcc9   : > { %v8253_v22 = vpack.c.b16 %v8237_v39, %v8235_v36  ;;  %v8254_v8 = vpack.c.b16 %v8238_v2, %v8236_v18  ;;  %v16745_v36 = vpop.f32.mrf.mxu1  ;;  %v16747_v39 = vpop.f32.mrf.mxu3 }
 0xcca   : > { %v12842_v59 = vpop.eup %12841 }
 0xccb   : > { %v12844_v43 = vpop.eup %12843  ;;  %v7923_v62 = vmul.f32 %v12842_v59, %v16407_v45  ;;  %v7924_v63 = vmul.f32 %v12842_v59, %v18236_v34  ;;  %v7206_v35 = vpop.xlane.xlu1 %7205 }
 0xccc   : > { %v7158_v29 = vpop.xlane.xlu0 %7157  ;;  %v7925_v20 = vmul.f32 %v12844_v43, %v18237_v46  ;;  %v7926_v27 = vmul.f32 %v12844_v43, %v18238_v61  ;;  %v7341_v45 = vsub.f32 %v16263_v7, %v7206_v35  ;;  %v7342_v42 = vsub.f32 %v16261_v32, %v7206_v35  ;;  %v16750_v32 = vpop.eup %12845 }
 0xccd   : > { %8410 = vmatmul.bf16.gmra.mxu1 %v8253_v22  ;;  %8459 = vmatmul.bf16.gmra.mxu3 %v8254_v8  ;;  %v7309_v11 = vsub.f32 %v16393_v47, %v7158_v29  ;;  %v7310_v33 = vsub.f32 %v16395_v53, %v7158_v29  ;;  %v7164_v52 = vpop.xlane.xlu2 %7163  ;;  %v8025_v19 = vpack.c.bf16 %v7924_v63, %v7923_v62  ;;  %v16752_v34 = vpop.eup %12847 }
 0xcce   : > { %v7313_v16 = vsub.f32 %v16447_v56, %v7164_v52  ;;  %v7314_v2 = vsub.f32 %v16449_v30, %v7164_v52  ;;  %v8026_v47 = vpack.c.bf16 %v7926_v27, %v7925_v20  ;;  %v7579_v31 = vmul.f32 1.442695, %v7341_v45 }
 0xccf   : > { %v7515_v58 = vmul.f32 1.442695, %v7309_v11  ;;  %v7517_v18 = vmul.f32 1.442695, %v7310_v33  ;;  %v7581_v53 = vmul.f32 1.442695, %v7342_v42  ;;  %v8501_v7 = vunpack.c.l.b16 %v8025_v19 }
 0xcd0   : > { %v7523_v22 = vmul.f32 1.442695, %v7313_v16  ;;  %v7525_v8 = vmul.f32 1.442695, %v7314_v2  ;;  %v8503_v59 = vunpack.c.l.b16 %v8026_v47  ;;  %v8502_v56 = vunpack.c.h.b16 %v8025_v19 }
 0xcd1   : > { %12849 = vpow2.f32 %v7515_v58  ;;  %v8504_v43 = vunpack.c.h.b16 %v8026_v47  ;;  %v8381_v20 = vpop.f32.mrf.mxu1 }
 0xcd2   : > { %12851 = vpow2.f32 %v7517_v18  ;;  %v8523_v29 = vpack.c.b16 %v8503_v59, %v8501_v7  ;;  %v18242_v59 = vld [vmem:[#allocation26_spill] sm:$0xff] }
 0xcd3   : > { %12853 = vpow2.f32 %v7579_v31  ;;  %v7701_v62 = vpop.xlane.xlu1 %7700  ;;  %v8524_v63 = vpack.c.b16 %v8504_v43, %v8502_v56 }
 0xcd4   : > { %12855 = vpow2.f32 %v7581_v53  ;;  %v7704_v30 = vpop.xlane.xlu0 %7703  ;;  %v18240_v53 = vld [vmem:[#allocation54_spill] sm:$0xff] }
 0xcd5   : > { %12857 = vpow2.f32 %v7523_v22  ;;  %8674 = vmatmul.bf16.gmra.mxu0 %v8523_v29  ;;  %8723 = vmatmul.bf16.gmra.mxu2 %v8524_v63  ;;  %v7777_v29 = vadd.f32 %v16752_v34, %v16750_v32 }
 0xcd6   : > { %12859 = vpow2.f32 %v7525_v8  ;;  %v18241_v8 = vld [vmem:[#allocation19_spill] sm:$0xff] }
 0xcd7   : > { %v16754_v35 = vpop.eup %12849  ;;  %12861 = vrcp.f32 %v7704_v30  ;;  %v8430_v61 = vpop.f32.mrf.mxu3 }
 0xcd8   : > { %v16756_v46 = vpop.eup %12851  ;;  %12863 = vrcp.f32 %v7701_v62  ;;  %v16760_v11 = vadd.f32 %v8430_v61, %v8381_v20 }
 0xcd9   : > { %v16758_v27 = vpop.eup %12853  ;;  %v7732_v33 = vadd.f32 %v16756_v46, %v16754_v35 }
 0xcda   : > { %18239 = vst [vmem:[#allocation97_spill] sm:$0xff] %v16760_v11  ;;  %v16764_v52 = vpop.eup %12855 }
 0xcdb   : > { %v16766_v58 = vpop.eup %12857  ;;  %v7780_v45 = vadd.f32 %v16764_v52, %v16758_v27  ;;  %7733 = vadd.xlane.f32.xlu1 %v7732_v33  ;;  %v7716_v18 = vpop.xlane.xlu1 %7715 }
 0xcdc   : > { %v16770_v42 = vpop.eup %12859  ;;  %v7713_v16 = vpop.xlane.xlu0 %7712 }
 0xcdd   : > { %v12862_v2 = vpop.eup %12861  ;;  %7781 = vadd.xlane.f32.xlu2 %v7780_v45  ;;  %v7738_v19 = vadd.f32 %v16770_v42, %v16766_v58  ;;  %12865 = vrcp.f32 %v7713_v16 }
 0xcde   : > { %v12864_v47 = vpop.eup %12863  ;;  %v7929_v31 = vmul.f32 %v12862_v2, %v16467_v26  ;;  %v7930_v22 = vmul.f32 %v12862_v2, %v18240_v53  ;;  %12867 = vrcp.f32 %v7716_v18  ;;  %v7225_v26 = vmax.f32 %v16683_v4, %v16685_v9 }
 0xcdf   : > { %v7927_v7 = vmul.f32 %v12864_v47, %v18241_v8  ;;  %v7928_v56 = vmul.f32 %v12864_v47, %v18242_v59  ;;  %7739 = vadd.xlane.f32.xlu0 %v7738_v19  ;;  %12869 = vrcp.f32 %v16734_v1  ;;  %v16788_v59 = vpop.f32.mrf.mxu1 }
 0xce0   : > { %v8028_v43 = vpack.c.bf16 %v7930_v22, %v7929_v31 }
 0xce1   : > { %v8027_v30 = vpack.c.bf16 %v7928_v56, %v7927_v7 }
 0xce2   : > { %v8507_v62 = vunpack.c.l.b16 %v8028_v43  ;;  %v8508_v63 = vunpack.c.h.b16 %v8028_v43 }
 0xce3   : > { %v12866_v20 = vpop.eup %12865  ;;  %7778 = vadd.xlane.f32.xlu1 %v7777_v29  ;;  %v8505_v61 = vunpack.c.l.b16 %v8027_v30  ;;  %v8506_v33 = vunpack.c.h.b16 %v8027_v30  ;;  %v7161_v1 = vpop.xlane.xlu1 %7160  ;;  %v7177_v30 = vmax.f32 %v16695_v55, %v16697_v17 }
 0xce4   : > { %v12868_v45 = vpop.eup %12867  ;;  %v7935_v16 = vmul.f32 %v12866_v20, %v16479_v3  ;;  %v7936_v18 = vmul.f32 %v12866_v20, %v16483_v54  ;;  %v7710_v2 = vpop.xlane.xlu0 %7709  ;;  %v7311_v8 = vsub.f32 %v16413_v51, %v7161_v1  ;;  %v7312_v3 = vsub.f32 %v16415_v21, %v7161_v1  ;;  %v18243_v20 = vld [vmem:[#allocation58_spill] sm:$0xff] }
 0xce5   : > { %v7937_v19 = vmul.f32 %v12868_v45, %v16486_v24  ;;  %v7938_v47 = vmul.f32 %v12868_v45, %v16489_v15  ;;  %7226 = vmax.xlane.f32.xlu2 %v7225_v26  ;;  %12871 = vrcp.f32 %v7710_v2  ;;  %v8525_v53 = vpack.c.b16 %v8507_v62, %v8505_v61  ;;  %v12870_v7 = vpop.eup %12869  ;;  %v16791_v29 = vpop.f32.mrf.mxu3  ;;  %v18244_v61 = vld [vmem:[#allocation77_spill] sm:$0xff] }
 0xce6   : > { %v8031_v31 = vpack.c.bf16 %v7936_v18, %v7935_v16  ;;  %v8526_v22 = vpack.c.b16 %v8508_v63, %v8506_v33  ;;  %v7519_v24 = vmul.f32 1.442695, %v7311_v8  ;;  %v7764_v15 = vpop.xlane.xlu2 %7763  ;;  %v7521_v51 = vmul.f32 1.442695, %v7312_v3 }
 0xce7   : > { %v8032_v56 = vpack.c.bf16 %v7938_v47, %v7937_v19  ;;  %8679 = vmatmul.bf16.gmra.mxu0 %v8525_v53  ;;  %v7931_v26 = vmul.f32 %v12870_v7, %v18243_v20  ;;  %v7932_v33 = vmul.f32 %v12870_v7, %v18244_v61  ;;  %v7180_v45 = vmax.f32 %v16710_v57, %v16714_v0 }
 0xce8   : > { %v8755_v54 = vunpack.c.l.b16 %v8031_v31  ;;  %v8756_v43 = vunpack.c.h.b16 %v8031_v31  ;;  %8728 = vmatmul.bf16.gmra.mxu2 %v8526_v22  ;;  %12873 = vpow2.f32 %v7519_v24 }
 0xce9   : > { %v8757_v62 = vunpack.c.l.b16 %v8032_v56  ;;  %v8758_v63 = vunpack.c.h.b16 %v8032_v56  ;;  %12875 = vpow2.f32 %v7521_v51  ;;  %v8029_v22 = vpack.c.bf16 %v7932_v33, %v7931_v26  ;;  %v8386_v7 = vpop.f32.mrf.mxu1 }
 0xceb   : > { %v12872_v21 = vpop.eup %12871  ;;  %7178 = vmax.xlane.f32.xlu1 %v7177_v30  ;;  %v8787_v16 = vpack.c.b16 %v8757_v62, %v8755_v54  ;;  %v8788_v18 = vpack.c.b16 %v8758_v63, %v8756_v43  ;;  %v7761_v19 = vpop.xlane.xlu1 %7760  ;;  %v8509_v62 = vunpack.c.l.b16 %v8029_v22  ;;  %v8510_v63 = vunpack.c.h.b16 %v8029_v22 }
 0xcec   : > { %v7933_v2 = vmul.f32 %v12872_v21, %v16509_v12  ;;  %v7934_v1 = vmul.f32 %v12872_v21, %v16511_v50  ;;  %v7212_v47 = vpop.xlane.xlu0 %7211  ;;  %12877 = vrcp.f32 %v7761_v19 }
 0xced   : > { %7181 = vmax.xlane.f32.xlu2 %v7180_v45  ;;  %8923 = vmatmul.bf16.vlgmr.msrb.gmra.mxu1 %v8787_v16  ;;  %v7345_v31 = vsub.f32 %v16505_v13, %v7212_v47  ;;  %v7346_v53 = vsub.f32 %v16507_v5, %v7212_v47  ;;  %12879 = vrcp.f32 %v7764_v15 }
 0xcee   : > { %8972 = vmatmul.bf16.vlgmr.msrb.gmra.mxu3 %v8788_v18  ;;  %v8030_v8 = vpack.c.bf16 %v7934_v1, %v7933_v2  ;;  %v16803_v54 = vpop.eup %12873  ;;  %v7719_v12 = vpop.xlane.xlu2 %7718 }
 0xcef   : > { %v7587_v56 = vmul.f32 1.442695, %v7345_v31  ;;  %v7589_v3 = vmul.f32 1.442695, %v7346_v53  ;;  %v8435_v50 = vpop.f32.mrf.mxu3  ;;  %v16805_v30 = vpop.eup %12875 }
 0xcf0   : > { %v8511_v43 = vunpack.c.l.b16 %v8030_v8  ;;  %v8512_v24 = vunpack.c.h.b16 %v8030_v8  ;;  %v16807_v13 = vadd.f32 %v8435_v50, %v8386_v7  ;;  %v7735_v5 = vadd.f32 %v16805_v30, %v16803_v54 }
 0xcf1   : > { %12881 = vpow2.f32 %v7587_v56 }
 0xcf2   : > { %18245 = vst [vmem:[#allocation91_spill] sm:$0xff] %v16807_v13  ;;  %12883 = vpow2.f32 %v7589_v3  ;;  %v12878_v51 = vpop.eup %12877  ;;  %v8527_v20 = vpack.c.b16 %v8511_v43, %v8509_v62  ;;  %v8528_v26 = vpack.c.b16 %v8512_v24, %v8510_v63  ;;  %v18247_v3 = vld [vmem:[#allocation79_spill] sm:$0xff] }
 0xcf3   : > { %12885 = vrcp.f32 %v7719_v12  ;;  %v7215_v61 = vpop.xlane.xlu1 %7214  ;;  %v12880_v45 = vpop.eup %12879  ;;  %v7967_v18 = vmul.f32 %v12878_v51, %v16519_v25  ;;  %v7968_v2 = vmul.f32 %v12878_v51, %v16523_v6  ;;  %v18246_v25 = vld [vmem:[#allocation17_spill] sm:$0xff] }
 0xcf4   : > { %v7722_v15 = vpop.xlane.xlu0 %7721  ;;  %v7347_v33 = vsub.f32 %v16533_v41, %v7215_v61  ;;  %v7348_v21 = vsub.f32 %v16535_v10, %v7215_v61  ;;  %v7969_v22 = vmul.f32 %v12880_v45, %v16525_v49  ;;  %v7970_v12 = vmul.f32 %v12880_v45, %v18247_v3  ;;  %v18248_v51 = vld [vmem:[#allocation21_spill] sm:$0xff] }
 0xcf5   : > { %7736 = vadd.xlane.f32.xlu2 %v7735_v5  ;;  %12887 = vrcp.f32 %v7722_v15  ;;  %v8047_v50 = vpack.c.bf16 %v7968_v2, %v7967_v18 }
 0xcf6   : > { %v7591_v1 = vmul.f32 1.442695, %v7347_v33  ;;  %v7593_v19 = vmul.f32 1.442695, %v7348_v21  ;;  %v7218_v31 = vpop.xlane.xlu2 %7217 }
 0xcf7   : > { %v16813_v16 = vpop.eup %12881  ;;  %8684 = vmatmul.bf16.gmra.mxu0 %v8527_v20  ;;  %v7349_v41 = vsub.f32 %v16571_v38, %v7218_v31  ;;  %v7350_v10 = vsub.f32 %v16573_v44, %v7218_v31  ;;  %v9029_v21 = vunpack.c.l.b16 %v8047_v50  ;;  %v16837_v45 = vpop.f32.mrf.mxu3 }
 0xcf8   : > { %v16817_v47 = vpop.eup %12883  ;;  %8733 = vmatmul.bf16.gmra.mxu2 %v8528_v26  ;;  %12889 = vpow2.f32 %v7591_v1  ;;  %v18249_v26 = vld [vmem:[#allocation24_spill] sm:$0xff]  ;;  %18251 = vst [vmem:[#allocation95_spill] sm:$0xff] %v16837_v45 }
 0xcf9   : > { %v12886_v53 = vpop.eup %12885  ;;  %12891 = vpow2.f32 %v7593_v19  ;;  %v7786_v6 = vadd.f32 %v16817_v47, %v16813_v16  ;;  %v7595_v43 = vmul.f32 1.442695, %v7349_v41  ;;  %v7597_v24 = vmul.f32 1.442695, %v7350_v10 }
 0xcfa   : > { %v7939_v8 = vmul.f32 %v12886_v53, %v16539_v14  ;;  %v7940_v7 = vmul.f32 %v12886_v53, %v18246_v25  ;;  %v9030_v25 = vunpack.c.h.b16 %v8047_v50 }
 0xcfb   : > { %v12888_v56 = vpop.eup %12887  ;;  %7787 = vadd.xlane.f32.xlu1 %v7786_v6  ;;  %v7170_v5 = vpop.xlane.xlu1 %7169  ;;  %12893 = vpow2.f32 %v7595_v43 }
 0xcfc   : > { %v7941_v49 = vmul.f32 %v12888_v56, %v16557_v23  ;;  %v7942_v38 = vmul.f32 %v12888_v56, %v16563_v60  ;;  %v7167_v44 = vpop.xlane.xlu0 %7166  ;;  %v8033_v14 = vpack.c.bf16 %v7940_v7, %v7939_v8  ;;  %12895 = vpow2.f32 %v7597_v24  ;;  %v16835_v60 = vpop.f32.mrf.mxu1 }
 0xcfd   : > { %v7315_v62 = vsub.f32 %v16553_v37, %v7167_v44  ;;  %v7316_v63 = vsub.f32 %v16555_v40, %v7167_v44  ;;  %v7317_v20 = vsub.f32 %v18248_v51, %v7170_v5  ;;  %v7318_v15 = vsub.f32 %v18249_v26, %v7170_v5  ;;  %18250 = vst [vmem:[#allocation107_spill] sm:$0xff] %v16835_v60  ;;  %v8650_v37 = vpop.f32.mrf.mxu0 }
 0xcfe   : > { %v8034_v61 = vpack.c.bf16 %v7942_v38, %v7941_v49  ;;  %v16833_v33 = vpop.eup %12889  ;;  %v8048_v23 = vpack.c.bf16 %v7970_v12, %v7969_v22  ;;  %v8759_v31 = vunpack.c.l.b16 %v8033_v14  ;;  %v8760_v22 = vunpack.c.h.b16 %v8033_v14  ;;  %v7728_v7 = vpop.xlane.xlu2 %7727 }
 0xcff   : > { %v7527_v18 = vmul.f32 1.442695, %v7315_v62  ;;  %v7529_v2 = vmul.f32 1.442695, %v7316_v63  ;;  %v16839_v1 = vpop.eup %12891  ;;  %v7531_v40 = vmul.f32 1.442695, %v7317_v20  ;;  %v8699_v41 = vpop.f32.mrf.mxu2 }
 0xd00   : > { %v7533_v19 = vmul.f32 1.442695, %v7318_v15  ;;  %v8761_v53 = vunpack.c.l.b16 %v8034_v61  ;;  %v7789_v10 = vadd.f32 %v16839_v1, %v16833_v33  ;;  %v8762_v8 = vunpack.c.h.b16 %v8034_v61 }
 0xd01   : > { %12897 = vpow2.f32 %v7527_v18  ;;  %v16843_v6 = vadd.f32 %v8699_v41, %v8650_v37  ;;  %v16845_v3 = vpop.eup %12893  ;;  %v9031_v24 = vunpack.c.l.b16 %v8048_v23  ;;  %v9032_v49 = vunpack.c.h.b16 %v8048_v23 }
 0xd02   : > { %12899 = vpow2.f32 %v7529_v2  ;;  %v8789_v56 = vpack.c.b16 %v8761_v53, %v8759_v31  ;;  %v8790_v12 = vpack.c.b16 %v8762_v8, %v8760_v22  ;;  %v16847_v43 = vpop.eup %12895  ;;  %v18255_v8 = vld [vmem:[#allocation83_spill] sm:$0xff] }
 0xd03   : > { %12901 = vpow2.f32 %v7531_v40  ;;  %7790 = vadd.xlane.f32.xlu1 %v7789_v10  ;;  %v7770_v44 = vpop.xlane.xlu1 %7769  ;;  %v7792_v50 = vadd.f32 %v16847_v43, %v16845_v3  ;;  %v9061_v5 = vpack.c.b16 %v9031_v24, %v9029_v21  ;;  %v9062_v14 = vpack.c.b16 %v9032_v49, %v9030_v25  ;;  %v18253_v40 = vld [vmem:[#allocation64_spill] sm:$0xff] }
 0xd04   : > { %12903 = vpow2.f32 %v7533_v19  ;;  %8928 = vmatmul.bf16.gmra.mxu1 %v8789_v56  ;;  %v7767_v38 = vpop.xlane.xlu0 %7766  ;;  %8977 = vmatmul.bf16.gmra.mxu3 %v8790_v12  ;;  %v8391_v63 = vpop.f32.mrf.mxu1  ;;  %v18254_v10 = vld [vmem:[#allocation20_spill] sm:$0xff] }
 0xd05   : > { %12905 = vrcp.f32 %v7728_v7  ;;  %7793 = vadd.xlane.f32.xlu2 %v7792_v50  ;;  %v16863_v21 = vpop.f32.mrf.mxu0  ;;  %v18256_v7 = vld [vmem:[#allocation27_spill] sm:$0xff]  ;;  %v18257_v12 = vld [vmem:[#allocation52_spill] sm:$0xff] }
 0xd06   : > { %12907 = vrcp.f32 %v7767_v38  ;;  %v18258_v49 = vld [vmem:[#allocation60_spill] sm:$0xff] }
 0xd07   : > { %v16851_v62 = vpop.eup %12897  ;;  %12909 = vrcp.f32 %v7770_v44  ;;  %v8440_v51 = vpop.f32.mrf.mxu3  ;;  %9197 = vmatmul.bf16.vlgmr.msrb.gmra.mxu0 %v9061_v5  ;;  %v18259_v44 = vld [vmem:[#allocation59_spill] sm:$0xff] }
 0xd08   : > { %v16853_v20 = vpop.eup %12899  ;;  %9246 = vmatmul.bf16.vlgmr.msrb.gmra.mxu2 %v9062_v14  ;;  %v16855_v26 = vadd.f32 %v8440_v51, %v8391_v63  ;;  %v18260_v5 = vld [vmem:[#allocation47_spill] sm:$0xff] }
 0xd09   : > { %v16857_v15 = vpop.eup %12901  ;;  %v7741_v61 = vadd.f32 %v16853_v20, %v16851_v62 }
 0xd0a   : > { %18252 = vst [vmem:[#allocation103_spill] sm:$0xff] %v16855_v26  ;;  %v16861_v23 = vpop.eup %12903  ;;  %v18265_v26 = vld [vmem:[#allocation69_spill] sm:$0xff] }
 0xd0b   : > { %v12906_v18 = vpop.eup %12905  ;;  %v7744_v2 = vadd.f32 %v16861_v23, %v16857_v15  ;;  %7742 = vadd.xlane.f32.xlu0 %v7741_v61  ;;  %v7725_v31 = vpop.xlane.xlu1 %7724 }
 0xd0c   : > { %v12908_v37 = vpop.eup %12907  ;;  %v7945_v19 = vmul.f32 %v12906_v18, %v18253_v40  ;;  %v7221_v53 = vpop.xlane.xlu0 %7220  ;;  %12911 = vrcp.f32 %v7725_v31  ;;  %v7946_v24 = vmul.f32 %v12906_v18, %v18257_v12 }
 0xd0d   : > { %v12910_v41 = vpop.eup %12909  ;;  %v7971_v22 = vmul.f32 %v12908_v37, %v18254_v10  ;;  %v7972_v25 = vmul.f32 %v12908_v37, %v18255_v8  ;;  %7745 = vadd.xlane.f32.xlu1 %v7744_v2  ;;  %v7351_v56 = vsub.f32 %v18256_v7, %v7221_v53  ;;  %v7352_v14 = vsub.f32 %v18260_v5, %v7221_v53  ;;  %v7773_v63 = vpop.xlane.xlu2 %7772  ;;  %v18262_v53 = vld [vmem:[#allocation49_spill] sm:$0xff] }
 0xd0e   : > { %v7973_v38 = vmul.f32 %v12910_v41, %v18258_v49  ;;  %v7974_v50 = vmul.f32 %v12910_v41, %v18259_v44  ;;  %12913 = vrcp.f32 %v7773_v63  ;;  %v16875_v40 = vpop.f32.mrf.mxu2  ;;  %v16877_v2 = vpop.f32.mrf.mxu1  ;;  %v8036_v41 = vpack.c.bf16 %v7946_v24, %v7945_v19 }
 0xd0f   : > { %v7599_v51 = vmul.f32 1.442695, %v7351_v56  ;;  %v8049_v61 = vpack.c.bf16 %v7972_v25, %v7971_v22  ;;  %v7601_v10 = vmul.f32 1.442695, %v7352_v14  ;;  %18261 = vst [vmem:[#allocation72_spill] sm:$0xff] %v16877_v2  ;;  %v18263_v56 = vld [vmem:[#allocation51_spill] sm:$0xff]  ;;  %v16885_v24 = vpop.f32.mrf.mxu3 }
 0xd10   : > { %v8050_v37 = vpack.c.bf16 %v7974_v50, %v7973_v38  ;;  %v18264_v50 = vld [vmem:[#allocation85_spill] sm:$0xff]  ;;  %v8765_v13 = vunpack.c.l.b16 %v8036_v41  ;;  %18266 = vst [vmem:[#allocation104_spill] sm:$0xff] %v16885_v24 }
 0xd11   : > { %12915 = vpow2.f32 %v7599_v51  ;;  %v9033_v31 = vunpack.c.l.b16 %v8049_v61  ;;  %v9034_v8 = vunpack.c.h.b16 %v8049_v61  ;;  %v8655_v18 = vpop.f32.mrf.mxu0 }
 0xd12   : > { %12917 = vpow2.f32 %v7601_v10  ;;  %v9035_v7 = vunpack.c.l.b16 %v8050_v37  ;;  %v9036_v12 = vunpack.c.h.b16 %v8050_v37  ;;  %v12912_v49 = vpop.eup %12911  ;;  %v8766_v37 = vunpack.c.h.b16 %v8036_v41 }
 0xd13   : > { %v7943_v44 = vmul.f32 %v12912_v49, %v18262_v53  ;;  %v7944_v5 = vmul.f32 %v12912_v49, %v18263_v56  ;;  %v7224_v63 = vpop.xlane.xlu1 %7223  ;;  %v18268_v56 = vld [vmem:[#allocation55_spill] sm:$0xff] }
 0xd14   : > { %v9063_v22 = vpack.c.b16 %v9035_v7, %v9033_v31  ;;  %v7776_v25 = vpop.xlane.xlu0 %7775  ;;  %v12914_v14 = vpop.eup %12913  ;;  %v9064_v38 = vpack.c.b16 %v9036_v12, %v9034_v8  ;;  %v7353_v51 = vsub.f32 %v18264_v50, %v7224_v63  ;;  %v7354_v61 = vsub.f32 %v18265_v26, %v7224_v63  ;;  %v18267_v31 = vld [vmem:[#allocation66_spill] sm:$0xff]  ;;  %v18269_v12 = vld [vmem:[#allocation53_spill] sm:$0xff]  ;;  %v18270_v50 = vld [vmem:[#allocation35_spill] sm:$0xff] }
 0xd15   : > { %12919 = vrcp.f32 %v7776_v25  ;;  %v7173_v10 = vpop.xlane.xlu2 %7172  ;;  %v8035_v2 = vpack.c.bf16 %v7944_v5, %v7943_v44  ;;  %v7975_v25 = vmul.f32 %v12914_v14, %v18269_v12  ;;  %v7976_v26 = vmul.f32 %v12914_v14, %v18270_v50  ;;  %v18274_v50 = vld [vmem:[#allocation87_spill] sm:$0xff] }
 0xd16   : > { %v7603_v53 = vmul.f32 1.442695, %v7353_v51  ;;  %v7605_v49 = vmul.f32 1.442695, %v7354_v61  ;;  %v7319_v7 = vsub.f32 %v18267_v31, %v7173_v10  ;;  %v7320_v45 = vsub.f32 %v18268_v56, %v7173_v10 }
 0xd17   : > { %v16883_v19 = vpop.eup %12915  ;;  %9202 = vmatmul.bf16.gmra.mxu0 %v9063_v22  ;;  %v8704_v44 = vpop.f32.mrf.mxu2  ;;  %v8763_v41 = vunpack.c.l.b16 %v8035_v2  ;;  %v8764_v5 = vunpack.c.h.b16 %v8035_v2  ;;  %v18273_v22 = vld [vmem:[#allocation81_spill] sm:$0xff] }
 0xd18   : > { %v16889_v8 = vpop.eup %12917  ;;  %9251 = vmatmul.bf16.gmra.mxu2 %v9064_v38  ;;  %12921 = vpow2.f32 %v7603_v53  ;;  %v7535_v63 = vmul.f32 1.442695, %v7319_v7  ;;  %v7537_v24 = vmul.f32 1.442695, %v7320_v45  ;;  %v16893_v51 = vadd.f32 %v8704_v44, %v8655_v18  ;;  %v18275_v18 = vld [vmem:[#allocation68_spill] sm:$0xff] }
 0xd19   : > { %v8396_v61 = vpop.f32.mrf.mxu1  ;;  %12923 = vpow2.f32 %v7605_v49  ;;  %v16895_v31 = vpop.f32.mrf.mxu0  ;;  %v7795_v10 = vadd.f32 %v16889_v8, %v16883_v19  ;;  %v8791_v56 = vpack.c.b16 %v8765_v13, %v8763_v41  ;;  %v8792_v12 = vpack.c.b16 %v8766_v37, %v8764_v5  ;;  %v18276_v49 = vld [vmem:[#allocation89_spill] sm:$0xff] }
 0xd1a   : > { %18271 = vst [vmem:[#allocation108_spill] sm:$0xff] %v16893_v51  ;;  %12925 = vpow2.f32 %v7535_v63  ;;  %v8051_v44 = vpack.c.bf16 %v7976_v26, %v7975_v25 }
 0xd1b   : > { %18272 = vst [vmem:[#allocation99_spill] sm:$0xff] %v16895_v31  ;;  %v12920_v14 = vpop.eup %12919  ;;  %12927 = vpow2.f32 %v7537_v24  ;;  %7796 = vadd.xlane.f32.xlu2 %v7795_v10  ;;  %8933 = vmatmul.bf16.gmra.mxu1 %v8791_v56 }
 0xd1c   : > { %v7977_v38 = vmul.f32 %v12920_v14, %v18273_v22  ;;  %v7978_v2 = vmul.f32 %v12920_v14, %v18274_v50  ;;  %v7176_v45 = vpop.xlane.xlu0 %7175  ;;  %8982 = vmatmul.bf16.gmra.mxu3 %v8792_v12  ;;  %v9037_v50 = vunpack.c.l.b16 %v8051_v44 }
 0xd1d   : > { %v7321_v53 = vsub.f32 %v18275_v18, %v7176_v45  ;;  %v7322_v7 = vsub.f32 %v18276_v49, %v7176_v45 }
 0xd1e   : > { %v8052_v60 = vpack.c.bf16 %v7978_v2, %v7977_v38  ;;  %v16903_v51 = vpop.eup %12921  ;;  %v9038_v38 = vunpack.c.h.b16 %v8051_v44 }
 0xd1f   : > { %v7539_v13 = vmul.f32 1.442695, %v7321_v53  ;;  %v7541_v37 = vmul.f32 1.442695, %v7322_v7  ;;  %v8445_v41 = vpop.f32.mrf.mxu3  ;;  %v16905_v5 = vpop.eup %12923 }
 0xd20   : > { %v16907_v63 = vadd.f32 %v8445_v41, %v8396_v61  ;;  %v16909_v24 = vpop.f32.mrf.mxu2  ;;  %v9040_v10 = vunpack.c.h.b16 %v8052_v60  ;;  %v9039_v56 = vunpack.c.l.b16 %v8052_v60  ;;  %v16911_v12 = vpop.eup %12925  ;;  %v7798_v25 = vadd.f32 %v16905_v5, %v16903_v51 }
 0xd21   : > { %18278 = vst [vmem:[#allocation93_spill] sm:$0xff] %v16909_v24  ;;  %12929 = vpow2.f32 %v7539_v13  ;;  %v16913_v14 = vpop.f32.mrf.mxu1  ;;  %v16917_v26 = vpop.eup %12927 }
 0xd22   : > { %18277 = vst [vmem:[#allocation94_spill] sm:$0xff] %v16907_v63  ;;  %12931 = vpow2.f32 %v7541_v37  ;;  %v8660_v22 = vpop.f32.mrf.mxu0  ;;  %7799 = vadd.xlane.f32.xlu0 %v7798_v25  ;;  %v7747_v61 = vadd.f32 %v16917_v26, %v16911_v12  ;;  %v9066_v2 = vpack.c.b16 %v9040_v10, %v9038_v38  ;;  %v9065_v45 = vpack.c.b16 %v9039_v56, %v9037_v50  ;;  %v18283_v56 = vld [vmem:[#allocation42_spill] sm:$0xff]  ;;  %v18284_v38 = vld [vmem:[#allocation40_spill] sm:$0xff] }
 0xd23   : > { %18279 = vst [vmem:[#allocation106_spill] sm:$0xff] %v16913_v14 }
 0xd24   : > { %v7731_v60 = vpop.xlane.xlu0 %7730  ;;  %7748 = vadd.xlane.f32.xlu1 %v7747_v61 }
 0xd27   : > { %v16921_v18 = vpop.eup %12929  ;;  %v16923_v53 = vpop.f32.mrf.mxu3  ;;  %9207 = vmatmul.bf16.gmra.mxu0 %v9065_v45 }
 0xd28   : > { %18280 = vst [vmem:[#allocation105_spill] sm:$0xff] %v16923_v53  ;;  %v16925_v49 = vpop.eup %12931  ;;  %9256 = vmatmul.bf16.gmra.mxu2 %v9066_v2  ;;  %v8709_v7 = vpop.f32.mrf.mxu2 }
 0xd29   : > { %v16927_v13 = vadd.f32 %v8709_v7, %v8660_v22  ;;  %v7750_v44 = vadd.f32 %v16925_v49, %v16921_v18 }
 0xd2a   : > { %v8401_v37 = vpop.f32.mrf.mxu1  ;;  %v16931_v41 = vpop.f32.mrf.mxu0 }
 0xd2b   : > { %18281 = vst [vmem:[#allocation25_spill] sm:$0xff] %v16927_v13  ;;  %7751 = vadd.xlane.f32.xlu2 %v7750_v44 }
 0xd2c   : > { %18282 = vst [vmem:[#allocation22_spill] sm:$0xff] %v16931_v41  ;;  %v7230_v10 = vpop.xlane.xlu0 %7229 }
 0xd2d   : > { %v7357_v25 = vsub.f32 %v18283_v56, %v7230_v10  ;;  %v7358_v50 = vsub.f32 %v18284_v38, %v7230_v10 }
 0xd2f   : > { %v7611_v61 = vmul.f32 1.442695, %v7357_v25  ;;  %v7613_v63 = vmul.f32 1.442695, %v7358_v50 }
 0xd30   : > { %v8450_v53 = vpop.f32.mrf.mxu3  ;;  %v16935_v2 = vpop.f32.mrf.mxu2 }
 0xd31   : > { %18285 = vst [vmem:[#allocation34_spill] sm:$0xff] %v16935_v2  ;;  %12933 = vpow2.f32 %v7611_v61  ;;  %v16937_v22 = vadd.f32 %v8450_v53, %v8401_v37 }
 0xd32   : > { %12935 = vpow2.f32 %v7613_v63  ;;  %v16939_v45 = vpop.f32.mrf.mxu1  ;;  %v8665_v7 = vpop.f32.mrf.mxu0 }
 0xd33   : > { %18286 = vst [vmem:[#allocation57_spill] sm:$0xff] %v16937_v22  ;;  %12937 = vrcp.f32 %v7731_v60 }
 0xd34   : > { %18287 = vst [vmem:[#allocation101_spill] sm:$0xff] %v16939_v45 }
 0xd37   : > { %v16941_v14 = vpop.eup %12933 }
 0xd38   : > { %v16943_v44 = vpop.eup %12935  ;;  %v16945_v13 = vpop.f32.mrf.mxu3 }
 0xd39   : > { %18288 = vst [vmem:[#allocation100_spill] sm:$0xff] %v16945_v13  ;;  %v8714_v56 = vpop.f32.mrf.mxu2  ;;  %v7804_v25 = vadd.f32 %v16943_v44, %v16941_v14 }
 0xd3a   : > { %v16947_v10 = vadd.f32 %v8714_v56, %v8665_v7  ;;  %v16951_v38 = vpop.f32.mrf.mxu0  ;;  %v8406_v53 = vpop.f32.mrf.mxu1 }
 0xd3b   : > { %18290 = vst [vmem:[#allocation32_spill] sm:$0xff] %v16951_v38  ;;  %7805 = vadd.xlane.f32.xlu1 %v7804_v25 }
 0xd3c   : > { %18289 = vst [vmem:[#allocation98_spill] sm:$0xff] %v16947_v10  ;;  %v12938_v10 = vpop.eup %12937 }
 0xd40   : > { %v8455_v63 = vpop.f32.mrf.mxu3 }
 0xd41   : > { %v16953_v37 = vpop.f32.mrf.mxu2  ;;  %v16955_v50 = vadd.f32 %v8455_v63, %v8406_v53  ;;  %v18298_v63 = vld [vmem:[#allocation41_spill] sm:$0xff] }
 0xd42   : > { %18291 = vst [vmem:[#allocation88_spill] sm:$0xff] %v16953_v37  ;;  %v8670_v61 = vpop.f32.mrf.mxu0  ;;  %v16957_v22 = vpop.f32.mrf.mxu1  ;;  %v18297_v37 = vld [vmem:[#allocation39_spill] sm:$0xff] }
 0xd43   : > { %18292 = vst [vmem:[#allocation70_spill] sm:$0xff] %v16955_v50  ;;  %v7947_v53 = vmul.f32 %v12938_v10, %v18297_v37  ;;  %v7948_v50 = vmul.f32 %v12938_v10, %v18298_v63 }
 0xd44   : > { %18293 = vst [vmem:[#allocation102_spill] sm:$0xff] %v16957_v22 }
 0xd48   : > { %v16959_v13 = vpop.f32.mrf.mxu3 }
 0xd49   : > { %18294 = vst [vmem:[#allocation44_spill] sm:$0xff] %v16959_v13  ;;  %v8719_v7 = vpop.f32.mrf.mxu2 }
 0xd4a   : > { %v16961_v56 = vadd.f32 %v8719_v7, %v8670_v61  ;;  %v16963_v45 = vpop.f32.mrf.mxu0  ;;  %v8411_v2 = vpop.f32.mrf.mxu1  ;;  %v2505_v61 = vld [vmem:[%s17431_s12] sm:$0xff] }
 0xd4b   : > { %18296 = vst [vmem:[#allocation54_spill] sm:$0xff] %v16963_v45 }
 0xd4c   : > { %18295 = vst [vmem:[#allocation18_spill] sm:$0xff] %v16961_v56  ;;  %v16974_v56 = vpop.xlane.xlu0 %7784 }
 0xd4e   : > { %v7734_v38 = vpop.xlane.xlu1 %7733 }
 0xd4f   : > { %12939 = vrcp.f32 %v7734_v38  ;;  %v8037_v38 = vpack.c.bf16 %v7948_v50, %v7947_v53 }
 0xd50   : > { %v7782_v25 = vpop.xlane.xlu2 %7781  ;;  %v8460_v41 = vpop.f32.mrf.mxu3 }
 0xd51   : > { %12941 = vrcp.f32 %v7782_v25  ;;  %v16967_v22 = vadd.f32 %v8460_v41, %v8411_v2  ;;  %v16969_v60 = vpop.f32.mrf.mxu2  ;;  %v8768_v11 = vunpack.c.h.b16 %v8037_v38 }
 0xd52   : > { %18300 = vst [vmem:[#allocation26_spill] sm:$0xff] %v16969_v60  ;;  %v8675_v7 = vpop.f32.mrf.mxu0  ;;  %v8767_v60 = vunpack.c.l.b16 %v8037_v38 }
 0xd53   : > { %18299 = vst [vmem:[#allocation19_spill] sm:$0xff] %v16967_v22 }
 0xd54   : > { %6208 = vperm.xlu1 %11531, %v2505_v61   ;;  %v2508_v61 = vld [vmem:[%s17431_s12 + $0x18] sm:$0xff] }
 0xd55   : > { %v12940_v13 = vpop.eup %12939 }
 0xd56   : > { %v7949_v45 = vmul.f32 %v12940_v13, %v16754_v35  ;;  %v7950_v37 = vmul.f32 %v12940_v13, %v16756_v46  ;;  %v7779_v10 = vpop.xlane.xlu1 %7778 }
 0xd57   : > { %v12942_v25 = vpop.eup %12941  ;;  %12943 = vrcp.f32 %v7779_v10 }
 0xd58   : > { %v7227_v41 = vpop.xlane.xlu2 %7226  ;;  %v8038_v2 = vpack.c.bf16 %v7950_v37, %v7949_v45  ;;  %v7981_v50 = vmul.f32 %v12942_v25, %v16758_v27  ;;  %v7982_v35 = vmul.f32 %v12942_v25, %v16764_v52 }
 0xd59   : > { %v7355_v63 = vsub.f32 %v16683_v4, %v7227_v41  ;;  %v7356_v22 = vsub.f32 %v16685_v9, %v7227_v41  ;;  %v8724_v46 = vpop.f32.mrf.mxu2  ;;  %v7740_v41 = vpop.xlane.xlu0 %7739 }
 0xd5a   : > { %v8769_v13 = vunpack.c.l.b16 %v8038_v2  ;;  %v8770_v53 = vunpack.c.h.b16 %v8038_v2  ;;  %v16985_v45 = vadd.f32 %v8724_v46, %v8675_v7  ;;  %v16987_v31 = vpop.f32.mrf.mxu0  ;;  %v8054_v25 = vpack.c.bf16 %v7982_v35, %v7981_v50 }
 0xd5b   : > { %v7607_v10 = vmul.f32 1.442695, %v7355_v63  ;;  %v7609_v24 = vmul.f32 1.442695, %v7356_v22 }
 0xd5c   : > { %6223 = vperm.xlu1 %11531, %v2508_v61   ;;  %v8793_v4 = vpack.c.b16 %v8769_v13, %v8767_v60  ;;  %v8794_v9 = vpack.c.b16 %v8770_v53, %v8768_v11  ;;  %v9044_v35 = vunpack.c.h.b16 %v8054_v25  ;;  %v9043_v46 = vunpack.c.l.b16 %v8054_v25 }
 0xd5d   : > { %v12944_v37 = vpop.eup %12943  ;;  %12945 = vpow2.f32 %v7607_v10 }
 0xd5e   : > { %v7979_v38 = vmul.f32 %v12944_v37, %v16750_v32  ;;  %v7980_v27 = vmul.f32 %v12944_v37, %v16752_v34  ;;  %12947 = vpow2.f32 %v7609_v24  ;;  %8938 = vmatmul.bf16.gmra.mxu1 %v8793_v4  ;;  %8987 = vmatmul.bf16.gmra.mxu3 %v8794_v9  ;;  %v7179_v52 = vpop.xlane.xlu1 %7178  ;;  %v2511_v34 = vld [vmem:[%s17431_s12 + $0x30] sm:$0xff] }
 0xd5f   : > { %v7323_v22 = vsub.f32 %v16695_v55, %v7179_v52  ;;  %v7324_v7 = vsub.f32 %v16697_v17, %v7179_v52  ;;  %12949 = vrcp.f32 %v7740_v41 }
 0xd60   : > { %v7182_v11 = vpop.xlane.xlu2 %7181  ;;  %v8053_v60 = vpack.c.bf16 %v7980_v27, %v7979_v38 }
 0xd61   : > { %v7543_v2 = vmul.f32 1.442695, %v7323_v22  ;;  %v7545_v63 = vmul.f32 1.442695, %v7324_v7  ;;  %v7325_v61 = vsub.f32 %v16710_v57, %v7182_v11  ;;  %v7326_v32 = vsub.f32 %v16714_v0, %v7182_v11  ;;  %v16998_v24 = vpop.f32.mrf.mxu2 }
 0xd62   : > { %v9042_v50 = vunpack.c.h.b16 %v8053_v60  ;;  %v9041_v55 = vunpack.c.l.b16 %v8053_v60 }
 0xd63   : > { %v17000_v17 = vpop.eup %12945  ;;  %12951 = vpow2.f32 %v7543_v2  ;;  %v7547_v13 = vmul.f32 1.442695, %v7325_v61  ;;  %v7549_v53 = vmul.f32 1.442695, %v7326_v32 }
 0xd64   : > { %v17002_v10 = vpop.eup %12947  ;;  %12953 = vpow2.f32 %v7545_v63  ;;  %6238 = vperm.xlu1 %11531, %v2511_v34   ;;  %v9068_v57 = vpack.c.b16 %v9044_v35, %v9042_v50  ;;  %v9067_v0 = vpack.c.b16 %v9043_v46, %v9041_v55  ;;  %v8680_v37 = vpop.f32.mrf.mxu0 }
 0xd65   : > { %12955 = vpow2.f32 %v7547_v13  ;;  %v7801_v4 = vadd.f32 %v17002_v10, %v17000_v17  ;;  %v12950_v9 = vpop.eup %12949 }
 0xd66   : > { %12957 = vpow2.f32 %v7549_v53  ;;  %9261 = vmatmul.bf16.gmra.mxu2 %v9068_v57  ;;  %9212 = vmatmul.bf16.gmra.mxu0 %v9067_v0  ;;  %v7953_v11 = vmul.f32 %v12950_v9, %v16766_v58  ;;  %v7954_v60 = vmul.f32 %v12950_v9, %v16770_v42  ;;  %v18301_v42 = vld [vmem:[#allocation96_spill] sm:$0xff] }
 0xd67   : > { %7802 = vadd.xlane.f32.xlu0 %v7801_v4  ;;  %12959 = vrcp.f32 %v16974_v56 }
 0xd68   : > { %v7737_v41 = vpop.xlane.xlu2 %7736  ;;  %v8040_v35 = vpack.c.bf16 %v7954_v60, %v7953_v11 }
 0xd69   : > { %v17007_v38 = vpop.eup %12951  ;;  %12961 = vrcp.f32 %v7737_v41 }
 0xd6a   : > { %v17009_v27 = vpop.eup %12953  ;;  %v8773_v0 = vunpack.c.l.b16 %v8040_v35  ;;  %v8774_v9 = vunpack.c.h.b16 %v8040_v35 }
 0xd6b   : > { %v17011_v52 = vpop.eup %12955  ;;  %v8729_v25 = vpop.f32.mrf.mxu2  ;;  %v7753_v22 = vadd.f32 %v17009_v27, %v17007_v38 }
 0xd6c   : > { %v17015_v7 = vpop.eup %12957  ;;  %v17019_v2 = vadd.f32 %v8729_v25, %v8680_v37  ;;  %v17025_v55 = vpop.f32.mrf.mxu0 }
 0xd6d   : > { %7754 = vadd.xlane.f32.xlu2 %v7753_v22  ;;  %v7756_v56 = vadd.f32 %v17015_v7, %v17011_v52  ;;  %v12960_v63 = vpop.eup %12959 }
 0xd6e   : > { %v7788_v32 = vpop.xlane.xlu1 %7787  ;;  %v7983_v58 = vmul.f32 %v12960_v63, %v16716_v28  ;;  %v7984_v46 = vmul.f32 %v12960_v63, %v18301_v42 }
 0xd6f   : > { %v12962_v61 = vpop.eup %12961  ;;  %7757 = vadd.xlane.f32.xlu0 %v7756_v56  ;;  %12963 = vrcp.f32 %v7788_v32 }
 0xd70   : > { %v7951_v34 = vmul.f32 %v12962_v61, %v16803_v54  ;;  %v7952_v50 = vmul.f32 %v12962_v61, %v16805_v30  ;;  %v8055_v25 = vpack.c.bf16 %v7984_v46, %v7983_v58 }
 0xd72   : > { %v8039_v13 = vpack.c.bf16 %v7952_v50, %v7951_v34  ;;  %v9045_v56 = vunpack.c.l.b16 %v8055_v25  ;;  %v9046_v34 = vunpack.c.h.b16 %v8055_v25 }
 0xd73   : > { %v17029_v53 = vpop.f32.mrf.mxu2 }
 0xd74   : > { %v8771_v57 = vunpack.c.l.b16 %v8039_v13  ;;  %v8772_v4 = vunpack.c.h.b16 %v8039_v13  ;;  %v8685_v63 = vpop.f32.mrf.mxu0  ;;  %v2507_v13 = vld [vmem:[%s17431_s12 + $0x10] sm:$0xff] }
 0xd75   : > { %v12964_v37 = vpop.eup %12963 }
 0xd76   : > { %v8795_v41 = vpack.c.b16 %v8773_v0, %v8771_v57  ;;  %v8796_v54 = vpack.c.b16 %v8774_v9, %v8772_v4  ;;  %v7985_v30 = vmul.f32 %v12964_v37, %v16813_v16  ;;  %v7986_v22 = vmul.f32 %v12964_v37, %v16817_v47  ;;  %v7791_v11 = vpop.xlane.xlu1 %7790 }
 0xd77   : > { %12965 = vrcp.f32 %v7791_v11 }
 0xd78   : > { %8943 = vmatmul.bf16.gmra.mxu1 %v8795_v41  ;;  %8992 = vmatmul.bf16.gmra.mxu3 %v8796_v54  ;;  %v8056_v28 = vpack.c.bf16 %v7986_v22, %v7985_v30  ;;  %v7794_v60 = vpop.xlane.xlu2 %7793  ;;  %v2506_v41 = vld [vmem:[%s17431_s12 + $0x8] sm:$0xff] }
 0xd79   : > { %12967 = vrcp.f32 %v7794_v60 }
 0xd7a   : > { %v9047_v32 = vunpack.c.l.b16 %v8056_v28  ;;  %v9048_v50 = vunpack.c.h.b16 %v8056_v28 }
 0xd7b   : > { %v8734_v61 = vpop.f32.mrf.mxu2 }
 0xd7c   : > { %v17033_v35 = vadd.f32 %v8734_v61, %v8685_v63  ;;  %v9069_v58 = vpack.c.b16 %v9047_v32, %v9045_v56  ;;  %v9070_v42 = vpack.c.b16 %v9048_v50, %v9046_v34 }
 0xd7d   : > { %v12966_v16 = vpop.eup %12965 }
 0xd7e   : > { %v7743_v46 = vpop.xlane.xlu0 %7742  ;;  %9217 = vmatmul.bf16.gmra.mxu0 %v9069_v58  ;;  %9266 = vmatmul.bf16.gmra.mxu2 %v9070_v42  ;;  %v7987_v0 = vmul.f32 %v12966_v16, %v16833_v33  ;;  %v7988_v4 = vmul.f32 %v12966_v16, %v16839_v1 }
 0xd7f   : > { %12969 = vrcp.f32 %v7743_v46  ;;  %v12968_v57 = vpop.eup %12967 }
 0xd80   : > { %v7746_v47 = vpop.xlane.xlu1 %7745  ;;  %v7989_v9 = vmul.f32 %v12968_v57, %v16845_v3  ;;  %v7990_v37 = vmul.f32 %v12968_v57, %v16847_v43  ;;  %v8057_v25 = vpack.c.bf16 %v7988_v4, %v7987_v0  ;;  %v2509_v43 = vld [vmem:[%s17431_s12 + $0x20] sm:$0xff] }
 0xd81   : > { %12971 = vrcp.f32 %v7746_v47  ;;  %v2512_v47 = vld [vmem:[%s17431_s12 + $0x38] sm:$0xff] }
 0xd82   : > { %v8058_v30 = vpack.c.bf16 %v7990_v37, %v7989_v9  ;;  %v9049_v60 = vunpack.c.l.b16 %v8057_v25  ;;  %v9050_v63 = vunpack.c.h.b16 %v8057_v25 }
 0xd83   : > { %6218 = vperm.xlu0 %11530, %v2507_v13  }
 0xd84   : > { %v9051_v56 = vunpack.c.l.b16 %v8058_v30  ;;  %v9052_v61 = vunpack.c.h.b16 %v8058_v30 }
 0xd85   : > { %v12970_v54 = vpop.eup %12969  ;;  %6213 = vperm.xlu2 %11532, %v2506_v41  }
 0xd86   : > { %v7955_v22 = vmul.f32 %v12970_v54, %v16851_v62  ;;  %v7956_v33 = vmul.f32 %v12970_v54, %v16853_v20  ;;  %v2510_v62 = vld [vmem:[%s17431_s12 + $0x28] sm:$0xff]  ;;  %v9072_v58 = vpack.c.b16 %v9052_v61, %v9050_v63 }
 0xd87   : > { %v12972_v11 = vpop.eup %12971 }
 0xd88   : > { %v7957_v1 = vmul.f32 %v12972_v11, %v16857_v15  ;;  %v7958_v3 = vmul.f32 %v12972_v11, %v16861_v23  ;;  %v8041_v28 = vpack.c.bf16 %v7956_v33, %v7955_v22  ;;  %v9071_v23 = vpack.c.b16 %v9051_v56, %v9049_v60 }
 0xd8a   : > { %v8042_v32 = vpack.c.bf16 %v7958_v3, %v7957_v1  ;;  %v8775_v20 = vunpack.c.l.b16 %v8041_v28  ;;  %v8776_v34 = vunpack.c.h.b16 %v8041_v28 }
 0xd8b   : > { %6228 = vperm.xlu0 %11530, %v2509_v43  }
 0xd8c   : > { %v8777_v15 = vunpack.c.l.b16 %v8042_v32  ;;  %v8778_v50 = vunpack.c.h.b16 %v8042_v32 }
 0xd8d   : > { %6233 = vperm.xlu2 %11532, %v2510_v62  }
 0xd8e   : > { %v8797_v42 = vpack.c.b16 %v8777_v15, %v8775_v20  ;;  %v8798_v16 = vpack.c.b16 %v8778_v50, %v8776_v34  ;;  %v7797_v46 = vpop.xlane.xlu2 %7796  ;;  %9222 = vmatmul.bf16.gmra.mxu0 %v9071_v23  ;;  %9271 = vmatmul.bf16.gmra.mxu2 %v9072_v58  ;;  %v18303_v50 = vld [vmem:[#allocation23_spill] sm:$0xff] }
 0xd8f   : > { %12973 = vrcp.f32 %v7797_v46  ;;  %v6072_v23 = vsel %vm514_vm0, %v18303_v50, 0.0  ;;  %v17072_v46 = vpop.f32.mrf.mxu2 }
 0xd90   : > { %8948 = vmatmul.bf16.gmra.mxu1 %v8797_v42  ;;  %8997 = vmatmul.bf16.gmra.mxu3 %v8798_v16 }
 0xd93   : > { %6243 = vperm.xlu0 %11530, %v2512_v47   ;;  %v18306_v47 = vld [vmem:[#allocation71_spill] sm:$0xff] }
 0xd95   : > { %v12974_v13 = vpop.eup %12973  ;;  %v7800_v57 = vpop.xlane.xlu0 %7799 }
 0xd96   : > { %12975 = vrcp.f32 %v7800_v57  ;;  %v7991_v4 = vmul.f32 %v12974_v13, %v16883_v19  ;;  %v7992_v9 = vmul.f32 %v12974_v13, %v16889_v8  ;;  %v18307_v13 = vld [vmem:[#allocation28_spill] sm:$0xff] }
 0xd97   : > { %v7749_v0 = vpop.xlane.xlu1 %7748  ;;  %v6086_v57 = vsel %vm514_vm0, %v18307_v13, 0.0 }
 0xd98   : > { %12977 = vrcp.f32 %v7749_v0  ;;  %v8059_v41 = vpack.c.bf16 %v7992_v9, %v7991_v4  ;;  %v18308_v0 = vld [vmem:[#allocation36_spill] sm:$0xff]  ;;  %v17078_v9 = vpop.f32.mrf.mxu0 }
 0xd99   : > { %v6087_v4 = vadd.f32 %v6086_v57, %v18308_v0  ;;  %v18316_v57 = vld [vmem:[#allocation74_spill] sm:$0xff] }
 0xd9a   : > { %v9053_v11 = vunpack.c.l.b16 %v8059_v41  ;;  %v9054_v1 = vunpack.c.h.b16 %v8059_v41 }
 0xd9c   : > { %v12976_v37 = vpop.eup %12975 }
 0xd9d   : > { %v7993_v54 = vmul.f32 %v12976_v37, %v16903_v51  ;;  %v7994_v25 = vmul.f32 %v12976_v37, %v16905_v5  ;;  %v18309_v37 = vld [vmem:[#allocation30_spill] sm:$0xff] }
 0xd9e   : > { %v7752_v30 = vpop.xlane.xlu2 %7751  ;;  %v12978_v22 = vpop.eup %12977  ;;  %v6088_v41 = vsel %vm514_vm0, %v18309_v37, 0.0 }
 0xd9f   : > { %12979 = vrcp.f32 %v7752_v30  ;;  %v8060_v33 = vpack.c.bf16 %v7994_v25, %v7993_v54  ;;  %v7959_v3 = vmul.f32 %v12978_v22, %v16911_v12  ;;  %v7960_v43 = vmul.f32 %v12978_v22, %v16917_v26  ;;  %v18302_v26 = vld [vmem:[#allocation63_spill] sm:$0xff]  ;;  %v17082_v25 = vpop.f32.mrf.mxu3  ;;  %v17084_v30 = vpop.f32.mrf.mxu1 }
 0xda0   : > { %v6089_v54 = vadd.f32 %v6088_v41, %v6087_v4  ;;  %v17086_v22 = vpop.f32.mrf.mxu2 }
 0xda1   : > { %v9055_v19 = vunpack.c.l.b16 %v8060_v33  ;;  %v9056_v28 = vunpack.c.h.b16 %v8060_v33  ;;  %v8043_v5 = vpack.c.bf16 %v7960_v43, %v7959_v3  ;;  %v9198_v33 = vpop.f32.mrf.mxu0  ;;  %v18310_v3 = vld [vmem:[#allocation33_spill] sm:$0xff]  ;;  %v18311_v43 = vld [vmem:[#allocation31_spill] sm:$0xff] }
 0xda3   : > { %v9073_v8 = vpack.c.b16 %v9055_v19, %v9053_v11  ;;  %v9074_v60 = vpack.c.b16 %v9056_v28, %v9054_v1  ;;  %v8779_v62 = vunpack.c.l.b16 %v8043_v5  ;;  %v8780_v20 = vunpack.c.h.b16 %v8043_v5  ;;  %v18312_v28 = vld [vmem:[#allocation45_spill] sm:$0xff] }
 0xda4   : > { %v6100_v19 = vsel %vm514_vm0, %v18311_v43, 0.0 }
 0xda5   : > { %v12980_v56 = vpop.eup %12979  ;;  %9227 = vmatmul.bf16.gmra.mxu0 %v9073_v8  ;;  %9276 = vmatmul.bf16.gmra.mxu2 %v9074_v60  ;;  %v6101_v8 = vadd.f32 %v6100_v19, %v18312_v28 }
 0xda6   : > { %v7961_v63 = vmul.f32 %v12980_v56, %v16921_v18  ;;  %v7962_v51 = vmul.f32 %v12980_v56, %v16925_v49  ;;  %v18304_v18 = vld [vmem:[#allocation65_spill] sm:$0xff] }
 0xda7   : > { %v6073_v58 = vadd.f32 %v6072_v23, %v18304_v18  ;;  %v18305_v49 = vld [vmem:[#allocation29_spill] sm:$0xff]  ;;  %v8973_v1 = vpop.f32.mrf.mxu3  ;;  %v8924_v60 = vpop.f32.mrf.mxu1 }
 0xda8   : > { %v8044_v61 = vpack.c.bf16 %v7962_v51, %v7961_v63  ;;  %v6074_v42 = vsel %vm514_vm0, %v18305_v49, 0.0  ;;  %v9249_v56 = vpop.f32.mrf.mxu2  ;;  %v18313_v63 = vld [vmem:[#allocation61_spill] sm:$0xff] }
 0xda9   : > { %v6075_v16 = vadd.f32 %v6074_v42, %v6073_v58  ;;  %v6102_v51 = vsel %vm514_vm0, %v18313_v63, 0.0 }
 0xdaa   : > { %v8781_v32 = vunpack.c.l.b16 %v8044_v61  ;;  %v8782_v34 = vunpack.c.h.b16 %v8044_v61  ;;  %v6103_v5 = vadd.f32 %v6102_v51, %v6101_v8  ;;  %v9200_v61 = vpop.f32.mrf.mxu0 }
 0xdac   : > { %v8799_v12 = vpack.c.b16 %v8781_v32, %v8779_v62  ;;  %v8800_v15 = vpack.c.b16 %v8782_v34, %v8780_v20 }
 0xdae   : > { %8953 = vmatmul.bf16.gmra.mxu1 %v8799_v12  ;;  %9002 = vmatmul.bf16.gmra.mxu3 %v8800_v15  ;;  %v7806_v11 = vpop.xlane.xlu1 %7805 }
 0xdaf   : > { %12981 = vrcp.f32 %v7806_v11  ;;  %v8975_v20 = vpop.f32.mrf.mxu3  ;;  %v8926_v15 = vpop.f32.mrf.mxu1  ;;  %v18317_v11 = vld [vmem:[#allocation62_spill] sm:$0xff] }
 0xdb0   : > { %v17096_v23 = vpop.f32.mrf.mxu2 }
 0xdb3   : > { %6174 = vxpose.xlu2.b32.start [1/16] (narrow) %v18302_v26, 64 }
 0xdb5   : > { %v12982_v32 = vpop.eup %12981 }
 0xdb6   : > { %v7997_v34 = vmul.f32 %v12982_v32, %v16941_v14  ;;  %v7998_v12 = vmul.f32 %v12982_v32, %v16943_v44  ;;  %v18315_v14 = vld [vmem:[#allocation46_spill] sm:$0xff] }
 0xdb7   : > { %v6114_v44 = vsel %vm514_vm0, %v18315_v14, 0.0  ;;  %v17106_v4 = vpop.f32.mrf.mxu3  ;;  %v17110_v43 = vpop.f32.mrf.mxu1 }
 0xdb8   : > { %v8062_v42 = vpack.c.bf16 %v7998_v12, %v7997_v34  ;;  %v6115_v0 = vadd.f32 %v6114_v44, %v18316_v57  ;;  %v9254_v34 = vpop.f32.mrf.mxu2 }
 0xdba   : > { %v9059_v41 = vunpack.c.l.b16 %v8062_v42 }
 0xdbb   : > { %6175 = vxpose.xlu2.b32.cont [2/16] (narrow) %v6075_v16, 64  ;;  %v17100_v16 = vpop.f32.mrf.mxu0 }
 0xdbf   : > { %v8980_v44 = vpop.f32.mrf.mxu3 }
 0xdc3   : > { %6176 = vxpose.xlu2.b32.cont [3/16] (narrow) %v18306_v47, 64  ;;  %v18314_v47 = vld [vmem:[#allocation43_spill] sm:$0xff] }
 0xdcb   : > { %6177 = vxpose.xlu2.b32.cont [4/16] (narrow) %v6089_v54, 64  ;;  %v9060_v54 = vunpack.c.h.b16 %v8062_v42  ;;  %v9248_v42 = vadd.f32 %v17086_v22, %v9198_v33  ;;  %v8428_v22 = vadd.f32 %v16747_v39, %v16745_v36  ;;  %v8702_v33 = vadd.f32 %v16875_v40, %v16863_v21 }
 0xdcd   : > { %v9304_v36 = vpack.c.bf16 %v8702_v33, %v8702_v33  ;;  %v18327_v33 = vld [vmem:[#allocation73_spill] sm:$0xff] }
 0xdd3   : > { %6178 = vxpose.xlu2.b32.cont [5/16] (narrow) %v18310_v3, 64  ;;  %v6116_v3 = vsel %vm514_vm0, %v18317_v11, 0.0 }
 0xdda   : > { %v7803_v62 = vpop.xlane.xlu0 %7802 }
 0xddb   : > { %12983 = vrcp.f32 %v7803_v62  ;;  %6179 = vxpose.xlu2.b32.cont [6/16] (narrow) %v6103_v5, 64  ;;  %v6117_v5 = vadd.f32 %v6116_v3, %v6115_v0  ;;  %v8931_v0 = vpop.f32.mrf.mxu1  ;;  %v18321_v3 = vld [vmem:[#allocation48_spill] sm:$0xff] }
 0xde0   : > { %v7755_v26 = vpop.xlane.xlu2 %7754 }
 0xde1   : > { %v12984_v50 = vpop.eup %12983  ;;  %12985 = vrcp.f32 %v7755_v26  ;;  %v8976_v26 = vadd.f32 %v8975_v20, %v8926_v15  ;;  %v18319_v20 = vld [vmem:[#allocation75_spill] sm:$0xff]  ;;  %v18320_v15 = vld [vmem:[#allocation38_spill] sm:$0xff] }
 0xde2   : > { %v7995_v18 = vmul.f32 %v12984_v50, %v17000_v17  ;;  %v7996_v58 = vmul.f32 %v12984_v50, %v17002_v10  ;;  %v7758_v49 = vpop.xlane.xlu0 %7757  ;;  %v9250_v50 = vadd.f32 %v9249_v56, %v9200_v61  ;;  %v18318_v56 = vld [vmem:[#allocation37_spill] sm:$0xff] }
 0xde3   : > { %12987 = vrcp.f32 %v7758_v49  ;;  %6180 = vxpose.xlu2.b32.cont [7/16] (narrow) %v18314_v47, 64  ;;  %v6128_v61 = vsel %vm514_vm0, %v18318_v56, 0.0  ;;  %v8934_v40 = vpop.f32.mrf.mxu1  ;;  %v18326_v56 = vld [vmem:[#allocation50_spill] sm:$0xff] }
 0xde4   : > { %v8061_v13 = vpack.c.bf16 %v7996_v58, %v7995_v18  ;;  %v9205_v58 = vpop.f32.mrf.mxu0 }
 0xde6   : > { %v9057_v37 = vunpack.c.l.b16 %v8061_v13  ;;  %v9058_v17 = vunpack.c.h.b16 %v8061_v13  ;;  %v9336_v13 = vpack.c.bf16 %v9250_v50, %v9250_v50  ;;  %v9255_v50 = vadd.f32 %v9254_v34, %v9205_v58  ;;  %v18322_v34 = vld [vmem:[#allocation84_spill] sm:$0xff] }
 0xde7   : > { %v12986_v10 = vpop.eup %12985  ;;  %v6142_v58 = vsel %vm514_vm0, %v18322_v34, 0.0  ;;  %v18335_v34 = vld [vmem:[#allocation34_spill] sm:$0xff] }
 0xde8   : > { %v7963_v19 = vmul.f32 %v12986_v10, %v17007_v38  ;;  %v7964_v28 = vmul.f32 %v12986_v10, %v17009_v27  ;;  %v9075_v8 = vpack.c.b16 %v9059_v41, %v9057_v37  ;;  %v9076_v63 = vpack.c.b16 %v9060_v54, %v9058_v17  ;;  %v17125_v54 = vpop.f32.mrf.mxu2 }
 0xde9   : > { %v12988_v51 = vpop.eup %12987  ;;  %v8974_v27 = vadd.f32 %v8973_v1, %v8924_v60  ;;  %v9335_v41 = vpack.c.bf16 %v9248_v42, %v9248_v42  ;;  %v9707_v60 = vunpack.c.l.b16 %v9336_v13  ;;  %v6129_v17 = vadd.f32 %v6128_v61, %v18320_v15 }
 0xdea   : > { %v7965_v62 = vmul.f32 %v12988_v51, %v17011_v52  ;;  %v7966_v32 = vmul.f32 %v12988_v51, %v17015_v7  ;;  %9232 = vmatmul.bf16.gmra.mxu0 %v9075_v8  ;;  %9281 = vmatmul.bf16.gmra.mxu2 %v9076_v63  ;;  %v8045_v12 = vpack.c.bf16 %v7964_v28, %v7963_v19  ;;  %v6130_v19 = vsel %vm514_vm0, %v18321_v3, 0.0  ;;  %v17129_v28 = vpop.f32.mrf.mxu3 }
 0xdeb   : > { %6181 = vxpose.xlu2.b32.cont [8/16] (narrow) %v6117_v5, 64  ;;  %v9320_v52 = vpack.c.bf16 %v8976_v26, %v8976_v26  ;;  %v9319_v37 = vpack.c.bf16 %v8974_v27, %v8974_v27  ;;  %v9706_v11 = vunpack.c.l.b16 %v9335_v41  ;;  %v9288_v63 = vpack.c.bf16 %v8428_v22, %v8428_v22 }
 0xdec   : > { %v8046_v18 = vpack.c.bf16 %v7966_v32, %v7965_v62  ;;  %v8783_v38 = vunpack.c.l.b16 %v8045_v12  ;;  %v8784_v49 = vunpack.c.h.b16 %v8045_v12  ;;  %v17131_v8 = vpop.f32.mrf.mxu0  ;;  %v6131_v21 = vadd.f32 %v6130_v19, %v6129_v17  ;;  %v18328_v19 = vld [vmem:[#allocation97_spill] sm:$0xff] }
 0xded   : > { %v9594_v1 = vunpack.c.l.b16 %v9320_v52  ;;  %v9593_v10 = vunpack.c.l.b16 %v9319_v37  ;;  %v9722_v51 = vpack.c.b16 %v9707_v60, %v9706_v11  ;;  %v9287_v5 = vpack.c.bf16 %v16728_v48, %v16728_v48 }
 0xdee   : > { %v8785_v47 = vunpack.c.l.b16 %v8046_v18  ;;  %v8786_v14 = vunpack.c.h.b16 %v8046_v18  ;;  %v9303_v62 = vpack.c.bf16 %v16843_v6, %v16843_v6  ;;  %v9368_v32 = vunpack.c.l.b16 %v9288_v63 }
 0xdef   : > { %v9609_v39 = vpack.c.b16 %v9594_v1, %v9593_v10  ;;  %v9481_v12 = vunpack.c.l.b16 %v9304_v36  ;;  %v8981_v26 = vadd.f32 %v8980_v44, %v8931_v0  ;;  %v9367_v18 = vunpack.c.l.b16 %v9287_v5  ;;  %v18325_v44 = vld [vmem:[#allocation93_spill] sm:$0xff]  ;;  %v18329_v36 = vld [vmem:[#allocation108_spill] sm:$0xff] }
 0xdf0   : > { %v8801_v7 = vpack.c.b16 %v8785_v47, %v8783_v38  ;;  %v8802_v57 = vpack.c.b16 %v8786_v14, %v8784_v49  ;;  %v9480_v38 = vunpack.c.l.b16 %v9303_v62  ;;  %v8979_v49 = vadd.f32 %v17106_v4, %v17110_v43  ;;  %v9259_v27 = vpop.f32.mrf.mxu2  ;;  %v8936_v4 = vpop.f32.mrf.mxu1  ;;  %v18323_v43 = vld [vmem:[#allocation76_spill] sm:$0xff] }
 0xdf1   : > { %v9253_v48 = vadd.f32 %v17096_v23, %v17100_v16  ;;  %v9383_v42 = vpack.c.b16 %v9368_v32, %v9367_v18  ;;  %v9322_v47 = vpack.c.bf16 %v8981_v26, %v8981_v26  ;;  %v9338_v14 = vpack.c.bf16 %v9255_v50, %v9255_v50  ;;  %v18324_v16 = vld [vmem:[#allocation99_spill] sm:$0xff] }
 0xdf2   : > { %8958 = vmatmul.bf16.gmra.mxu1 %v8801_v7  ;;  %9007 = vmatmul.bf16.gmra.mxu3 %v8802_v57  ;;  %v9496_v6 = vpack.c.b16 %v9481_v12, %v9480_v38  ;;  %v8985_v52 = vpop.f32.mrf.mxu3  ;;  %v9321_v7 = vpack.c.bf16 %v8979_v49, %v8979_v49  ;;  %v8433_v23 = vadd.f32 %v16791_v29, %v16788_v59  ;;  %v6144_v1 = vsel %vm514_vm0, %v18327_v33, 0.0 }
 0xdf3   : > { %6182 = vxpose.xlu2.b32.cont [9/16] (narrow) %v18319_v20, 64  ;;  %v9337_v57 = vpack.c.bf16 %v9253_v48, %v9253_v48  ;;  %v8707_v0 = vadd.f32 %v18325_v44, %v18324_v16  ;;  %v9596_v37 = vunpack.c.l.b16 %v9322_v47  ;;  %v9709_v41 = vunpack.c.l.b16 %v9338_v14  ;;  %v18330_v47 = vld [vmem:[#allocation67_spill] sm:$0xff] }
 0xdf4   : > { %v9210_v13 = vpop.f32.mrf.mxu0  ;;  %v6143_v61 = vadd.f32 %v6142_v58, %v18326_v56  ;;  %v9595_v20 = vunpack.c.l.b16 %v9321_v7  ;;  %v9290_v15 = vpack.c.bf16 %v8433_v23, %v8433_v23  ;;  %v9289_v63 = vpack.c.bf16 %v18328_v19, %v18328_v19  ;;  %v18336_v23 = vld [vmem:[#allocation78_spill] sm:$0xff] }
 0xdf5   : > { %v9708_v22 = vunpack.c.l.b16 %v9337_v57  ;;  %v9306_v17 = vpack.c.bf16 %v8707_v0, %v8707_v0  ;;  %v8986_v62 = vadd.f32 %v8985_v52, %v8936_v4  ;;  %v9260_v32 = vadd.f32 %v9259_v27, %v9210_v13  ;;  %v18334_v13 = vld [vmem:[#allocation22_spill] sm:$0xff] }
 0xdf6   : > { %v9610_v10 = vpack.c.b16 %v9596_v37, %v9595_v20  ;;  %v6145_v3 = vadd.f32 %v6144_v1, %v6143_v61  ;;  %v9369_v12 = vunpack.c.l.b16 %v9289_v63  ;;  %v8984_v50 = vadd.f32 %v17129_v28, %v8934_v40  ;;  %v18331_v28 = vld [vmem:[#allocation86_spill] sm:$0xff]  ;;  %v18332_v40 = vld [vmem:[#allocation107_spill] sm:$0xff] }
 0xdf7   : > { %v9723_v11 = vpack.c.b16 %v9709_v41, %v9708_v22  ;;  %v9483_v5 = vunpack.c.l.b16 %v9306_v17  ;;  %v9258_v18 = vadd.f32 %v17125_v54, %v17131_v8  ;;  %v9324_v48 = vpack.c.bf16 %v8986_v62, %v8986_v62  ;;  %v18333_v54 = vld [vmem:[#allocation95_spill] sm:$0xff]  ;;  %v18337_v41 = vld [vmem:[#allocation80_spill] sm:$0xff] }
 0xdf8   : > { %v17155_v60 = vpop.f32.mrf.mxu2  ;;  %v6156_v14 = vsel %vm514_vm0, %v18330_v47, 0.0  ;;  %v9323_v7 = vpack.c.bf16 %v8984_v50, %v8984_v50  ;;  %v8438_v8 = vadd.f32 %v18333_v54, %v18332_v40  ;;  %v8712_v58 = vadd.f32 %v18335_v34, %v18334_v13  ;;  %v18338_v17 = vld [vmem:[#allocation91_spill] sm:$0xff]  ;;  %v18346_v54 = vld [vmem:[#allocation90_spill] sm:$0xff] }
 0xdf9   : > { %v9339_v57 = vpack.c.bf16 %v9258_v18, %v9258_v18  ;;  %v9598_v4 = vunpack.c.l.b16 %v9324_v48  ;;  %v6157_v16 = vadd.f32 %v6156_v14, %v18336_v23  ;;  %v6158_v56 = vsel %vm514_vm0, %v18337_v41, 0.0 }
 0xdfa   : > { %11199 = vmatmul.msk.bf16.vlgmr.msra.gmra.mxu0 %vm2635_vm12, %v9609_v39  ;;  %11207 = vmatmul.msk.bf16.vlgmr.msra.gmra.mxu2 %vm2635_vm12, %v9722_v51  ;;  %v8988_v59 = vpop.f32.mrf.mxu3  ;;  %v9305_v39 = vpack.c.bf16 %v18329_v36, %v18329_v36  ;;  %v8939_v51 = vpop.f32.mrf.mxu1  ;;  %v9597_v0 = vunpack.c.l.b16 %v9323_v7  ;;  %v9292_v61 = vpack.c.bf16 %v8438_v8, %v8438_v8  ;;  %v9308_v20 = vpack.c.bf16 %v8712_v58, %v8712_v58 }
 0xdfb   : > { %6183 = vxpose.xlu2.b32.cont [10/16] (narrow) %v6131_v21, 64  ;;  %v9370_v21 = vunpack.c.l.b16 %v9290_v15  ;;  %v9710_v37 = vunpack.c.l.b16 %v9339_v57  ;;  %v6159_v1 = vadd.f32 %v6158_v56, %v6157_v16  ;;  %v18341_v57 = vld [vmem:[#allocation56_spill] sm:$0xff] }
 0xdfc   : > { %v9213_v29 = vpop.f32.mrf.mxu0  ;;  %v9482_v26 = vunpack.c.l.b16 %v9305_v39  ;;  %v9611_v22 = vpack.c.b16 %v9598_v4, %v9597_v0  ;;  %v9372_v36 = vunpack.c.l.b16 %v9292_v61  ;;  %v9485_v39 = vunpack.c.l.b16 %v9308_v20  ;;  %v18348_v61 = vld [vmem:[#allocation103_spill] sm:$0xff] }
 0xdfd   : > { %v9384_v38 = vpack.c.b16 %v9370_v21, %v9369_v12  ;;  %v9263_v50 = vadd.f32 %v17155_v60, %v9213_v29  ;;  %v18344_v60 = vld [vmem:[#allocation32_spill] sm:$0xff]  ;;  %v9293_v20 = vpack.c.bf16 %v18348_v61, %v18348_v61 }
 0xdfe   : > { %v9497_v49 = vpack.c.b16 %v9483_v5, %v9482_v26  ;;  %v8989_v26 = vadd.f32 %v8988_v59, %v8939_v51  ;;  %v18343_v59 = vld [vmem:[#allocation104_spill] sm:$0xff] }
 0xdff   : > { %v9341_v7 = vpack.c.bf16 %v9263_v50, %v9263_v50  ;;  %v18345_v29 = vld [vmem:[#allocation88_spill] sm:$0xff] }
 0xe00   : > { %v9325_v14 = vpack.c.bf16 %v8989_v26, %v8989_v26 }
 0xe01   : > { %v9712_v4 = vunpack.c.l.b16 %v9341_v7 }
 0xe02   : > { %11183 = vmatmul.msk.bf16.vlgmr.msra.gmra.mxu1 %vm2635_vm12, %v9383_v42  ;;  %11191 = vmatmul.msk.bf16.vlgmr.msra.gmra.mxu3 %vm2635_vm12, %v9496_v6  ;;  %v9340_v42 = vpack.c.bf16 %v9260_v32, %v9260_v32  ;;  %v9264_v6 = vpop.f32.mrf.mxu2  ;;  %v8990_v27 = vpop.f32.mrf.mxu3  ;;  %v9599_v58 = vunpack.c.l.b16 %v9325_v14  ;;  %v18351_v14 = vld [vmem:[#allocation105_spill] sm:$0xff] }
 0xe03   : > { %6184 = vxpose.xlu2.b32.cont [11/16] (narrow) %v18323_v43, 64  ;;  %v8941_v44 = vpop.f32.mrf.mxu1 }
 0xe04   : > { %v9215_v52 = vpop.f32.mrf.mxu0  ;;  %v9711_v43 = vunpack.c.l.b16 %v9340_v42  ;;  %v8991_v21 = vadd.f32 %v8990_v27, %v8941_v44  ;;  %v18340_v42 = vld [vmem:[#allocation92_spill] sm:$0xff] }
 0xe05   : > { %v9265_v5 = vadd.f32 %v9264_v6, %v9215_v52  ;;  %v6170_v47 = vsel %vm514_vm0, %v18340_v42, 0.0  ;;  %v18342_v27 = vld [vmem:[#allocation72_spill] sm:$0xff]  ;;  %v8717_v52 = vadd.f32 %v18345_v29, %v18344_v60 }
 0xe06   : > { %v9724_v33 = vpack.c.b16 %v9711_v43, %v9710_v37  ;;  %v8443_v51 = vadd.f32 %v18343_v59, %v18342_v27  ;;  %v6171_v8 = vadd.f32 %v6170_v47, %v18346_v54  ;;  %v18347_v43 = vld [vmem:[#allocation82_spill] sm:$0xff] }
 0xe07   : > { %v9342_v48 = vpack.c.bf16 %v9265_v5, %v9265_v5  ;;  %v6172_v23 = vsel %vm514_vm0, %v18347_v43, 0.0  ;;  %v9310_v0 = vpack.c.bf16 %v8717_v52, %v8717_v52  ;;  %v18350_v47 = vld [vmem:[#allocation106_spill] sm:$0xff] }
 0xe08   : > { %v9294_v44 = vpack.c.bf16 %v8443_v51, %v8443_v51  ;;  %v6173_v56 = vadd.f32 %v6172_v23, %v6171_v8  ;;  %v8448_v7 = vadd.f32 %v18351_v14, %v18350_v47  ;;  %v18354_v8 = vld [vmem:[#allocation94_spill] sm:$0xff] }
 0xe09   : > { %v9713_v40 = vunpack.c.l.b16 %v9342_v48 }
 0xe0a   : > { %11200 = vmatmul.msk.bf16.gmra.mxu0 %vm2635_vm12, %v9610_v10  ;;  %11208 = vmatmul.msk.bf16.gmra.mxu2 %vm2635_vm12, %v9723_v11  ;;  %v9267_v15 = vpop.f32.mrf.mxu2  ;;  %v9291_v10 = vpack.c.bf16 %v18338_v17, %v18338_v17  ;;  %v18339_v11 = vld [vmem:[#allocation25_spill] sm:$0xff]  ;;  %v8993_v19 = vpop.f32.mrf.mxu3  ;;  %v9487_v17 = vunpack.c.l.b16 %v9310_v0  ;;  %v9296_v60 = vpack.c.bf16 %v8448_v7, %v8448_v7 }
 0xe0b   : > { %6185 = vxpose.xlu2.b32.cont [12/16] (narrow) %v6145_v3, 64  ;;  %v9307_v3 = vpack.c.bf16 %v18339_v11, %v18339_v11  ;;  %v8944_v62 = vpop.f32.mrf.mxu1  ;;  %v9725_v41 = vpack.c.b16 %v9713_v40, %v9712_v4  ;;  %v17213_v4 = vpop.permute.xlu2 %6213 }
 0xe0c   : > { %v9218_v63 = vpop.f32.mrf.mxu0  ;;  %v9371_v32 = vunpack.c.l.b16 %v9291_v10  ;;  %v8994_v5 = vadd.f32 %v8993_v19, %v8944_v62  ;;  %v9376_v43 = vunpack.c.l.b16 %v9296_v60 }
 0xe0d   : > { %v9484_v12 = vunpack.c.l.b16 %v9307_v3 }
 0xe0e   : > { %v9385_v18 = vpack.c.b16 %v9372_v36, %v9371_v32  ;;  %v9268_v32 = vadd.f32 %v9267_v15, %v9218_v63  ;;  %v9327_v48 = vpack.c.bf16 %v8994_v5, %v8994_v5  ;;  %v18356_v5 = vld [vmem:[#allocation101_spill] sm:$0xff] }
 0xe10   : > { %v9343_v42 = vpack.c.bf16 %v9268_v32, %v9268_v32  ;;  %v9601_v63 = vunpack.c.l.b16 %v9327_v48  ;;  %v18357_v32 = vld [vmem:[#allocation100_spill] sm:$0xff] }
 0xe12   : > { %11184 = vmatmul.msk.bf16.gmra.mxu1 %vm2635_vm12, %v9384_v38  ;;  %11192 = vmatmul.msk.bf16.gmra.mxu3 %vm2635_vm12, %v9497_v49  ;;  %v9498_v38 = vpack.c.b16 %v9485_v39, %v9484_v12  ;;  %v9326_v49 = vpack.c.bf16 %v8991_v21, %v8991_v21  ;;  %v9269_v6 = vpop.f32.mrf.mxu2  ;;  %v8995_v13 = vpop.f32.mrf.mxu3  ;;  %v9373_v39 = vunpack.c.l.b16 %v9293_v20  ;;  %v9714_v62 = vunpack.c.l.b16 %v9343_v42 }
 0xe13   : > { %6186 = vxpose.xlu2.b32.cont [13/16] (narrow) %v18331_v28, 64  ;;  %v8946_v16 = vpop.f32.mrf.mxu1 }
 0xe14   : > { %v9600_v28 = vunpack.c.l.b16 %v9326_v49  ;;  %v9220_v34 = vpop.f32.mrf.mxu0  ;;  %v8996_v10 = vadd.f32 %v8995_v13, %v8946_v16  ;;  %v9295_v13 = vpack.c.bf16 %v18354_v8, %v18354_v8 }
 0xe15   : > { %v9270_v11 = vadd.f32 %v9269_v6, %v9220_v34  ;;  %v18352_v6 = vld [vmem:[#allocation54_spill] sm:$0xff] }
 0xe16   : > { %v9612_v37 = vpack.c.b16 %v9600_v28, %v9599_v58  ;;  %v18355_v34 = vld [vmem:[#allocation18_spill] sm:$0xff]  ;;  %v9375_v0 = vunpack.c.l.b16 %v9295_v13 }
 0xe17   : > { %v9344_v49 = vpack.c.bf16 %v9270_v11, %v9270_v11  ;;  %v9311_v58 = vpack.c.bf16 %v18355_v34, %v18355_v34 }
 0xe19   : > { %v9715_v15 = vunpack.c.l.b16 %v9344_v49 }
 0xe1a   : > { %11201 = vmatmul.msk.bf16.gmra.mxu0 %vm2635_vm12, %v9611_v22  ;;  %11209 = vmatmul.msk.bf16.gmra.mxu2 %vm2635_vm12, %v9724_v33  ;;  %v18349_v22 = vld [vmem:[#allocation98_spill] sm:$0xff]  ;;  %v8998_v3 = vpop.f32.mrf.mxu3  ;;  %v9272_v36 = vpop.f32.mrf.mxu2 }
 0xe1b   : > { %6187 = vxpose.xlu2.b32.cont [14/16] (narrow) %v6159_v1, 64  ;;  %v9309_v33 = vpack.c.bf16 %v18349_v22, %v18349_v22  ;;  %v9374_v1 = vunpack.c.l.b16 %v9294_v44  ;;  %v8949_v12 = vpop.f32.mrf.mxu1  ;;  %v9726_v28 = vpack.c.b16 %v9715_v15, %v9714_v62  ;;  %v9387_v22 = vpack.c.b16 %v9376_v43, %v9375_v0 }
 0xe1c   : > { %v9223_v26 = vpop.f32.mrf.mxu0 }
 0xe1d   : > { %v9486_v21 = vunpack.c.l.b16 %v9309_v33  ;;  %v9386_v50 = vpack.c.b16 %v9374_v1, %v9373_v39 }
 0xe22   : > { %11185 = vmatmul.msk.bf16.gmra.mxu1 %vm2635_vm12, %v9385_v18  ;;  %11193 = vmatmul.msk.bf16.gmra.mxu3 %vm2635_vm12, %v9498_v38  ;;  %v9499_v18 = vpack.c.b16 %v9487_v17, %v9486_v21  ;;  %v9328_v38 = vpack.c.bf16 %v8996_v10, %v8996_v10  ;;  %v9000_v59 = vpop.f32.mrf.mxu3  ;;  %v9274_v51 = vpop.f32.mrf.mxu2 }
 0xe23   : > { %6188 = vxpose.xlu2.b32.cont [15/16] (narrow) %v18341_v57, 64  ;;  %v18353_v57 = vld [vmem:[#allocation26_spill] sm:$0xff]  ;;  %v8951_v40 = vpop.f32.mrf.mxu1 }
 0xe24   : > { %v8722_v27 = vadd.f32 %v18353_v57, %v18352_v6  ;;  %v9602_v19 = vunpack.c.l.b16 %v9328_v38  ;;  %v9225_v54 = vpop.f32.mrf.mxu0  ;;  %v9001_v16 = vadd.f32 %v9000_v59, %v8951_v40  ;;  %v18358_v6 = vld [vmem:[#allocation57_spill] sm:$0xff] }
 0xe25   : > { %v9275_v44 = vadd.f32 %v9274_v51, %v9225_v54  ;;  %v9297_v57 = vpack.c.bf16 %v18358_v6, %v18358_v6  ;;  %v6254_v51 = vld [vmem:[%s13258_s17] sm:$0xff]  ;;  %v6257_v6 = vld [vmem:[%s13258_s17 + $0x30] sm:$0xff] }
 0xe26   : > { %v9312_v29 = vpack.c.bf16 %v8722_v27, %v8722_v27  ;;  %v9613_v52 = vpack.c.b16 %v9602_v19, %v9601_v63  ;;  %v9330_v1 = vpack.c.bf16 %v9001_v16, %v9001_v16  ;;  %v9313_v27 = vpack.c.bf16 %v16985_v45, %v16985_v45  ;;  %v17231_v63 = vpop.permute.xlu1 %6208  ;;  %v18359_v16 = vld [vmem:[#allocation102_spill] sm:$0xff] }
 0xe27   : > { %v9346_v17 = vpack.c.bf16 %v9275_v44, %v9275_v44  ;;  %v18360_v44 = vld [vmem:[#allocation44_spill] sm:$0xff] }
 0xe28   : > { %v9489_v23 = vunpack.c.l.b16 %v9312_v29  ;;  %v8458_v0 = vadd.f32 %v18360_v44, %v18359_v16 }
 0xe2a   : > { %11202 = vmatmul.msk.bf16.gmra.mxu0 %vm2635_vm12, %v9612_v37  ;;  %11210 = vmatmul.msk.bf16.gmra.mxu2 %vm2635_vm12, %v9725_v41  ;;  %v9488_v37 = vunpack.c.l.b16 %v9311_v58  ;;  %v8999_v41 = vadd.f32 %v8998_v3, %v8949_v12  ;;  %v9277_v61 = vpop.f32.mrf.mxu2  ;;  %v8727_v3 = vadd.f32 %v16998_v24, %v16987_v31  ;;  %v9604_v12 = vunpack.c.l.b16 %v9330_v1 }
 0xe2b   : > { %6189 = vxpose.xlu2.b32.end [16/16] (narrow) %v6173_v56, 64  ;;  %v9273_v56 = vadd.f32 %v9272_v36, %v9223_v26  ;;  %v8954_v11 = vpop.f32.mrf.mxu1  ;;  %v17223_v36 = vpop.permute.xlu2 %6233  ;;  %v9717_v26 = vunpack.c.l.b16 %v9346_v17 }
 0xe2c   : > { %v9500_v33 = vpack.c.b16 %v9489_v23, %v9488_v37  ;;  %v9228_v10 = vpop.f32.mrf.mxu0  ;;  %v9329_v39 = vpack.c.bf16 %v8999_v41, %v8999_v41  ;;  %v9314_v48 = vpack.c.bf16 %v8727_v3, %v8727_v3  ;;  %v8732_v37 = vadd.f32 %v17029_v53, %v17025_v55  ;;  %v17255_v3 = vpop.permute.xlu0 %6218 }
 0xe2d   : > { %v9345_v21 = vpack.c.bf16 %v9273_v56, %v9273_v56  ;;  %v9278_v45 = vadd.f32 %v9277_v61, %v9228_v10  ;;  %v6255_v61 = vld [vmem:[%s13258_s17 + $0x10] sm:$0xff]  ;;  %v9300_v10 = vpack.c.bf16 %v8458_v0, %v8458_v0  ;;  %v9315_v55 = vpack.c.bf16 %v17019_v2, %v17019_v2 }
 0xe2e   : > { %v9491_v15 = vunpack.c.l.b16 %v9314_v48  ;;  %v8463_v2 = vadd.f32 %v17082_v25, %v17084_v30  ;;  %v9317_v25 = vpack.c.bf16 %v17033_v35, %v17033_v35 }
 0xe2f   : > { %v9716_v38 = vunpack.c.l.b16 %v9345_v21  ;;  %v9347_v43 = vpack.c.bf16 %v9278_v45, %v9278_v45  ;;  %v9380_v53 = vunpack.c.l.b16 %v9300_v10 }
 0xe30   : > { %v9494_v45 = vunpack.c.l.b16 %v9317_v25 }
 0xe31   : > { %v9003_v20 = vpop.f32.mrf.mxu3  ;;  %v9727_v47 = vpack.c.b16 %v9717_v26, %v9716_v38 }
 0xe32   : > { %11186 = vmatmul.msk.bf16.gmra.mxu1 %vm2635_vm12, %v9386_v50  ;;  %11194 = vmatmul.msk.bf16.gmra.mxu3 %vm2635_vm12, %v9499_v18  ;;  %v8453_v50 = vadd.f32 %v18357_v32, %v18356_v5  ;;  %v9603_v18 = vunpack.c.l.b16 %v9329_v39  ;;  %v9279_v14 = vpop.f32.mrf.mxu2  ;;  %v9004_v40 = vadd.f32 %v9003_v20, %v8954_v11  ;;  %v9316_v11 = vpack.c.bf16 %v8732_v37, %v8732_v37  ;;  %v18361_v5 = vld [vmem:[#allocation70_spill] sm:$0xff] }
 0xe33   : > { %v8956_v24 = vpop.f32.mrf.mxu1  ;;  %v9299_v32 = vpack.c.bf16 %v18361_v5, %v18361_v5 }
 0xe34   : > { %v9298_v49 = vpack.c.bf16 %v8453_v50, %v8453_v50  ;;  %v9614_v42 = vpack.c.b16 %v9604_v12, %v9603_v18  ;;  %v9230_v31 = vpop.f32.mrf.mxu0  ;;  %v9331_v23 = vpack.c.bf16 %v9004_v40, %v9004_v40  ;;  %v9493_v50 = vunpack.c.l.b16 %v9316_v11  ;;  %v6256_v12 = vld [vmem:[%s13258_s17 + $0x20] sm:$0xff] }
 0xe35   : > { %v9280_v62 = vadd.f32 %v9279_v14, %v9230_v31  ;;  %v9379_v38 = vunpack.c.l.b16 %v9299_v32  ;;  %v8737_v14 = vadd.f32 %v17072_v46, %v17078_v9  ;;  %v17275_v9 = vpop.permute.xlu0 %6228  ;;  %v6260_v11 = vld [vmem:[%s13258_s17 + $0x60] sm:$0xff] }
 0xe36   : > { %v9378_v19 = vunpack.c.l.b16 %v9298_v49  ;;  %v9605_v1 = vunpack.c.l.b16 %v9331_v23  ;;  %v9492_v49 = vunpack.c.l.b16 %v9315_v55 }
 0xe37   : > { %v9348_v34 = vpack.c.bf16 %v9280_v62, %v9280_v62  ;;  %v18362_v62 = vld [vmem:[#allocation19_spill] sm:$0xff] }
 0xe39   : > { %v9005_v7 = vpop.f32.mrf.mxu3  ;;  %v9719_v41 = vunpack.c.l.b16 %v9348_v34 }
 0xe3a   : > { %11203 = vmatmul.msk.bf16.gmra.mxu0 %vm2635_vm12, %v9613_v52  ;;  %11211 = vmatmul.msk.bf16.gmra.mxu2 %vm2635_vm12, %v9726_v28  ;;  %v9006_v59 = vadd.f32 %v9005_v7, %v8956_v24  ;;  %v9377_v52 = vunpack.c.l.b16 %v9297_v57  ;;  %v9490_v28 = vunpack.c.l.b16 %v9313_v27  ;;  %v17266_v7 = vpop.permute.xlu1 %6223 }
 0xe3c   : > { %v9388_v8 = vpack.c.b16 %v9378_v19, %v9377_v52  ;;  %v9501_v13 = vpack.c.b16 %v9491_v15, %v9490_v28  ;;  %v9332_v58 = vpack.c.bf16 %v9006_v59, %v9006_v59  ;;  %v9302_v19 = vpack.c.bf16 %v8463_v2, %v8463_v2 }
 0xe3d   : > { %v9318_v15 = vpack.c.bf16 %v8737_v14, %v8737_v14  ;;  %v9301_v59 = vpack.c.bf16 %v18362_v62, %v18362_v62 }
 0xe3e   : > { %v9606_v56 = vunpack.c.l.b16 %v9332_v58  ;;  %v9382_v30 = vunpack.c.l.b16 %v9302_v19  ;;  %v6259_v58 = vld [vmem:[%s13258_s17 + $0x50] sm:$0xff] }
 0xe3f   : > { %v9495_v46 = vunpack.c.l.b16 %v9318_v15  ;;  %v9381_v28 = vunpack.c.l.b16 %v9301_v59 }
 0xe40   : > { %v9615_v21 = vpack.c.b16 %v9606_v56, %v9605_v1 }
 0xe41   : > { %v9503_v34 = vpack.c.b16 %v9495_v46, %v9494_v45 }
 0xe42   : > { %11187 = vmatmul.msk.bf16.gmra.mxu1 %vm2635_vm12, %v9387_v22  ;;  %11195 = vmatmul.msk.bf16.gmra.mxu3 %vm2635_vm12, %v9500_v33  ;;  %v9718_v33 = vunpack.c.l.b16 %v9347_v43 }
 0xe44   : > { %v9728_v39 = vpack.c.b16 %v9719_v41, %v9718_v33 }
 0xe4a   : > { %11204 = vmatmul.msk.bf16.gmra.mxu0 %vm2635_vm12, %v9614_v42  ;;  %11212 = vmatmul.msk.bf16.gmra.mxu2 %vm2635_vm12, %v9727_v47  ;;  %v9389_v42 = vpack.c.b16 %v9380_v53, %v9379_v38  ;;  %v9502_v47 = vpack.c.b16 %v9493_v50, %v9492_v49 }
 0xe4c   : > { %v6190_v60 = vpop.trf.xlu2 }
 0xe4d   : > { %v6246_v29 = vadd.f32 %v17231_v63, %v6190_v60 }
 0xe4f   : > { %v6262_v54 = vadd.f32 %v6254_v51, %v6246_v29  ;;  %v6258_v51 = vld [vmem:[%s13258_s17 + $0x40] sm:$0xff] }
 0xe51   : > { %6270 = vst [vmem:[%s17237_s19] sm:$0xff] %v6262_v54 }
 0xe52   : > { %11188 = vmatmul.msk.bf16.gmra.mxu1 %vm2635_vm12, %v9388_v8  ;;  %11196 = vmatmul.msk.bf16.gmra.mxu3 %vm2635_vm12, %v9501_v13  ;;  %v9390_v13 = vpack.c.b16 %v9382_v30, %v9381_v28 }
 0xe54   : > { %v6191_v20 = vpop.trf.xlu2 }
 0xe55   : > { %v6247_v22 = vadd.f32 %v17213_v4, %v6191_v20 }
 0xe57   : > { %v6263_v17 = vadd.f32 %v6255_v61, %v6247_v22 }
 0xe59   : > { %6271 = vst [vmem:[%s17237_s19 + $0x10] sm:$0xff] %v6263_v17  ;;  %v17285_v17 = vpop.permute.xlu1 %6238 }
 0xe5a   : > { %11205 = vmatmul.msk.bf16.gmra.mxu0 %vm2635_vm12, %v9615_v21  ;;  %11213 = vmatmul.msk.bf16.gmra.mxu2 %vm2635_vm12, %v9728_v39 }
 0xe5c   : > { %v6192_v26 = vpop.trf.xlu2 }
 0xe5d   : > { %v6248_v18 = vadd.f32 %v17255_v3, %v6192_v26 }
 0xe5f   : > { %v6264_v48 = vadd.f32 %v6256_v12, %v6248_v18 }
 0xe61   : > { %6272 = vst [vmem:[%s17237_s19 + $0x20] sm:$0xff] %v6264_v48  ;;  %v17291_v48 = vpop.permute.xlu0 %6243 }
 0xe62   : > { %11189 = vmatmul.msk.bf16.gmra.mxu1 %vm2635_vm12, %v9389_v42  ;;  %11197 = vmatmul.msk.bf16.gmra.mxu3 %vm2635_vm12, %v9502_v47  ;;  %v6261_v47 = vld [vmem:[%s13258_s17 + $0x70] sm:$0xff] }
 0xe64   : > { %v6193_v57 = vpop.trf.xlu2 }
 0xe65   : > { %v6249_v27 = vadd.f32 %v17266_v7, %v6193_v57 }
 0xe67   : > { %v6265_v31 = vadd.f32 %v6257_v6, %v6249_v27  ;;  %v9233_v24 = vpop.f32.mrf.mxu0 }
 0xe69   : > { %6273 = vst [vmem:[%s17237_s19 + $0x30] sm:$0xff] %v6265_v31 }
 0xe6c   : > { %v6194_v60 = vpop.trf.xlu2 }
 0xe6d   : > { %v9282_v29 = vpop.f32.mrf.mxu2  ;;  %v6250_v52 = vadd.f32 %v17275_v9, %v6194_v60 }
 0xe6e   : > { %v9283_v35 = vadd.f32 %v9282_v29, %v9233_v24 }
 0xe6f   : > { %v6266_v40 = vadd.f32 %v6258_v51, %v6250_v52  ;;  %v8959_v54 = vpop.f32.mrf.mxu1  ;;  %v9235_v8 = vpop.f32.mrf.mxu0 }
 0xe70   : > { %v9349_v0 = vpack.c.bf16 %v9283_v35, %v9283_v35 }
 0xe71   : > { %6274 = vst [vmem:[%s17237_s19 + $0x40] sm:$0xff] %v6266_v40 }
 0xe72   : > { %11190 = vmatmul.msk.bf16.gmra.mxu1 %vm2635_vm12, %v9390_v13  ;;  %11198 = vmatmul.msk.bf16.gmra.mxu3 %vm2635_vm12, %v9503_v34  ;;  %v9720_v22 = vunpack.c.l.b16 %v9349_v0 }
 0xe74   : > { %v6195_v43 = vpop.trf.xlu2 }
 0xe75   : > { %v9008_v23 = vpop.f32.mrf.mxu3  ;;  %v9284_v16 = vpop.f32.mrf.mxu2  ;;  %v6251_v44 = vadd.f32 %v17223_v36, %v6195_v43 }
 0xe76   : > { %v9285_v37 = vadd.f32 %v9284_v16, %v9235_v8  ;;  %v9009_v33 = vadd.f32 %v9008_v23, %v8959_v54 }
 0xe77   : > { %v6267_v41 = vadd.f32 %v6259_v58, %v6251_v44  ;;  %v8961_v56 = vpop.f32.mrf.mxu1  ;;  %v9650_v61 = vpop.f32.mrf.mxu0 }
 0xe78   : > { %v9350_v20 = vpack.c.bf16 %v9285_v37, %v9285_v37  ;;  %v9333_v55 = vpack.c.bf16 %v9009_v33, %v9009_v33  ;;  %v9806_v59 = vsel %vm514_vm0, %v9650_v61, 0.0 }
 0xe79   : > { %6275 = vst [vmem:[%s17237_s19 + $0x50] sm:$0xff] %v6267_v41 }
 0xe7a   : > { %v9721_v1 = vunpack.c.l.b16 %v9350_v20  ;;  %v9607_v38 = vunpack.c.l.b16 %v9333_v55 }
 0xe7c   : > { %v9729_v10 = vpack.c.b16 %v9721_v1, %v9720_v22  ;;  %v6196_v39 = vpop.trf.xlu2 }
 0xe7d   : > { %v9010_v21 = vpop.f32.mrf.mxu3  ;;  %v9763_v5 = vpop.f32.mrf.mxu2  ;;  %v6252_v32 = vadd.f32 %v17285_v17, %v6196_v39 }
 0xe7e   : > { %v9011_v53 = vadd.f32 %v9010_v21, %v8961_v56  ;;  %11214 = vmatmul.msk.bf16.gmra.mxu2 %vm2635_vm12, %v9729_v10  ;;  %v9808_v30 = vsel %vm514_vm0, %v9763_v5, 0.0 }
 0xe7f   : > { %v6268_v50 = vadd.f32 %v6260_v11, %v6252_v32  ;;  %v9424_v12 = vpop.f32.mrf.mxu1  ;;  %v9652_v26 = vpop.f32.mrf.mxu0 }
 0xe80   : > { %v9334_v18 = vpack.c.bf16 %v9011_v53, %v9011_v53  ;;  %v9803_v27 = vsel %vm514_vm0, %v9424_v12, 0.0  ;;  %v9813_v54 = vsel %vm514_vm0, %v9652_v26, 0.0 }
 0xe81   : > { %6276 = vst [vmem:[%s17237_s19 + $0x60] sm:$0xff] %v6268_v50 }
 0xe82   : > { %v9608_v49 = vunpack.c.l.b16 %v9334_v18 }
 0xe84   : > { %v9616_v42 = vpack.c.b16 %v9608_v49, %v9607_v38  ;;  %v6197_v2 = vpop.trf.xlu2 }
 0xe85   : > { %v9537_v14 = vpop.f32.mrf.mxu3  ;;  %v9765_v6 = vpop.f32.mrf.mxu2  ;;  %v6253_v57 = vadd.f32 %v17291_v48, %v6197_v2 }
 0xe86   : > { %v9804_v31 = vsel %vm514_vm0, %v9537_v14, 0.0  ;;  %11206 = vmatmul.msk.bf16.gmra.mxu0 %vm2635_vm12, %v9616_v42  ;;  %v9815_v13 = vsel %vm514_vm0, %v9765_v6, 0.0 }
 0xe87   : > { %v9805_v24 = vadd.f32 %v9804_v31, %v9803_v27  ;;  %v6269_v19 = vadd.f32 %v6261_v47, %v6253_v57  ;;  %v9426_v15 = vpop.f32.mrf.mxu1  ;;  %v9655_v62 = vpop.f32.mrf.mxu0 }
 0xe88   : > { %v9810_v29 = vsel %vm514_vm0, %v9426_v15, 0.0  ;;  %v9820_v37 = vsel %vm514_vm0, %v9655_v62, 0.0 }
 0xe89   : > { %v9807_v25 = vadd.f32 %v9806_v59, %v9805_v24  ;;  %6277 = vst [vmem:[%s17237_s19 + $0x70] sm:$0xff] %v6269_v19 }
 0xe8b   : > { %v9809_v46 = vadd.f32 %v9808_v30, %v9807_v25 }
 0xe8d   : > { %v9539_v51 = vpop.f32.mrf.mxu3  ;;  %v9768_v60 = vpop.f32.mrf.mxu2  ;;  %9915 = vxpose.xlu1.b32.start [1/16] (narrow) %v9809_v46, 64 }
 0xe8e   : > { %v9811_v52 = vsel %vm514_vm0, %v9539_v51, 0.0  ;;  %v9822_v56 = vsel %vm514_vm0, %v9768_v60, 0.0 }
 0xe8f   : > { %v9812_v28 = vadd.f32 %v9811_v52, %v9810_v29  ;;  %v9429_v45 = vpop.f32.mrf.mxu1  ;;  %v9657_v40 = vpop.f32.mrf.mxu0 }
 0xe90   : > { %v9817_v43 = vsel %vm514_vm0, %v9429_v45, 0.0  ;;  %v9827_v21 = vsel %vm514_vm0, %v9657_v40, 0.0 }
 0xe91   : > { %v9814_v8 = vadd.f32 %v9813_v54, %v9812_v28 }
 0xe93   : > { %v9816_v34 = vadd.f32 %v9815_v13, %v9814_v8 }
 0xe95   : > { %v9542_v35 = vpop.f32.mrf.mxu3  ;;  %v9770_v58 = vpop.f32.mrf.mxu2  ;;  %9916 = vxpose.xlu1.b32.cont [2/16] (narrow) %v9816_v34, 64 }
 0xe96   : > { %v9818_v23 = vsel %vm514_vm0, %v9542_v35, 0.0  ;;  %v9829_v32 = vsel %vm514_vm0, %v9770_v58, 0.0 }
 0xe97   : > { %v9819_v16 = vadd.f32 %v9818_v23, %v9817_v43  ;;  %v9431_v44 = vpop.f32.mrf.mxu1  ;;  %v9660_v0 = vpop.f32.mrf.mxu0 }
 0xe98   : > { %v9824_v33 = vsel %vm514_vm0, %v9431_v44, 0.0  ;;  %v9834_v42 = vsel %vm514_vm0, %v9660_v0, 0.0 }
 0xe99   : > { %v9821_v41 = vadd.f32 %v9820_v37, %v9819_v16 }
 0xe9b   : > { %v9823_v61 = vadd.f32 %v9822_v56, %v9821_v41 }
 0xe9d   : > { %v9544_v20 = vpop.f32.mrf.mxu3  ;;  %v9773_v22 = vpop.f32.mrf.mxu2  ;;  %9917 = vxpose.xlu1.b32.cont [3/16] (narrow) %v9823_v61, 64 }
 0xe9e   : > { %v9825_v1 = vsel %vm514_vm0, %v9544_v20, 0.0  ;;  %v9836_v2 = vsel %vm514_vm0, %v9773_v22, 0.0 }
 0xe9f   : > { %v9826_v10 = vadd.f32 %v9825_v1, %v9824_v33  ;;  %v9434_v11 = vpop.f32.mrf.mxu1  ;;  %v9662_v39 = vpop.f32.mrf.mxu0 }
 0xea0   : > { %v9831_v12 = vsel %vm514_vm0, %v9434_v11, 0.0  ;;  %v9841_v15 = vsel %vm514_vm0, %v9662_v39, 0.0 }
 0xea1   : > { %v9828_v5 = vadd.f32 %v9827_v21, %v9826_v10 }
 0xea3   : > { %v9830_v55 = vadd.f32 %v9829_v32, %v9828_v5 }
 0xea5   : > { %v9547_v53 = vpop.f32.mrf.mxu3  ;;  %v9775_v50 = vpop.f32.mrf.mxu2  ;;  %9918 = vxpose.xlu1.b32.cont [4/16] (narrow) %v9830_v55, 64 }
 0xea6   : > { %v9832_v26 = vsel %vm514_vm0, %v9547_v53, 0.0  ;;  %v9843_v25 = vsel %vm514_vm0, %v9775_v50, 0.0 }
 0xea7   : > { %v9833_v18 = vadd.f32 %v9832_v26, %v9831_v12  ;;  %v9436_v38 = vpop.f32.mrf.mxu1  ;;  %v9665_v49 = vpop.f32.mrf.mxu0 }
 0xea8   : > { %v9838_v27 = vsel %vm514_vm0, %v9436_v38, 0.0  ;;  %v9848_v45 = vsel %vm514_vm0, %v9665_v49, 0.0 }
 0xea9   : > { %v9835_v47 = vadd.f32 %v9834_v42, %v9833_v18 }
 0xeab   : > { %v9837_v14 = vadd.f32 %v9836_v2, %v9835_v47 }
 0xead   : > { %v9549_v6 = vpop.f32.mrf.mxu3  ;;  %v9778_v57 = vpop.f32.mrf.mxu2  ;;  %9919 = vxpose.xlu1.b32.cont [5/16] (narrow) %v9837_v14, 64 }
 0xeae   : > { %v9839_v31 = vsel %vm514_vm0, %v9549_v6, 0.0  ;;  %v9850_v54 = vsel %vm514_vm0, %v9778_v57, 0.0 }
 0xeaf   : > { %v9840_v24 = vadd.f32 %v9839_v31, %v9838_v27  ;;  %v9439_v19 = vpop.f32.mrf.mxu1  ;;  %v9667_v59 = vpop.f32.mrf.mxu0 }
 0xeb0   : > { %v9845_v60 = vsel %vm514_vm0, %v9439_v19, 0.0  ;;  %v9855_v44 = vsel %vm514_vm0, %v9667_v59, 0.0 }
 0xeb1   : > { %v9842_v62 = vadd.f32 %v9841_v15, %v9840_v24 }
 0xeb3   : > { %v9844_v30 = vadd.f32 %v9843_v25, %v9842_v62 }
 0xeb5   : > { %v9552_v46 = vpop.f32.mrf.mxu3  ;;  %v9780_v51 = vpop.f32.mrf.mxu2  ;;  %9920 = vxpose.xlu1.b32.cont [6/16] (narrow) %v9844_v30, 64 }
 0xeb6   : > { %v9846_v29 = vsel %vm514_vm0, %v9552_v46, 0.0  ;;  %v9857_v37 = vsel %vm514_vm0, %v9780_v51, 0.0 }
 0xeb7   : > { %v9847_v52 = vadd.f32 %v9846_v29, %v9845_v60  ;;  %v9441_v28 = vpop.f32.mrf.mxu1  ;;  %v9670_v13 = vpop.f32.mrf.mxu0 }
 0xeb8   : > { %v9852_v58 = vsel %vm514_vm0, %v9441_v28, 0.0  ;;  %v9862_v11 = vsel %vm514_vm0, %v9670_v13, 0.0 }
 0xeb9   : > { %v9849_v40 = vadd.f32 %v9848_v45, %v9847_v52 }
 0xebb   : > { %v9851_v8 = vadd.f32 %v9850_v54, %v9849_v40 }
 0xebd   : > { %v9554_v34 = vpop.f32.mrf.mxu3  ;;  %v9783_v35 = vpop.f32.mrf.mxu2  ;;  %9921 = vxpose.xlu1.b32.cont [7/16] (narrow) %v9851_v8, 64 }
 0xebe   : > { %v9853_v43 = vsel %vm514_vm0, %v9554_v34, 0.0  ;;  %v9864_v21 = vsel %vm514_vm0, %v9783_v35, 0.0 }
 0xebf   : > { %v9854_v23 = vadd.f32 %v9853_v43, %v9852_v58  ;;  %v9444_v16 = vpop.f32.mrf.mxu1  ;;  %v9672_v56 = vpop.f32.mrf.mxu0 }
 0xec0   : > { %v9859_v20 = vsel %vm514_vm0, %v9444_v16, 0.0  ;;  %v9869_v18 = vsel %vm514_vm0, %v9672_v56, 0.0 }
 0xec1   : > { %v9856_v0 = vadd.f32 %v9855_v44, %v9854_v23 }
 0xec3   : > { %v9858_v41 = vadd.f32 %v9857_v37, %v9856_v0 }
 0xec5   : > { %v9557_v61 = vpop.f32.mrf.mxu3  ;;  %9922 = vxpose.xlu1.b32.cont [8/16] (narrow) %v9858_v41, 64  ;;  %v9785_v1 = vpop.f32.mrf.mxu2 }
 0xec6   : > { %v9860_v22 = vsel %vm514_vm0, %v9557_v61, 0.0  ;;  %v9871_v42 = vsel %vm514_vm0, %v9785_v1, 0.0 }
 0xec7   : > { %v9861_v33 = vadd.f32 %v9860_v22, %v9859_v20  ;;  %v9446_v10 = vpop.f32.mrf.mxu1  ;;  %v9675_v50 = vpop.f32.mrf.mxu0 }
 0xec8   : > { %v9866_v55 = vsel %vm514_vm0, %v9446_v10, 0.0  ;;  %v9876_v31 = vsel %vm514_vm0, %v9675_v50, 0.0 }
 0xec9   : > { %v9863_v39 = vadd.f32 %v9862_v11, %v9861_v33 }
 0xecb   : > { %v9865_v5 = vadd.f32 %v9864_v21, %v9863_v39 }
 0xecd   : > { %v9559_v32 = vpop.f32.mrf.mxu3  ;;  %9923 = vxpose.xlu1.b32.cont [9/16] (narrow) %v9865_v5, 64  ;;  %v9788_v49 = vpop.f32.mrf.mxu2 }
 0xece   : > { %v9867_v53 = vsel %vm514_vm0, %v9559_v32, 0.0  ;;  %v9878_v15 = vsel %vm514_vm0, %v9788_v49, 0.0 }
 0xecf   : > { %v9868_v12 = vadd.f32 %v9867_v53, %v9866_v55  ;;  %v9449_v26 = vpop.f32.mrf.mxu1  ;;  %v9677_v24 = vpop.f32.mrf.mxu0 }
 0xed0   : > { %v9873_v14 = vsel %vm514_vm0, %v9449_v26, 0.0  ;;  %v9883_v60 = vsel %vm514_vm0, %v9677_v24, 0.0 }
 0xed1   : > { %v9870_v38 = vadd.f32 %v9869_v18, %v9868_v12 }
 0xed3   : > { %v9872_v47 = vadd.f32 %v9871_v42, %v9870_v38 }
 0xed5   : > { %v9562_v2 = vpop.f32.mrf.mxu3  ;;  %9924 = vxpose.xlu1.b32.cont [10/16] (narrow) %v9872_v47, 64  ;;  %v9790_v59 = vpop.f32.mrf.mxu2 }
 0xed6   : > { %v9874_v6 = vsel %vm514_vm0, %v9562_v2, 0.0  ;;  %v9885_v28 = vsel %vm514_vm0, %v9790_v59, 0.0 }
 0xed7   : > { %v9875_v57 = vadd.f32 %v9874_v6, %v9873_v14  ;;  %v9451_v27 = vpop.f32.mrf.mxu1  ;;  %v9680_v45 = vpop.f32.mrf.mxu0 }
 0xed8   : > { %v9880_v30 = vsel %vm514_vm0, %v9451_v27, 0.0  ;;  %v9890_v58 = vsel %vm514_vm0, %v9680_v45, 0.0 }
 0xed9   : > { %v9877_v19 = vadd.f32 %v9876_v31, %v9875_v57 }
 0xedb   : > { %v9879_v62 = vadd.f32 %v9878_v15, %v9877_v19  ;;  %v11215_v19 = vld [vmem:[%s13258_s17 + $0x8] sm:$0xff] }
 0xedd   : > { %v9564_v25 = vpop.f32.mrf.mxu3  ;;  %9925 = vxpose.xlu1.b32.cont [11/16] (narrow) %v9879_v62, 64  ;;  %v9793_v54 = vpop.f32.mrf.mxu2 }
 0xede   : > { %v9881_v46 = vsel %vm514_vm0, %v9564_v25, 0.0  ;;  %v9892_v23 = vsel %vm514_vm0, %v9793_v54, 0.0  ;;  %v11216_v25 = vld [vmem:[%s13258_s17 + $0x18] sm:$0xff] }
 0xedf   : > { %v9882_v51 = vadd.f32 %v9881_v46, %v9880_v30  ;;  %v9454_v52 = vpop.f32.mrf.mxu1  ;;  %v9682_v0 = vpop.f32.mrf.mxu0 }
 0xee0   : > { %v9887_v13 = vsel %vm514_vm0, %v9454_v52, 0.0  ;;  %v9897_v22 = vsel %vm514_vm0, %v9682_v0, 0.0 }
 0xee1   : > { %v9884_v29 = vadd.f32 %v9883_v60, %v9882_v51  ;;  %v11217_v60 = vld [vmem:[%s13258_s17 + $0x28] sm:$0xff] }
 0xee3   : > { %v9886_v40 = vadd.f32 %v9885_v28, %v9884_v29 }
 0xee5   : > { %v9567_v8 = vpop.f32.mrf.mxu3  ;;  %9926 = vxpose.xlu1.b32.cont [12/16] (narrow) %v9886_v40, 64  ;;  %v9795_v61 = vpop.f32.mrf.mxu2 }
 0xee6   : > { %v9888_v34 = vsel %vm514_vm0, %v9567_v8, 0.0  ;;  %v9899_v1 = vsel %vm514_vm0, %v9795_v61, 0.0 }
 0xee7   : > { %v9889_v35 = vadd.f32 %v9888_v34, %v9887_v13  ;;  %v9456_v44 = vpop.f32.mrf.mxu1 }
 0xee8   : > { %v9894_v41 = vsel %vm514_vm0, %v9456_v44, 0.0 }
 0xee9   : > { %v9891_v43 = vadd.f32 %v9890_v58, %v9889_v35 }
 0xeeb   : > { %v9893_v16 = vadd.f32 %v9892_v23, %v9891_v43 }
 0xeed   : > { %v9569_v37 = vpop.f32.mrf.mxu3  ;;  %9927 = vxpose.xlu1.b32.cont [13/16] (narrow) %v9893_v16, 64 }
 0xeee   : > { %v9895_v56 = vsel %vm514_vm0, %v9569_v37, 0.0 }
 0xeef   : > { %v9896_v20 = vadd.f32 %v9895_v56, %v9894_v41  ;;  %v9459_v39 = vpop.f32.mrf.mxu1 }
 0xef0   : > { %v9901_v32 = vsel %vm514_vm0, %v9459_v39, 0.0 }
 0xef1   : > { %v9898_v33 = vadd.f32 %v9897_v22, %v9896_v20 }
 0xef3   : > { %v9900_v10 = vadd.f32 %v9899_v1, %v9898_v33 }
 0xef5   : > { %9928 = vxpose.xlu1.b32.cont [14/16] (narrow) %v9900_v10, 64  ;;  %v9572_v11 = vpop.f32.mrf.mxu3 }
 0xef6   : > { %v9902_v21 = vsel %vm514_vm0, %v9572_v11, 0.0 }
 0xef7   : > { %v9903_v55 = vadd.f32 %v9902_v21, %v9901_v32  ;;  %v9461_v38 = vpop.f32.mrf.mxu1 }
 0xef8   : > { %v9908_v47 = vsel %vm514_vm0, %v9461_v38, 0.0 }
 0xefd   : > { %v9574_v12 = vpop.f32.mrf.mxu3 }
 0xefe   : > { %v9909_v42 = vsel %vm514_vm0, %v9574_v12, 0.0 }
 0xeff   : > { %v9910_v2 = vadd.f32 %v9909_v42, %v9908_v47 }
 0xf01   : > { %v9798_v5 = vpop.f32.mrf.mxu2 }
 0xf02   : > { %v9906_v18 = vsel %vm514_vm0, %v9798_v5, 0.0 }
 0xf03   : > { %v9685_v53 = vpop.f32.mrf.mxu0 }
 0xf04   : > { %v9904_v50 = vsel %vm514_vm0, %v9685_v53, 0.0 }
 0xf05   : > { %v9905_v26 = vadd.f32 %v9904_v50, %v9903_v55 }
 0xf07   : > { %v9907_v49 = vadd.f32 %v9906_v18, %v9905_v26 }
 0xf09   : > { %9929 = vxpose.xlu1.b32.cont [15/16] (narrow) %v9907_v49, 64  ;;  %v9800_v14 = vpop.f32.mrf.mxu2 }
 0xf0a   : > { %v9913_v31 = vsel %vm514_vm0, %v9800_v14, 0.0 }
 0xf0b   : > { %v9687_v6 = vpop.f32.mrf.mxu0 }
 0xf0c   : > { %v9911_v57 = vsel %vm514_vm0, %v9687_v6, 0.0 }
 0xf0d   : > { %v9912_v27 = vadd.f32 %v9911_v57, %v9910_v2 }
 0xf0f   : > { %v9914_v24 = vadd.f32 %v9913_v31, %v9912_v27 }
 0xf11   : > { %9930 = vxpose.xlu1.b32.end [16/16] (narrow) %v9914_v24, 64 }
 0xf3d   : > { %v9931_v15 = vpop.trf.xlu1 }
 0xf3e   : > { %v9947_v62 = vadd.f32 %v9931_v15, %v17231_v63  ;;  %v11218_v63 = vld [vmem:[%s13258_s17 + $0x38] sm:$0xff] }
 0xf40   : > { %v9964_v59 = vadd.f32 %v11215_v19, %v9947_v62 }
 0xf42   : > { %11223 = vst [vmem:[%s17237_s19 + $0x8] sm:$0xff] %v9964_v59 }
 0xf45   : > { %v9932_v30 = vpop.trf.xlu1 }
 0xf46   : > { %v9948_v46 = vadd.f32 %v9932_v30, %v17213_v4  ;;  %v11219_v4 = vld [vmem:[%s13258_s17 + $0x48] sm:$0xff] }
 0xf48   : > { %v9965_v51 = vadd.f32 %v11216_v25, %v9948_v46 }
 0xf4a   : > { %11224 = vst [vmem:[%s17237_s19 + $0x18] sm:$0xff] %v9965_v51 }
 0xf4d   : > { %v9933_v29 = vpop.trf.xlu1 }
 0xf4e   : > { %v9949_v52 = vadd.f32 %v9933_v29, %v17255_v3  ;;  %v11220_v3 = vld [vmem:[%s13258_s17 + $0x58] sm:$0xff] }
 0xf50   : > { %v9966_v28 = vadd.f32 %v11217_v60, %v9949_v52 }
 0xf52   : > { %11225 = vst [vmem:[%s17237_s19 + $0x28] sm:$0xff] %v9966_v28 }
 0xf55   : > { %v9934_v45 = vpop.trf.xlu1 }
 0xf56   : > { %v9950_v40 = vadd.f32 %v9934_v45, %v17266_v7  ;;  %v11221_v7 = vld [vmem:[%s13258_s17 + $0x68] sm:$0xff] }
 0xf58   : > { %v9967_v54 = vadd.f32 %v11218_v63, %v9950_v40 }
 0xf5a   : > { %11226 = vst [vmem:[%s17237_s19 + $0x38] sm:$0xff] %v9967_v54 }
 0xf5d   : > { %v9935_v8 = vpop.trf.xlu1 }
 0xf5e   : > { %v9951_v13 = vadd.f32 %v9935_v8, %v17275_v9  ;;  %v11222_v9 = vld [vmem:[%s13258_s17 + $0x78] sm:$0xff] }
 0xf60   : > { %v9968_v34 = vadd.f32 %v11219_v4, %v9951_v13 }
 0xf62   : > { %11227 = vst [vmem:[%s17237_s19 + $0x48] sm:$0xff] %v9968_v34 }
 0xf65   : > { %v9936_v35 = vpop.trf.xlu1 }
 0xf66   : > { %v9952_v58 = vadd.f32 %v9936_v35, %v17223_v36 }
 0xf68   : > { %v9969_v43 = vadd.f32 %v11220_v3, %v9952_v58 }
 0xf6a   : > { %11228 = vst [vmem:[%s17237_s19 + $0x58] sm:$0xff] %v9969_v43 }
 0xf6d   : > { %v9937_v23 = vpop.trf.xlu1 }
 0xf6e   : > { %v9953_v16 = vadd.f32 %v9937_v23, %v17285_v17 }
 0xf70   : > { %v9970_v44 = vadd.f32 %v11221_v7, %v9953_v16 }
 0xf72   : > { %11229 = vst [vmem:[%s17237_s19 + $0x68] sm:$0xff] %v9970_v44 }
 0xf75   : > { %v9938_v36 = vpop.trf.xlu1 }
 0xf76   : > { %v9954_v0 = vadd.f32 %v9938_v36, %v17291_v48 }
 0xf78   : > { %v9971_v37 = vadd.f32 %v11222_v9, %v9954_v0 }
 0xf7a   : > { %11230 = vst [vmem:[%s17237_s19 + $0x78] sm:$0xff] %v9971_v37 }
 0xf7b   : > { %13050 = shalt.err (!%p13047_p4)
}
 0xf7c   : > { %s13094_s30 = smov 256   ;;  %s13095_s19 = smov 16  }
 0xf7d   : > { %11480 = dma.vmem_to_hbm [thread:$0]  (%p13216_p11), %s9995_s16, 2048, %s9997_s21, %s9982_s13, %s13094_s30, %s13094_s30, %s13095_s19  }
 0xf7e PF: > { %s18365_s18 = sld [smem:[#allocation11_spill]]  ;;  %p18367_p7 = scmp.ge.s32.totalorder %s13089_s28, 2 }
 0xf80   : > { %p11487_p5 = pnand %p18367_p7, %p13220_p12 }
 0xf82   : > { %p11488_p8 = pneg %p11487_p5 }
 0xf84   : > { %s10011_s0 = sand.u32 1, %s18365_s18  }
 0xf85   : > { %s10012_s27 = scalar_lea.sflag [#allocation7], %s10011_s0 }
 0xf86   : > { %13072 = dma.done.wait (%p11488_p8), %s10012_s27, 2048  }
 0xf87   : > { %13074 = vsyncadd (%p11488_p8), %s10012_s27, 4294965248  ;;  %s18368_s28 = sld [smem:[#allocation13_spill]]  ;;  %s18371_s25 = smov %s13081_s26 }
 0xf88   : > { %s18369_s29 = sld [smem:[#allocation12_spill]] }
 0xf89   : > { %s18370_s27 = sld [smem:[#allocation14_spill]] }
 0xf8d   : > { %p26_p10 = scmp.ge.s32.totalorder %s18368_s28, 4  }
 0xf8e   : > { %s18372_s26 = smov %s18369_s29 }
 0xf8f   :  { %28 = sbr.rel (!%p26_p10) target bundleno = 8 (0x8), region = 126 }
 0xf94   :  { %10018 = vsyncpa [#allocation6], 1 }
 0xf95   :  { %10020 = vsyncpa [#allocation6 + $0x1], 1 }
 0xf96   :  { %10021 = vsyncpa [#allocation7], 1 }
 0xf97   :  { %10023 = vsyncpa [#allocation7 + $0x1], 1 }

</bundles_post_ra>
